<compile_context>
chip_gen: v5e
topology: v5e:2x2
jax: 0.10.0
libtpu: 0.0.40
codegen_flags: <defaults>
</compile_context>

<pallas_src>
import functools
import math

import jax
import jax.numpy as jnp
from jax.experimental import pallas as pl
from jax.experimental.pallas import tpu as pltpu


def _rup(x, m):
    return ((x + m - 1) // m) * m


# ----------------------------------------------------------------------------
# Pallas kernels
# ----------------------------------------------------------------------------
def _matmul_kernel(a_ref, b_ref, bias_ref, o_ref, acc_ref, *, relu):
    @pl.when(pl.program_id(2) == 0)
    def _():
        acc_ref[...] = jnp.zeros_like(acc_ref)

    acc_ref[...] += jnp.dot(a_ref[...], b_ref[...],
                            preferred_element_type=jnp.float32)

    @pl.when(pl.program_id(2) == pl.num_programs(2) - 1)
    def _():
        y = acc_ref[...] + bias_ref[...]
        if relu:
            y = jnp.maximum(y, 0.0)
        o_ref[...] = y.astype(o_ref.dtype)


def pallas_matmul(a, b, bias=None, relu=False):
    """C = A @ B (+ bias, +ReLU) ; bf16 operands, f32 MXU accumulation.

    Tile budget (<= ~2 MiB per generation of double-buffered blocks) is chosen to fit
    v7x's 32 MiB scoped-VMEM default as well as v5e/v6e.
    """
    M, K = a.shape
    K2, N = b.shape
    assert K == K2
    tm = min(256, _rup(M, 16))
    tn = min(256, _rup(N, 128))
    tk = min(512, _rup(K, 128))
    Mp, Kp, Np = _rup(M, tm), _rup(K, tk), _rup(N, tn)

    a_p = a.astype(jnp.bfloat16)
    if (Mp, Kp) != (M, K):
        a_p = jnp.pad(a_p, ((0, Mp - M), (0, Kp - K)))
    b_p = b.astype(jnp.bfloat16)
    if (Kp, Np) != (K, N):
        b_p = jnp.pad(b_p, ((0, Kp - K), (0, Np - N)))
    if bias is None:
        bias = jnp.zeros((N,), jnp.float32)
    bias_p = bias.astype(jnp.float32).reshape(1, N)
    if Np != N:
        bias_p = jnp.pad(bias_p, ((0, 0), (0, Np - N)))

    out = pl.pallas_call(
        functools.partial(_matmul_kernel, relu=relu),
        out_shape=jax.ShapeDtypeStruct((Mp, Np), jnp.float32),
        grid=(Mp // tm, Np // tn, Kp // tk),
        in_specs=[pl.BlockSpec((tm, tk), lambda i, j, k: (i, k)),
                  pl.BlockSpec((tk, tn), lambda i, j, k: (k, j)),
                  pl.BlockSpec((1, tn), lambda i, j, k: (0, j))],
        out_specs=pl.BlockSpec((tm, tn), lambda i, j, k: (i, j)),
        scratch_shapes=[pltpu.VMEM((tm, tn), jnp.float32)],
        compiler_params=pltpu.CompilerParams(
            dimension_semantics=("parallel", "parallel", "arbitrary")),
    )(a_p, b_p, bias_p)
    if (Mp, Np) != (M, N):
        out = out[:M, :N]
    return out


def _affine_kernel(x_ref, s_ref, b_ref, o_ref, *, relu):
    y = x_ref[...] * s_ref[...] + b_ref[...]
    if relu:
        y = jnp.maximum(y, 0.0)
    o_ref[...] = y


def pallas_affine(x2d, scale, shift, relu=False):
    """y = x * scale + shift (per-channel), optional ReLU.  Row-tiled."""
    M, C = x2d.shape
    tm = min(1024, _rup(M, 8))
    Mp = _rup(M, tm)
    x_p = x2d.astype(jnp.float32)
    if Mp != M:
        x_p = jnp.pad(x_p, ((0, Mp - M), (0, 0)))
    out = pl.pallas_call(
        functools.partial(_affine_kernel, relu=relu),
        out_shape=jax.ShapeDtypeStruct((Mp, C), jnp.float32),
        grid=(Mp // tm,),
        in_specs=[pl.BlockSpec((tm, C), lambda i: (i, 0)),
                  pl.BlockSpec((1, C), lambda i: (0, 0)),
                  pl.BlockSpec((1, C), lambda i: (0, 0))],
        out_specs=pl.BlockSpec((tm, C), lambda i: (i, 0)),
        compiler_params=pltpu.CompilerParams(dimension_semantics=("parallel",)),
    )(x_p, scale.reshape(1, C).astype(jnp.float32),
      shift.reshape(1, C).astype(jnp.float32))
    return out[:M] if Mp != M else out


def _bn_stats_kernel(x_ref, sum_ref, sq_ref):
    # Row-tiled accumulation of per-channel sum and sum-of-squares; padded rows are
    # zero so no mask is needed (var = E[x^2] - mean^2 computed outside).
    @pl.when(pl.program_id(0) == 0)
    def _():
        sum_ref[...] = jnp.zeros_like(sum_ref)
        sq_ref[...] = jnp.zeros_like(sq_ref)

    x = x_ref[...]
    sum_ref[...] += jnp.sum(x, axis=0, keepdims=True)
    sq_ref[...] += jnp.sum(x * x, axis=0, keepdims=True)


def batchnorm_relu(x_cl, bn, relu=True, eps=1e-5):
    """Train-mode BatchNorm3d (+ReLU).  x_cl: (B, T, H, W, C) channel-last."""
    B, T, H, W, C = x_cl.shape
    M = B * T * H * W
    x2d = x_cl.reshape(M, C).astype(jnp.float32)
    tm = min(1024, _rup(M, 8))
    Mp = _rup(M, tm)
    x_p = x2d if Mp == M else jnp.pad(x2d, ((0, Mp - M), (0, 0)))
    s, sq = pl.pallas_call(
        _bn_stats_kernel,
        out_shape=(jax.ShapeDtypeStruct((1, C), jnp.float32),
                   jax.ShapeDtypeStruct((1, C), jnp.float32)),
        grid=(Mp // tm,),
        in_specs=[pl.BlockSpec((tm, C), lambda i: (i, 0))],
        out_specs=(pl.BlockSpec((1, C), lambda i: (0, 0)),
                   pl.BlockSpec((1, C), lambda i: (0, 0))),
        compiler_params=pltpu.CompilerParams(dimension_semantics=("arbitrary",)),
    )(x_p)
    mean = s / M
    var = jnp.maximum(sq / M - mean * mean, 0.0)     # biased variance (train mode)
    inv_std = jax.lax.rsqrt(var + eps)
    scale = bn['gamma'].reshape(1, C) * inv_std
    shift = bn['beta'].reshape(1, C) - mean * scale
    y = pallas_affine(x2d, scale, shift, relu=relu)
    return y.reshape(B, T, H, W, C)


def _attn_kernel(q_ref, k_ref, v_ref, o_ref, *, sm_scale):
    q = q_ref[...]                      # (G, L, dh_pad)
    k = k_ref[...]
    v = v_ref[...]
    s = jnp.einsum('gqd,gkd->gqk', q, k,
                   preferred_element_type=jnp.float32) * sm_scale
    s = s - jnp.max(s, axis=-1, keepdims=True)
    p = jnp.exp(s)
    p = p / jnp.sum(p, axis=-1, keepdims=True)
    o_ref[...] = jnp.einsum('gqk,gkd->gqd', p, v,
                            preferred_element_type=jnp.float32)


def pallas_attention(q, k, v):
    """q, k, v: (NB, L, d) -> softmax(q k^T / sqrt(d)) v.

    G batched heads per grid step (amortizes per-step overhead since L is tiny at the
    latent resolution); head dim zero-padded to 128 lanes (exact).
    """
    NB, L, d = q.shape
    dp = _rup(d, 128)
    G = min(128, NB)
    NBp = _rup(NB, G)

    def prep(x):
        x = x.astype(jnp.float32)
        if (NBp, dp) != (NB, d):
            x = jnp.pad(x, ((0, NBp - NB), (0, 0), (0, dp - d)))
        return x

    spec = pl.BlockSpec((G, L, dp), lambda i: (i, 0, 0))
    out = pl.pallas_call(
        functools.partial(_attn_kernel, sm_scale=1.0 / math.sqrt(d)),
        out_shape=jax.ShapeDtypeStruct((NBp, L, dp), jnp.float32),
        grid=(NBp // G,),
        in_specs=[spec, spec, spec],
        out_specs=pl.BlockSpec((G, L, dp), lambda i: (i, 0, 0)),
        compiler_params=pltpu.CompilerParams(dimension_semantics=("parallel",)),
    )(prep(q), prep(k), prep(v))
    return out[:NB, :, :d]


def _vq_kernel(z_ref, et_ref, e_ref, e2_ref, q_ref, idx_ref, err_ref,
               *, n_codes, n_valid, inv_total):
    i = pl.program_id(0)

    @pl.when(i == 0)
    def _():
        err_ref[...] = jnp.zeros_like(err_ref)

    z = z_ref[...]                                   # (TN, D)
    # ||z||^2 is constant per row -> dropped for the argmin.
    dist = e2_ref[...] - 2.0 * jnp.dot(z, et_ref[...],
                                       preferred_element_type=jnp.float32)
    min_d = jnp.min(dist, axis=-1, keepdims=True)
    iota = jax.lax.broadcasted_iota(jnp.int32, dist.shape, 1)
    idx = jnp.min(jnp.where(dist <= min_d, iota, n_codes), axis=-1, keepdims=True)
    idx_ref[...] = idx.astype(jnp.int32)
    onehot = (iota == idx).astype(jnp.float32)
    quant = jnp.dot(onehot, e_ref[...], preferred_element_type=jnp.float32)
    q_ref[...] = quant
    rows = jax.lax.broadcasted_iota(jnp.int32, (z.shape[0], 1), 0) + i * z.shape[0]
    diff = quant - z
    row_err = jnp.where(rows < n_valid,
                        jnp.sum(diff * diff, axis=1, keepdims=True), 0.0)
    err_ref[...] += jnp.sum(row_err, axis=0, keepdims=True) * inv_total


def pallas_vq(z2d, codebook, beta=0.25):
    N, D = z2d.shape
    Kc = codebook.shape[0]
    tn_rows = min(512, _rup(N, 8))
    Np = _rup(N, tn_rows)
    z_p = z2d.astype(jnp.float32)
    if Np != N:
        z_p = jnp.pad(z_p, ((0, Np - N), (0, 0)))
    e = codebook.astype(jnp.float32)
    et = e.T
    e2 = jnp.sum(e * e, axis=1).reshape(1, Kc)       # precomputed once (tiny)
    quant, idx, err = pl.pallas_call(
        functools.partial(_vq_kernel, n_codes=Kc, n_valid=N,
                          inv_total=1.0 / float(N * D)),
        out_shape=(jax.ShapeDtypeStruct((Np, D), jnp.float32),
                   jax.ShapeDtypeStruct((Np, 1), jnp.int32),
                   jax.ShapeDtypeStruct((1, 1), jnp.float32)),
        grid=(Np // tn_rows,),
        in_specs=[pl.BlockSpec((tn_rows, D), lambda i: (i, 0)),
                  pl.BlockSpec((D, Kc), lambda i: (0, 0)),
                  pl.BlockSpec((Kc, D), lambda i: (0, 0)),
                  pl.BlockSpec((1, Kc), lambda i: (0, 0))],
        out_specs=(pl.BlockSpec((tn_rows, D), lambda i: (i, 0)),
                   pl.BlockSpec((tn_rows, 1), lambda i: (i, 0)),
                   pl.BlockSpec((1, 1), lambda i: (0, 0))),
        compiler_params=pltpu.CompilerParams(dimension_semantics=("arbitrary",)),
    )(z_p, et, e, e2)
    emb_loss = (1.0 + beta) * err[0, 0]
    return quant[:N], idx[:N, 0], emb_loss


# ----------------------------------------------------------------------------
# Convolution glue (im2col -> Pallas matmul w/ fused bias + ReLU)
# ----------------------------------------------------------------------------
def _im2col(x_cl, ksize, stride):
    """x_cl: padded (B, D, H, W, C) -> ((M, C*kd*kh*kw), (B, Do, Ho, Wo))."""
    B, D, H, W, C = x_cl.shape
    kd, kh, kw = ksize
    sd, sh, sw = stride
    Do = (D - kd) // sd + 1
    Ho = (H - kh) // sh + 1
    Wo = (W - kw) // sw + 1
    cols = []
    for i in range(kd):
        for j in range(kh):
            for l in range(kw):
                cols.append(x_cl[:, i:i + sd * Do:sd, j:j + sh * Ho:sh,
                                 l:l + sw * Wo:sw, :])
    p = jnp.stack(cols, axis=-1)                      # (B, Do, Ho, Wo, C, k^3)
    return p.reshape(B * Do * Ho * Wo, C * kd * kh * kw), (B, Do, Ho, Wo)


def _same_pads(ksize, stride):
    pads = []
    for k, s in zip(ksize, stride):
        p = k - s
        pads.append((p - p // 2, p // 2))             # (p//2 + p%2, p//2)
    return pads


def conv3d_same(x_cl, w, b, stride, relu=False):
    """SamePadConv3d.  w: (Cout, Cin, kd, kh, kw) (PyTorch layout)."""
    k = w.shape[2:]
    pads = _same_pads(k, stride)
    x_p = jnp.pad(x_cl, ((0, 0), pads[0], pads[1], pads[2], (0, 0)))
    cols, (B, Do, Ho, Wo) = _im2col(x_p, k, stride)
    Co = w.shape[0]
    y = pallas_matmul(cols, w.reshape(Co, -1).T, bias=b, relu=relu)
    return y.reshape(B, Do, Ho, Wo, Co)


def conv_transpose3d_same(x_cl, w, b, stride, relu=False):
    """SamePadConvTranspose3d, stride 2, kernel 4 (the VQGAN3D config).

    Exact sub-pixel (phase) decomposition of the equivalent zero-dilated correlation
    with the flipped / channel-swapped kernel: 8 phase matmuls with 2x2x2 sub-kernels
    (no all-zero rows ever materialized)."""
    assert tuple(stride) == (2, 2, 2)
    kd, kh, kw = w.shape[2:]
    assert (kd, kh, kw) == (4, 4, 4)
    pads = _same_pads((kd, kh, kw), stride)
    x_p = jnp.pad(x_cl, ((0, 0), pads[0], pads[1], pads[2], (0, 0)))
    B, D0, H0, W0, Cin = x_cl.shape
    wf = jnp.flip(w, axis=(2, 3, 4)).transpose(1, 0, 2, 3, 4)   # (Cout, Cin, 4,4,4)
    Co = wf.shape[0]
    # one shared (2,2,2)-tap, stride-1 im2col over the padded input
    cols, (_, Dc, Hc, Wc) = _im2col(x_p, (2, 2, 2), (1, 1, 1))
    cols = cols.reshape(B, Dc, Hc, Wc, Cin * 8)       # Dc = D0+1, ...
    ys = []
    for a in range(2):
        for bb in range(2):
            for c in range(2):
                sub_w = wf[:, :, a::2, bb::2, c::2].reshape(Co, -1).T   # (Cin*8, Co)
                sub_cols = cols[:, a:a + D0, bb:bb + H0, c:c + W0, :].reshape(-1, Cin * 8)
                y = pallas_matmul(sub_cols, sub_w, bias=b, relu=relu)
                ys.append(y.reshape(B, D0, H0, W0, Co))
    y = jnp.stack(ys, axis=0).reshape(2, 2, 2, B, D0, H0, W0, Co)
    y = jnp.transpose(y, (3, 4, 0, 5, 1, 6, 2, 7))    # interleave phases
    return y.reshape(B, 2 * D0, 2 * H0, 2 * W0, Co)


# ----------------------------------------------------------------------------
# Attention / residual blocks (activations are channel-last (B, T, H, W, C))
# ----------------------------------------------------------------------------
_AXIAL_AXIS = {'t': 2, 'h': 3, 'w': 4}   # axis in (B, n_head, T, H, W, d_head)


def multi_head_attention(x_cl, p, axial_axis, n_head=2):
    B, T, H, W, C = x_cl.shape
    dh = C // n_head
    flat = x_cl.reshape(-1, C)
    # fused q/k/v projection: one (C, 3C) matmul instead of three activation reads
    wqkv = jnp.concatenate([p['wq'], p['wk'], p['wv']], axis=0)       # (3C, C)
    qkv = pallas_matmul(flat, wqkv.T)
    q, k, v = qkv[:, :C], qkv[:, C:2 * C], qkv[:, 2 * C:]

    def prep(a):
        a = a.reshape(B, T, H, W, n_head, dh)
        a = jnp.moveaxis(a, 4, 1)                 # (B, nh, T, H, W, dh)
        a = jnp.moveaxis(a, axial_axis, 4)        # axial dim -> -2
        return a

    qa, ka, va = prep(q), prep(k), prep(v)
    shp = qa.shape
    L = shp[4]
    of = pallas_attention(qa.reshape(-1, L, dh), ka.reshape(-1, L, dh),
                          va.reshape(-1, L, dh))
    o = of.reshape(shp)
    o = jnp.moveaxis(o, 4, axial_axis)
    o = jnp.moveaxis(o, 1, 4)                     # (B, T, H, W, nh, dh)
    o = o.reshape(-1, C)
    out = pallas_matmul(o, p['fc_w'].T, bias=p['fc_b'])   # bias fused
    return out.reshape(B, T, H, W, C)


def axial_block(x_cl, p):
    return (multi_head_attention(x_cl, p['w'], _AXIAL_AXIS['w'])
            + multi_head_attention(x_cl, p['h'], _AXIAL_AXIS['h'])
            + multi_head_attention(x_cl, p['t'], _AXIAL_AXIS['t']))


def attention_residual_block(x_cl, bp):
    h = batchnorm_relu(x_cl, bp['bn1'], relu=True)
    h = conv3d_same(h, bp['conv1_w'], None, (1, 1, 1), relu=False)
    h = batchnorm_relu(h, bp['bn2'], relu=True)
    h = conv3d_same(h, bp['conv2_w'], None, (1, 1, 1), relu=False)
    h = batchnorm_relu(h, bp['bn3'], relu=True)
    h = axial_block(h, bp['axial'])
    return x_cl + h


def res_stack(x_cl, rp):
    for bp in rp['blocks']:
        x_cl = attention_residual_block(x_cl, bp)
    return batchnorm_relu(x_cl, rp['bn_final'], relu=True)


# ----------------------------------------------------------------------------
# Encoder3D / Decoder3D / VQGAN3D forward
# ----------------------------------------------------------------------------
def encoder_forward(x_cl, ep):
    h = x_cl
    for cp in ep['convs']:
        h = conv3d_same(h, cp['w'], cp['b'], (2, 2, 2), relu=True)
    h = conv3d_same(h, ep['conv_last']['w'], ep['conv_last']['b'], (1, 1, 1), relu=False)
    return res_stack(h, ep['res'])


def decoder_forward(x_cl, dp):
    h = res_stack(x_cl, dp['res'])
    n = len(dp['convts'])
    for i, cp in enumerate(dp['convts']):
        h = conv_transpose3d_same(h, cp['w'], cp['b'], (2, 2, 2), relu=(i < n - 1))
    return h


def quantize(z_cl, codebook, beta=0.25):
    B, D, H, W, Cd = z_cl.shape
    quant, idx, emb_loss = pallas_vq(z_cl.reshape(-1, Cd), codebook, beta=beta)
    quant = quant.reshape(B, D, H, W, Cd)
    # straight-through estimator (forward value unchanged, sane gradients if differentiated)
    quant = z_cl + jax.lax.stop_gradient(quant - z_cl)
    return quant, idx.reshape(B, D, H, W), emb_loss


def vqgan3d_forward(params, x_ncdhw, return_keys='dec'):
    # NCDHW (PyTorch) -> channel-last internal layout.
    x = jnp.transpose(x_ncdhw.astype(jnp.float32), (0, 2, 3, 4, 1))
    h = encoder_forward(x, params['encoder'])
    z = conv3d_same(h, params['pre_vq']['w'], params['pre_vq']['b'], (1, 1, 1))
    quant, quant_index, emb_loss = quantize(z, params['codebook'])
    res = {'quant_feat': jnp.transpose(quant, (0, 4, 1, 2, 3)),
           'quant_index': quant_index}
    if 'dec' in return_keys:
        hq = conv3d_same(quant, params['post_vq']['w'], params['post_vq']['b'], (1, 1, 1))
        dec = decoder_forward(hq, params['decoder'])
        res['dec'] = jnp.transpose(dec, (0, 4, 1, 2, 3))
    return res, emb_loss


# ----------------------------------------------------------------------------
# Deterministic parameter init (shapes follow the PyTorch module __init__)
# ----------------------------------------------------------------------------
def init_params(key, code_dim=64, n_codes=512, n_hiddens=240, n_res_layers=4):
    keys = iter(jax.random.split(key, 1024))

    def nk():
        return next(keys)

    def trunc_normal(shape, std=0.02):
        return std * jax.random.truncated_normal(nk(), -2.0, 2.0, shape, jnp.float32)

    def conv_p(cin, cout, k, bias=True):
        return {'w': trunc_normal((cout, cin, k, k, k)),
                'b': jnp.zeros((cout,), jnp.float32) if bias else None}

    def bn_p(c):
        return {'gamma': jnp.ones((c,), jnp.float32),
                'beta': jnp.zeros((c,), jnp.float32)}

    def mha_p(c):
        return {'wq': trunc_normal((c, c)), 'wk': trunc_normal((c, c)),
                'wv': trunc_normal((c, c)), 'fc_w': trunc_normal((c, c)),
                'fc_b': jnp.zeros((c,), jnp.float32)}

    def res_block_p(c):
        return {'bn1': bn_p(c),
                'conv1_w': trunc_normal((c // 2, c, 3, 3, 3)),
                'bn2': bn_p(c // 2),
                'conv2_w': trunc_normal((c, c // 2, 1, 1, 1)),
                'bn3': bn_p(c),
                'axial': {'w': mha_p(c), 'h': mha_p(c), 't': mha_p(c)}}

    def res_stack_p(c, n):
        return {'blocks': [res_block_p(c) for _ in range(n)], 'bn_final': bn_p(c)}

    encoder = {'convs': [conv_p(1, n_hiddens, 4), conv_p(n_hiddens, n_hiddens, 4)],
               'conv_last': conv_p(n_hiddens, n_hiddens, 3),
               'res': res_stack_p(n_hiddens, n_res_layers)}
    decoder = {'res': res_stack_p(n_hiddens, n_res_layers),
               'convts': [
                   {'w': trunc_normal((n_hiddens, n_hiddens, 4, 4, 4)),
                    'b': 0.02 * jax.random.normal(nk(), (n_hiddens,), jnp.float32)},
                   {'w': trunc_normal((n_hiddens, 1, 4, 4, 4)),
                    'b': 0.02 * jax.random.normal(nk(), (1,), jnp.float32)}]}
    # TODO(synk): build_quantizer(quantizer_opt) is not defined upstream; a standard
    # L2 nearest-neighbour codebook quantizer (with straight-through) is used instead.
    return {'encoder': encoder, 'decoder': decoder,
            'pre_vq': conv_p(n_hiddens, code_dim, 1),
            'post_vq': conv_p(code_dim, n_hiddens, 1),
            'codebook': 0.02 * jax.random.normal(nk(), (n_codes, code_dim), jnp.float32)}


# ----------------------------------------------------------------------------
if __name__ == "__main__":
    key = jax.random.PRNGKey(0)
    pkey, xkey = jax.random.split(key)
    params = init_params(pkey, code_dim=64, n_codes=512, n_hiddens=240, n_res_layers=4)

    # VQGAN3D input: (B, 1, T, H, W); downsample=[4,4,4] -> latent (B, 240, T/4, H/4, W/4)
    x = jax.random.normal(xkey, (1, 1, 8, 8, 8), jnp.float32)

    fwd = jax.jit(vqgan3d_forward)
    res, emb_loss = fwd(params, x)
    jax.block_until_ready((res, emb_loss))

    assert res['dec'].shape == (1, 1, 8, 8, 8)
    assert res['quant_feat'].shape == (1, 64, 2, 2, 2)
    assert res['quant_index'].shape == (1, 2, 2, 2)
    assert bool(jnp.all(jnp.isfinite(res['dec'])))
    assert bool(jnp.isfinite(emb_loss))
    print("KERNEL_OK")
</pallas_src>

<mosaic_0001>
module attributes {stable_mosaic.version = 11 : i64} {
  func.func @_matmul_kernel(%arg0: i32, %arg1: i32, %arg2: i32, %arg3: memref<64x128xbf16, #tpu.memory_space<vmem>>, %arg4: memref<128x256xbf16, #tpu.memory_space<vmem>>, %arg5: memref<1x256xf32, #tpu.memory_space<vmem>>, %arg6: memref<64x256xf32, #tpu.memory_space<vmem>>, %arg7: memref<64x256xf32, #tpu.memory_space<vmem>>) attributes {dimension_semantics = [#tpu.dimension_semantics<parallel>, #tpu.dimension_semantics<parallel>, #tpu.dimension_semantics<arbitrary>], iteration_bounds = array<i64: 1, 1, 1>, scalar_prefetch = 0 : i64, scratch_operands = 1 : i64, tpu.core_type = #tpu.core_type<tc>, window_params = [{transform_indices = @transform_0, window_bounds = array<i64: 64, 128>}, {transform_indices = @transform_1, window_bounds = array<i64: 128, 256>}, {transform_indices = @transform_2, window_bounds = array<i64: 1, 256>}, {transform_indices = @transform_3, window_bounds = array<i64: 64, 256>}]} {
    %c0_i32 = arith.constant 0 : i32
    %0 = arith.cmpi eq, %arg2, %c0_i32 : i32
    %1 = arith.extui %0 : i1 to i32
    %c0_i32_0 = arith.constant 0 : i32
    %2 = arith.cmpi ne, %1, %c0_i32_0 : i32
    scf.if %2 {
      %cst_10 = arith.constant 0.000000e+00 : f32
      %12 = vector.broadcast %cst_10 : f32 to vector<64x256xf32>
      %c0_11 = arith.constant 0 : index
      %c0_12 = arith.constant 0 : index
      %13 = vector.load %arg7[%c0_11, %c0_12] : memref<64x256xf32, #tpu.memory_space<vmem>>, vector<64x256xf32>
      tpu.vector_store %arg7[%c0_11, %c0_12], %12 {strides = array<i32>} : memref<64x256xf32, #tpu.memory_space<vmem>>, vector<64x256xf32>,
    } else {
    }
    %c0 = arith.constant 0 : index
    %c0_1 = arith.constant 0 : index
    %3 = vector.load %arg7[%c0, %c0_1] : memref<64x256xf32, #tpu.memory_space<vmem>>, vector<64x256xf32>
    %c0_2 = arith.constant 0 : index
    %c0_3 = arith.constant 0 : index
    %4 = vector.load %arg3[%c0_2, %c0_3] : memref<64x128xbf16, #tpu.memory_space<vmem>>, vector<64x128xbf16>
    %c0_4 = arith.constant 0 : index
    %c0_5 = arith.constant 0 : index
    %5 = vector.load %arg4[%c0_4, %c0_5] : memref<128x256xbf16, #tpu.memory_space<vmem>>, vector<128x256xbf16>
    %cst = arith.constant dense<0.000000e+00> : vector<64x256xf32>
    %6 = tpu.matmul %4, %5, %cst {dimension_numbers = #tpu.dot_dimension_numbers<[1], [0], [0], [1], [0, 0, 1, 1], [], []>} : vector<64x128xbf16>, vector<128x256xbf16>, vector<64x256xf32> -> vector<64x256xf32>
    %7 = arith.addf %3, %6 : vector<64x256xf32>
    %c0_6 = arith.constant 0 : index
    %c0_7 = arith.constant 0 : index
    %8 = vector.load %arg7[%c0_6, %c0_7] : memref<64x256xf32, #tpu.memory_space<vmem>>, vector<64x256xf32>
    tpu.vector_store %arg7[%c0_6, %c0_7], %7 {strides = array<i32>} : memref<64x256xf32, #tpu.memory_space<vmem>>, vector<64x256xf32>,
    %c0_i32_8 = arith.constant 0 : i32
    %9 = arith.cmpi eq, %arg2, %c0_i32_8 : i32
    %10 = arith.extui %9 : i1 to i32
    %c0_i32_9 = arith.constant 0 : i32
    %11 = arith.cmpi ne, %10, %c0_i32_9 : i32
    scf.if %11 {
      %c0_10 = arith.constant 0 : index
      %c0_11 = arith.constant 0 : index
      %12 = vector.load %arg7[%c0_10, %c0_11] : memref<64x256xf32, #tpu.memory_space<vmem>>, vector<64x256xf32>
      %c0_12 = arith.constant 0 : index
      %c0_13 = arith.constant 0 : index
      %13 = vector.load %arg5[%c0_12, %c0_13] : memref<1x256xf32, #tpu.memory_space<vmem>>, vector<1x256xf32>
      %14 = vector.broadcast %13 : vector<1x256xf32> to vector<64x256xf32>
      %15 = arith.addf %12, %14 : vector<64x256xf32>
      %cst_14 = arith.constant 0.000000e+00 : f32
      %16 = vector.broadcast %cst_14 : f32 to vector<64x256xf32>
      %17 = arith.maximumf %15, %16 : vector<64x256xf32>
      %c0_15 = arith.constant 0 : index
      %c0_16 = arith.constant 0 : index
      %18 = vector.load %arg6[%c0_15, %c0_16] : memref<64x256xf32, #tpu.memory_space<vmem>>, vector<64x256xf32>
      tpu.vector_store %arg6[%c0_15, %c0_16], %17 {strides = array<i32>} : memref<64x256xf32, #tpu.memory_space<vmem>>, vector<64x256xf32>,
    } else {
    }
    return
  }
  func.func @transform_0(%arg0: i32, %arg1: i32, %arg2: i32) -> (i32, i32) {
    %c0_i32 = arith.constant 0 : i32
    return %arg0, %arg2 : i32, i32
  }
  func.func @transform_1(%arg0: i32, %arg1: i32, %arg2: i32) -> (i32, i32) {
    %c0_i32 = arith.constant 0 : i32
    return %arg2, %arg1 : i32, i32
  }
  func.func @transform_2(%arg0: i32, %arg1: i32, %arg2: i32) -> (i32, i32) {
    %c0_i32 = arith.constant 0 : i32
    %c0_i32_0 = arith.constant 0 : i32
    return %c0_i32, %arg1 : i32, i32
  }
  func.func @transform_3(%arg0: i32, %arg1: i32, %arg2: i32) -> (i32, i32) {
    %c0_i32 = arith.constant 0 : i32
    return %arg0, %arg1 : i32, i32
  }
}

module attributes {stable_mosaic.version = 11 : i64} {
  func.func @_matmul_kernel(%arg0: i32, %arg1: i32, %arg2: i32, %arg3: memref<16x512xbf16, #tpu.memory_space<vmem>>, %arg4: memref<512x256xbf16, #tpu.memory_space<vmem>>, %arg5: memref<1x256xf32, #tpu.memory_space<vmem>>, %arg6: memref<16x256xf32, #tpu.memory_space<vmem>>, %arg7: memref<16x256xf32, #tpu.memory_space<vmem>>) attributes {dimension_semantics = [#tpu.dimension_semantics<parallel>, #tpu.dimension_semantics<parallel>, #tpu.dimension_semantics<arbitrary>], iteration_bounds = array<i64: 1, 1, 30>, scalar_prefetch = 0 : i64, scratch_operands = 1 : i64, tpu.core_type = #tpu.core_type<tc>, window_params = [{transform_indices = @transform_0, window_bounds = array<i64: 16, 512>}, {transform_indices = @transform_1, window_bounds = array<i64: 512, 256>}, {transform_indices = @transform_2, window_bounds = array<i64: 1, 256>}, {transform_indices = @transform_3, window_bounds = array<i64: 16, 256>}]} {
    %c0_i32 = arith.constant 0 : i32
    %0 = arith.cmpi eq, %arg2, %c0_i32 : i32
    %1 = arith.extui %0 : i1 to i32
    %c0_i32_0 = arith.constant 0 : i32
    %2 = arith.cmpi ne, %1, %c0_i32_0 : i32
    scf.if %2 {
      %cst_9 = arith.constant 0.000000e+00 : f32
      %12 = vector.broadcast %cst_9 : f32 to vector<16x256xf32>
      %c0_10 = arith.constant 0 : index
      %c0_11 = arith.constant 0 : index
      %13 = vector.load %arg7[%c0_10, %c0_11] : memref<16x256xf32, #tpu.memory_space<vmem>>, vector<16x256xf32>
      tpu.vector_store %arg7[%c0_10, %c0_11], %12 {strides = array<i32>} : memref<16x256xf32, #tpu.memory_space<vmem>>, vector<16x256xf32>,
    } else {
    }
    %c0 = arith.constant 0 : index
    %c0_1 = arith.constant 0 : index
    %3 = vector.load %arg7[%c0, %c0_1] : memref<16x256xf32, #tpu.memory_space<vmem>>, vector<16x256xf32>
    %c0_2 = arith.constant 0 : index
    %c0_3 = arith.constant 0 : index
    %4 = vector.load %arg3[%c0_2, %c0_3] : memref<16x512xbf16, #tpu.memory_space<vmem>>, vector<16x512xbf16>
    %c0_4 = arith.constant 0 : index
    %c0_5 = arith.constant 0 : index
    %5 = vector.load %arg4[%c0_4, %c0_5] : memref<512x256xbf16, #tpu.memory_space<vmem>>, vector<512x256xbf16>
    %cst = arith.constant dense<0.000000e+00> : vector<16x256xf32>
    %6 = tpu.matmul %4, %5, %cst {dimension_numbers = #tpu.dot_dimension_numbers<[1], [0], [0], [1], [0, 0, 1, 1], [], []>} : vector<16x512xbf16>, vector<512x256xbf16>, vector<16x256xf32> -> vector<16x256xf32>
    %7 = arith.addf %3, %6 : vector<16x256xf32>
    %c0_6 = arith.constant 0 : index
    %c0_7 = arith.constant 0 : index
    %8 = vector.load %arg7[%c0_6, %c0_7] : memref<16x256xf32, #tpu.memory_space<vmem>>, vector<16x256xf32>
    tpu.vector_store %arg7[%c0_6, %c0_7], %7 {strides = array<i32>} : memref<16x256xf32, #tpu.memory_space<vmem>>, vector<16x256xf32>,
    %c29_i32 = arith.constant 29 : i32
    %9 = arith.cmpi eq, %arg2, %c29_i32 : i32
    %10 = arith.extui %9 : i1 to i32
    %c0_i32_8 = arith.constant 0 : i32
    %11 = arith.cmpi ne, %10, %c0_i32_8 : i32
    scf.if %11 {
      %c0_9 = arith.constant 0 : index
      %c0_10 = arith.constant 0 : index
      %12 = vector.load %arg7[%c0_9, %c0_10] : memref<16x256xf32, #tpu.memory_space<vmem>>, vector<16x256xf32>
      %c0_11 = arith.constant 0 : index
      %c0_12 = arith.constant 0 : index
      %13 = vector.load %arg5[%c0_11, %c0_12] : memref<1x256xf32, #tpu.memory_space<vmem>>, vector<1x256xf32>
      %14 = vector.broadcast %13 : vector<1x256xf32> to vector<16x256xf32>
      %15 = arith.addf %12, %14 : vector<16x256xf32>
      %cst_13 = arith.constant 0.000000e+00 : f32
      %16 = vector.broadcast %cst_13 : f32 to vector<16x256xf32>
      %17 = arith.maximumf %15, %16 : vector<16x256xf32>
      %c0_14 = arith.constant 0 : index
      %c0_15 = arith.constant 0 : index
      %18 = vector.load %arg6[%c0_14, %c0_15] : memref<16x256xf32, #tpu.memory_space<vmem>>, vector<16x256xf32>
      tpu.vector_store %arg6[%c0_14, %c0_15], %17 {strides = array<i32>} : memref<16x256xf32, #tpu.memory_space<vmem>>, vector<16x256xf32>,
    } else {
    }
    return
  }
  func.func @transform_0(%arg0: i32, %arg1: i32, %arg2: i32) -> (i32, i32) {
    %c0_i32 = arith.constant 0 : i32
    return %arg0, %arg2 : i32, i32
  }
  func.func @transform_1(%arg0: i32, %arg1: i32, %arg2: i32) -> (i32, i32) {
    %c0_i32 = arith.constant 0 : i32
    return %arg2, %arg1 : i32, i32
  }
  func.func @transform_2(%arg0: i32, %arg1: i32, %arg2: i32) -> (i32, i32) {
    %c0_i32 = arith.constant 0 : i32
    %c0_i32_0 = arith.constant 0 : i32
    return %c0_i32, %arg1 : i32, i32
  }
  func.func @transform_3(%arg0: i32, %arg1: i32, %arg2: i32) -> (i32, i32) {
    %c0_i32 = arith.constant 0 : i32
    return %arg0, %arg1 : i32, i32
  }
}

module attributes {stable_mosaic.version = 11 : i64} {
  func.func @_matmul_kernel(%arg0: i32, %arg1: i32, %arg2: i32, %arg3: memref<16x512xbf16, #tpu.memory_space<vmem>>, %arg4: memref<512x256xbf16, #tpu.memory_space<vmem>>, %arg5: memref<1x256xf32, #tpu.memory_space<vmem>>, %arg6: memref<16x256xf32, #tpu.memory_space<vmem>>, %arg7: memref<16x256xf32, #tpu.memory_space<vmem>>) attributes {dimension_semantics = [#tpu.dimension_semantics<parallel>, #tpu.dimension_semantics<parallel>, #tpu.dimension_semantics<arbitrary>], iteration_bounds = array<i64: 1, 1, 13>, scalar_prefetch = 0 : i64, scratch_operands = 1 : i64, tpu.core_type = #tpu.core_type<tc>, window_params = [{transform_indices = @transform_0, window_bounds = array<i64: 16, 512>}, {transform_indices = @transform_1, window_bounds = array<i64: 512, 256>}, {transform_indices = @transform_2, window_bounds = array<i64: 1, 256>}, {transform_indices = @transform_3, window_bounds = array<i64: 16, 256>}]} {
    %c0_i32 = arith.constant 0 : i32
    %0 = arith.cmpi eq, %arg2, %c0_i32 : i32
    %1 = arith.extui %0 : i1 to i32
    %c0_i32_0 = arith.constant 0 : i32
    %2 = arith.cmpi ne, %1, %c0_i32_0 : i32
    scf.if %2 {
      %cst_9 = arith.constant 0.000000e+00 : f32
      %12 = vector.broadcast %cst_9 : f32 to vector<16x256xf32>
      %c0_10 = arith.constant 0 : index
      %c0_11 = arith.constant 0 : index
      %13 = vector.load %arg7[%c0_10, %c0_11] : memref<16x256xf32, #tpu.memory_space<vmem>>, vector<16x256xf32>
      tpu.vector_store %arg7[%c0_10, %c0_11], %12 {strides = array<i32>} : memref<16x256xf32, #tpu.memory_space<vmem>>, vector<16x256xf32>,
    } else {
    }
    %c0 = arith.constant 0 : index
    %c0_1 = arith.constant 0 : index
    %3 = vector.load %arg7[%c0, %c0_1] : memref<16x256xf32, #tpu.memory_space<vmem>>, vector<16x256xf32>
    %c0_2 = arith.constant 0 : index
    %c0_3 = arith.constant 0 : index
    %4 = vector.load %arg3[%c0_2, %c0_3] : memref<16x512xbf16, #tpu.memory_space<vmem>>, vector<16x512xbf16>
    %c0_4 = arith.constant 0 : index
    %c0_5 = arith.constant 0 : index
    %5 = vector.load %arg4[%c0_4, %c0_5] : memref<512x256xbf16, #tpu.memory_space<vmem>>, vector<512x256xbf16>
    %cst = arith.constant dense<0.000000e+00> : vector<16x256xf32>
    %6 = tpu.matmul %4, %5, %cst {dimension_numbers = #tpu.dot_dimension_numbers<[1], [0], [0], [1], [0, 0, 1, 1], [], []>} : vector<16x512xbf16>, vector<512x256xbf16>, vector<16x256xf32> -> vector<16x256xf32>
    %7 = arith.addf %3, %6 : vector<16x256xf32>
    %c0_6 = arith.constant 0 : index
    %c0_7 = arith.constant 0 : index
    %8 = vector.load %arg7[%c0_6, %c0_7] : memref<16x256xf32, #tpu.memory_space<vmem>>, vector<16x256xf32>
    tpu.vector_store %arg7[%c0_6, %c0_7], %7 {strides = array<i32>} : memref<16x256xf32, #tpu.memory_space<vmem>>, vector<16x256xf32>,
    %c12_i32 = arith.constant 12 : i32
    %9 = arith.cmpi eq, %arg2, %c12_i32 : i32
    %10 = arith.extui %9 : i1 to i32
    %c0_i32_8 = arith.constant 0 : i32
    %11 = arith.cmpi ne, %10, %c0_i32_8 : i32
    scf.if %11 {
      %c0_9 = arith.constant 0 : index
      %c0_10 = arith.constant 0 : index
      %12 = vector.load %arg7[%c0_9, %c0_10] : memref<16x256xf32, #tpu.memory_space<vmem>>, vector<16x256xf32>
      %c0_11 = arith.constant 0 : index
      %c0_12 = arith.constant 0 : index
      %13 = vector.load %arg5[%c0_11, %c0_12] : memref<1x256xf32, #tpu.memory_space<vmem>>, vector<1x256xf32>
      %14 = vector.broadcast %13 : vector<1x256xf32> to vector<16x256xf32>
      %15 = arith.addf %12, %14 : vector<16x256xf32>
      %c0_13 = arith.constant 0 : index
      %c0_14 = arith.constant 0 : index
      %16 = vector.load %arg6[%c0_13, %c0_14] : memref<16x256xf32, #tpu.memory_space<vmem>>, vector<16x256xf32>
      tpu.vector_store %arg6[%c0_13, %c0_14], %15 {strides = array<i32>} : memref<16x256xf32, #tpu.memory_space<vmem>>, vector<16x256xf32>,
    } else {
    }
    return
  }
  func.func @transform_0(%arg0: i32, %arg1: i32, %arg2: i32) -> (i32, i32) {
    %c0_i32 = arith.constant 0 : i32
    return %arg0, %arg2 : i32, i32
  }
  func.func @transform_1(%arg0: i32, %arg1: i32, %arg2: i32) -> (i32, i32) {
    %c0_i32 = arith.constant 0 : i32
    return %arg2, %arg1 : i32, i32
  }
  func.func @transform_2(%arg0: i32, %arg1: i32, %arg2: i32) -> (i32, i32) {
    %c0_i32 = arith.constant 0 : i32
    %c0_i32_0 = arith.constant 0 : i32
    return %c0_i32, %arg1 : i32, i32
  }
  func.func @transform_3(%arg0: i32, %arg1: i32, %arg2: i32) -> (i32, i32) {
    %c0_i32 = arith.constant 0 : i32
    return %arg0, %arg1 : i32, i32
  }
}

module attributes {stable_mosaic.version = 11 : i64} {
  func.func @_bn_stats_kernel(%arg0: i32, %arg1: memref<8x240xf32, #tpu.memory_space<vmem>>, %arg2: memref<1x240xf32, #tpu.memory_space<vmem>>, %arg3: memref<1x240xf32, #tpu.memory_space<vmem>>) attributes {dimension_semantics = [#tpu.dimension_semantics<arbitrary>], iteration_bounds = array<i64: 1>, scalar_prefetch = 0 : i64, scratch_operands = 0 : i64, tpu.core_type = #tpu.core_type<tc>, window_params = [{transform_indices = @transform_0, window_bounds = array<i64: 8, 240>}, {pipeline_mode = #tpu.pipeline_mode<synchronous>, transform_indices = @transform_1, window_bounds = array<i64: 1, 240>}, {pipeline_mode = #tpu.pipeline_mode<synchronous>, transform_indices = @transform_2, window_bounds = array<i64: 1, 240>}]} {
    %c0_i32 = arith.constant 0 : i32
    %0 = arith.cmpi eq, %arg0, %c0_i32 : i32
    %1 = arith.extui %0 : i1 to i32
    %c0_i32_0 = arith.constant 0 : i32
    %2 = arith.cmpi ne, %1, %c0_i32_0 : i32
    scf.if %2 {
      %cst_11 = arith.constant 0.000000e+00 : f32
      %15 = vector.broadcast %cst_11 : f32 to vector<1x240xf32>
      %c0_12 = arith.constant 0 : index
      %c0_13 = arith.constant 0 : index
      %16 = vector.load %arg2[%c0_12, %c0_13] : memref<1x240xf32, #tpu.memory_space<vmem>>, vector<1x240xf32>
      tpu.vector_store %arg2[%c0_12, %c0_13], %15 {strides = array<i32>} : memref<1x240xf32, #tpu.memory_space<vmem>>, vector<1x240xf32>,
      %cst_14 = arith.constant 0.000000e+00 : f32
      %17 = vector.broadcast %cst_14 : f32 to vector<1x240xf32>
      %c0_15 = arith.constant 0 : index
      %c0_16 = arith.constant 0 : index
      %18 = vector.load %arg3[%c0_15, %c0_16] : memref<1x240xf32, #tpu.memory_space<vmem>>, vector<1x240xf32>
      tpu.vector_store %arg3[%c0_15, %c0_16], %17 {strides = array<i32>} : memref<1x240xf32, #tpu.memory_space<vmem>>, vector<1x240xf32>,
    } else {
    }
    %c0 = arith.constant 0 : index
    %c0_1 = arith.constant 0 : index
    %3 = vector.load %arg1[%c0, %c0_1] : memref<8x240xf32, #tpu.memory_space<vmem>>, vector<8x240xf32>
    %c0_2 = arith.constant 0 : index
    %c0_3 = arith.constant 0 : index
    %4 = vector.load %arg2[%c0_2, %c0_3] : memref<1x240xf32, #tpu.memory_space<vmem>>, vector<1x240xf32>
    %cst = arith.constant dense<0.000000e+00> : vector<240xf32>
    %5 = vector.multi_reduction <add>, %3, %cst [0] : vector<8x240xf32> to vector<240xf32>
    %6 = vector.shape_cast %5 : vector<240xf32> to vector<1x240xf32>
    %7 = arith.addf %4, %6 : vector<1x240xf32>
    %c0_4 = arith.constant 0 : index
    %c0_5 = arith.constant 0 : index
    %8 = vector.load %arg2[%c0_4, %c0_5] : memref<1x240xf32, #tpu.memory_space<vmem>>, vector<1x240xf32>
    tpu.vector_store %arg2[%c0_4, %c0_5], %7 {strides = array<i32>} : memref<1x240xf32, #tpu.memory_space<vmem>>, vector<1x240xf32>,
    %c0_6 = arith.constant 0 : index
    %c0_7 = arith.constant 0 : index
    %9 = vector.load %arg3[%c0_6, %c0_7] : memref<1x240xf32, #tpu.memory_space<vmem>>, vector<1x240xf32>
    %10 = arith.mulf %3, %3 : vector<8x240xf32>
    %cst_8 = arith.constant dense<0.000000e+00> : vector<240xf32>
    %11 = vector.multi_reduction <add>, %10, %cst_8 [0] : vector<8x240xf32> to vector<240xf32>
    %12 = vector.shape_cast %11 : vector<240xf32> to vector<1x240xf32>
    %13 = arith.addf %9, %12 : vector<1x240xf32>
    %c0_9 = arith.constant 0 : index
    %c0_10 = arith.constant 0 : index
    %14 = vector.load %arg3[%c0_9, %c0_10] : memref<1x240xf32, #tpu.memory_space<vmem>>, vector<1x240xf32>
    tpu.vector_store %arg3[%c0_9, %c0_10], %13 {strides = array<i32>} : memref<1x240xf32, #tpu.memory_space<vmem>>, vector<1x240xf32>,
    return
  }
  func.func @transform_0(%arg0: i32) -> (i32, i32) {
    %c0_i32 = arith.constant 0 : i32
    %c0_i32_0 = arith.constant 0 : i32
    return %arg0, %c0_i32 : i32, i32
  }
  func.func @transform_1(%arg0: i32) -> (i32, i32) {
    %c0_i32 = arith.constant 0 : i32
    %c0_i32_0 = arith.constant 0 : i32
    %c0_i32_1 = arith.constant 0 : i32
    return %c0_i32, %c0_i32_0 : i32, i32
  }
  func.func @transform_2(%arg0: i32) -> (i32, i32) {
    %c0_i32 = arith.constant 0 : i32
    %c0_i32_0 = arith.constant 0 : i32
    %c0_i32_1 = arith.constant 0 : i32
    return %c0_i32, %c0_i32_0 : i32, i32
  }
}

module attributes {stable_mosaic.version = 11 : i64} {
  func.func @_affine_kernel(%arg0: i32, %arg1: memref<8x240xf32, #tpu.memory_space<vmem>>, %arg2: memref<1x240xf32, #tpu.memory_space<vmem>>, %arg3: memref<1x240xf32, #tpu.memory_space<vmem>>, %arg4: memref<8x240xf32, #tpu.memory_space<vmem>>) attributes {dimension_semantics = [#tpu.dimension_semantics<parallel>], iteration_bounds = array<i64: 1>, scalar_prefetch = 0 : i64, scratch_operands = 0 : i64, tpu.core_type = #tpu.core_type<tc>, window_params = [{transform_indices = @transform_0, window_bounds = array<i64: 8, 240>}, {pipeline_mode = #tpu.pipeline_mode<synchronous>, transform_indices = @transform_1, window_bounds = array<i64: 1, 240>}, {pipeline_mode = #tpu.pipeline_mode<synchronous>, transform_indices = @transform_2, window_bounds = array<i64: 1, 240>}, {transform_indices = @transform_3, window_bounds = array<i64: 8, 240>}]} {
    %c0 = arith.constant 0 : index
    %c0_0 = arith.constant 0 : index
    %0 = vector.load %arg1[%c0, %c0_0] : memref<8x240xf32, #tpu.memory_space<vmem>>, vector<8x240xf32>
    %c0_1 = arith.constant 0 : index
    %c0_2 = arith.constant 0 : index
    %1 = vector.load %arg2[%c0_1, %c0_2] : memref<1x240xf32, #tpu.memory_space<vmem>>, vector<1x240xf32>
    %2 = vector.broadcast %1 : vector<1x240xf32> to vector<8x240xf32>
    %3 = arith.mulf %0, %2 : vector<8x240xf32>
    %c0_3 = arith.constant 0 : index
    %c0_4 = arith.constant 0 : index
    %4 = vector.load %arg3[%c0_3, %c0_4] : memref<1x240xf32, #tpu.memory_space<vmem>>, vector<1x240xf32>
    %5 = vector.broadcast %4 : vector<1x240xf32> to vector<8x240xf32>
    %6 = arith.addf %3, %5 : vector<8x240xf32>
    %cst = arith.constant 0.000000e+00 : f32
    %7 = vector.broadcast %cst : f32 to vector<8x240xf32>
    %8 = arith.maximumf %6, %7 : vector<8x240xf32>
    %c0_5 = arith.constant 0 : index
    %c0_6 = arith.constant 0 : index
    %9 = vector.load %arg4[%c0_5, %c0_6] : memref<8x240xf32, #tpu.memory_space<vmem>>, vector<8x240xf32>
    tpu.vector_store %arg4[%c0_5, %c0_6], %8 {strides = array<i32>} : memref<8x240xf32, #tpu.memory_space<vmem>>, vector<8x240xf32>,
    return
  }
  func.func @transform_0(%arg0: i32) -> (i32, i32) {
    %c0_i32 = arith.constant 0 : i32
    %c0_i32_0 = arith.constant 0 : i32
    return %arg0, %c0_i32 : i32, i32
  }
  func.func @transform_1(%arg0: i32) -> (i32, i32) {
    %c0_i32 = arith.constant 0 : i32
    %c0_i32_0 = arith.constant 0 : i32
    %c0_i32_1 = arith.constant 0 : i32
    return %c0_i32, %c0_i32_0 : i32, i32
  }
  func.func @transform_2(%arg0: i32) -> (i32, i32) {
    %c0_i32 = arith.constant 0 : i32
    %c0_i32_0 = arith.constant 0 : i32
    %c0_i32_1 = arith.constant 0 : i32
    return %c0_i32, %c0_i32_0 : i32, i32
  }
  func.func @transform_3(%arg0: i32) -> (i32, i32) {
    %c0_i32 = arith.constant 0 : i32
    %c0_i32_0 = arith.constant 0 : i32
    return %arg0, %c0_i32 : i32, i32
  }
}

module attributes {stable_mosaic.version = 11 : i64} {
  func.func @_matmul_kernel(%arg0: i32, %arg1: i32, %arg2: i32, %arg3: memref<16x512xbf16, #tpu.memory_space<vmem>>, %arg4: memref<512x128xbf16, #tpu.memory_space<vmem>>, %arg5: memref<1x128xf32, #tpu.memory_space<vmem>>, %arg6: memref<16x128xf32, #tpu.memory_space<vmem>>, %arg7: memref<16x128xf32, #tpu.memory_space<vmem>>) attributes {dimension_semantics = [#tpu.dimension_semantics<parallel>, #tpu.dimension_semantics<parallel>, #tpu.dimension_semantics<arbitrary>], iteration_bounds = array<i64: 1, 1, 13>, scalar_prefetch = 0 : i64, scratch_operands = 1 : i64, tpu.core_type = #tpu.core_type<tc>, window_params = [{transform_indices = @transform_0, window_bounds = array<i64: 16, 512>}, {transform_indices = @transform_1, window_bounds = array<i64: 512, 128>}, {transform_indices = @transform_2, window_bounds = array<i64: 1, 128>}, {transform_indices = @transform_3, window_bounds = array<i64: 16, 128>}]} {
    %c0_i32 = arith.constant 0 : i32
    %0 = arith.cmpi eq, %arg2, %c0_i32 : i32
    %1 = arith.extui %0 : i1 to i32
    %c0_i32_0 = arith.constant 0 : i32
    %2 = arith.cmpi ne, %1, %c0_i32_0 : i32
    scf.if %2 {
      %cst_9 = arith.constant 0.000000e+00 : f32
      %12 = vector.broadcast %cst_9 : f32 to vector<16x128xf32>
      %c0_10 = arith.constant 0 : index
      %c0_11 = arith.constant 0 : index
      %13 = vector.load %arg7[%c0_10, %c0_11] : memref<16x128xf32, #tpu.memory_space<vmem>>, vector<16x128xf32>
      tpu.vector_store %arg7[%c0_10, %c0_11], %12 {strides = array<i32>} : memref<16x128xf32, #tpu.memory_space<vmem>>, vector<16x128xf32>,
    } else {
    }
    %c0 = arith.constant 0 : index
    %c0_1 = arith.constant 0 : index
    %3 = vector.load %arg7[%c0, %c0_1] : memref<16x128xf32, #tpu.memory_space<vmem>>, vector<16x128xf32>
    %c0_2 = arith.constant 0 : index
    %c0_3 = arith.constant 0 : index
    %4 = vector.load %arg3[%c0_2, %c0_3] : memref<16x512xbf16, #tpu.memory_space<vmem>>, vector<16x512xbf16>
    %c0_4 = arith.constant 0 : index
    %c0_5 = arith.constant 0 : index
    %5 = vector.load %arg4[%c0_4, %c0_5] : memref<512x128xbf16, #tpu.memory_space<vmem>>, vector<512x128xbf16>
    %cst = arith.constant dense<0.000000e+00> : vector<16x128xf32>
    %6 = tpu.matmul %4, %5, %cst {dimension_numbers = #tpu.dot_dimension_numbers<[1], [0], [0], [1], [0, 0, 1, 1], [], []>} : vector<16x512xbf16>, vector<512x128xbf16>, vector<16x128xf32> -> vector<16x128xf32>
    %7 = arith.addf %3, %6 : vector<16x128xf32>
    %c0_6 = arith.constant 0 : index
    %c0_7 = arith.constant 0 : index
    %8 = vector.load %arg7[%c0_6, %c0_7] : memref<16x128xf32, #tpu.memory_space<vmem>>, vector<16x128xf32>
    tpu.vector_store %arg7[%c0_6, %c0_7], %7 {strides = array<i32>} : memref<16x128xf32, #tpu.memory_space<vmem>>, vector<16x128xf32>,
    %c12_i32 = arith.constant 12 : i32
    %9 = arith.cmpi eq, %arg2, %c12_i32 : i32
    %10 = arith.extui %9 : i1 to i32
    %c0_i32_8 = arith.constant 0 : i32
    %11 = arith.cmpi ne, %10, %c0_i32_8 : i32
    scf.if %11 {
      %c0_9 = arith.constant 0 : index
      %c0_10 = arith.constant 0 : index
      %12 = vector.load %arg7[%c0_9, %c0_10] : memref<16x128xf32, #tpu.memory_space<vmem>>, vector<16x128xf32>
      %c0_11 = arith.constant 0 : index
      %c0_12 = arith.constant 0 : index
      %13 = vector.load %arg5[%c0_11, %c0_12] : memref<1x128xf32, #tpu.memory_space<vmem>>, vector<1x128xf32>
      %14 = vector.broadcast %13 : vector<1x128xf32> to vector<16x128xf32>
      %15 = arith.addf %12, %14 : vector<16x128xf32>
      %c0_13 = arith.constant 0 : index
      %c0_14 = arith.constant 0 : index
      %16 = vector.load %arg6[%c0_13, %c0_14] : memref<16x128xf32, #tpu.memory_space<vmem>>, vector<16x128xf32>
      tpu.vector_store %arg6[%c0_13, %c0_14], %15 {strides = array<i32>} : memref<16x128xf32, #tpu.memory_space<vmem>>, vector<16x128xf32>,
    } else {
    }
    return
  }
  func.func @transform_0(%arg0: i32, %arg1: i32, %arg2: i32) -> (i32, i32) {
    %c0_i32 = arith.constant 0 : i32
    return %arg0, %arg2 : i32, i32
  }
  func.func @transform_1(%arg0: i32, %arg1: i32, %arg2: i32) -> (i32, i32) {
    %c0_i32 = arith.constant 0 : i32
    return %arg2, %arg1 : i32, i32
  }
  func.func @transform_2(%arg0: i32, %arg1: i32, %arg2: i32) -> (i32, i32) {
    %c0_i32 = arith.constant 0 : i32
    %c0_i32_0 = arith.constant 0 : i32
    return %c0_i32, %arg1 : i32, i32
  }
  func.func @transform_3(%arg0: i32, %arg1: i32, %arg2: i32) -> (i32, i32) {
    %c0_i32 = arith.constant 0 : i32
    return %arg0, %arg1 : i32, i32
  }
}

module attributes {stable_mosaic.version = 11 : i64} {
  func.func @_bn_stats_kernel(%arg0: i32, %arg1: memref<8x120xf32, #tpu.memory_space<vmem>>, %arg2: memref<1x120xf32, #tpu.memory_space<vmem>>, %arg3: memref<1x120xf32, #tpu.memory_space<vmem>>) attributes {dimension_semantics = [#tpu.dimension_semantics<arbitrary>], iteration_bounds = array<i64: 1>, scalar_prefetch = 0 : i64, scratch_operands = 0 : i64, tpu.core_type = #tpu.core_type<tc>, window_params = [{transform_indices = @transform_0, window_bounds = array<i64: 8, 120>}, {pipeline_mode = #tpu.pipeline_mode<synchronous>, transform_indices = @transform_1, window_bounds = array<i64: 1, 120>}, {pipeline_mode = #tpu.pipeline_mode<synchronous>, transform_indices = @transform_2, window_bounds = array<i64: 1, 120>}]} {
    %c0_i32 = arith.constant 0 : i32
    %0 = arith.cmpi eq, %arg0, %c0_i32 : i32
    %1 = arith.extui %0 : i1 to i32
    %c0_i32_0 = arith.constant 0 : i32
    %2 = arith.cmpi ne, %1, %c0_i32_0 : i32
    scf.if %2 {
      %cst_11 = arith.constant 0.000000e+00 : f32
      %15 = vector.broadcast %cst_11 : f32 to vector<1x120xf32>
      %c0_12 = arith.constant 0 : index
      %c0_13 = arith.constant 0 : index
      %16 = vector.load %arg2[%c0_12, %c0_13] : memref<1x120xf32, #tpu.memory_space<vmem>>, vector<1x120xf32>
      tpu.vector_store %arg2[%c0_12, %c0_13], %15 {strides = array<i32>} : memref<1x120xf32, #tpu.memory_space<vmem>>, vector<1x120xf32>,
      %cst_14 = arith.constant 0.000000e+00 : f32
      %17 = vector.broadcast %cst_14 : f32 to vector<1x120xf32>
      %c0_15 = arith.constant 0 : index
      %c0_16 = arith.constant 0 : index
      %18 = vector.load %arg3[%c0_15, %c0_16] : memref<1x120xf32, #tpu.memory_space<vmem>>, vector<1x120xf32>
      tpu.vector_store %arg3[%c0_15, %c0_16], %17 {strides = array<i32>} : memref<1x120xf32, #tpu.memory_space<vmem>>, vector<1x120xf32>,
    } else {
    }
    %c0 = arith.constant 0 : index
    %c0_1 = arith.constant 0 : index
    %3 = vector.load %arg1[%c0, %c0_1] : memref<8x120xf32, #tpu.memory_space<vmem>>, vector<8x120xf32>
    %c0_2 = arith.constant 0 : index
    %c0_3 = arith.constant 0 : index
    %4 = vector.load %arg2[%c0_2, %c0_3] : memref<1x120xf32, #tpu.memory_space<vmem>>, vector<1x120xf32>
    %cst = arith.constant dense<0.000000e+00> : vector<120xf32>
    %5 = vector.multi_reduction <add>, %3, %cst [0] : vector<8x120xf32> to vector<120xf32>
    %6 = vector.shape_cast %5 : vector<120xf32> to vector<1x120xf32>
    %7 = arith.addf %4, %6 : vector<1x120xf32>
    %c0_4 = arith.constant 0 : index
    %c0_5 = arith.constant 0 : index
    %8 = vector.load %arg2[%c0_4, %c0_5] : memref<1x120xf32, #tpu.memory_space<vmem>>, vector<1x120xf32>
    tpu.vector_store %arg2[%c0_4, %c0_5], %7 {strides = array<i32>} : memref<1x120xf32, #tpu.memory_space<vmem>>, vector<1x120xf32>,
    %c0_6 = arith.constant 0 : index
    %c0_7 = arith.constant 0 : index
    %9 = vector.load %arg3[%c0_6, %c0_7] : memref<1x120xf32, #tpu.memory_space<vmem>>, vector<1x120xf32>
    %10 = arith.mulf %3, %3 : vector<8x120xf32>
    %cst_8 = arith.constant dense<0.000000e+00> : vector<120xf32>
    %11 = vector.multi_reduction <add>, %10, %cst_8 [0] : vector<8x120xf32> to vector<120xf32>
    %12 = vector.shape_cast %11 : vector<120xf32> to vector<1x120xf32>
    %13 = arith.addf %9, %12 : vector<1x120xf32>
    %c0_9 = arith.constant 0 : index
    %c0_10 = arith.constant 0 : index
    %14 = vector.load %arg3[%c0_9, %c0_10] : memref<1x120xf32, #tpu.memory_space<vmem>>, vector<1x120xf32>
    tpu.vector_store %arg3[%c0_9, %c0_10], %13 {strides = array<i32>} : memref<1x120xf32, #tpu.memory_space<vmem>>, vector<1x120xf32>,
    return
  }
  func.func @transform_0(%arg0: i32) -> (i32, i32) {
    %c0_i32 = arith.constant 0 : i32
    %c0_i32_0 = arith.constant 0 : i32
    return %arg0, %c0_i32 : i32, i32
  }
  func.func @transform_1(%arg0: i32) -> (i32, i32) {
    %c0_i32 = arith.constant 0 : i32
    %c0_i32_0 = arith.constant 0 : i32
    %c0_i32_1 = arith.constant 0 : i32
    return %c0_i32, %c0_i32_0 : i32, i32
  }
  func.func @transform_2(%arg0: i32) -> (i32, i32) {
    %c0_i32 = arith.constant 0 : i32
    %c0_i32_0 = arith.constant 0 : i32
    %c0_i32_1 = arith.constant 0 : i32
    return %c0_i32, %c0_i32_0 : i32, i32
  }
}

module attributes {stable_mosaic.version = 11 : i64} {
  func.func @_affine_kernel(%arg0: i32, %arg1: memref<8x120xf32, #tpu.memory_space<vmem>>, %arg2: memref<1x120xf32, #tpu.memory_space<vmem>>, %arg3: memref<1x120xf32, #tpu.memory_space<vmem>>, %arg4: memref<8x120xf32, #tpu.memory_space<vmem>>) attributes {dimension_semantics = [#tpu.dimension_semantics<parallel>], iteration_bounds = array<i64: 1>, scalar_prefetch = 0 : i64, scratch_operands = 0 : i64, tpu.core_type = #tpu.core_type<tc>, window_params = [{transform_indices = @transform_0, window_bounds = array<i64: 8, 120>}, {pipeline_mode = #tpu.pipeline_mode<synchronous>, transform_indices = @transform_1, window_bounds = array<i64: 1, 120>}, {pipeline_mode = #tpu.pipeline_mode<synchronous>, transform_indices = @transform_2, window_bounds = array<i64: 1, 120>}, {transform_indices = @transform_3, window_bounds = array<i64: 8, 120>}]} {
    %c0 = arith.constant 0 : index
    %c0_0 = arith.constant 0 : index
    %0 = vector.load %arg1[%c0, %c0_0] : memref<8x120xf32, #tpu.memory_space<vmem>>, vector<8x120xf32>
    %c0_1 = arith.constant 0 : index
    %c0_2 = arith.constant 0 : index
    %1 = vector.load %arg2[%c0_1, %c0_2] : memref<1x120xf32, #tpu.memory_space<vmem>>, vector<1x120xf32>
    %2 = vector.broadcast %1 : vector<1x120xf32> to vector<8x120xf32>
    %3 = arith.mulf %0, %2 : vector<8x120xf32>
    %c0_3 = arith.constant 0 : index
    %c0_4 = arith.constant 0 : index
    %4 = vector.load %arg3[%c0_3, %c0_4] : memref<1x120xf32, #tpu.memory_space<vmem>>, vector<1x120xf32>
    %5 = vector.broadcast %4 : vector<1x120xf32> to vector<8x120xf32>
    %6 = arith.addf %3, %5 : vector<8x120xf32>
    %cst = arith.constant 0.000000e+00 : f32
    %7 = vector.broadcast %cst : f32 to vector<8x120xf32>
    %8 = arith.maximumf %6, %7 : vector<8x120xf32>
    %c0_5 = arith.constant 0 : index
    %c0_6 = arith.constant 0 : index
    %9 = vector.load %arg4[%c0_5, %c0_6] : memref<8x120xf32, #tpu.memory_space<vmem>>, vector<8x120xf32>
    tpu.vector_store %arg4[%c0_5, %c0_6], %8 {strides = array<i32>} : memref<8x120xf32, #tpu.memory_space<vmem>>, vector<8x120xf32>,
    return
  }
  func.func @transform_0(%arg0: i32) -> (i32, i32) {
    %c0_i32 = arith.constant 0 : i32
    %c0_i32_0 = arith.constant 0 : i32
    return %arg0, %c0_i32 : i32, i32
  }
  func.func @transform_1(%arg0: i32) -> (i32, i32) {
    %c0_i32 = arith.constant 0 : i32
    %c0_i32_0 = arith.constant 0 : i32
    %c0_i32_1 = arith.constant 0 : i32
    return %c0_i32, %c0_i32_0 : i32, i32
  }
  func.func @transform_2(%arg0: i32) -> (i32, i32) {
    %c0_i32 = arith.constant 0 : i32
    %c0_i32_0 = arith.constant 0 : i32
    %c0_i32_1 = arith.constant 0 : i32
    return %c0_i32, %c0_i32_0 : i32, i32
  }
  func.func @transform_3(%arg0: i32) -> (i32, i32) {
    %c0_i32 = arith.constant 0 : i32
    %c0_i32_0 = arith.constant 0 : i32
    return %arg0, %c0_i32 : i32, i32
  }
}

module attributes {stable_mosaic.version = 11 : i64} {
  func.func @_matmul_kernel(%arg0: i32, %arg1: i32, %arg2: i32, %arg3: memref<16x128xbf16, #tpu.memory_space<vmem>>, %arg4: memref<128x256xbf16, #tpu.memory_space<vmem>>, %arg5: memref<1x256xf32, #tpu.memory_space<vmem>>, %arg6: memref<16x256xf32, #tpu.memory_space<vmem>>, %arg7: memref<16x256xf32, #tpu.memory_space<vmem>>) attributes {dimension_semantics = [#tpu.dimension_semantics<parallel>, #tpu.dimension_semantics<parallel>, #tpu.dimension_semantics<arbitrary>], iteration_bounds = array<i64: 1, 1, 1>, scalar_prefetch = 0 : i64, scratch_operands = 1 : i64, tpu.core_type = #tpu.core_type<tc>, window_params = [{transform_indices = @transform_0, window_bounds = array<i64: 16, 128>}, {transform_indices = @transform_1, window_bounds = array<i64: 128, 256>}, {transform_indices = @transform_2, window_bounds = array<i64: 1, 256>}, {transform_indices = @transform_3, window_bounds = array<i64: 16, 256>}]} {
    %c0_i32 = arith.constant 0 : i32
    %0 = arith.cmpi eq, %arg2, %c0_i32 : i32
    %1 = arith.extui %0 : i1 to i32
    %c0_i32_0 = arith.constant 0 : i32
    %2 = arith.cmpi ne, %1, %c0_i32_0 : i32
    scf.if %2 {
      %cst_10 = arith.constant 0.000000e+00 : f32
      %12 = vector.broadcast %cst_10 : f32 to vector<16x256xf32>
      %c0_11 = arith.constant 0 : index
      %c0_12 = arith.constant 0 : index
      %13 = vector.load %arg7[%c0_11, %c0_12] : memref<16x256xf32, #tpu.memory_space<vmem>>, vector<16x256xf32>
      tpu.vector_store %arg7[%c0_11, %c0_12], %12 {strides = array<i32>} : memref<16x256xf32, #tpu.memory_space<vmem>>, vector<16x256xf32>,
    } else {
    }
    %c0 = arith.constant 0 : index
    %c0_1 = arith.constant 0 : index
    %3 = vector.load %arg7[%c0, %c0_1] : memref<16x256xf32, #tpu.memory_space<vmem>>, vector<16x256xf32>
    %c0_2 = arith.constant 0 : index
    %c0_3 = arith.constant 0 : index
    %4 = vector.load %arg3[%c0_2, %c0_3] : memref<16x128xbf16, #tpu.memory_space<vmem>>, vector<16x128xbf16>
    %c0_4 = arith.constant 0 : index
    %c0_5 = arith.constant 0 : index
    %5 = vector.load %arg4[%c0_4, %c0_5] : memref<128x256xbf16, #tpu.memory_space<vmem>>, vector<128x256xbf16>
    %cst = arith.constant dense<0.000000e+00> : vector<16x256xf32>
    %6 = tpu.matmul %4, %5, %cst {dimension_numbers = #tpu.dot_dimension_numbers<[1], [0], [0], [1], [0, 0, 1, 1], [], []>} : vector<16x128xbf16>, vector<128x256xbf16>, vector<16x256xf32> -> vector<16x256xf32>
    %7 = arith.addf %3, %6 : vector<16x256xf32>
    %c0_6 = arith.constant 0 : index
    %c0_7 = arith.constant 0 : index
    %8 = vector.load %arg7[%c0_6, %c0_7] : memref<16x256xf32, #tpu.memory_space<vmem>>, vector<16x256xf32>
    tpu.vector_store %arg7[%c0_6, %c0_7], %7 {strides = array<i32>} : memref<16x256xf32, #tpu.memory_space<vmem>>, vector<16x256xf32>,
    %c0_i32_8 = arith.constant 0 : i32
    %9 = arith.cmpi eq, %arg2, %c0_i32_8 : i32
    %10 = arith.extui %9 : i1 to i32
    %c0_i32_9 = arith.constant 0 : i32
    %11 = arith.cmpi ne, %10, %c0_i32_9 : i32
    scf.if %11 {
      %c0_10 = arith.constant 0 : index
      %c0_11 = arith.constant 0 : index
      %12 = vector.load %arg7[%c0_10, %c0_11] : memref<16x256xf32, #tpu.memory_space<vmem>>, vector<16x256xf32>
      %c0_12 = arith.constant 0 : index
      %c0_13 = arith.constant 0 : index
      %13 = vector.load %arg5[%c0_12, %c0_13] : memref<1x256xf32, #tpu.memory_space<vmem>>, vector<1x256xf32>
      %14 = vector.broadcast %13 : vector<1x256xf32> to vector<16x256xf32>
      %15 = arith.addf %12, %14 : vector<16x256xf32>
      %c0_14 = arith.constant 0 : index
      %c0_15 = arith.constant 0 : index
      %16 = vector.load %arg6[%c0_14, %c0_15] : memref<16x256xf32, #tpu.memory_space<vmem>>, vector<16x256xf32>
      tpu.vector_store %arg6[%c0_14, %c0_15], %15 {strides = array<i32>} : memref<16x256xf32, #tpu.memory_space<vmem>>, vector<16x256xf32>,
    } else {
    }
    return
  }
  func.func @transform_0(%arg0: i32, %arg1: i32, %arg2: i32) -> (i32, i32) {
    %c0_i32 = arith.constant 0 : i32
    return %arg0, %arg2 : i32, i32
  }
  func.func @transform_1(%arg0: i32, %arg1: i32, %arg2: i32) -> (i32, i32) {
    %c0_i32 = arith.constant 0 : i32
    return %arg2, %arg1 : i32, i32
  }
  func.func @transform_2(%arg0: i32, %arg1: i32, %arg2: i32) -> (i32, i32) {
    %c0_i32 = arith.constant 0 : i32
    %c0_i32_0 = arith.constant 0 : i32
    return %c0_i32, %arg1 : i32, i32
  }
  func.func @transform_3(%arg0: i32, %arg1: i32, %arg2: i32) -> (i32, i32) {
    %c0_i32 = arith.constant 0 : i32
    return %arg0, %arg1 : i32, i32
  }
}

module attributes {stable_mosaic.version = 11 : i64} {
  func.func @_matmul_kernel(%arg0: i32, %arg1: i32, %arg2: i32, %arg3: memref<16x256xbf16, #tpu.memory_space<vmem>>, %arg4: memref<256x256xbf16, #tpu.memory_space<vmem>>, %arg5: memref<1x256xf32, #tpu.memory_space<vmem>>, %arg6: memref<16x256xf32, #tpu.memory_space<vmem>>, %arg7: memref<16x256xf32, #tpu.memory_space<vmem>>) attributes {dimension_semantics = [#tpu.dimension_semantics<parallel>, #tpu.dimension_semantics<parallel>, #tpu.dimension_semantics<arbitrary>], iteration_bounds = array<i64: 1, 3, 1>, scalar_prefetch = 0 : i64, scratch_operands = 1 : i64, tpu.core_type = #tpu.core_type<tc>, window_params = [{transform_indices = @transform_0, window_bounds = array<i64: 16, 256>}, {transform_indices = @transform_1, window_bounds = array<i64: 256, 256>}, {transform_indices = @transform_2, window_bounds = array<i64: 1, 256>}, {transform_indices = @transform_3, window_bounds = array<i64: 16, 256>}]} {
    %c0_i32 = arith.constant 0 : i32
    %0 = arith.cmpi eq, %arg2, %c0_i32 : i32
    %1 = arith.extui %0 : i1 to i32
    %c0_i32_0 = arith.constant 0 : i32
    %2 = arith.cmpi ne, %1, %c0_i32_0 : i32
    scf.if %2 {
      %cst_10 = arith.constant 0.000000e+00 : f32
      %12 = vector.broadcast %cst_10 : f32 to vector<16x256xf32>
      %c0_11 = arith.constant 0 : index
      %c0_12 = arith.constant 0 : index
      %13 = vector.load %arg7[%c0_11, %c0_12] : memref<16x256xf32, #tpu.memory_space<vmem>>, vector<16x256xf32>
      tpu.vector_store %arg7[%c0_11, %c0_12], %12 {strides = array<i32>} : memref<16x256xf32, #tpu.memory_space<vmem>>, vector<16x256xf32>,
    } else {
    }
    %c0 = arith.constant 0 : index
    %c0_1 = arith.constant 0 : index
    %3 = vector.load %arg7[%c0, %c0_1] : memref<16x256xf32, #tpu.memory_space<vmem>>, vector<16x256xf32>
    %c0_2 = arith.constant 0 : index
    %c0_3 = arith.constant 0 : index
    %4 = vector.load %arg3[%c0_2, %c0_3] : memref<16x256xbf16, #tpu.memory_space<vmem>>, vector<16x256xbf16>
    %c0_4 = arith.constant 0 : index
    %c0_5 = arith.constant 0 : index
    %5 = vector.load %arg4[%c0_4, %c0_5] : memref<256x256xbf16, #tpu.memory_space<vmem>>, vector<256x256xbf16>
    %cst = arith.constant dense<0.000000e+00> : vector<16x256xf32>
    %6 = tpu.matmul %4, %5, %cst {dimension_numbers = #tpu.dot_dimension_numbers<[1], [0], [0], [1], [0, 0, 1, 1], [], []>} : vector<16x256xbf16>, vector<256x256xbf16>, vector<16x256xf32> -> vector<16x256xf32>
    %7 = arith.addf %3, %6 : vector<16x256xf32>
    %c0_6 = arith.constant 0 : index
    %c0_7 = arith.constant 0 : index
    %8 = vector.load %arg7[%c0_6, %c0_7] : memref<16x256xf32, #tpu.memory_space<vmem>>, vector<16x256xf32>
    tpu.vector_store %arg7[%c0_6, %c0_7], %7 {strides = array<i32>} : memref<16x256xf32, #tpu.memory_space<vmem>>, vector<16x256xf32>,
    %c0_i32_8 = arith.constant 0 : i32
    %9 = arith.cmpi eq, %arg2, %c0_i32_8 : i32
    %10 = arith.extui %9 : i1 to i32
    %c0_i32_9 = arith.constant 0 : i32
    %11 = arith.cmpi ne, %10, %c0_i32_9 : i32
    scf.if %11 {
      %c0_10 = arith.constant 0 : index
      %c0_11 = arith.constant 0 : index
      %12 = vector.load %arg7[%c0_10, %c0_11] : memref<16x256xf32, #tpu.memory_space<vmem>>, vector<16x256xf32>
      %c0_12 = arith.constant 0 : index
      %c0_13 = arith.constant 0 : index
      %13 = vector.load %arg5[%c0_12, %c0_13] : memref<1x256xf32, #tpu.memory_space<vmem>>, vector<1x256xf32>
      %14 = vector.broadcast %13 : vector<1x256xf32> to vector<16x256xf32>
      %15 = arith.addf %12, %14 : vector<16x256xf32>
      %c0_14 = arith.constant 0 : index
      %c0_15 = arith.constant 0 : index
      %16 = vector.load %arg6[%c0_14, %c0_15] : memref<16x256xf32, #tpu.memory_space<vmem>>, vector<16x256xf32>
      tpu.vector_store %arg6[%c0_14, %c0_15], %15 {strides = array<i32>} : memref<16x256xf32, #tpu.memory_space<vmem>>, vector<16x256xf32>,
    } else {
    }
    return
  }
  func.func @transform_0(%arg0: i32, %arg1: i32, %arg2: i32) -> (i32, i32) {
    %c0_i32 = arith.constant 0 : i32
    return %arg0, %arg2 : i32, i32
  }
  func.func @transform_1(%arg0: i32, %arg1: i32, %arg2: i32) -> (i32, i32) {
    %c0_i32 = arith.constant 0 : i32
    return %arg2, %arg1 : i32, i32
  }
  func.func @transform_2(%arg0: i32, %arg1: i32, %arg2: i32) -> (i32, i32) {
    %c0_i32 = arith.constant 0 : i32
    %c0_i32_0 = arith.constant 0 : i32
    return %c0_i32, %arg1 : i32, i32
  }
  func.func @transform_3(%arg0: i32, %arg1: i32, %arg2: i32) -> (i32, i32) {
    %c0_i32 = arith.constant 0 : i32
    return %arg0, %arg1 : i32, i32
  }
}

module attributes {stable_mosaic.version = 11 : i64} {
  func.func @_attn_kernel(%arg0: i32, %arg1: memref<8x2x128xf32, #tpu.memory_space<vmem>>, %arg2: memref<8x2x128xf32, #tpu.memory_space<vmem>>, %arg3: memref<8x2x128xf32, #tpu.memory_space<vmem>>, %arg4: memref<8x2x128xf32, #tpu.memory_space<vmem>>) attributes {dimension_semantics = [#tpu.dimension_semantics<parallel>], iteration_bounds = array<i64: 1>, scalar_prefetch = 0 : i64, scratch_operands = 0 : i64, tpu.core_type = #tpu.core_type<tc>, window_params = [{transform_indices = @transform_0, window_bounds = array<i64: 8, 2, 128>}, {transform_indices = @transform_1, window_bounds = array<i64: 8, 2, 128>}, {transform_indices = @transform_2, window_bounds = array<i64: 8, 2, 128>}, {transform_indices = @transform_3, window_bounds = array<i64: 8, 2, 128>}]} {
    %c0 = arith.constant 0 : index
    %c0_0 = arith.constant 0 : index
    %c0_1 = arith.constant 0 : index
    %0 = vector.load %arg1[%c0, %c0_0, %c0_1] : memref<8x2x128xf32, #tpu.memory_space<vmem>>, vector<8x2x128xf32>
    %c0_2 = arith.constant 0 : index
    %c0_3 = arith.constant 0 : index
    %c0_4 = arith.constant 0 : index
    %1 = vector.load %arg2[%c0_2, %c0_3, %c0_4] : memref<8x2x128xf32, #tpu.memory_space<vmem>>, vector<8x2x128xf32>
    %c0_5 = arith.constant 0 : index
    %c0_6 = arith.constant 0 : index
    %c0_7 = arith.constant 0 : index
    %2 = vector.load %arg3[%c0_5, %c0_6, %c0_7] : memref<8x2x128xf32, #tpu.memory_space<vmem>>, vector<8x2x128xf32>
    "tpu.trace_start"() <{level = 10 : i32, message = "gqd,gkd->gqk"}> : () -> ()
    %cst = arith.constant dense<0.000000e+00> : vector<8x2x2xf32>
    %3 = tpu.matmul %0, %1, %cst {dimension_numbers = #tpu.dot_dimension_numbers<[2], [2], [1], [1], [0, 0, 0, 1, 1, 1], [0], [0]>} : vector<8x2x128xf32>, vector<8x2x128xf32>, vector<8x2x2xf32> -> vector<8x2x2xf32>
    "tpu.trace_stop"() : () -> ()
    %cst_8 = arith.constant 0.0912870914 : f32
    %4 = vector.broadcast %cst_8 : f32 to vector<8x2x2xf32>
    %5 = arith.mulf %3, %4 : vector<8x2x2xf32>
    %cst_9 = arith.constant dense<0xFF800000> : vector<8x2xf32>
    %6 = vector.multi_reduction <maximumf>, %5, %cst_9 [2] : vector<8x2x2xf32> to vector<8x2xf32>
    %7 = vector.shape_cast %6 : vector<8x2xf32> to vector<8x2x1xf32>
    %8 = vector.broadcast %7 : vector<8x2x1xf32> to vector<8x2x2xf32>
    %9 = arith.subf %5, %8 : vector<8x2x2xf32>
    %10 = math.exp %9 : vector<8x2x2xf32>
    %cst_10 = arith.constant dense<0.000000e+00> : vector<8x2xf32>
    %11 = vector.multi_reduction <add>, %10, %cst_10 [2] : vector<8x2x2xf32> to vector<8x2xf32>
    %12 = vector.shape_cast %11 : vector<8x2xf32> to vector<8x2x1xf32>
    %13 = vector.broadcast %12 : vector<8x2x1xf32> to vector<8x2x2xf32>
    %14 = arith.divf %10, %13 : vector<8x2x2xf32>
    "tpu.trace_start"() <{level = 10 : i32, message = "gqk,gkd->gqd"}> : () -> ()
    %cst_11 = arith.constant dense<0.000000e+00> : vector<8x2x128xf32>
    %15 = tpu.matmul %14, %2, %cst_11 {dimension_numbers = #tpu.dot_dimension_numbers<[2], [1], [1], [2], [0, 0, 0, 1, 1, 2], [0], [0]>} : vector<8x2x2xf32>, vector<8x2x128xf32>, vector<8x2x128xf32> -> vector<8x2x128xf32>
    "tpu.trace_stop"() : () -> ()
    %c0_12 = arith.constant 0 : index
    %c0_13 = arith.constant 0 : index
    %c0_14 = arith.constant 0 : index
    %16 = vector.load %arg4[%c0_12, %c0_13, %c0_14] : memref<8x2x128xf32, #tpu.memory_space<vmem>>, vector<8x2x128xf32>
    tpu.vector_store %arg4[%c0_12, %c0_13, %c0_14], %15 {strides = array<i32>} : memref<8x2x128xf32, #tpu.memory_space<vmem>>, vector<8x2x128xf32>,
    return
  }
  func.func @transform_0(%arg0: i32) -> (i32, i32, i32) {
    %c0_i32 = arith.constant 0 : i32
    %c0_i32_0 = arith.constant 0 : i32
    %c0_i32_1 = arith.constant 0 : i32
    return %arg0, %c0_i32, %c0_i32_0 : i32, i32, i32
  }
  func.func @transform_1(%arg0: i32) -> (i32, i32, i32) {
    %c0_i32 = arith.constant 0 : i32
    %c0_i32_0 = arith.constant 0 : i32
    %c0_i32_1 = arith.constant 0 : i32
    return %arg0, %c0_i32, %c0_i32_0 : i32, i32, i32
  }
  func.func @transform_2(%arg0: i32) -> (i32, i32, i32) {
    %c0_i32 = arith.constant 0 : i32
    %c0_i32_0 = arith.constant 0 : i32
    %c0_i32_1 = arith.constant 0 : i32
    return %arg0, %c0_i32, %c0_i32_0 : i32, i32, i32
  }
  func.func @transform_3(%arg0: i32) -> (i32, i32, i32) {
    %c0_i32 = arith.constant 0 : i32
    %c0_i32_0 = arith.constant 0 : i32
    %c0_i32_1 = arith.constant 0 : i32
    return %arg0, %c0_i32, %c0_i32_0 : i32, i32, i32
  }
}

module attributes {stable_mosaic.version = 11 : i64} {
  func.func @_matmul_kernel(%arg0: i32, %arg1: i32, %arg2: i32, %arg3: memref<16x256xbf16, #tpu.memory_space<vmem>>, %arg4: memref<256x256xbf16, #tpu.memory_space<vmem>>, %arg5: memref<1x256xf32, #tpu.memory_space<vmem>>, %arg6: memref<16x256xf32, #tpu.memory_space<vmem>>, %arg7: memref<16x256xf32, #tpu.memory_space<vmem>>) attributes {dimension_semantics = [#tpu.dimension_semantics<parallel>, #tpu.dimension_semantics<parallel>, #tpu.dimension_semantics<arbitrary>], iteration_bounds = array<i64: 1, 1, 1>, scalar_prefetch = 0 : i64, scratch_operands = 1 : i64, tpu.core_type = #tpu.core_type<tc>, window_params = [{transform_indices = @transform_0, window_bounds = array<i64: 16, 256>}, {transform_indices = @transform_1, window_bounds = array<i64: 256, 256>}, {transform_indices = @transform_2, window_bounds = array<i64: 1, 256>}, {transform_indices = @transform_3, window_bounds = array<i64: 16, 256>}]} {
    %c0_i32 = arith.constant 0 : i32
    %0 = arith.cmpi eq, %arg2, %c0_i32 : i32
    %1 = arith.extui %0 : i1 to i32
    %c0_i32_0 = arith.constant 0 : i32
    %2 = arith.cmpi ne, %1, %c0_i32_0 : i32
    scf.if %2 {
      %cst_10 = arith.constant 0.000000e+00 : f32
      %12 = vector.broadcast %cst_10 : f32 to vector<16x256xf32>
      %c0_11 = arith.constant 0 : index
      %c0_12 = arith.constant 0 : index
      %13 = vector.load %arg7[%c0_11, %c0_12] : memref<16x256xf32, #tpu.memory_space<vmem>>, vector<16x256xf32>
      tpu.vector_store %arg7[%c0_11, %c0_12], %12 {strides = array<i32>} : memref<16x256xf32, #tpu.memory_space<vmem>>, vector<16x256xf32>,
    } else {
    }
    %c0 = arith.constant 0 : index
    %c0_1 = arith.constant 0 : index
    %3 = vector.load %arg7[%c0, %c0_1] : memref<16x256xf32, #tpu.memory_space<vmem>>, vector<16x256xf32>
    %c0_2 = arith.constant 0 : index
    %c0_3 = arith.constant 0 : index
    %4 = vector.load %arg3[%c0_2, %c0_3] : memref<16x256xbf16, #tpu.memory_space<vmem>>, vector<16x256xbf16>
    %c0_4 = arith.constant 0 : index
    %c0_5 = arith.constant 0 : index
    %5 = vector.load %arg4[%c0_4, %c0_5] : memref<256x256xbf16, #tpu.memory_space<vmem>>, vector<256x256xbf16>
    %cst = arith.constant dense<0.000000e+00> : vector<16x256xf32>
    %6 = tpu.matmul %4, %5, %cst {dimension_numbers = #tpu.dot_dimension_numbers<[1], [0], [0], [1], [0, 0, 1, 1], [], []>} : vector<16x256xbf16>, vector<256x256xbf16>, vector<16x256xf32> -> vector<16x256xf32>
    %7 = arith.addf %3, %6 : vector<16x256xf32>
    %c0_6 = arith.constant 0 : index
    %c0_7 = arith.constant 0 : index
    %8 = vector.load %arg7[%c0_6, %c0_7] : memref<16x256xf32, #tpu.memory_space<vmem>>, vector<16x256xf32>
    tpu.vector_store %arg7[%c0_6, %c0_7], %7 {strides = array<i32>} : memref<16x256xf32, #tpu.memory_space<vmem>>, vector<16x256xf32>,
    %c0_i32_8 = arith.constant 0 : i32
    %9 = arith.cmpi eq, %arg2, %c0_i32_8 : i32
    %10 = arith.extui %9 : i1 to i32
    %c0_i32_9 = arith.constant 0 : i32
    %11 = arith.cmpi ne, %10, %c0_i32_9 : i32
    scf.if %11 {
      %c0_10 = arith.constant 0 : index
      %c0_11 = arith.constant 0 : index
      %12 = vector.load %arg7[%c0_10, %c0_11] : memref<16x256xf32, #tpu.memory_space<vmem>>, vector<16x256xf32>
      %c0_12 = arith.constant 0 : index
      %c0_13 = arith.constant 0 : index
      %13 = vector.load %arg5[%c0_12, %c0_13] : memref<1x256xf32, #tpu.memory_space<vmem>>, vector<1x256xf32>
      %14 = vector.broadcast %13 : vector<1x256xf32> to vector<16x256xf32>
      %15 = arith.addf %12, %14 : vector<16x256xf32>
      %c0_14 = arith.constant 0 : index
      %c0_15 = arith.constant 0 : index
      %16 = vector.load %arg6[%c0_14, %c0_15] : memref<16x256xf32, #tpu.memory_space<vmem>>, vector<16x256xf32>
      tpu.vector_store %arg6[%c0_14, %c0_15], %15 {strides = array<i32>} : memref<16x256xf32, #tpu.memory_space<vmem>>, vector<16x256xf32>,
    } else {
    }
    return
  }
  func.func @transform_0(%arg0: i32, %arg1: i32, %arg2: i32) -> (i32, i32) {
    %c0_i32 = arith.constant 0 : i32
    return %arg0, %arg2 : i32, i32
  }
  func.func @transform_1(%arg0: i32, %arg1: i32, %arg2: i32) -> (i32, i32) {
    %c0_i32 = arith.constant 0 : i32
    return %arg2, %arg1 : i32, i32
  }
  func.func @transform_2(%arg0: i32, %arg1: i32, %arg2: i32) -> (i32, i32) {
    %c0_i32 = arith.constant 0 : i32
    %c0_i32_0 = arith.constant 0 : i32
    return %c0_i32, %arg1 : i32, i32
  }
  func.func @transform_3(%arg0: i32, %arg1: i32, %arg2: i32) -> (i32, i32) {
    %c0_i32 = arith.constant 0 : i32
    return %arg0, %arg1 : i32, i32
  }
}

module attributes {stable_mosaic.version = 11 : i64} {
  func.func @_matmul_kernel(%arg0: i32, %arg1: i32, %arg2: i32, %arg3: memref<16x256xbf16, #tpu.memory_space<vmem>>, %arg4: memref<256x128xbf16, #tpu.memory_space<vmem>>, %arg5: memref<1x128xf32, #tpu.memory_space<vmem>>, %arg6: memref<16x128xf32, #tpu.memory_space<vmem>>, %arg7: memref<16x128xf32, #tpu.memory_space<vmem>>) attributes {dimension_semantics = [#tpu.dimension_semantics<parallel>, #tpu.dimension_semantics<parallel>, #tpu.dimension_semantics<arbitrary>], iteration_bounds = array<i64: 1, 1, 1>, scalar_prefetch = 0 : i64, scratch_operands = 1 : i64, tpu.core_type = #tpu.core_type<tc>, window_params = [{transform_indices = @transform_0, window_bounds = array<i64: 16, 256>}, {transform_indices = @transform_1, window_bounds = array<i64: 256, 128>}, {transform_indices = @transform_2, window_bounds = array<i64: 1, 128>}, {transform_indices = @transform_3, window_bounds = array<i64: 16, 128>}]} {
    %c0_i32 = arith.constant 0 : i32
    %0 = arith.cmpi eq, %arg2, %c0_i32 : i32
    %1 = arith.extui %0 : i1 to i32
    %c0_i32_0 = arith.constant 0 : i32
    %2 = arith.cmpi ne, %1, %c0_i32_0 : i32
    scf.if %2 {
      %cst_10 = arith.constant 0.000000e+00 : f32
      %12 = vector.broadcast %cst_10 : f32 to vector<16x128xf32>
      %c0_11 = arith.constant 0 : index
      %c0_12 = arith.constant 0 : index
      %13 = vector.load %arg7[%c0_11, %c0_12] : memref<16x128xf32, #tpu.memory_space<vmem>>, vector<16x128xf32>
      tpu.vector_store %arg7[%c0_11, %c0_12], %12 {strides = array<i32>} : memref<16x128xf32, #tpu.memory_space<vmem>>, vector<16x128xf32>,
    } else {
    }
    %c0 = arith.constant 0 : index
    %c0_1 = arith.constant 0 : index
    %3 = vector.load %arg7[%c0, %c0_1] : memref<16x128xf32, #tpu.memory_space<vmem>>, vector<16x128xf32>
    %c0_2 = arith.constant 0 : index
    %c0_3 = arith.constant 0 : index
    %4 = vector.load %arg3[%c0_2, %c0_3] : memref<16x256xbf16, #tpu.memory_space<vmem>>, vector<16x256xbf16>
    %c0_4 = arith.constant 0 : index
    %c0_5 = arith.constant 0 : index
    %5 = vector.load %arg4[%c0_4, %c0_5] : memref<256x128xbf16, #tpu.memory_space<vmem>>, vector<256x128xbf16>
    %cst = arith.constant dense<0.000000e+00> : vector<16x128xf32>
    %6 = tpu.matmul %4, %5, %cst {dimension_numbers = #tpu.dot_dimension_numbers<[1], [0], [0], [1], [0, 0, 1, 1], [], []>} : vector<16x256xbf16>, vector<256x128xbf16>, vector<16x128xf32> -> vector<16x128xf32>
    %7 = arith.addf %3, %6 : vector<16x128xf32>
    %c0_6 = arith.constant 0 : index
    %c0_7 = arith.constant 0 : index
    %8 = vector.load %arg7[%c0_6, %c0_7] : memref<16x128xf32, #tpu.memory_space<vmem>>, vector<16x128xf32>
    tpu.vector_store %arg7[%c0_6, %c0_7], %7 {strides = array<i32>} : memref<16x128xf32, #tpu.memory_space<vmem>>, vector<16x128xf32>,
    %c0_i32_8 = arith.constant 0 : i32
    %9 = arith.cmpi eq, %arg2, %c0_i32_8 : i32
    %10 = arith.extui %9 : i1 to i32
    %c0_i32_9 = arith.constant 0 : i32
    %11 = arith.cmpi ne, %10, %c0_i32_9 : i32
    scf.if %11 {
      %c0_10 = arith.constant 0 : index
      %c0_11 = arith.constant 0 : index
      %12 = vector.load %arg7[%c0_10, %c0_11] : memref<16x128xf32, #tpu.memory_space<vmem>>, vector<16x128xf32>
      %c0_12 = arith.constant 0 : index
      %c0_13 = arith.constant 0 : index
      %13 = vector.load %arg5[%c0_12, %c0_13] : memref<1x128xf32, #tpu.memory_space<vmem>>, vector<1x128xf32>
      %14 = vector.broadcast %13 : vector<1x128xf32> to vector<16x128xf32>
      %15 = arith.addf %12, %14 : vector<16x128xf32>
      %c0_14 = arith.constant 0 : index
      %c0_15 = arith.constant 0 : index
      %16 = vector.load %arg6[%c0_14, %c0_15] : memref<16x128xf32, #tpu.memory_space<vmem>>, vector<16x128xf32>
      tpu.vector_store %arg6[%c0_14, %c0_15], %15 {strides = array<i32>} : memref<16x128xf32, #tpu.memory_space<vmem>>, vector<16x128xf32>,
    } else {
    }
    return
  }
  func.func @transform_0(%arg0: i32, %arg1: i32, %arg2: i32) -> (i32, i32) {
    %c0_i32 = arith.constant 0 : i32
    return %arg0, %arg2 : i32, i32
  }
  func.func @transform_1(%arg0: i32, %arg1: i32, %arg2: i32) -> (i32, i32) {
    %c0_i32 = arith.constant 0 : i32
    return %arg2, %arg1 : i32, i32
  }
  func.func @transform_2(%arg0: i32, %arg1: i32, %arg2: i32) -> (i32, i32) {
    %c0_i32 = arith.constant 0 : i32
    %c0_i32_0 = arith.constant 0 : i32
    return %c0_i32, %arg1 : i32, i32
  }
  func.func @transform_3(%arg0: i32, %arg1: i32, %arg2: i32) -> (i32, i32) {
    %c0_i32 = arith.constant 0 : i32
    return %arg0, %arg1 : i32, i32
  }
}

module attributes {stable_mosaic.version = 11 : i64} {
  func.func @_vq_kernel(%arg0: i32, %arg1: memref<8x64xf32, #tpu.memory_space<vmem>>, %arg2: memref<64x512xf32, #tpu.memory_space<vmem>>, %arg3: memref<512x64xf32, #tpu.memory_space<vmem>>, %arg4: memref<1x512xf32, #tpu.memory_space<vmem>>, %arg5: memref<8x64xf32, #tpu.memory_space<vmem>>, %arg6: memref<8x1xi32, #tpu.memory_space<vmem>>, %arg7: memref<1x1xf32, #tpu.memory_space<vmem>>) attributes {dimension_semantics = [#tpu.dimension_semantics<arbitrary>], iteration_bounds = array<i64: 1>, scalar_prefetch = 0 : i64, scratch_operands = 0 : i64, tpu.core_type = #tpu.core_type<tc>, window_params = [{transform_indices = @transform_0, window_bounds = array<i64: 8, 64>}, {pipeline_mode = #tpu.pipeline_mode<synchronous>, transform_indices = @transform_1, window_bounds = array<i64: 64, 512>}, {pipeline_mode = #tpu.pipeline_mode<synchronous>, transform_indices = @transform_2, window_bounds = array<i64: 512, 64>}, {pipeline_mode = #tpu.pipeline_mode<synchronous>, transform_indices = @transform_3, window_bounds = array<i64: 1, 512>}, {transform_indices = @transform_4, window_bounds = array<i64: 8, 64>}, {transform_indices = @transform_5, window_bounds = array<i64: 8, 1>}, {pipeline_mode = #tpu.pipeline_mode<synchronous>, transform_indices = @transform_6, window_bounds = array<i64: 1, 1>}]} {
    %c0_i32 = arith.constant 0 : i32
    %0 = arith.cmpi eq, %arg0, %c0_i32 : i32
    %1 = arith.extui %0 : i1 to i32
    %c0_i32_0 = arith.constant 0 : i32
    %2 = arith.cmpi ne, %1, %c0_i32_0 : i32
    scf.if %2 {
      %cst_25 = arith.constant 0.000000e+00 : f32
      %47 = vector.broadcast %cst_25 : f32 to vector<1x1xf32>
      %c0_26 = arith.constant 0 : index
      %c0_27 = arith.constant 0 : index
      %48 = vector.load %arg7[%c0_26, %c0_27] : memref<1x1xf32, #tpu.memory_space<vmem>>, vector<1x1xf32>
      tpu.vector_store %arg7[%c0_26, %c0_27], %47 {strides = array<i32>} : memref<1x1xf32, #tpu.memory_space<vmem>>, vector<1x1xf32>,
    } else {
    }
    %c0 = arith.constant 0 : index
    %c0_1 = arith.constant 0 : index
    %3 = vector.load %arg1[%c0, %c0_1] : memref<8x64xf32, #tpu.memory_space<vmem>>, vector<8x64xf32>
    %c0_2 = arith.constant 0 : index
    %c0_3 = arith.constant 0 : index
    %4 = vector.load %arg4[%c0_2, %c0_3] : memref<1x512xf32, #tpu.memory_space<vmem>>, vector<1x512xf32>
    %c0_4 = arith.constant 0 : index
    %c0_5 = arith.constant 0 : index
    %5 = vector.load %arg2[%c0_4, %c0_5] : memref<64x512xf32, #tpu.memory_space<vmem>>, vector<64x512xf32>
    %cst = arith.constant dense<0.000000e+00> : vector<8x512xf32>
    %6 = tpu.matmul %3, %5, %cst {dimension_numbers = #tpu.dot_dimension_numbers<[1], [0], [0], [1], [0, 0, 1, 1], [], []>} : vector<8x64xf32>, vector<64x512xf32>, vector<8x512xf32> -> vector<8x512xf32>
    %cst_6 = arith.constant 2.000000e+00 : f32
    %7 = vector.broadcast %cst_6 : f32 to vector<8x512xf32>
    %8 = arith.mulf %7, %6 : vector<8x512xf32>
    %9 = vector.broadcast %4 : vector<1x512xf32> to vector<8x512xf32>
    %10 = arith.subf %9, %8 : vector<8x512xf32>
    %cst_7 = arith.constant dense<0x7F800000> : vector<8xf32>
    %11 = vector.multi_reduction <minimumf>, %10, %cst_7 [1] : vector<8x512xf32> to vector<8xf32>
    %12 = vector.shape_cast %11 : vector<8xf32> to vector<8x1xf32>
    %13 = tpu.iota {dimensions = array<i32: 1>} : vector<8x512xi32>
    %14 = vector.broadcast %12 : vector<8x1xf32> to vector<8x512xf32>
    %15 = arith.cmpf ole, %10, %14 : vector<8x512xf32>
    %c512_i32 = arith.constant 512 : i32
    %16 = vector.broadcast %c512_i32 : i32 to vector<8x512xi32>
    %17 = arith.select %15, %13, %16 : vector<8x512xi1>, vector<8x512xi32>
    %cst_8 = arith.constant dense<2147483647> : vector<8xi32>
    %18 = vector.multi_reduction <minsi>, %17, %cst_8 [1] : vector<8x512xi32> to vector<8xi32>
    %19 = vector.shape_cast %18 : vector<8xi32> to vector<8x1xi32>
    %c0_9 = arith.constant 0 : index
    %c0_10 = arith.constant 0 : index
    %20 = vector.load %arg6[%c0_9, %c0_10] : memref<8x1xi32, #tpu.memory_space<vmem>>, vector<8x1xi32>
    tpu.vector_store %arg6[%c0_9, %c0_10], %19 {strides = array<i32>} : memref<8x1xi32, #tpu.memory_space<vmem>>, vector<8x1xi32>,
    %21 = vector.broadcast %19 : vector<8x1xi32> to vector<8x512xi32>
    %22 = arith.cmpi eq, %13, %21 : vector<8x512xi32>
    %23 = arith.extui %22 : vector<8x512xi1> to vector<8x512xi32>
    %24 = arith.sitofp %23 : vector<8x512xi32> to vector<8x512xf32>
    %c0_11 = arith.constant 0 : index
    %c0_12 = arith.constant 0 : index
    %25 = vector.load %arg3[%c0_11, %c0_12] : memref<512x64xf32, #tpu.memory_space<vmem>>, vector<512x64xf32>
    %cst_13 = arith.constant dense<0.000000e+00> : vector<8x64xf32>
    %26 = tpu.matmul %24, %25, %cst_13 {dimension_numbers = #tpu.dot_dimension_numbers<[1], [0], [0], [1], [0, 0, 1, 1], [], []>} : vector<8x512xf32>, vector<512x64xf32>, vector<8x64xf32> -> vector<8x64xf32>
    %c0_14 = arith.constant 0 : index
    %c0_15 = arith.constant 0 : index
    %27 = vector.load %arg5[%c0_14, %c0_15] : memref<8x64xf32, #tpu.memory_space<vmem>>, vector<8x64xf32>
    tpu.vector_store %arg5[%c0_14, %c0_15], %26 {strides = array<i32>} : memref<8x64xf32, #tpu.memory_space<vmem>>, vector<8x64xf32>,
    %28 = tpu.iota {dimensions = array<i32: 0>} : vector<8x1xi32>
    %c8_i32 = arith.constant 8 : i32
    %29 = arith.muli %arg0, %c8_i32 : i32
    %30 = vector.broadcast %29 : i32 to vector<8x1xi32>
    %31 = arith.addi %28, %30 : vector<8x1xi32>
    %32 = arith.subf %26, %3 : vector<8x64xf32>
    %c8_i32_16 = arith.constant 8 : i32
    %33 = vector.broadcast %c8_i32_16 : i32 to vector<8x1xi32>
    %34 = arith.cmpi slt, %31, %33 : vector<8x1xi32>
    %35 = arith.mulf %32, %32 : vector<8x64xf32>
    %cst_17 = arith.constant dense<0.000000e+00> : vector<8xf32>
    %36 = vector.multi_reduction <add>, %35, %cst_17 [1] : vector<8x64xf32> to vector<8xf32>
    %37 = vector.shape_cast %36 : vector<8xf32> to vector<8x1xf32>
    %cst_18 = arith.constant 0.000000e+00 : f32
    %38 = vector.broadcast %cst_18 : f32 to vector<8x1xf32>
    %39 = arith.select %34, %37, %38 : vector<8x1xi1>, vector<8x1xf32>
    %c0_19 = arith.constant 0 : index
    %c0_20 = arith.constant 0 : index
    %40 = vector.load %arg7[%c0_19, %c0_20] : memref<1x1xf32, #tpu.memory_space<vmem>>, vector<1x1xf32>
    %cst_21 = arith.constant dense<0.000000e+00> : vector<1xf32>
    %41 = vector.multi_reduction <add>, %39, %cst_21 [0] : vector<8x1xf32> to vector<1xf32>
    %42 = vector.shape_cast %41 : vector<1xf32> to vector<1x1xf32>
    %cst_22 = arith.constant 0.001953125 : f32
    %43 = vector.broadcast %cst_22 : f32 to vector<1x1xf32>
    %44 = arith.mulf %42, %43 : vector<1x1xf32>
    %45 = arith.addf %40, %44 : vector<1x1xf32>
    %c0_23 = arith.constant 0 : index
    %c0_24 = arith.constant 0 : index
    %46 = vector.load %arg7[%c0_23, %c0_24] : memref<1x1xf32, #tpu.memory_space<vmem>>, vector<1x1xf32>
    tpu.vector_store %arg7[%c0_23, %c0_24], %45 {strides = array<i32>} : memref<1x1xf32, #tpu.memory_space<vmem>>, vector<1x1xf32>,
    return
  }
  func.func @transform_0(%arg0: i32) -> (i32, i32) {
    %c0_i32 = arith.constant 0 : i32
    %c0_i32_0 = arith.constant 0 : i32
    return %arg0, %c0_i32 : i32, i32
  }
  func.func @transform_1(%arg0: i32) -> (i32, i32) {
    %c0_i32 = arith.constant 0 : i32
    %c0_i32_0 = arith.constant 0 : i32
    %c0_i32_1 = arith.constant 0 : i32
    return %c0_i32, %c0_i32_0 : i32, i32
  }
  func.func @transform_2(%arg0: i32) -> (i32, i32) {
    %c0_i32 = arith.constant 0 : i32
    %c0_i32_0 = arith.constant 0 : i32
    %c0_i32_1 = arith.constant 0 : i32
    return %c0_i32, %c0_i32_0 : i32, i32
  }
  func.func @transform_3(%arg0: i32) -> (i32, i32) {
    %c0_i32 = arith.constant 0 : i32
    %c0_i32_0 = arith.constant 0 : i32
    %c0_i32_1 = arith.constant 0 : i32
    return %c0_i32, %c0_i32_0 : i32, i32
  }
  func.func @transform_4(%arg0: i32) -> (i32, i32) {
    %c0_i32 = arith.constant 0 : i32
    %c0_i32_0 = arith.constant 0 : i32
    return %arg0, %c0_i32 : i32, i32
  }
  func.func @transform_5(%arg0: i32) -> (i32, i32) {
    %c0_i32 = arith.constant 0 : i32
    %c0_i32_0 = arith.constant 0 : i32
    return %arg0, %c0_i32 : i32, i32
  }
  func.func @transform_6(%arg0: i32) -> (i32, i32) {
    %c0_i32 = arith.constant 0 : i32
    %c0_i32_0 = arith.constant 0 : i32
    %c0_i32_1 = arith.constant 0 : i32
    return %c0_i32, %c0_i32_0 : i32, i32
  }
}

module attributes {stable_mosaic.version = 11 : i64} {
  func.func @_matmul_kernel(%arg0: i32, %arg1: i32, %arg2: i32, %arg3: memref<16x512xbf16, #tpu.memory_space<vmem>>, %arg4: memref<512x256xbf16, #tpu.memory_space<vmem>>, %arg5: memref<1x256xf32, #tpu.memory_space<vmem>>, %arg6: memref<16x256xf32, #tpu.memory_space<vmem>>, %arg7: memref<16x256xf32, #tpu.memory_space<vmem>>) attributes {dimension_semantics = [#tpu.dimension_semantics<parallel>, #tpu.dimension_semantics<parallel>, #tpu.dimension_semantics<arbitrary>], iteration_bounds = array<i64: 1, 1, 4>, scalar_prefetch = 0 : i64, scratch_operands = 1 : i64, tpu.core_type = #tpu.core_type<tc>, window_params = [{transform_indices = @transform_0, window_bounds = array<i64: 16, 512>}, {transform_indices = @transform_1, window_bounds = array<i64: 512, 256>}, {transform_indices = @transform_2, window_bounds = array<i64: 1, 256>}, {transform_indices = @transform_3, window_bounds = array<i64: 16, 256>}]} {
    %c0_i32 = arith.constant 0 : i32
    %0 = arith.cmpi eq, %arg2, %c0_i32 : i32
    %1 = arith.extui %0 : i1 to i32
    %c0_i32_0 = arith.constant 0 : i32
    %2 = arith.cmpi ne, %1, %c0_i32_0 : i32
    scf.if %2 {
      %cst_9 = arith.constant 0.000000e+00 : f32
      %12 = vector.broadcast %cst_9 : f32 to vector<16x256xf32>
      %c0_10 = arith.constant 0 : index
      %c0_11 = arith.constant 0 : index
      %13 = vector.load %arg7[%c0_10, %c0_11] : memref<16x256xf32, #tpu.memory_space<vmem>>, vector<16x256xf32>
      tpu.vector_store %arg7[%c0_10, %c0_11], %12 {strides = array<i32>} : memref<16x256xf32, #tpu.memory_space<vmem>>, vector<16x256xf32>,
    } else {
    }
    %c0 = arith.constant 0 : index
    %c0_1 = arith.constant 0 : index
    %3 = vector.load %arg7[%c0, %c0_1] : memref<16x256xf32, #tpu.memory_space<vmem>>, vector<16x256xf32>
    %c0_2 = arith.constant 0 : index
    %c0_3 = arith.constant 0 : index
    %4 = vector.load %arg3[%c0_2, %c0_3] : memref<16x512xbf16, #tpu.memory_space<vmem>>, vector<16x512xbf16>
    %c0_4 = arith.constant 0 : index
    %c0_5 = arith.constant 0 : index
    %5 = vector.load %arg4[%c0_4, %c0_5] : memref<512x256xbf16, #tpu.memory_space<vmem>>, vector<512x256xbf16>
    %cst = arith.constant dense<0.000000e+00> : vector<16x256xf32>
    %6 = tpu.matmul %4, %5, %cst {dimension_numbers = #tpu.dot_dimension_numbers<[1], [0], [0], [1], [0, 0, 1, 1], [], []>} : vector<16x512xbf16>, vector<512x256xbf16>, vector<16x256xf32> -> vector<16x256xf32>
    %7 = arith.addf %3, %6 : vector<16x256xf32>
    %c0_6 = arith.constant 0 : index
    %c0_7 = arith.constant 0 : index
    %8 = vector.load %arg7[%c0_6, %c0_7] : memref<16x256xf32, #tpu.memory_space<vmem>>, vector<16x256xf32>
    tpu.vector_store %arg7[%c0_6, %c0_7], %7 {strides = array<i32>} : memref<16x256xf32, #tpu.memory_space<vmem>>, vector<16x256xf32>,
    %c3_i32 = arith.constant 3 : i32
    %9 = arith.cmpi eq, %arg2, %c3_i32 : i32
    %10 = arith.extui %9 : i1 to i32
    %c0_i32_8 = arith.constant 0 : i32
    %11 = arith.cmpi ne, %10, %c0_i32_8 : i32
    scf.if %11 {
      %c0_9 = arith.constant 0 : index
      %c0_10 = arith.constant 0 : index
      %12 = vector.load %arg7[%c0_9, %c0_10] : memref<16x256xf32, #tpu.memory_space<vmem>>, vector<16x256xf32>
      %c0_11 = arith.constant 0 : index
      %c0_12 = arith.constant 0 : index
      %13 = vector.load %arg5[%c0_11, %c0_12] : memref<1x256xf32, #tpu.memory_space<vmem>>, vector<1x256xf32>
      %14 = vector.broadcast %13 : vector<1x256xf32> to vector<16x256xf32>
      %15 = arith.addf %12, %14 : vector<16x256xf32>
      %cst_13 = arith.constant 0.000000e+00 : f32
      %16 = vector.broadcast %cst_13 : f32 to vector<16x256xf32>
      %17 = arith.maximumf %15, %16 : vector<16x256xf32>
      %c0_14 = arith.constant 0 : index
      %c0_15 = arith.constant 0 : index
      %18 = vector.load %arg6[%c0_14, %c0_15] : memref<16x256xf32, #tpu.memory_space<vmem>>, vector<16x256xf32>
      tpu.vector_store %arg6[%c0_14, %c0_15], %17 {strides = array<i32>} : memref<16x256xf32, #tpu.memory_space<vmem>>, vector<16x256xf32>,
    } else {
    }
    return
  }
  func.func @transform_0(%arg0: i32, %arg1: i32, %arg2: i32) -> (i32, i32) {
    %c0_i32 = arith.constant 0 : i32
    return %arg0, %arg2 : i32, i32
  }
  func.func @transform_1(%arg0: i32, %arg1: i32, %arg2: i32) -> (i32, i32) {
    %c0_i32 = arith.constant 0 : i32
    return %arg2, %arg1 : i32, i32
  }
  func.func @transform_2(%arg0: i32, %arg1: i32, %arg2: i32) -> (i32, i32) {
    %c0_i32 = arith.constant 0 : i32
    %c0_i32_0 = arith.constant 0 : i32
    return %c0_i32, %arg1 : i32, i32
  }
  func.func @transform_3(%arg0: i32, %arg1: i32, %arg2: i32) -> (i32, i32) {
    %c0_i32 = arith.constant 0 : i32
    return %arg0, %arg1 : i32, i32
  }
}

module attributes {stable_mosaic.version = 11 : i64} {
  func.func @_matmul_kernel(%arg0: i32, %arg1: i32, %arg2: i32, %arg3: memref<64x512xbf16, #tpu.memory_space<vmem>>, %arg4: memref<512x128xbf16, #tpu.memory_space<vmem>>, %arg5: memref<1x128xf32, #tpu.memory_space<vmem>>, %arg6: memref<64x128xf32, #tpu.memory_space<vmem>>, %arg7: memref<64x128xf32, #tpu.memory_space<vmem>>) attributes {dimension_semantics = [#tpu.dimension_semantics<parallel>, #tpu.dimension_semantics<parallel>, #tpu.dimension_semantics<arbitrary>], iteration_bounds = array<i64: 1, 1, 4>, scalar_prefetch = 0 : i64, scratch_operands = 1 : i64, tpu.core_type = #tpu.core_type<tc>, window_params = [{transform_indices = @transform_0, window_bounds = array<i64: 64, 512>}, {transform_indices = @transform_1, window_bounds = array<i64: 512, 128>}, {transform_indices = @transform_2, window_bounds = array<i64: 1, 128>}, {transform_indices = @transform_3, window_bounds = array<i64: 64, 128>}]} {
    %c0_i32 = arith.constant 0 : i32
    %0 = arith.cmpi eq, %arg2, %c0_i32 : i32
    %1 = arith.extui %0 : i1 to i32
    %c0_i32_0 = arith.constant 0 : i32
    %2 = arith.cmpi ne, %1, %c0_i32_0 : i32
    scf.if %2 {
      %cst_9 = arith.constant 0.000000e+00 : f32
      %12 = vector.broadcast %cst_9 : f32 to vector<64x128xf32>
      %c0_10 = arith.constant 0 : index
      %c0_11 = arith.constant 0 : index
      %13 = vector.load %arg7[%c0_10, %c0_11] : memref<64x128xf32, #tpu.memory_space<vmem>>, vector<64x128xf32>
      tpu.vector_store %arg7[%c0_10, %c0_11], %12 {strides = array<i32>} : memref<64x128xf32, #tpu.memory_space<vmem>>, vector<64x128xf32>,
    } else {
    }
    %c0 = arith.constant 0 : index
    %c0_1 = arith.constant 0 : index
    %3 = vector.load %arg7[%c0, %c0_1] : memref<64x128xf32, #tpu.memory_space<vmem>>, vector<64x128xf32>
    %c0_2 = arith.constant 0 : index
    %c0_3 = arith.constant 0 : index
    %4 = vector.load %arg3[%c0_2, %c0_3] : memref<64x512xbf16, #tpu.memory_space<vmem>>, vector<64x512xbf16>
    %c0_4 = arith.constant 0 : index
    %c0_5 = arith.constant 0 : index
    %5 = vector.load %arg4[%c0_4, %c0_5] : memref<512x128xbf16, #tpu.memory_space<vmem>>, vector<512x128xbf16>
    %cst = arith.constant dense<0.000000e+00> : vector<64x128xf32>
    %6 = tpu.matmul %4, %5, %cst {dimension_numbers = #tpu.dot_dimension_numbers<[1], [0], [0], [1], [0, 0, 1, 1], [], []>} : vector<64x512xbf16>, vector<512x128xbf16>, vector<64x128xf32> -> vector<64x128xf32>
    %7 = arith.addf %3, %6 : vector<64x128xf32>
    %c0_6 = arith.constant 0 : index
    %c0_7 = arith.constant 0 : index
    %8 = vector.load %arg7[%c0_6, %c0_7] : memref<64x128xf32, #tpu.memory_space<vmem>>, vector<64x128xf32>
    tpu.vector_store %arg7[%c0_6, %c0_7], %7 {strides = array<i32>} : memref<64x128xf32, #tpu.memory_space<vmem>>, vector<64x128xf32>,
    %c3_i32 = arith.constant 3 : i32
    %9 = arith.cmpi eq, %arg2, %c3_i32 : i32
    %10 = arith.extui %9 : i1 to i32
    %c0_i32_8 = arith.constant 0 : i32
    %11 = arith.cmpi ne, %10, %c0_i32_8 : i32
    scf.if %11 {
      %c0_9 = arith.constant 0 : index
      %c0_10 = arith.constant 0 : index
      %12 = vector.load %arg7[%c0_9, %c0_10] : memref<64x128xf32, #tpu.memory_space<vmem>>, vector<64x128xf32>
      %c0_11 = arith.constant 0 : index
      %c0_12 = arith.constant 0 : index
      %13 = vector.load %arg5[%c0_11, %c0_12] : memref<1x128xf32, #tpu.memory_space<vmem>>, vector<1x128xf32>
      %14 = vector.broadcast %13 : vector<1x128xf32> to vector<64x128xf32>
      %15 = arith.addf %12, %14 : vector<64x128xf32>
      %c0_13 = arith.constant 0 : index
      %c0_14 = arith.constant 0 : index
      %16 = vector.load %arg6[%c0_13, %c0_14] : memref<64x128xf32, #tpu.memory_space<vmem>>, vector<64x128xf32>
      tpu.vector_store %arg6[%c0_13, %c0_14], %15 {strides = array<i32>} : memref<64x128xf32, #tpu.memory_space<vmem>>, vector<64x128xf32>,
    } else {
    }
    return
  }
  func.func @transform_0(%arg0: i32, %arg1: i32, %arg2: i32) -> (i32, i32) {
    %c0_i32 = arith.constant 0 : i32
    return %arg0, %arg2 : i32, i32
  }
  func.func @transform_1(%arg0: i32, %arg1: i32, %arg2: i32) -> (i32, i32) {
    %c0_i32 = arith.constant 0 : i32
    return %arg2, %arg1 : i32, i32
  }
  func.func @transform_2(%arg0: i32, %arg1: i32, %arg2: i32) -> (i32, i32) {
    %c0_i32 = arith.constant 0 : i32
    %c0_i32_0 = arith.constant 0 : i32
    return %c0_i32, %arg1 : i32, i32
  }
  func.func @transform_3(%arg0: i32, %arg1: i32, %arg2: i32) -> (i32, i32) {
    %c0_i32 = arith.constant 0 : i32
    return %arg0, %arg1 : i32, i32
  }
}

</mosaic_0001>

<bundles_post_ra>
// kernel: vqgan3d_forward.162
= control target key start
LH: loop header
LB: loop body
LE: loop exit
PB: predicated region body
PF: predicated region fallthrough
CT: control target
= control target key end

     0   :  { %s640_s1 = inlined_call_operand.vmem [shape: bf16[128,256], index: 1, kind: input, shape index: {}]   ;;  %s641_s0 = inlined_call_operand.vmem [shape: bf16[64,128], index: 0, kind: input, shape index: {}]   ;;  %s642_s2 = inlined_call_operand.vmem [shape: f32[1,256], index: 2, kind: input, shape index: {}]   ;;  %s643_s3 = inlined_call_operand.vmem [shape: f32[64,256], index: 3, kind: output, shape index: {}]  }
   0x1   :  { %v419_v0 = vld [vmem:[%s640_s1 + $0x70] sm:$0xf]  ;;  %v444_v1 = vld [vmem:[%s640_s1 + $0x74] sm:$0xf0]  ;;  %v443_v2 = vld [vmem:[%s640_s1 + $0x74] sm:$0xf] }
   0x2   :  { %v420_v3 = vor.u32 %v444_v1, %v419_v0  ;;  %v421_v4 = vld [vmem:[%s640_s1 + $0x78] sm:$0xf0]  ;;  %v411_v5 = vld [vmem:[%s640_s1 + $0x60] sm:$0xf]  ;;  %v442_v6 = vld [vmem:[%s640_s1 + $0x64] sm:$0xf0] }
   0x3   :  { %v424_v7 = vor.u32 %v443_v2, %v421_v4  ;;  %v441_v8 = vld [vmem:[%s640_s1 + $0x64] sm:$0xf]  ;;  %v413_v9 = vld [vmem:[%s640_s1 + $0x68] sm:$0xf0]  ;;  %v412_v10 = vor.u32 %v442_v6, %v411_v5  ;;  %v403_v12 = vld [vmem:[%s640_s1 + $0x50] sm:$0xf] }
   0x4   :  { %178 = vmatpush.bf16.msra.mxu0 %v420_v3  ;;  %445 = vmatpush.bf16.msra.mxu2 %v420_v3  ;;  %v416_v11 = vor.u32 %v441_v8, %v413_v9  ;;  %v440_v13 = vld [vmem:[%s640_s1 + $0x54] sm:$0xf0]  ;;  %v439_v14 = vld [vmem:[%s640_s1 + $0x54] sm:$0xf]  ;;  %v405_v15 = vld [vmem:[%s640_s1 + $0x58] sm:$0xf0] }
   0x5   :  { %207 = vmatpush.bf16.msra.mxu1 %v424_v7  ;;  %453 = vmatpush.bf16.msra.mxu3 %v424_v7  ;;  %v404_v16 = vor.u32 %v440_v13, %v403_v12  ;;  %v408_v17 = vor.u32 %v439_v14, %v405_v15  ;;  %v395_v18 = vld [vmem:[%s640_s1 + $0x40] sm:$0xf]  ;;  %v438_v19 = vld [vmem:[%s640_s1 + $0x44] sm:$0xf0]  ;;  %v437_v20 = vld [vmem:[%s640_s1 + $0x44] sm:$0xf] }
   0x6   :  { %v397_v21 = vld [vmem:[%s640_s1 + $0x48] sm:$0xf0]  ;;  %v396_v22 = vor.u32 %v438_v19, %v395_v18  ;;  %v387_v24 = vld [vmem:[%s640_s1 + $0x30] sm:$0xf]  ;;  %v436_v25 = vld [vmem:[%s640_s1 + $0x34] sm:$0xf0] }
   0x7   :  { %v400_v23 = vor.u32 %v437_v20, %v397_v21  ;;  %v435_v26 = vld [vmem:[%s640_s1 + $0x34] sm:$0xf]  ;;  %v389_v27 = vld [vmem:[%s640_s1 + $0x38] sm:$0xf0]  ;;  %v388_v28 = vor.u32 %v436_v25, %v387_v24  ;;  %v379_v30 = vld [vmem:[%s640_s1 + $0x20] sm:$0xf] }
   0x8   :  { %179 = vmatpush.bf16.msra.mxu0 %v412_v10  ;;  %446 = vmatpush.bf16.msra.mxu2 %v412_v10  ;;  %v392_v29 = vor.u32 %v435_v26, %v389_v27  ;;  %v434_v31 = vld [vmem:[%s640_s1 + $0x24] sm:$0xf0]  ;;  %v433_v32 = vld [vmem:[%s640_s1 + $0x24] sm:$0xf]  ;;  %v381_v33 = vld [vmem:[%s640_s1 + $0x28] sm:$0xf0] }
   0x9   :  { %208 = vmatpush.bf16.msra.mxu1 %v416_v11  ;;  %454 = vmatpush.bf16.msra.mxu3 %v416_v11  ;;  %v380_v34 = vor.u32 %v434_v31, %v379_v30  ;;  %v384_v35 = vor.u32 %v433_v32, %v381_v33  ;;  %v371_v36 = vld [vmem:[%s640_s1 + $0x10] sm:$0xf]  ;;  %v432_v37 = vld [vmem:[%s640_s1 + $0x14] sm:$0xf0]  ;;  %v431_v38 = vld [vmem:[%s640_s1 + $0x14] sm:$0xf] }
   0xa   :  { %v373_v39 = vld [vmem:[%s640_s1 + $0x18] sm:$0xf0]  ;;  %v372_v40 = vor.u32 %v432_v37, %v371_v36  ;;  %v363_v42 = vld [vmem:[%s640_s1] sm:$0xf]  ;;  %v430_v43 = vld [vmem:[%s640_s1 + $0x4] sm:$0xf0] }
   0xb   :  { %v376_v41 = vor.u32 %v431_v38, %v373_v39  ;;  %v429_v44 = vld [vmem:[%s640_s1 + $0x4] sm:$0xf]  ;;  %v365_v45 = vld [vmem:[%s640_s1 + $0x8] sm:$0xf0]  ;;  %v364_v46 = vor.u32 %v430_v43, %v363_v42  ;;  %v427_v49 = vld [vmem:[%s641_s0 + $0x10] sm:$0xff] }
   0xc   :  { %180 = vmatpush.bf16.msra.mxu0 %v404_v16  ;;  %447 = vmatpush.bf16.msra.mxu2 %v404_v16  ;;  %v368_v47 = vor.u32 %v429_v44, %v365_v45  ;;  %v425_v48 = vld [vmem:[%s641_s0] sm:$0xff]  ;;  %v426_v50 = vld [vmem:[%s641_s0 + $0x8] sm:$0xff]  ;;  %v428_v51 = vld [vmem:[%s641_s0 + $0x18] sm:$0xff] }
   0xd   :  { %209 = vmatpush.bf16.msra.mxu1 %v408_v17  ;;  %455 = vmatpush.bf16.msra.mxu3 %v408_v17  ;;  %v287_v52 = vld [vmem:[%s642_s2] sm:$0x3] }
   0xe   :  { %v289_v53 = vperm.slane %v287_v52, 0  ;;  %v290_v54 = vperm.slane %v287_v52, 1 }
  0x10   :  { %181 = vmatpush.bf16.msra.mxu0 %v396_v22  ;;  %448 = vmatpush.bf16.msra.mxu2 %v396_v22 }
  0x11   :  { %210 = vmatpush.bf16.msra.mxu1 %v400_v23  ;;  %456 = vmatpush.bf16.msra.mxu3 %v400_v23 }
  0x14   :  { %182 = vmatpush.bf16.msra.mxu0 %v388_v28  ;;  %449 = vmatpush.bf16.msra.mxu2 %v388_v28 }
  0x15   :  { %211 = vmatpush.bf16.msra.mxu1 %v392_v29  ;;  %457 = vmatpush.bf16.msra.mxu3 %v392_v29 }
  0x18   :  { %183 = vmatpush.bf16.msra.mxu0 %v380_v34  ;;  %450 = vmatpush.bf16.msra.mxu2 %v380_v34 }
  0x19   :  { %212 = vmatpush.bf16.msra.mxu1 %v384_v35  ;;  %458 = vmatpush.bf16.msra.mxu3 %v384_v35 }
  0x1c   :  { %184 = vmatpush.bf16.msra.mxu0 %v372_v40  ;;  %451 = vmatpush.bf16.msra.mxu2 %v372_v40 }
  0x1d   :  { %213 = vmatpush.bf16.msra.mxu1 %v376_v41  ;;  %459 = vmatpush.bf16.msra.mxu3 %v376_v41 }
  0x20   :  { %185 = vmatpush.bf16.msra.mxu0 %v364_v46  ;;  %452 = vmatpush.bf16.msra.mxu2 %v364_v46 }
  0x21   :  { %214 = vmatpush.bf16.msra.mxu1 %v368_v47  ;;  %460 = vmatpush.bf16.msra.mxu3 %v368_v47 }
  0x23   :  { %186 = vmatmul.bf16.vlgmr.msra.gmra.mxu0 %v425_v48  ;;  %196 = vmatmul.bf16.vlgmr.msra.gmra.mxu2 %v427_v49 }
  0x24   :  { %215 = vmatmul.bf16.vlgmr.msra.gmra.mxu1 %v425_v48  ;;  %225 = vmatmul.bf16.vlgmr.msra.gmra.mxu3 %v427_v49 }
  0x33   :  { %191 = vmatmul.bf16.gmra.mxu0 %v426_v50  ;;  %201 = vmatmul.bf16.gmra.mxu2 %v428_v51 }
  0x34   :  { %220 = vmatmul.bf16.gmra.mxu1 %v426_v50  ;;  %230 = vmatmul.bf16.gmra.mxu3 %v428_v51 }
  0xa0   :  { %v187_v55 = vpop.f32.mrf.mxu0 }
  0xa1   :  { %v293_v56 = vadd.f32 %v289_v53, %v187_v55  ;;  %v216_v57 = vpop.f32.mrf.mxu1 }
  0xa2   :  { %v294_v58 = vadd.f32 %v290_v54, %v216_v57 }
  0xa3   :  { %v309_v59 = vmax.f32 %v293_v56, 0.0 }
  0xa4   :  { %v310_v60 = vmax.f32 %v294_v58, 0.0 }
  0xa5   :  { %325 = vst [vmem:[%s643_s3] sm:$0xff] %v309_v59 }
  0xa6   :  { %326 = vst [vmem:[%s643_s3 + $0x8] sm:$0xff] %v310_v60  ;;  %v197_v61 = vpop.f32.mrf.mxu2 }
  0xa7   :  { %v301_v62 = vadd.f32 %v289_v53, %v197_v61  ;;  %v226_v63 = vpop.f32.mrf.mxu3 }
  0xa8   :  { %v302_v0 = vadd.f32 %v290_v54, %v226_v63  ;;  %v189_v1 = vpop.f32.mrf.mxu0 }
  0xa9   :  { %v317_v2 = vmax.f32 %v301_v62, 0.0  ;;  %v295_v3 = vadd.f32 %v289_v53, %v189_v1  ;;  %v218_v4 = vpop.f32.mrf.mxu1 }
  0xaa   :  { %v318_v5 = vmax.f32 %v302_v0, 0.0  ;;  %v296_v6 = vadd.f32 %v290_v54, %v218_v4 }
  0xab   :  { %333 = vst [vmem:[%s643_s3 + $0x40] sm:$0xff] %v317_v2  ;;  %v311_v7 = vmax.f32 %v295_v3, 0.0 }
  0xac   :  { %334 = vst [vmem:[%s643_s3 + $0x48] sm:$0xff] %v318_v5  ;;  %v312_v8 = vmax.f32 %v296_v6, 0.0 }
  0xad   :  { %327 = vst [vmem:[%s643_s3 + $0x10] sm:$0xff] %v311_v7 }
  0xae   :  { %328 = vst [vmem:[%s643_s3 + $0x18] sm:$0xff] %v312_v8  ;;  %v199_v9 = vpop.f32.mrf.mxu2 }
  0xaf   :  { %v303_v10 = vadd.f32 %v289_v53, %v199_v9  ;;  %v228_v11 = vpop.f32.mrf.mxu3 }
  0xb0   :  { %v304_v12 = vadd.f32 %v290_v54, %v228_v11  ;;  %v192_v13 = vpop.f32.mrf.mxu0 }
  0xb1   :  { %v319_v14 = vmax.f32 %v303_v10, 0.0  ;;  %v297_v15 = vadd.f32 %v289_v53, %v192_v13  ;;  %v221_v16 = vpop.f32.mrf.mxu1 }
  0xb2   :  { %v320_v17 = vmax.f32 %v304_v12, 0.0  ;;  %v298_v18 = vadd.f32 %v290_v54, %v221_v16 }
  0xb3   :  { %335 = vst [vmem:[%s643_s3 + $0x50] sm:$0xff] %v319_v14  ;;  %v313_v19 = vmax.f32 %v297_v15, 0.0 }
  0xb4   :  { %336 = vst [vmem:[%s643_s3 + $0x58] sm:$0xff] %v320_v17  ;;  %v314_v20 = vmax.f32 %v298_v18, 0.0 }
  0xb5   :  { %329 = vst [vmem:[%s643_s3 + $0x20] sm:$0xff] %v313_v19 }
  0xb6   :  { %330 = vst [vmem:[%s643_s3 + $0x28] sm:$0xff] %v314_v20  ;;  %v202_v21 = vpop.f32.mrf.mxu2 }
  0xb7   :  { %v305_v22 = vadd.f32 %v289_v53, %v202_v21  ;;  %v231_v23 = vpop.f32.mrf.mxu3 }
  0xb8   :  { %v306_v24 = vadd.f32 %v290_v54, %v231_v23  ;;  %v194_v25 = vpop.f32.mrf.mxu0 }
  0xb9   :  { %v321_v26 = vmax.f32 %v305_v22, 0.0  ;;  %v299_v27 = vadd.f32 %v289_v53, %v194_v25  ;;  %v223_v28 = vpop.f32.mrf.mxu1 }
  0xba   :  { %v322_v29 = vmax.f32 %v306_v24, 0.0  ;;  %v300_v30 = vadd.f32 %v290_v54, %v223_v28 }
  0xbb   :  { %337 = vst [vmem:[%s643_s3 + $0x60] sm:$0xff] %v321_v26  ;;  %v315_v31 = vmax.f32 %v299_v27, 0.0 }
  0xbc   :  { %338 = vst [vmem:[%s643_s3 + $0x68] sm:$0xff] %v322_v29  ;;  %v316_v32 = vmax.f32 %v300_v30, 0.0 }
  0xbd   :  { %331 = vst [vmem:[%s643_s3 + $0x30] sm:$0xff] %v315_v31 }
  0xbe   :  { %332 = vst [vmem:[%s643_s3 + $0x38] sm:$0xff] %v316_v32  ;;  %v204_v33 = vpop.f32.mrf.mxu2 }
  0xbf   :  { %v307_v34 = vadd.f32 %v289_v53, %v204_v33  ;;  %v233_v35 = vpop.f32.mrf.mxu3 }
  0xc0   :  { %v308_v36 = vadd.f32 %v290_v54, %v233_v35 }
  0xc1   :  { %v323_v37 = vmax.f32 %v307_v34, 0.0 }
  0xc2   :  { %v324_v38 = vmax.f32 %v308_v36, 0.0 }
  0xc3   :  { %339 = vst [vmem:[%s643_s3 + $0x70] sm:$0xff] %v323_v37 }
  0xc4   :  { %340 = vst [vmem:[%s643_s3 + $0x78] sm:$0xff] %v324_v38 }

// kernel: vqgan3d_forward.163
= control target key start
LH: loop header
LB: loop body
LE: loop exit
PB: predicated region body
PF: predicated region fallthrough
CT: control target
= control target key end

     0   :  { %s1448_s12 = smov 0   ;;  %s1450_s13 = smov 0   ;;  %s1686_s0 = inlined_call_operand.vmem [shape: bf16[16,15360], index: 0, kind: input, shape index: {}]   ;;  %s1687_s1 = inlined_call_operand.vmem [shape: bf16[15360,256], index: 1, kind: input, shape index: {}]   ;;  %s1688_s2 = inlined_call_operand.vmem [shape: f32[1,256], index: 2, kind: input, shape index: {}]   ;;  %s1689_s3 = inlined_call_operand.vmem [shape: f32[16,256], index: 3, kind: output, shape index: {}]  }
   0x1   :  { %s1452_s14 = smov 0   ;;  %s1454_s15 = smov 0  }
   0x2   :  { %s1456_s16 = smov 0  }
   0x3 LB: > { %s25_s17 = sadd.s32 1, %s1421_s15  ;;  %p48_p1 = scmp.ne.s32.totalorder %s1413_s13, %s1409_s12  ;;  %s1425_s16 = sphi %s1456_s16, %s13_s16   ;;  %s1421_s15 = sphi %s1454_s15, %s1693_s15   ;;  %s1417_s14 = sphi %s1452_s14, %s1692_s14   ;;  %s1413_s13 = sphi %s1450_s13, %s1691_s13   ;;  %s1409_s12 = sphi %s1448_s12, %s1690_s12  }
   0x4   : > { %p26_p0 = scmp.ge.s32.totalorder %s25_s17, 30  ;;  %p49_p2 = scmp.eq.s32.totalorder %s1425_s16, 0 }
   0x5   : > { %s41_s19 = sadd.s32 1, %s1413_s13  ;;  %p989_p5 = scmp.ge.s32.totalorder %s1425_s16, 30 }
   0x6   : > { %s1695_s17 = smov (%p26_p0, %s25_s17), 0  ;;  %p50_p3 = por %p49_p2, %p48_p1 }
   0x7   : > { %s37_s18 = ssub.s32 %s1421_s15, %s1695_s17  ;;  %164 = sbr.rel (%p989_p5) target bundleno = 20 (0x14), region = 20 }
   0x8   : > { %p39_p4 = scmp.eq.s32.totalorder %s37_s18, 0 }
   0xa   : > { %s1483_s20 = scalar_select %p39_p4, %s1413_s13, %s41_s19  }
   0xc   : > { %167 = sbr.rel (!%p50_p3) target bundleno = 20 (0x14), region = 24  ;;  %s169_s21 = sand.u32 (%p50_p3), 1, %s1413_s13  }
   0xd   : > { %s1276_s22 = sshll.u32 (%p50_p3), %s1421_s15, 4  ;;  %s990_s23 = sshll.u32 (%p50_p3), %s169_s21, 5 }
   0xe   : > { %s177_s26 = scalar_lea.vmem (%p50_p3), %s1686_s0, %s1276_s22  ;;  %s171_s27 = scalar_lea.vmem (%p50_p3), [#allocation3], %s990_s23 }
   0xf   : > { %v190_v0 = vld [vmem:[%s177_s26] sm:$0xff] (%p50_p3)  ;;  %v192_v1 = vld [vmem:[%s177_s26 + $0x8] sm:$0xff] (%p50_p3) }
  0x10   : > { %v194_v2 = vld [vmem:[%s177_s26 + $0x1e0] sm:$0xff] (%p50_p3)  ;;  %191 = vst [vmem:[%s171_s27] sm:$0xff] (%p50_p3), %v190_v0  ;;  %v196_v3 = vld [vmem:[%s177_s26 + $0x1e8] sm:$0xff] (%p50_p3) }
  0x11   : > { %193 = vst [vmem:[%s171_s27 + $0x8] sm:$0xff] %v192_v1 }
  0x12   : > { %195 = vst [vmem:[%s171_s27 + $0x10] sm:$0xff] %v194_v2 }
  0x13   : > { %197 = vst [vmem:[%s171_s27 + $0x18] sm:$0xff] %v196_v3 }
  0x14 PF: > { %p993_p6 = scmp.ge.s32.totalorder %s1425_s16, 1  ;;  %p217_p7 = scmp.lt.s32.totalorder %s1425_s16, 31 }
  0x16   : > { %p218_p8 = pnand %p993_p6, %p217_p7 }
  0x17   : > { %s224_s28 = sand.u32 (!%p218_p8), 1, %s1409_s12   ;;  %s995_s29 = sshll.u32 (!%p218_p8), %s1417_s14, 6 }
  0x18   : > { %221 = sbr.rel (%p218_p8) target bundleno = 266 (0x10a), region = 51  ;;  %s994_s30 = sshll.u32 (!%p218_p8), %s224_s28, 5 }
  0x19   : > { %p270_p9 = scmp.lt.s32.totalorder (!%p218_p8), %s995_s29, 1919  ;;  %s1500_s8 = scalar_lea.vmem (!%p218_p8), [#allocation3], %s994_s30 }
  0x1a   : > { %p998_p10 = scmp.ne.s32.totalorder (!%p218_p8), %s1417_s14, 0 }
  0x1d   : > { %s1697_s29 = smov (!%p270_p9, %s995_s29), 1919  ;;  %300 = sbr.rel (%p998_p10) target bundleno = 39 (0x27), region = 59 }
  0x1e   : > { %s1277_s4 = sshll.u32 %s1697_s29, 3 }
  0x1f   : > { %s1498_s7 = scalar_lea.vmem %s1687_s1, %s1277_s4 }
  0x22   : > { %v1427_v4 = vmov 0.0  }
  0x23   : > { %301 = vst [vmem:[#allocation2 + $0x10] sm:$0xff] %v1427_v4 }
  0x24   : > { %302 = vst [vmem:[#allocation2] sm:$0xff] %v1427_v4 }
  0x25   : > { %303 = vst [vmem:[#allocation2 + $0x18] sm:$0xff] %v1427_v4 }
  0x26   : > { %304 = vst [vmem:[#allocation2 + $0x8] sm:$0xff] %v1427_v4 }
  0x27 PF: > { %v1073_v5 = vld [vmem:[%s1498_s7 + $0x70] sm:$0xf]  ;;  %v1297_v6 = vld [vmem:[%s1498_s7 + $0x74] sm:$0xf0]  ;;  %v1065_v16 = vld [vmem:[%s1498_s7 + $0x60] sm:$0xf] }
  0x28   : > { %v1137_v7 = vld [vmem:[%s1498_s7 + $0xf0] sm:$0xf]  ;;  %v1074_v8 = vor.u32 %v1297_v6, %v1073_v5  ;;  %v1313_v9 = vld [vmem:[%s1498_s7 + $0xf4] sm:$0xf0]  ;;  %v1295_v18 = vld [vmem:[%s1498_s7 + $0x64] sm:$0xf0] }
  0x29   : > { %v1201_v10 = vld [vmem:[%s1498_s7 + $0x170] sm:$0xf]  ;;  %v1329_v11 = vld [vmem:[%s1498_s7 + $0x174] sm:$0xf0]  ;;  %v1138_v12 = vor.u32 %v1313_v9, %v1137_v7  ;;  %v1129_v19 = vld [vmem:[%s1498_s7 + $0xe0] sm:$0xf]  ;;  %v1066_v21 = vor.u32 %v1295_v18, %v1065_v16 }
  0x2a   : > { %v1202_v13 = vor.u32 %v1329_v11, %v1201_v10  ;;  %v1265_v14 = vld [vmem:[%s1498_s7 + $0x1f0] sm:$0xf]  ;;  %v1345_v15 = vld [vmem:[%s1498_s7 + $0x1f4] sm:$0xf0]  ;;  %717 = vmatpush.bf16.msra.mxu0 %v1074_v8  ;;  %v1311_v20 = vld [vmem:[%s1498_s7 + $0xe4] sm:$0xf0] }
  0x2b   : > { %v1266_v17 = vor.u32 %v1345_v15, %v1265_v14  ;;  %731 = vmatpush.bf16.msra.mxu1 %v1138_v12  ;;  %v1130_v22 = vor.u32 %v1311_v20, %v1129_v19  ;;  %v1193_v23 = vld [vmem:[%s1498_s7 + $0x160] sm:$0xf]  ;;  %v1327_v24 = vld [vmem:[%s1498_s7 + $0x164] sm:$0xf0]  ;;  %v1057_v28 = vld [vmem:[%s1498_s7 + $0x50] sm:$0xf] }
  0x2c   : > { %745 = vmatpush.bf16.msra.mxu2 %v1202_v13  ;;  %v1257_v25 = vld [vmem:[%s1498_s7 + $0x1e0] sm:$0xf]  ;;  %v1194_v26 = vor.u32 %v1327_v24, %v1193_v23  ;;  %v1343_v27 = vld [vmem:[%s1498_s7 + $0x1e4] sm:$0xf0]  ;;  %v1293_v29 = vld [vmem:[%s1498_s7 + $0x54] sm:$0xf0] }
  0x2d   : > { %759 = vmatpush.bf16.msra.mxu3 %v1266_v17  ;;  %v1258_v30 = vor.u32 %v1343_v27, %v1257_v25  ;;  %v1121_v31 = vld [vmem:[%s1498_s7 + $0xd0] sm:$0xf]  ;;  %v1309_v32 = vld [vmem:[%s1498_s7 + $0xd4] sm:$0xf0]  ;;  %v1058_v34 = vor.u32 %v1293_v29, %v1057_v28  ;;  %v1049_v40 = vld [vmem:[%s1498_s7 + $0x40] sm:$0xf] }
  0x2e   : > { %v1185_v33 = vld [vmem:[%s1498_s7 + $0x150] sm:$0xf]  ;;  %718 = vmatpush.bf16.msra.mxu0 %v1066_v21  ;;  %v1325_v35 = vld [vmem:[%s1498_s7 + $0x154] sm:$0xf0]  ;;  %v1122_v38 = vor.u32 %v1309_v32, %v1121_v31  ;;  %v1291_v41 = vld [vmem:[%s1498_s7 + $0x44] sm:$0xf0] }
  0x2f   : > { %v1249_v36 = vld [vmem:[%s1498_s7 + $0x1d0] sm:$0xf]  ;;  %v1341_v37 = vld [vmem:[%s1498_s7 + $0x1d4] sm:$0xf0]  ;;  %732 = vmatpush.bf16.msra.mxu1 %v1130_v22  ;;  %v1186_v39 = vor.u32 %v1325_v35, %v1185_v33  ;;  %v1113_v42 = vld [vmem:[%s1498_s7 + $0xc0] sm:$0xf]  ;;  %v1050_v49 = vor.u32 %v1291_v41, %v1049_v40 }
  0x30   : > { %746 = vmatpush.bf16.msra.mxu2 %v1194_v26  ;;  %v1250_v43 = vor.u32 %v1341_v37, %v1249_v36  ;;  %v1307_v44 = vld [vmem:[%s1498_s7 + $0xc4] sm:$0xf0]  ;;  %v1177_v45 = vld [vmem:[%s1498_s7 + $0x140] sm:$0xf]  ;;  %v1041_v52 = vld [vmem:[%s1498_s7 + $0x30] sm:$0xf] }
  0x31   : > { %760 = vmatpush.bf16.msra.mxu3 %v1258_v30  ;;  %v1323_v46 = vld [vmem:[%s1498_s7 + $0x144] sm:$0xf0]  ;;  %v1241_v47 = vld [vmem:[%s1498_s7 + $0x1c0] sm:$0xf]  ;;  %v1114_v50 = vor.u32 %v1307_v44, %v1113_v42  ;;  %v1289_v53 = vld [vmem:[%s1498_s7 + $0x34] sm:$0xf0] }
  0x32   : > { %v1339_v48 = vld [vmem:[%s1498_s7 + $0x1c4] sm:$0xf0]  ;;  %719 = vmatpush.bf16.msra.mxu0 %v1058_v34  ;;  %v1178_v51 = vor.u32 %v1323_v46, %v1177_v45  ;;  %v1105_v54 = vld [vmem:[%s1498_s7 + $0xb0] sm:$0xf]  ;;  %v1305_v56 = vld [vmem:[%s1498_s7 + $0xb4] sm:$0xf0]  ;;  %v1042_v61 = vor.u32 %v1289_v53, %v1041_v52 }
  0x33   : > { %733 = vmatpush.bf16.msra.mxu1 %v1122_v38  ;;  %v1242_v55 = vor.u32 %v1339_v48, %v1241_v47  ;;  %v1169_v57 = vld [vmem:[%s1498_s7 + $0x130] sm:$0xf]  ;;  %v1321_v58 = vld [vmem:[%s1498_s7 + $0x134] sm:$0xf0]  ;;  %v1106_v62 = vor.u32 %v1305_v56, %v1105_v54  ;;  %v1033_v0 = vld [vmem:[%s1498_s7 + $0x20] sm:$0xf] }
  0x34   : > { %747 = vmatpush.bf16.msra.mxu2 %v1186_v39  ;;  %v1233_v59 = vld [vmem:[%s1498_s7 + $0x1b0] sm:$0xf]  ;;  %v1337_v60 = vld [vmem:[%s1498_s7 + $0x1b4] sm:$0xf0]  ;;  %v1170_v63 = vor.u32 %v1321_v58, %v1169_v57  ;;  %v1287_v1 = vld [vmem:[%s1498_s7 + $0x24] sm:$0xf0] }
  0x35   : > { %761 = vmatpush.bf16.msra.mxu3 %v1250_v43  ;;  %v1097_v2 = vld [vmem:[%s1498_s7 + $0xa0] sm:$0xf]  ;;  %v1234_v3 = vor.u32 %v1337_v60, %v1233_v59  ;;  %v1303_v4 = vld [vmem:[%s1498_s7 + $0xa4] sm:$0xf0]  ;;  %v1034_v9 = vor.u32 %v1287_v1, %v1033_v0  ;;  %v1025_v12 = vld [vmem:[%s1498_s7 + $0x10] sm:$0xf] }
  0x36   : > { %720 = vmatpush.bf16.msra.mxu0 %v1050_v49  ;;  %v1161_v5 = vld [vmem:[%s1498_s7 + $0x120] sm:$0xf]  ;;  %v1319_v6 = vld [vmem:[%s1498_s7 + $0x124] sm:$0xf0]  ;;  %v1098_v10 = vor.u32 %v1303_v4, %v1097_v2  ;;  %v1285_v13 = vld [vmem:[%s1498_s7 + $0x14] sm:$0xf0] }
  0x37   : > { %734 = vmatpush.bf16.msra.mxu1 %v1114_v50  ;;  %v1225_v7 = vld [vmem:[%s1498_s7 + $0x1a0] sm:$0xf]  ;;  %v1335_v8 = vld [vmem:[%s1498_s7 + $0x1a4] sm:$0xf0]  ;;  %v1162_v11 = vor.u32 %v1319_v6, %v1161_v5  ;;  %v1089_v14 = vld [vmem:[%s1498_s7 + $0x90] sm:$0xf]  ;;  %v1026_v22 = vor.u32 %v1285_v13, %v1025_v12 }
  0x38   : > { %748 = vmatpush.bf16.msra.mxu2 %v1178_v51  ;;  %v1226_v15 = vor.u32 %v1335_v8, %v1225_v7  ;;  %v1301_v16 = vld [vmem:[%s1498_s7 + $0x94] sm:$0xf0]  ;;  %v1153_v17 = vld [vmem:[%s1498_s7 + $0x110] sm:$0xf]  ;;  %v1017_v21 = vld [vmem:[%s1498_s7] sm:$0xf] }
  0x39   : > { %762 = vmatpush.bf16.msra.mxu3 %v1242_v55  ;;  %v1317_v18 = vld [vmem:[%s1498_s7 + $0x114] sm:$0xf0]  ;;  %v1217_v19 = vld [vmem:[%s1498_s7 + $0x190] sm:$0xf]  ;;  %v1283_v23 = vld [vmem:[%s1498_s7 + $0x4] sm:$0xf0]  ;;  %v1090_v26 = vor.u32 %v1301_v16, %v1089_v14 }
  0x3a   : > { %721 = vmatpush.bf16.msra.mxu0 %v1042_v61  ;;  %v1333_v20 = vld [vmem:[%s1498_s7 + $0x194] sm:$0xf0]  ;;  %v1081_v24 = vld [vmem:[%s1498_s7 + $0x80] sm:$0xf]  ;;  %v1299_v25 = vld [vmem:[%s1498_s7 + $0x84] sm:$0xf0]  ;;  %v1154_v27 = vor.u32 %v1317_v18, %v1153_v17  ;;  %v1018_v38 = vor.u32 %v1283_v23, %v1017_v21 }
  0x3b   : > { %735 = vmatpush.bf16.msra.mxu1 %v1106_v62  ;;  %v1145_v28 = vld [vmem:[%s1498_s7 + $0x100] sm:$0xf]  ;;  %v1315_v29 = vld [vmem:[%s1498_s7 + $0x104] sm:$0xf0]  ;;  %v1218_v31 = vor.u32 %v1333_v20, %v1217_v19  ;;  %v1296_v33 = vld [vmem:[%s1498_s7 + $0x74] sm:$0xf]  ;;  %v1082_v42 = vor.u32 %v1299_v25, %v1081_v24 }
  0x3c   : > { %749 = vmatpush.bf16.msra.mxu2 %v1170_v63  ;;  %v1209_v30 = vld [vmem:[%s1498_s7 + $0x180] sm:$0xf]  ;;  %v1331_v32 = vld [vmem:[%s1498_s7 + $0x184] sm:$0xf0]  ;;  %v1075_v34 = vld [vmem:[%s1498_s7 + $0x78] sm:$0xf0]  ;;  %v1146_v43 = vor.u32 %v1315_v29, %v1145_v28 }
  0x3d   : > { %763 = vmatpush.bf16.msra.mxu3 %v1234_v3  ;;  %v1312_v35 = vld [vmem:[%s1498_s7 + $0xf4] sm:$0xf]  ;;  %v1139_v36 = vld [vmem:[%s1498_s7 + $0xf8] sm:$0xf0]  ;;  %v1294_v44 = vld [vmem:[%s1498_s7 + $0x64] sm:$0xf]  ;;  %v1210_v48 = vor.u32 %v1331_v32, %v1209_v30  ;;  %v1078_v49 = vor.u32 %v1296_v33, %v1075_v34 }
  0x3e   : > { %722 = vmatpush.bf16.msra.mxu0 %v1034_v9  ;;  %v1328_v37 = vld [vmem:[%s1498_s7 + $0x174] sm:$0xf]  ;;  %v1203_v39 = vld [vmem:[%s1498_s7 + $0x178] sm:$0xf0]  ;;  %v1067_v45 = vld [vmem:[%s1498_s7 + $0x68] sm:$0xf0]  ;;  %v1142_v54 = vor.u32 %v1312_v35, %v1139_v36 }
  0x3f   : > { %736 = vmatpush.bf16.msra.mxu1 %v1098_v10  ;;  %v1344_v40 = vld [vmem:[%s1498_s7 + $0x1f4] sm:$0xf]  ;;  %v1267_v41 = vld [vmem:[%s1498_s7 + $0x1f8] sm:$0xf0]  ;;  %v1009_v46 = vld [vmem:[%s1500_s8 + $0x8] sm:$0xf]  ;;  %v1206_v55 = vor.u32 %v1328_v37, %v1203_v39  ;;  %v1070_v4 = vor.u32 %v1294_v44, %v1067_v45 }
  0x40   : > { %750 = vmatpush.bf16.msra.mxu2 %v1162_v11  ;;  %v1281_v47 = vld [vmem:[%s1500_s8 + $0x14] sm:$0xf0]  ;;  %v1310_v50 = vld [vmem:[%s1498_s7 + $0xe4] sm:$0xf]  ;;  %v1131_v51 = vld [vmem:[%s1498_s7 + $0xe8] sm:$0xf0]  ;;  %v1270_v59 = vor.u32 %v1344_v40, %v1267_v41 }
  0x41   : > { %764 = vmatpush.bf16.msra.mxu3 %v1226_v15  ;;  %v1326_v52 = vld [vmem:[%s1498_s7 + $0x164] sm:$0xf]  ;;  %v1195_v53 = vld [vmem:[%s1498_s7 + $0x168] sm:$0xf0]  ;;  %v1011_v57 = vld [vmem:[%s1500_s8 + $0x18] sm:$0xf0]  ;;  %v1586_v60 = vor.u32 %v1281_v47, %v1009_v46  ;;  %v1134_v6 = vor.u32 %v1310_v50, %v1131_v51 }
  0x42   : > { %723 = vmatpush.bf16.msra.mxu0 %v1026_v22  ;;  %v1279_v56 = vld [vmem:[%s1500_s8 + $0xc] sm:$0xf]  ;;  %v1001_v58 = vld [vmem:[%s1500_s8] sm:$0xf]  ;;  %v1280_v61 = vld [vmem:[%s1500_s8 + $0xc] sm:$0xf0]  ;;  %v1198_v7 = vor.u32 %v1326_v52, %v1195_v53 }
  0x43   : > { %737 = vmatpush.bf16.msra.mxu1 %v1090_v26  ;;  %v1278_v62 = vld [vmem:[%s1500_s8 + $0x4] sm:$0xf]  ;;  %v1003_v63 = vld [vmem:[%s1500_s8 + $0x10] sm:$0xf0]  ;;  %v1259_v1 = vld [vmem:[%s1498_s7 + $0x1e8] sm:$0xf0]  ;;  %v1593_v2 = vor.u32 %v1279_v56, %v1011_v57  ;;  %v1595_v3 = vor.u32 %v1280_v61, %v1001_v58 }
  0x44   : > { %751 = vmatpush.bf16.msra.mxu2 %v1154_v27  ;;  %v1342_v0 = vld [vmem:[%s1498_s7 + $0x1e4] sm:$0xf]  ;;  %v1597_v5 = vor.u32 %v1278_v62, %v1003_v63  ;;  %v1292_v8 = vld [vmem:[%s1498_s7 + $0x54] sm:$0xf]  ;;  %v1059_v9 = vld [vmem:[%s1498_s7 + $0x58] sm:$0xf0] }
  0x45   : > { %765 = vmatpush.bf16.msra.mxu3 %v1218_v31  ;;  %v1308_v10 = vld [vmem:[%s1498_s7 + $0xd4] sm:$0xf]  ;;  %v1262_v11 = vor.u32 %v1342_v0, %v1259_v1  ;;  %v1123_v12 = vld [vmem:[%s1498_s7 + $0xd8] sm:$0xf0]  ;;  %v1062_v17 = vor.u32 %v1292_v8, %v1059_v9  ;;  %v1290_v20 = vld [vmem:[%s1498_s7 + $0x44] sm:$0xf] }
  0x46   : > { %724 = vmatpush.bf16.msra.mxu0 %v1018_v38  ;;  %v1324_v13 = vld [vmem:[%s1498_s7 + $0x154] sm:$0xf]  ;;  %v1187_v14 = vld [vmem:[%s1498_s7 + $0x158] sm:$0xf0]  ;;  %v1126_v18 = vor.u32 %v1308_v10, %v1123_v12  ;;  %v1051_v21 = vld [vmem:[%s1498_s7 + $0x48] sm:$0xf0] }
  0x47   : > { %738 = vmatpush.bf16.msra.mxu1 %v1082_v42  ;;  %v1340_v15 = vld [vmem:[%s1498_s7 + $0x1d4] sm:$0xf]  ;;  %v1251_v16 = vld [vmem:[%s1498_s7 + $0x1d8] sm:$0xf0]  ;;  %v1190_v19 = vor.u32 %v1324_v13, %v1187_v14  ;;  %v1306_v22 = vld [vmem:[%s1498_s7 + $0xc4] sm:$0xf]  ;;  %v1054_v29 = vor.u32 %v1290_v20, %v1051_v21 }
  0x48   : > { %752 = vmatpush.bf16.msra.mxu2 %v1146_v43  ;;  %v1254_v23 = vor.u32 %v1340_v15, %v1251_v16  ;;  %v1115_v24 = vld [vmem:[%s1498_s7 + $0xc8] sm:$0xf0]  ;;  %v1322_v25 = vld [vmem:[%s1498_s7 + $0x144] sm:$0xf]  ;;  %v1288_v32 = vld [vmem:[%s1498_s7 + $0x34] sm:$0xf] }
  0x49   : > { %766 = vmatpush.bf16.msra.mxu3 %v1210_v48  ;;  %725 = vmatmul.bf16.vlgmr.msra.gmra.mxu0 %v1595_v3  ;;  %v1179_v26 = vld [vmem:[%s1498_s7 + $0x148] sm:$0xf0]  ;;  %v1338_v27 = vld [vmem:[%s1498_s7 + $0x1c4] sm:$0xf]  ;;  %v1118_v30 = vor.u32 %v1306_v22, %v1115_v24  ;;  %v1043_v33 = vld [vmem:[%s1498_s7 + $0x38] sm:$0xf0] }
  0x4a   : > { %773 = vmatpush.bf16.msrb.mxu0 %v1078_v49  ;;  %739 = vmatmul.bf16.vlgmr.msra.gmra.mxu1 %v1597_v5  ;;  %v1243_v28 = vld [vmem:[%s1498_s7 + $0x1c8] sm:$0xf0]  ;;  %v1182_v31 = vor.u32 %v1322_v25, %v1179_v26  ;;  %v1304_v34 = vld [vmem:[%s1498_s7 + $0xb4] sm:$0xf]  ;;  %v1107_v36 = vld [vmem:[%s1498_s7 + $0xb8] sm:$0xf0]  ;;  %v1046_v41 = vor.u32 %v1288_v32, %v1043_v33 }
  0x4b   : > { %787 = vmatpush.bf16.msrb.mxu1 %v1142_v54  ;;  %753 = vmatmul.bf16.vlgmr.msra.gmra.mxu2 %v1586_v60  ;;  %v1246_v35 = vor.u32 %v1338_v27, %v1243_v28  ;;  %v1320_v37 = vld [vmem:[%s1498_s7 + $0x134] sm:$0xf]  ;;  %v1171_v38 = vld [vmem:[%s1498_s7 + $0x138] sm:$0xf0]  ;;  %v1110_v42 = vor.u32 %v1304_v34, %v1107_v36  ;;  %v1286_v44 = vld [vmem:[%s1498_s7 + $0x24] sm:$0xf] }
  0x4c   : > { %801 = vmatpush.bf16.msrb.mxu2 %v1206_v55  ;;  %767 = vmatmul.bf16.vlgmr.msra.gmra.mxu3 %v1593_v2  ;;  %v1336_v39 = vld [vmem:[%s1498_s7 + $0x1b4] sm:$0xf]  ;;  %v1235_v40 = vld [vmem:[%s1498_s7 + $0x1b8] sm:$0xf0]  ;;  %v1174_v43 = vor.u32 %v1320_v37, %v1171_v38  ;;  %v1035_v45 = vld [vmem:[%s1498_s7 + $0x28] sm:$0xf0] }
  0x4d   : > { %815 = vmatpush.bf16.msrb.mxu3 %v1270_v59  ;;  %v1302_v46 = vld [vmem:[%s1498_s7 + $0xa4] sm:$0xf]  ;;  %v1238_v47 = vor.u32 %v1336_v39, %v1235_v40  ;;  %v1099_v48 = vld [vmem:[%s1498_s7 + $0xa8] sm:$0xf0]  ;;  %v1038_v53 = vor.u32 %v1286_v44, %v1035_v45  ;;  %v1284_v56 = vld [vmem:[%s1498_s7 + $0x14] sm:$0xf] }
  0x4e   : > { %774 = vmatpush.bf16.msrb.mxu0 %v1070_v4  ;;  %v1318_v49 = vld [vmem:[%s1498_s7 + $0x124] sm:$0xf]  ;;  %v1163_v50 = vld [vmem:[%s1498_s7 + $0x128] sm:$0xf0]  ;;  %v1102_v54 = vor.u32 %v1302_v46, %v1099_v48  ;;  %v1027_v57 = vld [vmem:[%s1498_s7 + $0x18] sm:$0xf0] }
  0x4f   : > { %788 = vmatpush.bf16.msrb.mxu1 %v1134_v6  ;;  %v1334_v51 = vld [vmem:[%s1498_s7 + $0x1a4] sm:$0xf]  ;;  %v1227_v52 = vld [vmem:[%s1498_s7 + $0x1a8] sm:$0xf0]  ;;  %v1166_v55 = vor.u32 %v1318_v49, %v1163_v50  ;;  %v1300_v58 = vld [vmem:[%s1498_s7 + $0x94] sm:$0xf]  ;;  %v1030_v4 = vor.u32 %v1284_v56, %v1027_v57 }
  0x50   : > { %802 = vmatpush.bf16.msrb.mxu2 %v1198_v7  ;;  %v1230_v59 = vor.u32 %v1334_v51, %v1227_v52  ;;  %v1091_v61 = vld [vmem:[%s1498_s7 + $0x98] sm:$0xf0]  ;;  %v1316_v62 = vld [vmem:[%s1498_s7 + $0x114] sm:$0xf]  ;;  %v1282_v8 = vld [vmem:[%s1498_s7 + $0x4] sm:$0xf] }
  0x51   : > { %816 = vmatpush.bf16.msrb.mxu3 %v1262_v11  ;;  %v1155_v63 = vld [vmem:[%s1498_s7 + $0x118] sm:$0xf0]  ;;  %v1332_v0 = vld [vmem:[%s1498_s7 + $0x194] sm:$0xf]  ;;  %v1094_v6 = vor.u32 %v1300_v58, %v1091_v61  ;;  %v1019_v9 = vld [vmem:[%s1498_s7 + $0x8] sm:$0xf0] }
  0x52   : > { %775 = vmatpush.bf16.msrb.mxu0 %v1062_v17  ;;  %v1219_v1 = vld [vmem:[%s1498_s7 + $0x198] sm:$0xf0]  ;;  %v1158_v7 = vor.u32 %v1316_v62, %v1155_v63  ;;  %v1298_v10 = vld [vmem:[%s1498_s7 + $0x84] sm:$0xf]  ;;  %v1083_v12 = vld [vmem:[%s1498_s7 + $0x88] sm:$0xf0]  ;;  %v1022_v17 = vor.u32 %v1282_v8, %v1019_v9 }
  0x53   : > { %789 = vmatpush.bf16.msrb.mxu1 %v1126_v18  ;;  %v1222_v11 = vor.u32 %v1332_v0, %v1219_v1  ;;  %v1314_v13 = vld [vmem:[%s1498_s7 + $0x104] sm:$0xf]  ;;  %v1147_v14 = vld [vmem:[%s1498_s7 + $0x108] sm:$0xf0]  ;;  %v1086_v18 = vor.u32 %v1298_v10, %v1083_v12  ;;  %v305_v27 = vld [vmem:[#allocation2 + $0x10] sm:$0xff]  ;;  %p1271_p11 = scmp.ne.s32.totalorder %s1417_s14, 29 }
  0x54   : > { %803 = vmatpush.bf16.msrb.mxu2 %v1190_v19  ;;  %v1330_v15 = vld [vmem:[%s1498_s7 + $0x184] sm:$0xf]  ;;  %v1211_v16 = vld [vmem:[%s1498_s7 + $0x188] sm:$0xf0]  ;;  %v1150_v19 = vor.u32 %v1314_v13, %v1147_v14  ;;  %v307_v34 = vld [vmem:[#allocation2 + $0x18] sm:$0xff] }
  0x55   : > { %817 = vmatpush.bf16.msrb.mxu3 %v1254_v23  ;;  %v1214_v20 = vor.u32 %v1330_v15, %v1211_v16  ;;  %v308_v49 = vld [vmem:[#allocation2 + $0x8] sm:$0xff] }
  0x56   : > { %776 = vmatpush.bf16.msrb.mxu0 %v1054_v29 }
  0x57   : > { %790 = vmatpush.bf16.msrb.mxu1 %v1118_v30 }
  0x58   : > { %804 = vmatpush.bf16.msrb.mxu2 %v1182_v31 }
  0x59   : > { %818 = vmatpush.bf16.msrb.mxu3 %v1246_v35 }
  0x5a   : > { %777 = vmatpush.bf16.msrb.mxu0 %v1046_v41  ;;  %v306_v41 = vld [vmem:[#allocation2] sm:$0xff] }
  0x5b   : > { %791 = vmatpush.bf16.msrb.mxu1 %v1110_v42 }
  0x5c   : > { %805 = vmatpush.bf16.msrb.mxu2 %v1174_v43 }
  0x5d   : > { %819 = vmatpush.bf16.msrb.mxu3 %v1238_v47 }
  0x5e   : > { %778 = vmatpush.bf16.msrb.mxu0 %v1038_v53 }
  0x5f   : > { %792 = vmatpush.bf16.msrb.mxu1 %v1102_v54 }
  0x60   : > { %806 = vmatpush.bf16.msrb.mxu2 %v1166_v55 }
  0x61   : > { %820 = vmatpush.bf16.msrb.mxu3 %v1230_v59 }
  0x62   : > { %779 = vmatpush.bf16.msrb.mxu0 %v1030_v4 }
  0x63   : > { %793 = vmatpush.bf16.msrb.mxu1 %v1094_v6 }
  0x64   : > { %807 = vmatpush.bf16.msrb.mxu2 %v1158_v7 }
  0x65   : > { %821 = vmatpush.bf16.msrb.mxu3 %v1222_v11 }
  0x66   : > { %780 = vmatpush.bf16.msrb.mxu0 %v1022_v17 }
  0x67   : > { %794 = vmatpush.bf16.msrb.mxu1 %v1086_v18 }
  0x68   : > { %808 = vmatpush.bf16.msrb.mxu2 %v1150_v19 }
  0x69   : > { %822 = vmatpush.bf16.msrb.mxu3 %v1214_v20  ;;  %781 = vmatmul.bf16.vlgmr.msrb.gmra.mxu0 %v1595_v3 }
  0x6a   : > { %795 = vmatmul.bf16.vlgmr.msrb.gmra.mxu1 %v1597_v5 }
  0x6b   : > { %809 = vmatmul.bf16.vlgmr.msrb.gmra.mxu2 %v1586_v60 }
  0x6c   : > { %823 = vmatmul.bf16.vlgmr.msrb.gmra.mxu3 %v1593_v2 }
  0xc6   : > { %v726_v21 = vpop.f32.mrf.mxu0 }
  0xc7   : > { %v740_v22 = vpop.f32.mrf.mxu1 }
  0xc8   : > { %v741_v23 = vadd.f32 %v740_v22, %v726_v21 }
  0xce   : > { %v754_v24 = vpop.f32.mrf.mxu2  ;;  %v728_v29 = vpop.f32.mrf.mxu0 }
  0xcf   : > { %v755_v25 = vadd.f32 %v754_v24, %v741_v23  ;;  %v768_v26 = vpop.f32.mrf.mxu3  ;;  %v742_v30 = vpop.f32.mrf.mxu1 }
  0xd0   : > { %v743_v32 = vadd.f32 %v742_v30, %v728_v29 }
  0xd1   : > { %v769_v28 = vadd.f32 %v768_v26, %v755_v25 }
  0xd3   : > { %v829_v31 = vadd.f32 %v769_v28, %v305_v27 }
  0xd5   : > { %833 = vst [vmem:[#allocation2 + $0x10] sm:$0xff] %v829_v31 }
  0xd6   : > { %v756_v3 = vpop.f32.mrf.mxu2 }
  0xd7   : > { %v757_v33 = vadd.f32 %v756_v3, %v743_v32  ;;  %v770_v5 = vpop.f32.mrf.mxu3 }
  0xd9   : > { %v771_v60 = vadd.f32 %v770_v5, %v757_v33 }
  0xdb   : > { %v831_v35 = vadd.f32 %v771_v60, %v307_v34 }
  0xdd   : > { %835 = vst [vmem:[#allocation2 + $0x18] sm:$0xff] %v831_v35 }
  0xe6   : > { %v782_v2 = vpop.f32.mrf.mxu0 }
  0xe7   : > { %v796_v36 = vpop.f32.mrf.mxu1 }
  0xe8   : > { %v797_v37 = vadd.f32 %v796_v36, %v782_v2 }
  0xee   : > { %v810_v38 = vpop.f32.mrf.mxu2  ;;  %v784_v43 = vpop.f32.mrf.mxu0 }
  0xef   : > { %v811_v39 = vadd.f32 %v810_v38, %v797_v37  ;;  %v824_v40 = vpop.f32.mrf.mxu3  ;;  %v798_v44 = vpop.f32.mrf.mxu1 }
  0xf0   : > { %v799_v46 = vadd.f32 %v798_v44, %v784_v43 }
  0xf1   : > { %v825_v42 = vadd.f32 %v824_v40, %v811_v39 }
  0xf3   : > { %v830_v45 = vadd.f32 %v825_v42, %v306_v41 }
  0xf5   : > { %834 = vst [vmem:[#allocation2] sm:$0xff] %v830_v45 }
  0xf6   : > { %v812_v47 = vpop.f32.mrf.mxu2 }
  0xf7   : > { %v813_v48 = vadd.f32 %v812_v47, %v799_v46  ;;  %v826_v50 = vpop.f32.mrf.mxu3 }
  0xf9   : > { %v827_v51 = vadd.f32 %v826_v50, %v813_v48  ;;  %840 = sbr.rel (%p1271_p11) target bundleno = 266 (0x10a), region = 63 }
  0xfb   : > { %v832_v52 = vadd.f32 %v827_v51, %v308_v49 }
  0xfd   : > { %836 = vst [vmem:[#allocation2 + $0x8] sm:$0xff] %v832_v52 }
  0xfe   : > { %v841_v53 = vld [vmem:[#allocation2 + $0x10] sm:$0xff]  ;;  %v845_v54 = vld [vmem:[%s1688_s2] sm:$0x3]  ;;  %v843_v58 = vld [vmem:[#allocation2 + $0x18] sm:$0xff] }
  0xff   : > { %v842_v55 = vld [vmem:[#allocation2] sm:$0xff]  ;;  %v847_v56 = vperm.slane %v845_v54, 0  ;;  %v848_v57 = vperm.slane %v845_v54, 1 }
 0x101   : > { %v851_v61 = vadd.f32 %v847_v56, %v841_v53  ;;  %v852_v62 = vadd.f32 %v848_v57, %v842_v55  ;;  %v853_v63 = vadd.f32 %v847_v56, %v843_v58 }
 0x103   : > { %v855_v1 = vmax.f32 %v851_v61, 0.0  ;;  %v856_v4 = vmax.f32 %v852_v62, 0.0  ;;  %v857_v6 = vmax.f32 %v853_v63, 0.0 }
 0x104   : > { %v844_v59 = vld [vmem:[#allocation2 + $0x8] sm:$0xff] }
 0x105   : > { %v854_v0 = vadd.f32 %v848_v57, %v844_v59  ;;  %859 = vst [vmem:[%s1689_s3] sm:$0xff] %v855_v1 }
 0x106   : > { %860 = vst [vmem:[%s1689_s3 + $0x8] sm:$0xff] %v856_v4 }
 0x107   : > { %v858_v7 = vmax.f32 %v854_v0, 0.0  ;;  %861 = vst [vmem:[%s1689_s3 + $0x10] sm:$0xff] %v857_v6 }
 0x109   : > { %862 = vst [vmem:[%s1689_s3 + $0x18] sm:$0xff] %v858_v7 }
 0x10a PF: > { %s13_s16 = sadd.s32 1, %s1425_s16   ;;  %s1690_s12 = smov %s1413_s13 }
 0x10b   : > { %p10_p12 = scmp.ge.s32.totalorder %s13_s16, 32   ;;  %s1691_s13 = smov %s1483_s20 }
 0x10c   : > { %s1692_s14 = smov %s1421_s15  ;;  %s1693_s15 = smov %s1695_s17 }
 0x10d   :  { %12 = sbr.rel (!%p10_p12) target bundleno = 3 (0x3), region = 104 }

// kernel: vqgan3d_forward.164
= control target key start
LH: loop header
LB: loop body
LE: loop exit
PB: predicated region body
PF: predicated region fallthrough
CT: control target
= control target key end

     0   :  { %s1444_s12 = smov 0   ;;  %s1446_s13 = smov 0   ;;  %s1682_s0 = inlined_call_operand.vmem [shape: bf16[16,6656], index: 0, kind: input, shape index: {}]   ;;  %s1683_s1 = inlined_call_operand.vmem [shape: bf16[6656,256], index: 1, kind: input, shape index: {}]   ;;  %s1684_s2 = inlined_call_operand.vmem [shape: f32[1,256], index: 2, kind: input, shape index: {}]   ;;  %s1685_s3 = inlined_call_operand.vmem [shape: f32[16,256], index: 3, kind: output, shape index: {}]  }
   0x1   :  { %s1448_s14 = smov 0   ;;  %s1450_s15 = smov 0  }
   0x2   :  { %s1452_s16 = smov 0  }
   0x3 LB: > { %s25_s17 = sadd.s32 1, %s1417_s15  ;;  %p48_p1 = scmp.ne.s32.totalorder %s1409_s13, %s1405_s12  ;;  %s1421_s16 = sphi %s1452_s16, %s13_s16   ;;  %s1417_s15 = sphi %s1450_s15, %s1689_s15   ;;  %s1413_s14 = sphi %s1448_s14, %s1688_s14   ;;  %s1409_s13 = sphi %s1446_s13, %s1687_s13   ;;  %s1405_s12 = sphi %s1444_s12, %s1686_s12  }
   0x4   : > { %p26_p0 = scmp.ge.s32.totalorder %s25_s17, 13  ;;  %p49_p2 = scmp.eq.s32.totalorder %s1421_s16, 0 }
   0x5   : > { %s41_s19 = sadd.s32 1, %s1409_s13  ;;  %p985_p5 = scmp.ge.s32.totalorder %s1421_s16, 13 }
   0x6   : > { %s1691_s17 = smov (%p26_p0, %s25_s17), 0  ;;  %p50_p3 = por %p49_p2, %p48_p1 }
   0x7   : > { %s37_s18 = ssub.s32 %s1417_s15, %s1691_s17  ;;  %164 = sbr.rel (%p985_p5) target bundleno = 20 (0x14), region = 20 }
   0x8   : > { %p39_p4 = scmp.eq.s32.totalorder %s37_s18, 0 }
   0xa   : > { %s1479_s20 = scalar_select %p39_p4, %s1409_s13, %s41_s19  }
   0xc   : > { %167 = sbr.rel (!%p50_p3) target bundleno = 20 (0x14), region = 24  ;;  %s169_s21 = sand.u32 (%p50_p3), 1, %s1409_s13  }
   0xd   : > { %s1272_s22 = sshll.u32 (%p50_p3), %s1417_s15, 4  ;;  %s986_s23 = sshll.u32 (%p50_p3), %s169_s21, 5 }
   0xe   : > { %s177_s26 = scalar_lea.vmem (%p50_p3), %s1682_s0, %s1272_s22  ;;  %s171_s27 = scalar_lea.vmem (%p50_p3), [#allocation3], %s986_s23 }
   0xf   : > { %v190_v0 = vld [vmem:[%s177_s26] sm:$0xff] (%p50_p3)  ;;  %v192_v1 = vld [vmem:[%s177_s26 + $0x8] sm:$0xff] (%p50_p3)  ;;  %v194_v2 = vld [vmem:[%s177_s26 + $0xd0] sm:$0xff] (%p50_p3) }
  0x10   : > { %191 = vst [vmem:[%s171_s27] sm:$0xff] (%p50_p3), %v190_v0  ;;  %v196_v3 = vld [vmem:[%s177_s26 + $0xd8] sm:$0xff] (%p50_p3) }
  0x11   : > { %193 = vst [vmem:[%s171_s27 + $0x8] sm:$0xff] %v192_v1 }
  0x12   : > { %195 = vst [vmem:[%s171_s27 + $0x10] sm:$0xff] %v194_v2 }
  0x13   : > { %197 = vst [vmem:[%s171_s27 + $0x18] sm:$0xff] %v196_v3 }
  0x14 PF: > { %p989_p6 = scmp.ge.s32.totalorder %s1421_s16, 1  ;;  %p217_p7 = scmp.lt.s32.totalorder %s1421_s16, 14 }
  0x16   : > { %p218_p8 = pnand %p989_p6, %p217_p7 }
  0x17   : > { %s224_s28 = sand.u32 (!%p218_p8), 1, %s1405_s12   ;;  %s991_s29 = sshll.u32 (!%p218_p8), %s1413_s14, 6 }
  0x18   : > { %221 = sbr.rel (%p218_p8) target bundleno = 264 (0x108), region = 51  ;;  %s990_s30 = sshll.u32 (!%p218_p8), %s224_s28, 5 }
  0x19   : > { %p270_p9 = scmp.lt.s32.totalorder (!%p218_p8), %s991_s29, 831  ;;  %s1496_s8 = scalar_lea.vmem (!%p218_p8), [#allocation3], %s990_s30 }
  0x1a   : > { %p994_p10 = scmp.ne.s32.totalorder (!%p218_p8), %s1413_s14, 0 }
  0x1d   : > { %s1693_s29 = smov (!%p270_p9, %s991_s29), 831  ;;  %300 = sbr.rel (%p994_p10) target bundleno = 39 (0x27), region = 59 }
  0x1e   : > { %s1273_s4 = sshll.u32 %s1693_s29, 3 }
  0x1f   : > { %s1494_s7 = scalar_lea.vmem %s1683_s1, %s1273_s4 }
  0x22   : > { %v1423_v4 = vmov 0.0  }
  0x23   : > { %301 = vst [vmem:[#allocation2 + $0x10] sm:$0xff] %v1423_v4 }
  0x24   : > { %302 = vst [vmem:[#allocation2] sm:$0xff] %v1423_v4 }
  0x25   : > { %303 = vst [vmem:[#allocation2 + $0x18] sm:$0xff] %v1423_v4 }
  0x26   : > { %304 = vst [vmem:[#allocation2 + $0x8] sm:$0xff] %v1423_v4 }
  0x27 PF: > { %v1069_v5 = vld [vmem:[%s1494_s7 + $0x70] sm:$0xf]  ;;  %v1293_v6 = vld [vmem:[%s1494_s7 + $0x74] sm:$0xf0]  ;;  %v1061_v16 = vld [vmem:[%s1494_s7 + $0x60] sm:$0xf] }
  0x28   : > { %v1133_v7 = vld [vmem:[%s1494_s7 + $0xf0] sm:$0xf]  ;;  %v1070_v8 = vor.u32 %v1293_v6, %v1069_v5  ;;  %v1309_v9 = vld [vmem:[%s1494_s7 + $0xf4] sm:$0xf0]  ;;  %v1291_v18 = vld [vmem:[%s1494_s7 + $0x64] sm:$0xf0] }
  0x29   : > { %v1197_v10 = vld [vmem:[%s1494_s7 + $0x170] sm:$0xf]  ;;  %v1325_v11 = vld [vmem:[%s1494_s7 + $0x174] sm:$0xf0]  ;;  %v1134_v12 = vor.u32 %v1309_v9, %v1133_v7  ;;  %v1125_v19 = vld [vmem:[%s1494_s7 + $0xe0] sm:$0xf]  ;;  %v1062_v21 = vor.u32 %v1291_v18, %v1061_v16 }
  0x2a   : > { %v1198_v13 = vor.u32 %v1325_v11, %v1197_v10  ;;  %v1261_v14 = vld [vmem:[%s1494_s7 + $0x1f0] sm:$0xf]  ;;  %v1341_v15 = vld [vmem:[%s1494_s7 + $0x1f4] sm:$0xf0]  ;;  %717 = vmatpush.bf16.msra.mxu0 %v1070_v8  ;;  %v1307_v20 = vld [vmem:[%s1494_s7 + $0xe4] sm:$0xf0] }
  0x2b   : > { %v1262_v17 = vor.u32 %v1341_v15, %v1261_v14  ;;  %731 = vmatpush.bf16.msra.mxu1 %v1134_v12  ;;  %v1126_v22 = vor.u32 %v1307_v20, %v1125_v19  ;;  %v1189_v23 = vld [vmem:[%s1494_s7 + $0x160] sm:$0xf]  ;;  %v1323_v24 = vld [vmem:[%s1494_s7 + $0x164] sm:$0xf0]  ;;  %v1053_v28 = vld [vmem:[%s1494_s7 + $0x50] sm:$0xf] }
  0x2c   : > { %745 = vmatpush.bf16.msra.mxu2 %v1198_v13  ;;  %v1253_v25 = vld [vmem:[%s1494_s7 + $0x1e0] sm:$0xf]  ;;  %v1190_v26 = vor.u32 %v1323_v24, %v1189_v23  ;;  %v1339_v27 = vld [vmem:[%s1494_s7 + $0x1e4] sm:$0xf0]  ;;  %v1289_v29 = vld [vmem:[%s1494_s7 + $0x54] sm:$0xf0] }
  0x2d   : > { %759 = vmatpush.bf16.msra.mxu3 %v1262_v17  ;;  %v1254_v30 = vor.u32 %v1339_v27, %v1253_v25  ;;  %v1117_v31 = vld [vmem:[%s1494_s7 + $0xd0] sm:$0xf]  ;;  %v1305_v32 = vld [vmem:[%s1494_s7 + $0xd4] sm:$0xf0]  ;;  %v1054_v34 = vor.u32 %v1289_v29, %v1053_v28  ;;  %v1045_v40 = vld [vmem:[%s1494_s7 + $0x40] sm:$0xf] }
  0x2e   : > { %v1181_v33 = vld [vmem:[%s1494_s7 + $0x150] sm:$0xf]  ;;  %718 = vmatpush.bf16.msra.mxu0 %v1062_v21  ;;  %v1321_v35 = vld [vmem:[%s1494_s7 + $0x154] sm:$0xf0]  ;;  %v1118_v38 = vor.u32 %v1305_v32, %v1117_v31  ;;  %v1287_v41 = vld [vmem:[%s1494_s7 + $0x44] sm:$0xf0] }
  0x2f   : > { %v1245_v36 = vld [vmem:[%s1494_s7 + $0x1d0] sm:$0xf]  ;;  %v1337_v37 = vld [vmem:[%s1494_s7 + $0x1d4] sm:$0xf0]  ;;  %732 = vmatpush.bf16.msra.mxu1 %v1126_v22  ;;  %v1182_v39 = vor.u32 %v1321_v35, %v1181_v33  ;;  %v1109_v42 = vld [vmem:[%s1494_s7 + $0xc0] sm:$0xf]  ;;  %v1046_v49 = vor.u32 %v1287_v41, %v1045_v40 }
  0x30   : > { %746 = vmatpush.bf16.msra.mxu2 %v1190_v26  ;;  %v1246_v43 = vor.u32 %v1337_v37, %v1245_v36  ;;  %v1303_v44 = vld [vmem:[%s1494_s7 + $0xc4] sm:$0xf0]  ;;  %v1173_v45 = vld [vmem:[%s1494_s7 + $0x140] sm:$0xf]  ;;  %v1037_v52 = vld [vmem:[%s1494_s7 + $0x30] sm:$0xf] }
  0x31   : > { %760 = vmatpush.bf16.msra.mxu3 %v1254_v30  ;;  %v1319_v46 = vld [vmem:[%s1494_s7 + $0x144] sm:$0xf0]  ;;  %v1237_v47 = vld [vmem:[%s1494_s7 + $0x1c0] sm:$0xf]  ;;  %v1110_v50 = vor.u32 %v1303_v44, %v1109_v42  ;;  %v1285_v53 = vld [vmem:[%s1494_s7 + $0x34] sm:$0xf0] }
  0x32   : > { %v1335_v48 = vld [vmem:[%s1494_s7 + $0x1c4] sm:$0xf0]  ;;  %719 = vmatpush.bf16.msra.mxu0 %v1054_v34  ;;  %v1174_v51 = vor.u32 %v1319_v46, %v1173_v45  ;;  %v1101_v54 = vld [vmem:[%s1494_s7 + $0xb0] sm:$0xf]  ;;  %v1301_v56 = vld [vmem:[%s1494_s7 + $0xb4] sm:$0xf0]  ;;  %v1038_v61 = vor.u32 %v1285_v53, %v1037_v52 }
  0x33   : > { %733 = vmatpush.bf16.msra.mxu1 %v1118_v38  ;;  %v1238_v55 = vor.u32 %v1335_v48, %v1237_v47  ;;  %v1165_v57 = vld [vmem:[%s1494_s7 + $0x130] sm:$0xf]  ;;  %v1317_v58 = vld [vmem:[%s1494_s7 + $0x134] sm:$0xf0]  ;;  %v1102_v62 = vor.u32 %v1301_v56, %v1101_v54  ;;  %v1029_v0 = vld [vmem:[%s1494_s7 + $0x20] sm:$0xf] }
  0x34   : > { %747 = vmatpush.bf16.msra.mxu2 %v1182_v39  ;;  %v1229_v59 = vld [vmem:[%s1494_s7 + $0x1b0] sm:$0xf]  ;;  %v1333_v60 = vld [vmem:[%s1494_s7 + $0x1b4] sm:$0xf0]  ;;  %v1166_v63 = vor.u32 %v1317_v58, %v1165_v57  ;;  %v1283_v1 = vld [vmem:[%s1494_s7 + $0x24] sm:$0xf0] }
  0x35   : > { %761 = vmatpush.bf16.msra.mxu3 %v1246_v43  ;;  %v1093_v2 = vld [vmem:[%s1494_s7 + $0xa0] sm:$0xf]  ;;  %v1230_v3 = vor.u32 %v1333_v60, %v1229_v59  ;;  %v1299_v4 = vld [vmem:[%s1494_s7 + $0xa4] sm:$0xf0]  ;;  %v1030_v9 = vor.u32 %v1283_v1, %v1029_v0  ;;  %v1021_v12 = vld [vmem:[%s1494_s7 + $0x10] sm:$0xf] }
  0x36   : > { %720 = vmatpush.bf16.msra.mxu0 %v1046_v49  ;;  %v1157_v5 = vld [vmem:[%s1494_s7 + $0x120] sm:$0xf]  ;;  %v1315_v6 = vld [vmem:[%s1494_s7 + $0x124] sm:$0xf0]  ;;  %v1094_v10 = vor.u32 %v1299_v4, %v1093_v2  ;;  %v1281_v13 = vld [vmem:[%s1494_s7 + $0x14] sm:$0xf0] }
  0x37   : > { %734 = vmatpush.bf16.msra.mxu1 %v1110_v50  ;;  %v1221_v7 = vld [vmem:[%s1494_s7 + $0x1a0] sm:$0xf]  ;;  %v1331_v8 = vld [vmem:[%s1494_s7 + $0x1a4] sm:$0xf0]  ;;  %v1158_v11 = vor.u32 %v1315_v6, %v1157_v5  ;;  %v1085_v14 = vld [vmem:[%s1494_s7 + $0x90] sm:$0xf]  ;;  %v1022_v22 = vor.u32 %v1281_v13, %v1021_v12 }
  0x38   : > { %748 = vmatpush.bf16.msra.mxu2 %v1174_v51  ;;  %v1222_v15 = vor.u32 %v1331_v8, %v1221_v7  ;;  %v1297_v16 = vld [vmem:[%s1494_s7 + $0x94] sm:$0xf0]  ;;  %v1149_v17 = vld [vmem:[%s1494_s7 + $0x110] sm:$0xf]  ;;  %v1013_v21 = vld [vmem:[%s1494_s7] sm:$0xf] }
  0x39   : > { %762 = vmatpush.bf16.msra.mxu3 %v1238_v55  ;;  %v1313_v18 = vld [vmem:[%s1494_s7 + $0x114] sm:$0xf0]  ;;  %v1213_v19 = vld [vmem:[%s1494_s7 + $0x190] sm:$0xf]  ;;  %v1279_v23 = vld [vmem:[%s1494_s7 + $0x4] sm:$0xf0]  ;;  %v1086_v26 = vor.u32 %v1297_v16, %v1085_v14 }
  0x3a   : > { %721 = vmatpush.bf16.msra.mxu0 %v1038_v61  ;;  %v1329_v20 = vld [vmem:[%s1494_s7 + $0x194] sm:$0xf0]  ;;  %v1077_v24 = vld [vmem:[%s1494_s7 + $0x80] sm:$0xf]  ;;  %v1295_v25 = vld [vmem:[%s1494_s7 + $0x84] sm:$0xf0]  ;;  %v1150_v27 = vor.u32 %v1313_v18, %v1149_v17  ;;  %v1014_v38 = vor.u32 %v1279_v23, %v1013_v21 }
  0x3b   : > { %735 = vmatpush.bf16.msra.mxu1 %v1102_v62  ;;  %v1141_v28 = vld [vmem:[%s1494_s7 + $0x100] sm:$0xf]  ;;  %v1311_v29 = vld [vmem:[%s1494_s7 + $0x104] sm:$0xf0]  ;;  %v1214_v31 = vor.u32 %v1329_v20, %v1213_v19  ;;  %v1292_v33 = vld [vmem:[%s1494_s7 + $0x74] sm:$0xf]  ;;  %v1078_v42 = vor.u32 %v1295_v25, %v1077_v24 }
  0x3c   : > { %749 = vmatpush.bf16.msra.mxu2 %v1166_v63  ;;  %v1205_v30 = vld [vmem:[%s1494_s7 + $0x180] sm:$0xf]  ;;  %v1327_v32 = vld [vmem:[%s1494_s7 + $0x184] sm:$0xf0]  ;;  %v1071_v34 = vld [vmem:[%s1494_s7 + $0x78] sm:$0xf0]  ;;  %v1142_v43 = vor.u32 %v1311_v29, %v1141_v28 }
  0x3d   : > { %763 = vmatpush.bf16.msra.mxu3 %v1230_v3  ;;  %v1308_v35 = vld [vmem:[%s1494_s7 + $0xf4] sm:$0xf]  ;;  %v1135_v36 = vld [vmem:[%s1494_s7 + $0xf8] sm:$0xf0]  ;;  %v1290_v44 = vld [vmem:[%s1494_s7 + $0x64] sm:$0xf]  ;;  %v1206_v48 = vor.u32 %v1327_v32, %v1205_v30  ;;  %v1074_v49 = vor.u32 %v1292_v33, %v1071_v34 }
  0x3e   : > { %722 = vmatpush.bf16.msra.mxu0 %v1030_v9  ;;  %v1324_v37 = vld [vmem:[%s1494_s7 + $0x174] sm:$0xf]  ;;  %v1199_v39 = vld [vmem:[%s1494_s7 + $0x178] sm:$0xf0]  ;;  %v1063_v45 = vld [vmem:[%s1494_s7 + $0x68] sm:$0xf0]  ;;  %v1138_v54 = vor.u32 %v1308_v35, %v1135_v36 }
  0x3f   : > { %736 = vmatpush.bf16.msra.mxu1 %v1094_v10  ;;  %v1340_v40 = vld [vmem:[%s1494_s7 + $0x1f4] sm:$0xf]  ;;  %v1263_v41 = vld [vmem:[%s1494_s7 + $0x1f8] sm:$0xf0]  ;;  %v1005_v46 = vld [vmem:[%s1496_s8 + $0x8] sm:$0xf]  ;;  %v1202_v55 = vor.u32 %v1324_v37, %v1199_v39  ;;  %v1066_v4 = vor.u32 %v1290_v44, %v1063_v45 }
  0x40   : > { %750 = vmatpush.bf16.msra.mxu2 %v1158_v11  ;;  %v1277_v47 = vld [vmem:[%s1496_s8 + $0x14] sm:$0xf0]  ;;  %v1306_v50 = vld [vmem:[%s1494_s7 + $0xe4] sm:$0xf]  ;;  %v1127_v51 = vld [vmem:[%s1494_s7 + $0xe8] sm:$0xf0]  ;;  %v1266_v59 = vor.u32 %v1340_v40, %v1263_v41 }
  0x41   : > { %764 = vmatpush.bf16.msra.mxu3 %v1222_v15  ;;  %v1322_v52 = vld [vmem:[%s1494_s7 + $0x164] sm:$0xf]  ;;  %v1191_v53 = vld [vmem:[%s1494_s7 + $0x168] sm:$0xf0]  ;;  %v1007_v57 = vld [vmem:[%s1496_s8 + $0x18] sm:$0xf0]  ;;  %v1582_v60 = vor.u32 %v1277_v47, %v1005_v46  ;;  %v1130_v6 = vor.u32 %v1306_v50, %v1127_v51 }
  0x42   : > { %723 = vmatpush.bf16.msra.mxu0 %v1022_v22  ;;  %v1275_v56 = vld [vmem:[%s1496_s8 + $0xc] sm:$0xf]  ;;  %v997_v58 = vld [vmem:[%s1496_s8] sm:$0xf]  ;;  %v1276_v61 = vld [vmem:[%s1496_s8 + $0xc] sm:$0xf0]  ;;  %v1194_v7 = vor.u32 %v1322_v52, %v1191_v53 }
  0x43   : > { %737 = vmatpush.bf16.msra.mxu1 %v1086_v26  ;;  %v1274_v62 = vld [vmem:[%s1496_s8 + $0x4] sm:$0xf]  ;;  %v999_v63 = vld [vmem:[%s1496_s8 + $0x10] sm:$0xf0]  ;;  %v1255_v1 = vld [vmem:[%s1494_s7 + $0x1e8] sm:$0xf0]  ;;  %v1589_v2 = vor.u32 %v1275_v56, %v1007_v57  ;;  %v1591_v3 = vor.u32 %v1276_v61, %v997_v58 }
  0x44   : > { %751 = vmatpush.bf16.msra.mxu2 %v1150_v27  ;;  %v1338_v0 = vld [vmem:[%s1494_s7 + $0x1e4] sm:$0xf]  ;;  %v1593_v5 = vor.u32 %v1274_v62, %v999_v63  ;;  %v1288_v8 = vld [vmem:[%s1494_s7 + $0x54] sm:$0xf]  ;;  %v1055_v9 = vld [vmem:[%s1494_s7 + $0x58] sm:$0xf0] }
  0x45   : > { %765 = vmatpush.bf16.msra.mxu3 %v1214_v31  ;;  %v1304_v10 = vld [vmem:[%s1494_s7 + $0xd4] sm:$0xf]  ;;  %v1258_v11 = vor.u32 %v1338_v0, %v1255_v1  ;;  %v1119_v12 = vld [vmem:[%s1494_s7 + $0xd8] sm:$0xf0]  ;;  %v1058_v17 = vor.u32 %v1288_v8, %v1055_v9  ;;  %v1286_v20 = vld [vmem:[%s1494_s7 + $0x44] sm:$0xf] }
  0x46   : > { %724 = vmatpush.bf16.msra.mxu0 %v1014_v38  ;;  %v1320_v13 = vld [vmem:[%s1494_s7 + $0x154] sm:$0xf]  ;;  %v1183_v14 = vld [vmem:[%s1494_s7 + $0x158] sm:$0xf0]  ;;  %v1122_v18 = vor.u32 %v1304_v10, %v1119_v12  ;;  %v1047_v21 = vld [vmem:[%s1494_s7 + $0x48] sm:$0xf0] }
  0x47   : > { %738 = vmatpush.bf16.msra.mxu1 %v1078_v42  ;;  %v1336_v15 = vld [vmem:[%s1494_s7 + $0x1d4] sm:$0xf]  ;;  %v1247_v16 = vld [vmem:[%s1494_s7 + $0x1d8] sm:$0xf0]  ;;  %v1186_v19 = vor.u32 %v1320_v13, %v1183_v14  ;;  %v1302_v22 = vld [vmem:[%s1494_s7 + $0xc4] sm:$0xf]  ;;  %v1050_v29 = vor.u32 %v1286_v20, %v1047_v21 }
  0x48   : > { %752 = vmatpush.bf16.msra.mxu2 %v1142_v43  ;;  %v1250_v23 = vor.u32 %v1336_v15, %v1247_v16  ;;  %v1111_v24 = vld [vmem:[%s1494_s7 + $0xc8] sm:$0xf0]  ;;  %v1318_v25 = vld [vmem:[%s1494_s7 + $0x144] sm:$0xf]  ;;  %v1284_v32 = vld [vmem:[%s1494_s7 + $0x34] sm:$0xf] }
  0x49   : > { %766 = vmatpush.bf16.msra.mxu3 %v1206_v48  ;;  %725 = vmatmul.bf16.vlgmr.msra.gmra.mxu0 %v1591_v3  ;;  %v1175_v26 = vld [vmem:[%s1494_s7 + $0x148] sm:$0xf0]  ;;  %v1334_v27 = vld [vmem:[%s1494_s7 + $0x1c4] sm:$0xf]  ;;  %v1114_v30 = vor.u32 %v1302_v22, %v1111_v24  ;;  %v1039_v33 = vld [vmem:[%s1494_s7 + $0x38] sm:$0xf0] }
  0x4a   : > { %773 = vmatpush.bf16.msrb.mxu0 %v1074_v49  ;;  %739 = vmatmul.bf16.vlgmr.msra.gmra.mxu1 %v1593_v5  ;;  %v1239_v28 = vld [vmem:[%s1494_s7 + $0x1c8] sm:$0xf0]  ;;  %v1178_v31 = vor.u32 %v1318_v25, %v1175_v26  ;;  %v1300_v34 = vld [vmem:[%s1494_s7 + $0xb4] sm:$0xf]  ;;  %v1103_v36 = vld [vmem:[%s1494_s7 + $0xb8] sm:$0xf0]  ;;  %v1042_v41 = vor.u32 %v1284_v32, %v1039_v33 }
  0x4b   : > { %787 = vmatpush.bf16.msrb.mxu1 %v1138_v54  ;;  %753 = vmatmul.bf16.vlgmr.msra.gmra.mxu2 %v1582_v60  ;;  %v1242_v35 = vor.u32 %v1334_v27, %v1239_v28  ;;  %v1316_v37 = vld [vmem:[%s1494_s7 + $0x134] sm:$0xf]  ;;  %v1167_v38 = vld [vmem:[%s1494_s7 + $0x138] sm:$0xf0]  ;;  %v1106_v42 = vor.u32 %v1300_v34, %v1103_v36  ;;  %v1282_v44 = vld [vmem:[%s1494_s7 + $0x24] sm:$0xf] }
  0x4c   : > { %801 = vmatpush.bf16.msrb.mxu2 %v1202_v55  ;;  %767 = vmatmul.bf16.vlgmr.msra.gmra.mxu3 %v1589_v2  ;;  %v1332_v39 = vld [vmem:[%s1494_s7 + $0x1b4] sm:$0xf]  ;;  %v1231_v40 = vld [vmem:[%s1494_s7 + $0x1b8] sm:$0xf0]  ;;  %v1170_v43 = vor.u32 %v1316_v37, %v1167_v38  ;;  %v1031_v45 = vld [vmem:[%s1494_s7 + $0x28] sm:$0xf0] }
  0x4d   : > { %815 = vmatpush.bf16.msrb.mxu3 %v1266_v59  ;;  %v1298_v46 = vld [vmem:[%s1494_s7 + $0xa4] sm:$0xf]  ;;  %v1234_v47 = vor.u32 %v1332_v39, %v1231_v40  ;;  %v1095_v48 = vld [vmem:[%s1494_s7 + $0xa8] sm:$0xf0]  ;;  %v1034_v53 = vor.u32 %v1282_v44, %v1031_v45  ;;  %v1280_v56 = vld [vmem:[%s1494_s7 + $0x14] sm:$0xf] }
  0x4e   : > { %774 = vmatpush.bf16.msrb.mxu0 %v1066_v4  ;;  %v1314_v49 = vld [vmem:[%s1494_s7 + $0x124] sm:$0xf]  ;;  %v1159_v50 = vld [vmem:[%s1494_s7 + $0x128] sm:$0xf0]  ;;  %v1098_v54 = vor.u32 %v1298_v46, %v1095_v48  ;;  %v1023_v57 = vld [vmem:[%s1494_s7 + $0x18] sm:$0xf0] }
  0x4f   : > { %788 = vmatpush.bf16.msrb.mxu1 %v1130_v6  ;;  %v1330_v51 = vld [vmem:[%s1494_s7 + $0x1a4] sm:$0xf]  ;;  %v1223_v52 = vld [vmem:[%s1494_s7 + $0x1a8] sm:$0xf0]  ;;  %v1162_v55 = vor.u32 %v1314_v49, %v1159_v50  ;;  %v1296_v58 = vld [vmem:[%s1494_s7 + $0x94] sm:$0xf]  ;;  %v1026_v4 = vor.u32 %v1280_v56, %v1023_v57 }
  0x50   : > { %802 = vmatpush.bf16.msrb.mxu2 %v1194_v7  ;;  %v1226_v59 = vor.u32 %v1330_v51, %v1223_v52  ;;  %v1087_v61 = vld [vmem:[%s1494_s7 + $0x98] sm:$0xf0]  ;;  %v1312_v62 = vld [vmem:[%s1494_s7 + $0x114] sm:$0xf]  ;;  %v1278_v8 = vld [vmem:[%s1494_s7 + $0x4] sm:$0xf] }
  0x51   : > { %816 = vmatpush.bf16.msrb.mxu3 %v1258_v11  ;;  %v1151_v63 = vld [vmem:[%s1494_s7 + $0x118] sm:$0xf0]  ;;  %v1328_v0 = vld [vmem:[%s1494_s7 + $0x194] sm:$0xf]  ;;  %v1090_v6 = vor.u32 %v1296_v58, %v1087_v61  ;;  %v1015_v9 = vld [vmem:[%s1494_s7 + $0x8] sm:$0xf0] }
  0x52   : > { %775 = vmatpush.bf16.msrb.mxu0 %v1058_v17  ;;  %v1215_v1 = vld [vmem:[%s1494_s7 + $0x198] sm:$0xf0]  ;;  %v1154_v7 = vor.u32 %v1312_v62, %v1151_v63  ;;  %v1294_v10 = vld [vmem:[%s1494_s7 + $0x84] sm:$0xf]  ;;  %v1079_v12 = vld [vmem:[%s1494_s7 + $0x88] sm:$0xf0]  ;;  %v1018_v17 = vor.u32 %v1278_v8, %v1015_v9 }
  0x53   : > { %789 = vmatpush.bf16.msrb.mxu1 %v1122_v18  ;;  %v1218_v11 = vor.u32 %v1328_v0, %v1215_v1  ;;  %v1310_v13 = vld [vmem:[%s1494_s7 + $0x104] sm:$0xf]  ;;  %v1143_v14 = vld [vmem:[%s1494_s7 + $0x108] sm:$0xf0]  ;;  %v1082_v18 = vor.u32 %v1294_v10, %v1079_v12  ;;  %v305_v27 = vld [vmem:[#allocation2 + $0x10] sm:$0xff]  ;;  %p1267_p11 = scmp.ne.s32.totalorder %s1413_s14, 12 }
  0x54   : > { %803 = vmatpush.bf16.msrb.mxu2 %v1186_v19  ;;  %v1326_v15 = vld [vmem:[%s1494_s7 + $0x184] sm:$0xf]  ;;  %v1207_v16 = vld [vmem:[%s1494_s7 + $0x188] sm:$0xf0]  ;;  %v1146_v19 = vor.u32 %v1310_v13, %v1143_v14  ;;  %v307_v34 = vld [vmem:[#allocation2 + $0x18] sm:$0xff] }
  0x55   : > { %817 = vmatpush.bf16.msrb.mxu3 %v1250_v23  ;;  %v1210_v20 = vor.u32 %v1326_v15, %v1207_v16  ;;  %v308_v49 = vld [vmem:[#allocation2 + $0x8] sm:$0xff] }
  0x56   : > { %776 = vmatpush.bf16.msrb.mxu0 %v1050_v29 }
  0x57   : > { %790 = vmatpush.bf16.msrb.mxu1 %v1114_v30 }
  0x58   : > { %804 = vmatpush.bf16.msrb.mxu2 %v1178_v31 }
  0x59   : > { %818 = vmatpush.bf16.msrb.mxu3 %v1242_v35 }
  0x5a   : > { %777 = vmatpush.bf16.msrb.mxu0 %v1042_v41  ;;  %v306_v41 = vld [vmem:[#allocation2] sm:$0xff] }
  0x5b   : > { %791 = vmatpush.bf16.msrb.mxu1 %v1106_v42 }
  0x5c   : > { %805 = vmatpush.bf16.msrb.mxu2 %v1170_v43 }
  0x5d   : > { %819 = vmatpush.bf16.msrb.mxu3 %v1234_v47 }
  0x5e   : > { %778 = vmatpush.bf16.msrb.mxu0 %v1034_v53 }
  0x5f   : > { %792 = vmatpush.bf16.msrb.mxu1 %v1098_v54 }
  0x60   : > { %806 = vmatpush.bf16.msrb.mxu2 %v1162_v55 }
  0x61   : > { %820 = vmatpush.bf16.msrb.mxu3 %v1226_v59 }
  0x62   : > { %779 = vmatpush.bf16.msrb.mxu0 %v1026_v4 }
  0x63   : > { %793 = vmatpush.bf16.msrb.mxu1 %v1090_v6 }
  0x64   : > { %807 = vmatpush.bf16.msrb.mxu2 %v1154_v7 }
  0x65   : > { %821 = vmatpush.bf16.msrb.mxu3 %v1218_v11 }
  0x66   : > { %780 = vmatpush.bf16.msrb.mxu0 %v1018_v17 }
  0x67   : > { %794 = vmatpush.bf16.msrb.mxu1 %v1082_v18 }
  0x68   : > { %808 = vmatpush.bf16.msrb.mxu2 %v1146_v19 }
  0x69   : > { %822 = vmatpush.bf16.msrb.mxu3 %v1210_v20  ;;  %781 = vmatmul.bf16.vlgmr.msrb.gmra.mxu0 %v1591_v3 }
  0x6a   : > { %795 = vmatmul.bf16.vlgmr.msrb.gmra.mxu1 %v1593_v5 }
  0x6b   : > { %809 = vmatmul.bf16.vlgmr.msrb.gmra.mxu2 %v1582_v60 }
  0x6c   : > { %823 = vmatmul.bf16.vlgmr.msrb.gmra.mxu3 %v1589_v2 }
  0xc6   : > { %v726_v21 = vpop.f32.mrf.mxu0 }
  0xc7   : > { %v740_v22 = vpop.f32.mrf.mxu1 }
  0xc8   : > { %v741_v23 = vadd.f32 %v740_v22, %v726_v21 }
  0xce   : > { %v754_v24 = vpop.f32.mrf.mxu2  ;;  %v728_v29 = vpop.f32.mrf.mxu0 }
  0xcf   : > { %v755_v25 = vadd.f32 %v754_v24, %v741_v23  ;;  %v768_v26 = vpop.f32.mrf.mxu3  ;;  %v742_v30 = vpop.f32.mrf.mxu1 }
  0xd0   : > { %v743_v32 = vadd.f32 %v742_v30, %v728_v29 }
  0xd1   : > { %v769_v28 = vadd.f32 %v768_v26, %v755_v25 }
  0xd3   : > { %v829_v31 = vadd.f32 %v769_v28, %v305_v27 }
  0xd5   : > { %833 = vst [vmem:[#allocation2 + $0x10] sm:$0xff] %v829_v31 }
  0xd6   : > { %v756_v3 = vpop.f32.mrf.mxu2 }
  0xd7   : > { %v757_v33 = vadd.f32 %v756_v3, %v743_v32  ;;  %v770_v5 = vpop.f32.mrf.mxu3 }
  0xd9   : > { %v771_v60 = vadd.f32 %v770_v5, %v757_v33 }
  0xdb   : > { %v831_v35 = vadd.f32 %v771_v60, %v307_v34 }
  0xdd   : > { %835 = vst [vmem:[#allocation2 + $0x18] sm:$0xff] %v831_v35 }
  0xe6   : > { %v782_v2 = vpop.f32.mrf.mxu0 }
  0xe7   : > { %v796_v36 = vpop.f32.mrf.mxu1 }
  0xe8   : > { %v797_v37 = vadd.f32 %v796_v36, %v782_v2 }
  0xee   : > { %v810_v38 = vpop.f32.mrf.mxu2  ;;  %v784_v43 = vpop.f32.mrf.mxu0 }
  0xef   : > { %v811_v39 = vadd.f32 %v810_v38, %v797_v37  ;;  %v824_v40 = vpop.f32.mrf.mxu3  ;;  %v798_v44 = vpop.f32.mrf.mxu1 }
  0xf0   : > { %v799_v46 = vadd.f32 %v798_v44, %v784_v43 }
  0xf1   : > { %v825_v42 = vadd.f32 %v824_v40, %v811_v39 }
  0xf3   : > { %v830_v45 = vadd.f32 %v825_v42, %v306_v41 }
  0xf5   : > { %834 = vst [vmem:[#allocation2] sm:$0xff] %v830_v45 }
  0xf6   : > { %v812_v47 = vpop.f32.mrf.mxu2 }
  0xf7   : > { %v813_v48 = vadd.f32 %v812_v47, %v799_v46  ;;  %v826_v50 = vpop.f32.mrf.mxu3 }
  0xf9   : > { %v827_v51 = vadd.f32 %v826_v50, %v813_v48  ;;  %840 = sbr.rel (%p1267_p11) target bundleno = 264 (0x108), region = 63 }
  0xfb   : > { %v832_v52 = vadd.f32 %v827_v51, %v308_v49 }
  0xfd   : > { %836 = vst [vmem:[#allocation2 + $0x8] sm:$0xff] %v832_v52 }
  0xfe   : > { %v841_v53 = vld [vmem:[#allocation2 + $0x10] sm:$0xff]  ;;  %v845_v54 = vld [vmem:[%s1684_s2] sm:$0x3]  ;;  %v843_v58 = vld [vmem:[#allocation2 + $0x18] sm:$0xff] }
  0xff   : > { %v842_v55 = vld [vmem:[#allocation2] sm:$0xff]  ;;  %v847_v56 = vperm.slane %v845_v54, 0  ;;  %v848_v57 = vperm.slane %v845_v54, 1 }
 0x101   : > { %v851_v61 = vadd.f32 %v847_v56, %v841_v53  ;;  %v852_v62 = vadd.f32 %v848_v57, %v842_v55  ;;  %v853_v63 = vadd.f32 %v847_v56, %v843_v58 }
 0x103   : > { %855 = vst [vmem:[%s1685_s3] sm:$0xff] %v851_v61 }
 0x104   : > { %v844_v59 = vld [vmem:[#allocation2 + $0x8] sm:$0xff]  ;;  %856 = vst [vmem:[%s1685_s3 + $0x8] sm:$0xff] %v852_v62 }
 0x105   : > { %v854_v0 = vadd.f32 %v848_v57, %v844_v59  ;;  %857 = vst [vmem:[%s1685_s3 + $0x10] sm:$0xff] %v853_v63 }
 0x107   : > { %858 = vst [vmem:[%s1685_s3 + $0x18] sm:$0xff] %v854_v0 }
 0x108 PF: > { %s13_s16 = sadd.s32 1, %s1421_s16   ;;  %s1686_s12 = smov %s1409_s13 }
 0x109   : > { %p10_p12 = scmp.ge.s32.totalorder %s13_s16, 15   ;;  %s1687_s13 = smov %s1479_s20 }
 0x10a   : > { %s1688_s14 = smov %s1417_s15  ;;  %s1689_s15 = smov %s1691_s17 }
 0x10b   :  { %12 = sbr.rel (!%p10_p12) target bundleno = 3 (0x3), region = 104 }

// kernel: vqgan3d_forward.165
= control target key start
LH: loop header
LB: loop body
LE: loop exit
PB: predicated region body
PF: predicated region fallthrough
CT: control target
= control target key end

     0   :  { %v14_v0 = vlaneseq  ;;  %vm29_vm0 = vcmask 916480   ;;  %v81_v7 = vmov 0.0   ;;  %vm40_vm2 = vcmask 1040384   ;;  %s135_s0 = inlined_call_operand.vmem [shape: f32[8,240], index: 0, kind: input, shape index: {}]   ;;  %s136_s1 = inlined_call_operand.vmem [shape: f32[1,240], index: 1, kind: output, shape index: {0}]   ;;  %s137_s2 = inlined_call_operand.vmem [shape: f32[1,240], index: 2, kind: output, shape index: {1}]  }
   0x1   :  { %v20_v1 = vld [vmem:[%s135_s0] sm:$0xff]  ;;  %v21_v2 = vld [vmem:[%s135_s0 + $0x8] sm:$0xff] }
   0x2   :  { %vm103_vm1 = vcmp.lt.s32.totalorder %v14_v0, 240  ;;  %v23_v4 = vrot.slane %v20_v1, 4  ;;  %v30_v5 = vsel %vm29_vm0, %v21_v2, 0.0  ;;  %v50_v6 = vmul.f32 %v20_v1, %v20_v1 }
   0x3   :  { %18 = vst.msk [vmem:[%s136_s1] sm:$0x3] %vm103_vm1, %v81_v7  ;;  %v31_v8 = vrot.slane %v30_v5, 4  ;;  %v51_v9 = vmul.f32 %v21_v2, %v21_v2 }
   0x4   :  { %v24_v10 = vadd.f32 %v23_v4, %v20_v1  ;;  %19 = vst.msk [vmem:[%s137_s2] sm:$0x3] %vm103_vm1, %v81_v7  ;;  %v52_v11 = vrot.slane %v50_v6, 4 }
   0x5   :  { %v32_v12 = vadd.f32 %v31_v8, %v30_v5  ;;  %v58_v13 = vsel %vm29_vm0, %v51_v9, 0.0 }
   0x6   :  { %v25_v14 = vrot.slane %v24_v10, 2  ;;  %v53_v15 = vadd.f32 %v52_v11, %v50_v6  ;;  %v59_v16 = vrot.slane %v58_v13, 4 }
   0x7   :  { %v33_v17 = vrot.slane %v32_v12, 2 }
   0x8   :  { %v26_v18 = vadd.f32 %v25_v14, %v24_v10  ;;  %v54_v19 = vrot.slane %v53_v15, 2  ;;  %v60_v20 = vadd.f32 %v59_v16, %v58_v13 }
   0x9   :  { %v34_v21 = vadd.f32 %v33_v17, %v32_v12 }
   0xa   :  { %v27_v22 = vrot.slane %v26_v18, 1  ;;  %v55_v23 = vadd.f32 %v54_v19, %v53_v15  ;;  %v61_v24 = vrot.slane %v60_v20, 2  ;;  %v22_v31 = vld [vmem:[%s136_s1] sm:$0x3] }
   0xb   :  { %v35_v25 = vrot.slane %v34_v21, 1  ;;  %v49_v37 = vld [vmem:[%s137_s2] sm:$0x3] }
   0xc   :  { %v56_v26 = vrot.slane %v55_v23, 1  ;;  %v62_v27 = vadd.f32 %v61_v24, %v60_v20  ;;  %v28_v28 = vadd.f32 %v27_v22, %v26_v18 }
   0xd   :  { %v36_v29 = vadd.f32 %v35_v25, %v34_v21 }
   0xe   :  { %v63_v30 = vrot.slane %v62_v27, 1  ;;  %v57_v33 = vadd.f32 %v56_v26, %v55_v23 }
   0xf   :  { %v39_v32 = vrot.slane %v36_v29, 7 }
  0x10   :  { %v64_v34 = vadd.f32 %v63_v30, %v62_v27 }
  0x11   :  { %v41_v35 = vsel %vm40_vm2, %v28_v28, %v39_v32 }
  0x12   :  { %v43_v36 = vadd.f32 %v41_v35, %v22_v31  ;;  %v67_v38 = vrot.slane %v64_v34, 7 }
  0x14   :  { %48 = vst.msk [vmem:[%s136_s1] sm:$0x3] %vm103_vm1, %v43_v36  ;;  %v68_v39 = vsel %vm40_vm2, %v57_v33, %v67_v38 }
  0x15   :  { %v70_v40 = vadd.f32 %v68_v39, %v49_v37 }
  0x17   :  { %71 = vst.msk [vmem:[%s137_s2] sm:$0x3] %vm103_vm1, %v70_v40 }

// kernel: vqgan3d_forward.166
= control target key start
LH: loop header
LB: loop body
LE: loop exit
PB: predicated region body
PF: predicated region fallthrough
CT: control target
= control target key end

     0   :  { %vm35_vm0 = vcmask 916480   ;;  %s79_s0 = inlined_call_operand.vmem [shape: f32[8,240], index: 0, kind: input, shape index: {}]   ;;  %s80_s1 = inlined_call_operand.vmem [shape: f32[1,240], index: 1, kind: input, shape index: {}]   ;;  %s81_s2 = inlined_call_operand.vmem [shape: f32[1,240], index: 2, kind: input, shape index: {}]   ;;  %s82_s3 = inlined_call_operand.vmem [shape: f32[8,240], index: 3, kind: output, shape index: {}]  }
   0x1   :  { %v14_v0 = vld [vmem:[%s79_s0] sm:$0xff]  ;;  %v15_v1 = vld [vmem:[%s79_s0 + $0x8] sm:$0xff] }
   0x2   :  { %v16_v2 = vld [vmem:[%s80_s1] sm:$0x3] }
   0x3   :  { %v18_v3 = vperm.slane %v16_v2, 0  ;;  %v19_v4 = vperm.slane %v16_v2, 1  ;;  %v24_v5 = vld [vmem:[%s81_s2] sm:$0x3] }
   0x4   :  { %v26_v6 = vperm.slane %v24_v5, 0  ;;  %v27_v7 = vperm.slane %v24_v5, 1 }
   0x5   :  { %v22_v8 = vmul.f32 %v18_v3, %v14_v0  ;;  %v23_v9 = vmul.f32 %v19_v4, %v15_v1 }
   0x7   :  { %v30_v10 = vadd.f32 %v26_v6, %v22_v8  ;;  %v31_v11 = vadd.f32 %v27_v7, %v23_v9 }
   0x9   :  { %v32_v12 = vmax.f32 %v30_v10, 0.0  ;;  %v33_v13 = vmax.f32 %v31_v11, 0.0 }
   0xb   :  { %34 = vst [vmem:[%s82_s3] sm:$0xff] %v32_v12 }
   0xc   :  { %36 = vst.msk [vmem:[%s82_s3 + $0x8] sm:$0xff] %vm35_vm0, %v33_v13 }

// kernel: vqgan3d_forward.168
= control target key start
LH: loop header
LB: loop body
LE: loop exit
PB: predicated region body
PF: predicated region fallthrough
CT: control target
= control target key end

     0   :  { %vm14_vm0 = vcmask 974848   ;;  %vm19_vm1 = vcmask 982016   ;;  %v50_v0 = vmov 0.0   ;;  %s91_s0 = inlined_call_operand.vmem [shape: f32[8,120], index: 0, kind: input, shape index: {}]   ;;  %s92_s1 = inlined_call_operand.vmem [shape: f32[1,120], index: 1, kind: output, shape index: {0}]   ;;  %s93_s2 = inlined_call_operand.vmem [shape: f32[1,120], index: 2, kind: output, shape index: {1}]  }
   0x1   :  { %15 = vst.msk [vmem:[%s92_s1] sm:$0x1] %vm14_vm0, %v50_v0  ;;  %v17_v1 = vld [vmem:[%s91_s0] sm:$0xff] }
   0x2   :  { %v20_v2 = vsel %vm19_vm1, %v17_v1, 0.0  ;;  %16 = vst.msk [vmem:[%s93_s2] sm:$0x1] %vm14_vm0, %v50_v0  ;;  %v31_v3 = vmul.f32 %v17_v1, %v17_v1 }
   0x3   :  { %v21_v4 = vrot.slane %v20_v2, 4 }
   0x4   :  { %v32_v5 = vsel %vm19_vm1, %v31_v3, 0.0 }
   0x5   :  { %v22_v6 = vadd.f32 %v21_v4, %v20_v2  ;;  %v33_v7 = vrot.slane %v32_v5, 4 }
   0x7   :  { %v23_v8 = vrot.slane %v22_v6, 2  ;;  %v34_v9 = vadd.f32 %v33_v7, %v32_v5 }
   0x8   :  { %v18_v14 = vld [vmem:[%s92_s1] sm:$0x1] }
   0x9   :  { %v24_v10 = vadd.f32 %v23_v8, %v22_v6  ;;  %v35_v11 = vrot.slane %v34_v9, 2  ;;  %v30_v17 = vld [vmem:[%s93_s2] sm:$0x1] }
   0xb   :  { %v25_v12 = vrot.slane %v24_v10, 1  ;;  %v36_v13 = vadd.f32 %v35_v11, %v34_v9 }
   0xd   :  { %v26_v15 = vadd.f32 %v25_v12, %v24_v10  ;;  %v37_v16 = vrot.slane %v36_v13, 1 }
   0xf   :  { %v27_v18 = vadd.f32 %v26_v15, %v18_v14  ;;  %v38_v19 = vadd.f32 %v37_v16, %v36_v13 }
  0x11   :  { %29 = vst.msk [vmem:[%s92_s1] sm:$0x1] %vm14_vm0, %v27_v18  ;;  %v39_v20 = vadd.f32 %v38_v19, %v30_v17 }
  0x13   :  { %40 = vst.msk [vmem:[%s93_s2] sm:$0x1] %vm14_vm0, %v39_v20 }

// kernel: vqgan3d_forward.167
= control target key start
LH: loop header
LB: loop body
LE: loop exit
PB: predicated region body
PF: predicated region fallthrough
CT: control target
= control target key end

     0   :  { %s1053_s12 = smov 0   ;;  %s1055_s13 = smov 0   ;;  %s1173_s0 = inlined_call_operand.vmem [shape: bf16[16,6656], index: 0, kind: input, shape index: {}]   ;;  %s1174_s1 = inlined_call_operand.vmem [shape: bf16[6656,128], index: 1, kind: input, shape index: {}]   ;;  %s1175_s2 = inlined_call_operand.vmem [shape: f32[1,128], index: 2, kind: input, shape index: {}]   ;;  %s1176_s3 = inlined_call_operand.vmem [shape: f32[16,128], index: 3, kind: output, shape index: {}]  }
   0x1   :  { %s1057_s14 = smov 0   ;;  %s1059_s15 = smov 0  }
   0x2   :  { %s1061_s16 = smov 0  }
   0x3 LB: > { %s25_s17 = sadd.s32 1, %s1026_s15  ;;  %p48_p1 = scmp.ne.s32.totalorder %s1018_s13, %s1014_s12  ;;  %s1030_s16 = sphi %s1061_s16, %s13_s16   ;;  %s1026_s15 = sphi %s1059_s15, %s1180_s15   ;;  %s1022_s14 = sphi %s1057_s14, %s1179_s14   ;;  %s1018_s13 = sphi %s1055_s13, %s1178_s13   ;;  %s1014_s12 = sphi %s1053_s12, %s1177_s12  }
   0x4   : > { %p26_p0 = scmp.ge.s32.totalorder %s25_s17, 13  ;;  %p49_p2 = scmp.eq.s32.totalorder %s1030_s16, 0 }
   0x5   : > { %s41_s19 = sadd.s32 1, %s1018_s13  ;;  %p755_p5 = scmp.ge.s32.totalorder %s1030_s16, 13 }
   0x6   : > { %s1182_s17 = smov (%p26_p0, %s25_s17), 0  ;;  %p50_p3 = por %p49_p2, %p48_p1 }
   0x7   : > { %s37_s18 = ssub.s32 %s1026_s15, %s1182_s17  ;;  %162 = sbr.rel (%p755_p5) target bundleno = 20 (0x14), region = 20 }
   0x8   : > { %p39_p4 = scmp.eq.s32.totalorder %s37_s18, 0 }
   0xa   : > { %s1088_s20 = scalar_select %p39_p4, %s1018_s13, %s41_s19  }
   0xc   : > { %165 = sbr.rel (!%p50_p3) target bundleno = 20 (0x14), region = 24  ;;  %s167_s21 = sand.u32 (%p50_p3), 1, %s1018_s13  }
   0xd   : > { %s913_s22 = sshll.u32 (%p50_p3), %s1026_s15, 4  ;;  %s756_s23 = sshll.u32 (%p50_p3), %s167_s21, 5 }
   0xe   : > { %s175_s26 = scalar_lea.vmem (%p50_p3), %s1173_s0, %s913_s22  ;;  %s169_s27 = scalar_lea.vmem (%p50_p3), [#allocation3], %s756_s23 }
   0xf   : > { %v188_v0 = vld [vmem:[%s175_s26] sm:$0xff] (%p50_p3)  ;;  %v190_v1 = vld [vmem:[%s175_s26 + $0x8] sm:$0xff] (%p50_p3)  ;;  %v192_v2 = vld [vmem:[%s175_s26 + $0xd0] sm:$0xff] (%p50_p3) }
  0x10   : > { %189 = vst [vmem:[%s169_s27] sm:$0xff] (%p50_p3), %v188_v0  ;;  %v194_v3 = vld [vmem:[%s175_s26 + $0xd8] sm:$0xff] (%p50_p3) }
  0x11   : > { %191 = vst [vmem:[%s169_s27 + $0x8] sm:$0xff] %v190_v1 }
  0x12   : > { %193 = vst [vmem:[%s169_s27 + $0x10] sm:$0xff] %v192_v2 }
  0x13   : > { %195 = vst [vmem:[%s169_s27 + $0x18] sm:$0xff] %v194_v3 }
  0x14 PF: > { %p759_p6 = scmp.ge.s32.totalorder %s1030_s16, 1  ;;  %p212_p7 = scmp.lt.s32.totalorder %s1030_s16, 14 }
  0x16   : > { %p213_p8 = pnand %p759_p6, %p212_p7 }
  0x17   : > { %s219_s28 = sand.u32 (!%p213_p8), 1, %s1014_s12   ;;  %s761_s29 = sshll.u32 (!%p213_p8), %s1022_s14, 6 }
  0x18   : > { %216 = sbr.rel (%p213_p8) target bundleno = 228 (0xe4), region = 51  ;;  %s760_s30 = sshll.u32 (!%p213_p8), %s219_s28, 5 }
  0x19   : > { %p259_p9 = scmp.lt.s32.totalorder (!%p213_p8), %s761_s29, 831  ;;  %s1105_s8 = scalar_lea.vmem (!%p213_p8), [#allocation3], %s760_s30 }
  0x1a   : > { %p763_p10 = scmp.ne.s32.totalorder (!%p213_p8), %s1022_s14, 0 }
  0x1d   : > { %s1184_s29 = smov (!%p259_p9, %s761_s29), 831  ;;  %282 = sbr.rel (%p763_p10) target bundleno = 37 (0x25), region = 59 }
  0x1e   : > { %s762_s4 = sshll.u32 %s1184_s29, 2 }
  0x1f   : > { %s1103_s7 = scalar_lea.vmem %s1174_s1, %s762_s4 }
  0x22   : > { %v1032_v4 = vmov 0.0  }
  0x23   : > { %283 = vst [vmem:[#allocation2] sm:$0xff] %v1032_v4 }
  0x24   : > { %284 = vst [vmem:[#allocation2 + $0x8] sm:$0xff] %v1032_v4 }
  0x25 PF: > { %v925_v5 = vld [vmem:[%s1103_s7 + $0x38] sm:$0xff]  ;;  %v924_v9 = vld [vmem:[%s1103_s7 + $0x30] sm:$0xff]  ;;  %v923_v13 = vld [vmem:[%s1103_s7 + $0x28] sm:$0xff]  ;;  %p908_p11 = scmp.ne.s32.totalorder %s1022_s14, 12 }
  0x26   : > { %v933_v6 = vld [vmem:[%s1103_s7 + $0x78] sm:$0xff]  ;;  %567 = vmatpush.bf16.msra.mxu0 %v925_v5  ;;  %v932_v10 = vld [vmem:[%s1103_s7 + $0x70] sm:$0xff]  ;;  %v931_v14 = vld [vmem:[%s1103_s7 + $0x68] sm:$0xff] }
  0x27   : > { %v941_v7 = vld [vmem:[%s1103_s7 + $0xb8] sm:$0xff]  ;;  %581 = vmatpush.bf16.msra.mxu1 %v933_v6  ;;  %v940_v11 = vld [vmem:[%s1103_s7 + $0xb0] sm:$0xff]  ;;  %v939_v15 = vld [vmem:[%s1103_s7 + $0xa8] sm:$0xff] }
  0x28   : > { %v949_v8 = vld [vmem:[%s1103_s7 + $0xf8] sm:$0xff]  ;;  %595 = vmatpush.bf16.msra.mxu2 %v941_v7  ;;  %v948_v12 = vld [vmem:[%s1103_s7 + $0xf0] sm:$0xff]  ;;  %v947_v16 = vld [vmem:[%s1103_s7 + $0xe8] sm:$0xff] }
  0x29   : > { %609 = vmatpush.bf16.msra.mxu3 %v949_v8  ;;  %v922_v17 = vld [vmem:[%s1103_s7 + $0x20] sm:$0xff]  ;;  %v921_v21 = vld [vmem:[%s1103_s7 + $0x18] sm:$0xff]  ;;  %v920_v25 = vld [vmem:[%s1103_s7 + $0x10] sm:$0xff] }
  0x2a   : > { %568 = vmatpush.bf16.msra.mxu0 %v924_v9  ;;  %v930_v18 = vld [vmem:[%s1103_s7 + $0x60] sm:$0xff]  ;;  %v929_v22 = vld [vmem:[%s1103_s7 + $0x58] sm:$0xff]  ;;  %v928_v26 = vld [vmem:[%s1103_s7 + $0x50] sm:$0xff] }
  0x2b   : > { %582 = vmatpush.bf16.msra.mxu1 %v932_v10  ;;  %v938_v19 = vld [vmem:[%s1103_s7 + $0xa0] sm:$0xff]  ;;  %v937_v23 = vld [vmem:[%s1103_s7 + $0x98] sm:$0xff]  ;;  %v936_v27 = vld [vmem:[%s1103_s7 + $0x90] sm:$0xff] }
  0x2c   : > { %596 = vmatpush.bf16.msra.mxu2 %v940_v11  ;;  %v946_v20 = vld [vmem:[%s1103_s7 + $0xe0] sm:$0xff]  ;;  %v945_v24 = vld [vmem:[%s1103_s7 + $0xd8] sm:$0xff]  ;;  %v944_v28 = vld [vmem:[%s1103_s7 + $0xd0] sm:$0xff] }
  0x2d   : > { %610 = vmatpush.bf16.msra.mxu3 %v948_v12  ;;  %v919_v29 = vld [vmem:[%s1103_s7 + $0x8] sm:$0xff]  ;;  %v918_v33 = vld [vmem:[%s1103_s7] sm:$0xff]  ;;  %v766_v37 = vld [vmem:[%s1105_s8] sm:$0xf] }
  0x2e   : > { %569 = vmatpush.bf16.msra.mxu0 %v923_v13  ;;  %v927_v30 = vld [vmem:[%s1103_s7 + $0x48] sm:$0xff]  ;;  %v926_v34 = vld [vmem:[%s1103_s7 + $0x40] sm:$0xff]  ;;  %v914_v39 = vld [vmem:[%s1105_s8 + $0x4] sm:$0xf] }
  0x2f   : > { %583 = vmatpush.bf16.msra.mxu1 %v931_v14  ;;  %v935_v31 = vld [vmem:[%s1103_s7 + $0x88] sm:$0xff]  ;;  %v934_v35 = vld [vmem:[%s1103_s7 + $0x80] sm:$0xff]  ;;  %v774_v41 = vld [vmem:[%s1105_s8 + $0x8] sm:$0xf] }
  0x30   : > { %597 = vmatpush.bf16.msra.mxu2 %v939_v15  ;;  %v943_v32 = vld [vmem:[%s1103_s7 + $0xc8] sm:$0xff]  ;;  %v942_v36 = vld [vmem:[%s1103_s7 + $0xc0] sm:$0xff]  ;;  %v915_v43 = vld [vmem:[%s1105_s8 + $0xc] sm:$0xf] }
  0x31   : > { %611 = vmatpush.bf16.msra.mxu3 %v947_v16  ;;  %v916_v38 = vld [vmem:[%s1105_s8 + $0xc] sm:$0xf0]  ;;  %v768_v40 = vld [vmem:[%s1105_s8 + $0x10] sm:$0xf0]  ;;  %v917_v42 = vld [vmem:[%s1105_s8 + $0x14] sm:$0xf0] }
  0x32   : > { %570 = vmatpush.bf16.msra.mxu0 %v922_v17  ;;  %v776_v44 = vld [vmem:[%s1105_s8 + $0x18] sm:$0xf0]  ;;  %v767_v45 = vor.u32 %v916_v38, %v766_v37  ;;  %v771_v46 = vor.u32 %v914_v39, %v768_v40  ;;  %v775_v47 = vor.u32 %v917_v42, %v774_v41  ;;  %v285_v55 = vld [vmem:[#allocation2] sm:$0xff] }
  0x33   : > { %584 = vmatpush.bf16.msra.mxu1 %v930_v18  ;;  %v779_v48 = vor.u32 %v915_v43, %v776_v44  ;;  %v286_v63 = vld [vmem:[#allocation2 + $0x8] sm:$0xff] }
  0x34   : > { %598 = vmatpush.bf16.msra.mxu2 %v938_v19 }
  0x35   : > { %612 = vmatpush.bf16.msra.mxu3 %v946_v20 }
  0x36   : > { %571 = vmatpush.bf16.msra.mxu0 %v921_v21 }
  0x37   : > { %585 = vmatpush.bf16.msra.mxu1 %v929_v22 }
  0x38   : > { %599 = vmatpush.bf16.msra.mxu2 %v937_v23 }
  0x39   : > { %613 = vmatpush.bf16.msra.mxu3 %v945_v24 }
  0x3a   : > { %572 = vmatpush.bf16.msra.mxu0 %v920_v25 }
  0x3b   : > { %586 = vmatpush.bf16.msra.mxu1 %v928_v26 }
  0x3c   : > { %600 = vmatpush.bf16.msra.mxu2 %v936_v27 }
  0x3d   : > { %614 = vmatpush.bf16.msra.mxu3 %v944_v28 }
  0x3e   : > { %573 = vmatpush.bf16.msra.mxu0 %v919_v29 }
  0x3f   : > { %587 = vmatpush.bf16.msra.mxu1 %v927_v30 }
  0x40   : > { %601 = vmatpush.bf16.msra.mxu2 %v935_v31 }
  0x41   : > { %615 = vmatpush.bf16.msra.mxu3 %v943_v32 }
  0x42   : > { %574 = vmatpush.bf16.msra.mxu0 %v918_v33 }
  0x43   : > { %588 = vmatpush.bf16.msra.mxu1 %v926_v34 }
  0x44   : > { %602 = vmatpush.bf16.msra.mxu2 %v934_v35 }
  0x45   : > { %616 = vmatpush.bf16.msra.mxu3 %v942_v36  ;;  %575 = vmatmul.bf16.vlgmr.msra.gmra.mxu0 %v767_v45 }
  0x46   : > { %589 = vmatmul.bf16.vlgmr.msra.gmra.mxu1 %v771_v46 }
  0x47   : > { %603 = vmatmul.bf16.vlgmr.msra.gmra.mxu2 %v775_v47 }
  0x48   : > { %617 = vmatmul.bf16.vlgmr.msra.gmra.mxu3 %v779_v48 }
  0xc2   : > { %v576_v49 = vpop.f32.mrf.mxu0 }
  0xc3   : > { %v590_v50 = vpop.f32.mrf.mxu1 }
  0xc4   : > { %v591_v51 = vadd.f32 %v590_v50, %v576_v49 }
  0xca   : > { %v604_v52 = vpop.f32.mrf.mxu2  ;;  %v578_v57 = vpop.f32.mrf.mxu0 }
  0xcb   : > { %v618_v53 = vpop.f32.mrf.mxu3  ;;  %v605_v54 = vadd.f32 %v604_v52, %v591_v51  ;;  %v592_v58 = vpop.f32.mrf.mxu1 }
  0xcc   : > { %v593_v60 = vadd.f32 %v592_v58, %v578_v57 }
  0xcd   : > { %v619_v56 = vadd.f32 %v618_v53, %v605_v54 }
  0xcf   : > { %v623_v59 = vadd.f32 %v619_v56, %v285_v55 }
  0xd1   : > { %625 = vst [vmem:[#allocation2] sm:$0xff] %v623_v59 }
  0xd2   : > { %v606_v61 = vpop.f32.mrf.mxu2 }
  0xd3   : > { %v607_v62 = vadd.f32 %v606_v61, %v593_v60  ;;  %v620_v0 = vpop.f32.mrf.mxu3 }
  0xd5   : > { %v621_v1 = vadd.f32 %v620_v0, %v607_v62  ;;  %630 = sbr.rel (%p908_p11) target bundleno = 228 (0xe4), region = 63 }
  0xd7   : > { %v624_v2 = vadd.f32 %v621_v1, %v286_v63 }
  0xd9   : > { %626 = vst [vmem:[#allocation2 + $0x8] sm:$0xff] %v624_v2 }
  0xda   : > { %v631_v3 = vld [vmem:[#allocation2] sm:$0xff] }
  0xdb   : > { %v991_v4 = vld [vmem:[%s1175_s2] ss:$0 sm:$0xff] }
  0xdc   : > { %v637_v6 = vadd.f32 %v991_v4, %v631_v3 }
  0xde   : > { %639 = vst [vmem:[%s1176_s3] sm:$0xff] %v637_v6 }
  0xe0   : > { %v632_v5 = vld [vmem:[#allocation2 + $0x8] sm:$0xff] }
  0xe1   : > { %v638_v7 = vadd.f32 %v991_v4, %v632_v5 }
  0xe3   : > { %640 = vst [vmem:[%s1176_s3 + $0x8] sm:$0xff] %v638_v7 }
  0xe4 PF: > { %s13_s16 = sadd.s32 1, %s1030_s16   ;;  %s1177_s12 = smov %s1018_s13 }
  0xe5   : > { %p10_p12 = scmp.ge.s32.totalorder %s13_s16, 15   ;;  %s1178_s13 = smov %s1088_s20 }
  0xe6   : > { %s1179_s14 = smov %s1026_s15  ;;  %s1180_s15 = smov %s1182_s17 }
  0xe7   :  { %12 = sbr.rel (!%p10_p12) target bundleno = 3 (0x3), region = 104 }

// kernel: vqgan3d_forward.169
= control target key start
LH: loop header
LB: loop body
LE: loop exit
PB: predicated region body
PF: predicated region fallthrough
CT: control target
= control target key end

     0   :  { %vm26_vm0 = vcmask 982016   ;;  %s66_s0 = inlined_call_operand.vmem [shape: f32[8,120], index: 0, kind: input, shape index: {}]   ;;  %s67_s1 = inlined_call_operand.vmem [shape: f32[1,120], index: 1, kind: input, shape index: {}]   ;;  %s68_s2 = inlined_call_operand.vmem [shape: f32[1,120], index: 2, kind: input, shape index: {}]   ;;  %s69_s3 = inlined_call_operand.vmem [shape: f32[8,120], index: 3, kind: output, shape index: {}]  }
   0x1   :  { %v14_v0 = vld [vmem:[%s66_s0] sm:$0xff] }
   0x2   :  { %v32_v1 = vld [vmem:[%s67_s1] ss:$0 sm:$0xff] }
   0x3   :  { %v33_v2 = vld [vmem:[%s68_s2] ss:$0 sm:$0xff]  ;;  %v19_v3 = vmul.f32 %v32_v1, %v14_v0 }
   0x5   :  { %v24_v4 = vadd.f32 %v33_v2, %v19_v3 }
   0x7   :  { %v25_v5 = vmax.f32 %v24_v4, 0.0 }
   0x9   :  { %27 = vst.msk [vmem:[%s69_s3] sm:$0xff] %vm26_vm0, %v25_v5 }

// kernel: vqgan3d_forward.170
= control target key start
LH: loop header
LB: loop body
LE: loop exit
PB: predicated region body
PF: predicated region fallthrough
CT: control target
= control target key end

     0   :  { %s410_s1 = inlined_call_operand.vmem [shape: bf16[128,256], index: 1, kind: input, shape index: {}]   ;;  %s411_s0 = inlined_call_operand.vmem [shape: bf16[16,128], index: 0, kind: input, shape index: {}]   ;;  %s412_s2 = inlined_call_operand.vmem [shape: f32[1,256], index: 2, kind: input, shape index: {}]   ;;  %s413_s3 = inlined_call_operand.vmem [shape: f32[16,256], index: 3, kind: output, shape index: {}]  }
   0x1   :  { %v253_v0 = vld [vmem:[%s410_s1 + $0x70] sm:$0xf]  ;;  %v275_v1 = vld [vmem:[%s410_s1 + $0x74] sm:$0xf0]  ;;  %v274_v2 = vld [vmem:[%s410_s1 + $0x74] sm:$0xf] }
   0x2   :  { %v254_v3 = vor.u32 %v275_v1, %v253_v0  ;;  %v255_v4 = vld [vmem:[%s410_s1 + $0x78] sm:$0xf0]  ;;  %v245_v5 = vld [vmem:[%s410_s1 + $0x60] sm:$0xf]  ;;  %v273_v6 = vld [vmem:[%s410_s1 + $0x64] sm:$0xf0] }
   0x3   :  { %v258_v7 = vor.u32 %v274_v2, %v255_v4  ;;  %v272_v8 = vld [vmem:[%s410_s1 + $0x64] sm:$0xf]  ;;  %v247_v9 = vld [vmem:[%s410_s1 + $0x68] sm:$0xf0]  ;;  %v246_v10 = vor.u32 %v273_v6, %v245_v5  ;;  %v237_v12 = vld [vmem:[%s410_s1 + $0x50] sm:$0xf] }
   0x4   :  { %130 = vmatpush.bf16.msra.mxu0 %v254_v3  ;;  %v250_v11 = vor.u32 %v272_v8, %v247_v9  ;;  %v271_v13 = vld [vmem:[%s410_s1 + $0x54] sm:$0xf0]  ;;  %v270_v14 = vld [vmem:[%s410_s1 + $0x54] sm:$0xf]  ;;  %v239_v15 = vld [vmem:[%s410_s1 + $0x58] sm:$0xf0] }
   0x5   :  { %144 = vmatpush.bf16.msra.mxu1 %v258_v7  ;;  %v238_v16 = vor.u32 %v271_v13, %v237_v12  ;;  %v242_v17 = vor.u32 %v270_v14, %v239_v15  ;;  %v229_v18 = vld [vmem:[%s410_s1 + $0x40] sm:$0xf]  ;;  %v269_v19 = vld [vmem:[%s410_s1 + $0x44] sm:$0xf0]  ;;  %v268_v20 = vld [vmem:[%s410_s1 + $0x44] sm:$0xf] }
   0x6   :  { %v231_v21 = vld [vmem:[%s410_s1 + $0x48] sm:$0xf0]  ;;  %v230_v22 = vor.u32 %v269_v19, %v229_v18  ;;  %v221_v24 = vld [vmem:[%s410_s1 + $0x30] sm:$0xf]  ;;  %v267_v25 = vld [vmem:[%s410_s1 + $0x34] sm:$0xf0] }
   0x7   :  { %v234_v23 = vor.u32 %v268_v20, %v231_v21  ;;  %v266_v26 = vld [vmem:[%s410_s1 + $0x34] sm:$0xf]  ;;  %v223_v27 = vld [vmem:[%s410_s1 + $0x38] sm:$0xf0]  ;;  %v222_v28 = vor.u32 %v267_v25, %v221_v24  ;;  %v213_v30 = vld [vmem:[%s410_s1 + $0x20] sm:$0xf] }
   0x8   :  { %131 = vmatpush.bf16.msra.mxu0 %v246_v10  ;;  %v226_v29 = vor.u32 %v266_v26, %v223_v27  ;;  %v265_v31 = vld [vmem:[%s410_s1 + $0x24] sm:$0xf0]  ;;  %v264_v32 = vld [vmem:[%s410_s1 + $0x24] sm:$0xf]  ;;  %v215_v33 = vld [vmem:[%s410_s1 + $0x28] sm:$0xf0] }
   0x9   :  { %145 = vmatpush.bf16.msra.mxu1 %v250_v11  ;;  %v214_v34 = vor.u32 %v265_v31, %v213_v30  ;;  %v218_v35 = vor.u32 %v264_v32, %v215_v33  ;;  %v205_v36 = vld [vmem:[%s410_s1 + $0x10] sm:$0xf]  ;;  %v263_v37 = vld [vmem:[%s410_s1 + $0x14] sm:$0xf0]  ;;  %v262_v38 = vld [vmem:[%s410_s1 + $0x14] sm:$0xf] }
   0xa   :  { %v207_v39 = vld [vmem:[%s410_s1 + $0x18] sm:$0xf0]  ;;  %v206_v40 = vor.u32 %v263_v37, %v205_v36  ;;  %v197_v42 = vld [vmem:[%s410_s1] sm:$0xf]  ;;  %v261_v43 = vld [vmem:[%s410_s1 + $0x4] sm:$0xf0] }
   0xb   :  { %v210_v41 = vor.u32 %v262_v38, %v207_v39  ;;  %v260_v44 = vld [vmem:[%s410_s1 + $0x4] sm:$0xf]  ;;  %v199_v45 = vld [vmem:[%s410_s1 + $0x8] sm:$0xf0]  ;;  %v198_v46 = vor.u32 %v261_v43, %v197_v42  ;;  %v173_v49 = vld [vmem:[%s412_s2] sm:$0x3] }
   0xc   :  { %132 = vmatpush.bf16.msra.mxu0 %v238_v16  ;;  %v202_v47 = vor.u32 %v260_v44, %v199_v45  ;;  %v259_v48 = vld [vmem:[%s411_s0] sm:$0xff]  ;;  %v175_v50 = vperm.slane %v173_v49, 0  ;;  %v176_v51 = vperm.slane %v173_v49, 1 }
   0xd   :  { %146 = vmatpush.bf16.msra.mxu1 %v242_v17 }
  0x10   :  { %133 = vmatpush.bf16.msra.mxu0 %v230_v22 }
  0x11   :  { %147 = vmatpush.bf16.msra.mxu1 %v234_v23 }
  0x14   :  { %134 = vmatpush.bf16.msra.mxu0 %v222_v28 }
  0x15   :  { %148 = vmatpush.bf16.msra.mxu1 %v226_v29 }
  0x18   :  { %135 = vmatpush.bf16.msra.mxu0 %v214_v34 }
  0x19   :  { %149 = vmatpush.bf16.msra.mxu1 %v218_v35 }
  0x1c   :  { %136 = vmatpush.bf16.msra.mxu0 %v206_v40 }
  0x1d   :  { %150 = vmatpush.bf16.msra.mxu1 %v210_v41 }
  0x20   :  { %137 = vmatpush.bf16.msra.mxu0 %v198_v46 }
  0x21   :  { %151 = vmatpush.bf16.msra.mxu1 %v202_v47 }
  0x23   :  { %138 = vmatmul.bf16.vlgmr.msra.gmra.mxu0 %v259_v48 }
  0x24   :  { %152 = vmatmul.bf16.vlgmr.msra.gmra.mxu1 %v259_v48 }
  0xa0   :  { %v139_v52 = vpop.f32.mrf.mxu0 }
  0xa1   :  { %v179_v53 = vadd.f32 %v175_v50, %v139_v52  ;;  %v153_v54 = vpop.f32.mrf.mxu1 }
  0xa2   :  { %v180_v55 = vadd.f32 %v176_v51, %v153_v54 }
  0xa3   :  { %183 = vst [vmem:[%s413_s3] sm:$0xff] %v179_v53 }
  0xa4   :  { %184 = vst [vmem:[%s413_s3 + $0x8] sm:$0xff] %v180_v55 }
  0xa8   :  { %v141_v56 = vpop.f32.mrf.mxu0 }
  0xa9   :  { %v181_v57 = vadd.f32 %v175_v50, %v141_v56  ;;  %v155_v58 = vpop.f32.mrf.mxu1 }
  0xaa   :  { %v182_v59 = vadd.f32 %v176_v51, %v155_v58 }
  0xab   :  { %185 = vst [vmem:[%s413_s3 + $0x10] sm:$0xff] %v181_v57 }
  0xac   :  { %186 = vst [vmem:[%s413_s3 + $0x18] sm:$0xff] %v182_v59 }

// kernel: vqgan3d_forward.173
= control target key start
LH: loop header
LB: loop body
LE: loop exit
PB: predicated region body
PF: predicated region fallthrough
CT: control target
= control target key end

     0   :  { %s1145_s12 = smov 0   ;;  %s1147_s13 = smov 0   ;;  %s1371_s0 = inlined_call_operand.vmem [shape: bf16[16,256], index: 0, kind: input, shape index: {}]   ;;  %s1372_s1 = inlined_call_operand.vmem [shape: bf16[256,768], index: 1, kind: input, shape index: {}]   ;;  %s1373_s2 = inlined_call_operand.vmem [shape: f32[1,768], index: 2, kind: input, shape index: {}]   ;;  %s1374_s3 = inlined_call_operand.vmem [shape: f32[16,768], index: 3, kind: output, shape index: {}]  }
   0x1   :  { %s1149_s14 = smov 0   ;;  %s1151_s15 = smov 0  }
   0x2   :  { %s1153_s16 = smov 0  }
   0x3 LB: > { %s28_s17 = sadd.s32 1, %s1119_s15  ;;  %s856_s18 = sadd.s32 4294967295, %s1123_s16   ;;  %s1123_s16 = sphi %s1153_s16, %s13_s16   ;;  %s1119_s15 = sphi %s1151_s15, %s1379_s15   ;;  %s1115_s14 = sphi %s1149_s14, %s1378_s14   ;;  %s1111_s13 = sphi %s1147_s13, %s1377_s13   ;;  %s1107_s12 = sphi %s1145_s12, %s1376_s12  }
   0x4   : > { %p30_p0 = scmp.ge.s32.totalorder %s28_s17, 3  ;;  %p76_p1 = scmp.ne.s32.totalorder %s1111_s13, %s1107_s12 }
   0x5   : > { %p77_p2 = scmp.eq.s32.totalorder %s1123_s16, 0  ;;  %p134_p4 = scmp.eq.s32.totalorder %s856_s18, 2 }
   0x6   : > { %s1381_s17 = smov (%p30_p0, %s28_s17), 0  ;;  %s69_s20 = sadd.s32 1, %s1111_s13 }
   0x7   : > { %p78_p3 = por %p77_p2, %p76_p1  ;;  %s65_s19 = ssub.s32 %s1119_s15, %s1381_s17 }
   0x8   : > { %p67_p5 = scmp.eq.s32.totalorder %s65_s19, 0  ;;  %p1180_p6 = por %p134_p4, %p76_p1 }
   0x9   : > { %p860_p7 = scmp.ge.s32.totalorder %s1123_s16, 3 }
   0xa   : > { %s1185_s22 = scalar_select %p67_p5, %s1111_s13, %s69_s20  }
   0xb   : > { %171 = sbr.rel (%p860_p7) target bundleno = 52 (0x34), region = 20 }
  0x10   : > { %174 = sbr.rel (!%p78_p3) target bundleno = 52 (0x34), region = 24  ;;  %s176_s23 = sand.u32 (%p78_p3), 1, %s1111_s13  }
  0x11   : > { %s1009_s24 = sshll.u32 (%p78_p3), %s1119_s15, 3  ;;  %s861_s25 = sshll.u32 (%p78_p3), %s176_s23, 8 }
  0x12   : > { %s1193_s28 = scalar_lea.vmem (%p78_p3), %s1372_s1, %s1009_s24  ;;  %s1198_s29 = scalar_lea.vmem (%p78_p3), [#allocation3], %s861_s25 }
  0x13   : > { %v275_v0 = vld [vmem:[%s1193_s28] sm:$0xff] (%p78_p3)  ;;  %v277_v1 = vld [vmem:[%s1193_s28 + $0x18] sm:$0xff] (%p78_p3)  ;;  %v279_v2 = vld [vmem:[%s1193_s28 + $0x30] sm:$0xff] (%p78_p3) }
  0x14   : > { %276 = vst [vmem:[%s1198_s29] sm:$0xff] (%p78_p3), %v275_v0  ;;  %v281_v3 = vld [vmem:[%s1193_s28 + $0x48] sm:$0xff] (%p78_p3)  ;;  %v283_v4 = vld [vmem:[%s1193_s28 + $0x60] sm:$0xff] (%p78_p3)  ;;  %v285_v5 = vld [vmem:[%s1193_s28 + $0x78] sm:$0xff] (%p78_p3) }
  0x15   : > { %278 = vst [vmem:[%s1198_s29 + $0x8] sm:$0xff] %v277_v1  ;;  %v287_v6 = vld [vmem:[%s1193_s28 + $0x90] sm:$0xff]  ;;  %v289_v7 = vld [vmem:[%s1193_s28 + $0xa8] sm:$0xff]  ;;  %v291_v8 = vld [vmem:[%s1193_s28 + $0xc0] sm:$0xff] }
  0x16   : > { %280 = vst [vmem:[%s1198_s29 + $0x10] sm:$0xff] %v279_v2  ;;  %v293_v9 = vld [vmem:[%s1193_s28 + $0xd8] sm:$0xff]  ;;  %v295_v10 = vld [vmem:[%s1193_s28 + $0xf0] sm:$0xff]  ;;  %v297_v11 = vld [vmem:[%s1193_s28 + $0x108] sm:$0xff] }
  0x17   : > { %282 = vst [vmem:[%s1198_s29 + $0x18] sm:$0xff] %v281_v3  ;;  %v299_v12 = vld [vmem:[%s1193_s28 + $0x120] sm:$0xff]  ;;  %v301_v13 = vld [vmem:[%s1193_s28 + $0x138] sm:$0xff]  ;;  %v303_v14 = vld [vmem:[%s1193_s28 + $0x150] sm:$0xff] }
  0x18   : > { %284 = vst [vmem:[%s1198_s29 + $0x20] sm:$0xff] %v283_v4  ;;  %v305_v15 = vld [vmem:[%s1193_s28 + $0x168] sm:$0xff]  ;;  %v307_v16 = vld [vmem:[%s1193_s28 + $0x180] sm:$0xff]  ;;  %v309_v17 = vld [vmem:[%s1193_s28 + $0x198] sm:$0xff] }
  0x19   : > { %286 = vst [vmem:[%s1198_s29 + $0x28] sm:$0xff] %v285_v5  ;;  %v311_v18 = vld [vmem:[%s1193_s28 + $0x1b0] sm:$0xff]  ;;  %v313_v19 = vld [vmem:[%s1193_s28 + $0x1c8] sm:$0xff]  ;;  %v315_v20 = vld [vmem:[%s1193_s28 + $0x1e0] sm:$0xff] }
  0x1a   : > { %288 = vst [vmem:[%s1198_s29 + $0x30] sm:$0xff] %v287_v6  ;;  %v317_v21 = vld [vmem:[%s1193_s28 + $0x1f8] sm:$0xff]  ;;  %v319_v22 = vld [vmem:[%s1193_s28 + $0x210] sm:$0xff]  ;;  %v321_v23 = vld [vmem:[%s1193_s28 + $0x228] sm:$0xff] }
  0x1b   : > { %290 = vst [vmem:[%s1198_s29 + $0x38] sm:$0xff] %v289_v7  ;;  %v323_v24 = vld [vmem:[%s1193_s28 + $0x240] sm:$0xff]  ;;  %v325_v25 = vld [vmem:[%s1193_s28 + $0x258] sm:$0xff]  ;;  %v327_v26 = vld [vmem:[%s1193_s28 + $0x270] sm:$0xff] }
  0x1c   : > { %292 = vst [vmem:[%s1198_s29 + $0x40] sm:$0xff] %v291_v8  ;;  %v329_v27 = vld [vmem:[%s1193_s28 + $0x288] sm:$0xff]  ;;  %v331_v28 = vld [vmem:[%s1193_s28 + $0x2a0] sm:$0xff]  ;;  %v333_v29 = vld [vmem:[%s1193_s28 + $0x2b8] sm:$0xff] }
  0x1d   : > { %294 = vst [vmem:[%s1198_s29 + $0x48] sm:$0xff] %v293_v9  ;;  %v335_v30 = vld [vmem:[%s1193_s28 + $0x2d0] sm:$0xff]  ;;  %v337_v31 = vld [vmem:[%s1193_s28 + $0x2e8] sm:$0xff] }
  0x1e   : > { %296 = vst [vmem:[%s1198_s29 + $0x50] sm:$0xff] %v295_v10 }
  0x1f   : > { %298 = vst [vmem:[%s1198_s29 + $0x58] sm:$0xff] %v297_v11 }
  0x20   : > { %300 = vst [vmem:[%s1198_s29 + $0x60] sm:$0xff] %v299_v12 }
  0x21   : > { %302 = vst [vmem:[%s1198_s29 + $0x68] sm:$0xff] %v301_v13 }
  0x22   : > { %304 = vst [vmem:[%s1198_s29 + $0x70] sm:$0xff] %v303_v14 }
  0x23   : > { %306 = vst [vmem:[%s1198_s29 + $0x78] sm:$0xff] %v305_v15 }
  0x24   : > { %308 = vst [vmem:[%s1198_s29 + $0x80] sm:$0xff] %v307_v16 }
  0x25   : > { %310 = vst [vmem:[%s1198_s29 + $0x88] sm:$0xff] %v309_v17 }
  0x26   : > { %312 = vst [vmem:[%s1198_s29 + $0x90] sm:$0xff] %v311_v18 }
  0x27   : > { %314 = vst [vmem:[%s1198_s29 + $0x98] sm:$0xff] %v313_v19 }
  0x28   : > { %316 = vst [vmem:[%s1198_s29 + $0xa0] sm:$0xff] %v315_v20 }
  0x29   : > { %318 = vst [vmem:[%s1198_s29 + $0xa8] sm:$0xff] %v317_v21 }
  0x2a   : > { %320 = vst [vmem:[%s1198_s29 + $0xb0] sm:$0xff] %v319_v22 }
  0x2b   : > { %322 = vst [vmem:[%s1198_s29 + $0xb8] sm:$0xff] %v321_v23 }
  0x2c   : > { %324 = vst [vmem:[%s1198_s29 + $0xc0] sm:$0xff] %v323_v24 }
  0x2d   : > { %326 = vst [vmem:[%s1198_s29 + $0xc8] sm:$0xff] %v325_v25 }
  0x2e   : > { %328 = vst [vmem:[%s1198_s29 + $0xd0] sm:$0xff] %v327_v26 }
  0x2f   : > { %330 = vst [vmem:[%s1198_s29 + $0xd8] sm:$0xff] %v329_v27 }
  0x30   : > { %332 = vst [vmem:[%s1198_s29 + $0xe0] sm:$0xff] %v331_v28 }
  0x31   : > { %334 = vst [vmem:[%s1198_s29 + $0xe8] sm:$0xff] %v333_v29 }
  0x32   : > { %336 = vst [vmem:[%s1198_s29 + $0xf0] sm:$0xff] %v335_v30 }
  0x33   : > { %338 = vst [vmem:[%s1198_s29 + $0xf8] sm:$0xff] %v337_v31 }
  0x34 PF: > { %p864_p8 = scmp.ge.s32.totalorder %s1123_s16, 1  ;;  %p351_p9 = scmp.lt.s32.totalorder %s1123_s16, 4 }
  0x36   : > { %p352_p10 = pnand %p864_p8, %p351_p9 }
  0x37   : > { %s358_s30 = sand.u32 (!%p352_p10), 1, %s1107_s12   ;;  %s867_s20 = sshll.u32 (!%p352_p10), %s1115_s14, 1 }
  0x38   : > { %355 = sbr.rel (%p352_p10) target bundleno = 250 (0xfa), region = 66  ;;  %s865_s4 = sshll.u32 (!%p352_p10), %s358_s30, 8 }
  0x39   : > { %s1266_s5 = scalar_lea.vmem (!%p352_p10), [#allocation3], %s865_s4  ;;  %p409_p11 = scmp.lt.s32.totalorder (!%p352_p10), %s867_s20, 5 }
  0x3a   : > { %s866_s26 = sshll.u32 (!%p352_p10), %s358_s30, 5 }
  0x3b   : > { %s393_s27 = scalar_lea.vmem (!%p352_p10), [#allocation4], %s866_s26 }
  0x3d   : > { %v934_v32 = vld [vmem:[%s1266_s5 + $0x70] sm:$0xf]  ;;  %v1027_v33 = vld [vmem:[%s1266_s5 + $0x74] sm:$0xf0]  ;;  %v1026_v37 = vld [vmem:[%s1266_s5 + $0x74] sm:$0xf] }
  0x3e   : > { %v998_v34 = vld [vmem:[%s1266_s5 + $0xf0] sm:$0xf]  ;;  %v935_v35 = vor.u32 %v1027_v33, %v934_v32  ;;  %v1043_v36 = vld [vmem:[%s1266_s5 + $0xf4] sm:$0xf0]  ;;  %v936_v38 = vld [vmem:[%s1266_s5 + $0x78] sm:$0xf0] }
  0x3f   : > { %v999_v39 = vor.u32 %v1043_v36, %v998_v34  ;;  %v939_v40 = vor.u32 %v1026_v37, %v936_v38  ;;  %v1042_v41 = vld [vmem:[%s1266_s5 + $0xf4] sm:$0xf]  ;;  %v1000_v42 = vld [vmem:[%s1266_s5 + $0xf8] sm:$0xf0]  ;;  %v926_v43 = vld [vmem:[%s1266_s5 + $0x60] sm:$0xf] }
  0x40   : > { %631 = vmatpush.bf16.msra.mxu0 %v935_v35  ;;  %v1003_v44 = vor.u32 %v1042_v41, %v1000_v42  ;;  %v1025_v45 = vld [vmem:[%s1266_s5 + $0x64] sm:$0xf0]  ;;  %v990_v46 = vld [vmem:[%s1266_s5 + $0xe0] sm:$0xf]  ;;  %v1024_v50 = vld [vmem:[%s1266_s5 + $0x64] sm:$0xf] }
  0x41   : > { %v1041_v47 = vld [vmem:[%s1266_s5 + $0xe4] sm:$0xf0]  ;;  %645 = vmatpush.bf16.msra.mxu1 %v999_v39  ;;  %659 = vmatpush.bf16.msra.mxu2 %v939_v40  ;;  %v927_v48 = vor.u32 %v1025_v45, %v926_v43  ;;  %v928_v51 = vld [vmem:[%s1266_s5 + $0x68] sm:$0xf0]  ;;  %v1040_v52 = vld [vmem:[%s1266_s5 + $0xe4] sm:$0xf] }
  0x42   : > { %v991_v49 = vor.u32 %v1041_v47, %v990_v46  ;;  %673 = vmatpush.bf16.msra.mxu3 %v1003_v44  ;;  %v931_v53 = vor.u32 %v1024_v50, %v928_v51  ;;  %v992_v54 = vld [vmem:[%s1266_s5 + $0xe8] sm:$0xf0]  ;;  %v918_v55 = vld [vmem:[%s1266_s5 + $0x50] sm:$0xf]  ;;  %v1023_v56 = vld [vmem:[%s1266_s5 + $0x54] sm:$0xf0] }
  0x43   : > { %v995_v57 = vor.u32 %v1040_v52, %v992_v54  ;;  %v982_v58 = vld [vmem:[%s1266_s5 + $0xd0] sm:$0xf]  ;;  %v1039_v59 = vld [vmem:[%s1266_s5 + $0xd4] sm:$0xf0]  ;;  %v1022_v60 = vld [vmem:[%s1266_s5 + $0x54] sm:$0xf]  ;;  %v919_v61 = vor.u32 %v1023_v56, %v918_v55 }
  0x44   : > { %632 = vmatpush.bf16.msra.mxu0 %v927_v48  ;;  %v920_v62 = vld [vmem:[%s1266_s5 + $0x58] sm:$0xf0]  ;;  %v1038_v63 = vld [vmem:[%s1266_s5 + $0xd4] sm:$0xf]  ;;  %v983_v1 = vor.u32 %v1039_v59, %v982_v58  ;;  %v910_v3 = vld [vmem:[%s1266_s5 + $0x40] sm:$0xf] }
  0x45   : > { %v984_v0 = vld [vmem:[%s1266_s5 + $0xd8] sm:$0xf0]  ;;  %646 = vmatpush.bf16.msra.mxu1 %v991_v49  ;;  %660 = vmatpush.bf16.msra.mxu2 %v931_v53  ;;  %v923_v2 = vor.u32 %v1022_v60, %v920_v62  ;;  %v1021_v4 = vld [vmem:[%s1266_s5 + $0x44] sm:$0xf0]  ;;  %v974_v5 = vld [vmem:[%s1266_s5 + $0xc0] sm:$0xf] }
  0x46   : > { %674 = vmatpush.bf16.msra.mxu3 %v995_v57  ;;  %v987_v6 = vor.u32 %v1038_v63, %v984_v0  ;;  %v1037_v7 = vld [vmem:[%s1266_s5 + $0xc4] sm:$0xf0]  ;;  %v1020_v8 = vld [vmem:[%s1266_s5 + $0x44] sm:$0xf]  ;;  %v912_v9 = vld [vmem:[%s1266_s5 + $0x48] sm:$0xf0]  ;;  %v911_v12 = vor.u32 %v1021_v4, %v910_v3 }
  0x47   : > { %v1036_v10 = vld [vmem:[%s1266_s5 + $0xc4] sm:$0xf]  ;;  %v976_v11 = vld [vmem:[%s1266_s5 + $0xc8] sm:$0xf0]  ;;  %v975_v13 = vor.u32 %v1037_v7, %v974_v5  ;;  %v915_v14 = vor.u32 %v1020_v8, %v912_v9  ;;  %v902_v15 = vld [vmem:[%s1266_s5 + $0x30] sm:$0xf] }
  0x48   : > { %633 = vmatpush.bf16.msra.mxu0 %v919_v61  ;;  %v1019_v16 = vld [vmem:[%s1266_s5 + $0x34] sm:$0xf0]  ;;  %v966_v17 = vld [vmem:[%s1266_s5 + $0xb0] sm:$0xf]  ;;  %v979_v18 = vor.u32 %v1036_v10, %v976_v11  ;;  %v1018_v20 = vld [vmem:[%s1266_s5 + $0x34] sm:$0xf] }
  0x49   : > { %647 = vmatpush.bf16.msra.mxu1 %v983_v1  ;;  %661 = vmatpush.bf16.msra.mxu2 %v923_v2  ;;  %v1035_v19 = vld [vmem:[%s1266_s5 + $0xb4] sm:$0xf0]  ;;  %v904_v21 = vld [vmem:[%s1266_s5 + $0x38] sm:$0xf0]  ;;  %v1034_v22 = vld [vmem:[%s1266_s5 + $0xb4] sm:$0xf]  ;;  %v903_v24 = vor.u32 %v1019_v16, %v902_v15 }
  0x4a   : > { %675 = vmatpush.bf16.msra.mxu3 %v987_v6  ;;  %v968_v23 = vld [vmem:[%s1266_s5 + $0xb8] sm:$0xf0]  ;;  %v967_v25 = vor.u32 %v1035_v19, %v966_v17  ;;  %v907_v26 = vor.u32 %v1018_v20, %v904_v21  ;;  %v894_v27 = vld [vmem:[%s1266_s5 + $0x20] sm:$0xf]  ;;  %v1017_v28 = vld [vmem:[%s1266_s5 + $0x24] sm:$0xf0] }
  0x4b   : > { %v958_v29 = vld [vmem:[%s1266_s5 + $0xa0] sm:$0xf]  ;;  %v971_v30 = vor.u32 %v1034_v22, %v968_v23  ;;  %v1033_v31 = vld [vmem:[%s1266_s5 + $0xa4] sm:$0xf0]  ;;  %v1016_v32 = vld [vmem:[%s1266_s5 + $0x24] sm:$0xf]  ;;  %v895_v36 = vor.u32 %v1017_v28, %v894_v27 }
  0x4c   : > { %634 = vmatpush.bf16.msra.mxu0 %v911_v12  ;;  %v896_v33 = vld [vmem:[%s1266_s5 + $0x28] sm:$0xf0]  ;;  %v1032_v34 = vld [vmem:[%s1266_s5 + $0xa4] sm:$0xf]  ;;  %v959_v37 = vor.u32 %v1033_v31, %v958_v29  ;;  %v886_v39 = vld [vmem:[%s1266_s5 + $0x10] sm:$0xf] }
  0x4d   : > { %648 = vmatpush.bf16.msra.mxu1 %v975_v13  ;;  %662 = vmatpush.bf16.msra.mxu2 %v915_v14  ;;  %v960_v35 = vld [vmem:[%s1266_s5 + $0xa8] sm:$0xf0]  ;;  %v899_v38 = vor.u32 %v1016_v32, %v896_v33  ;;  %v1015_v40 = vld [vmem:[%s1266_s5 + $0x14] sm:$0xf0]  ;;  %v950_v41 = vld [vmem:[%s1266_s5 + $0x90] sm:$0xf] }
  0x4e   : > { %676 = vmatpush.bf16.msra.mxu3 %v979_v18  ;;  %v963_v42 = vor.u32 %v1032_v34, %v960_v35  ;;  %v1031_v43 = vld [vmem:[%s1266_s5 + $0x94] sm:$0xf0]  ;;  %v1014_v44 = vld [vmem:[%s1266_s5 + $0x14] sm:$0xf]  ;;  %v888_v45 = vld [vmem:[%s1266_s5 + $0x18] sm:$0xf0]  ;;  %v887_v48 = vor.u32 %v1015_v40, %v886_v39 }
  0x4f   : > { %v1030_v46 = vld [vmem:[%s1266_s5 + $0x94] sm:$0xf]  ;;  %v952_v47 = vld [vmem:[%s1266_s5 + $0x98] sm:$0xf0]  ;;  %v951_v49 = vor.u32 %v1031_v43, %v950_v41  ;;  %v891_v50 = vor.u32 %v1014_v44, %v888_v45  ;;  %v878_v51 = vld [vmem:[%s1266_s5] sm:$0xf] }
  0x50   : > { %635 = vmatpush.bf16.msra.mxu0 %v903_v24  ;;  %v1013_v52 = vld [vmem:[%s1266_s5 + $0x4] sm:$0xf0]  ;;  %v942_v53 = vld [vmem:[%s1266_s5 + $0x80] sm:$0xf]  ;;  %v955_v54 = vor.u32 %v1030_v46, %v952_v47  ;;  %v1012_v56 = vld [vmem:[%s1266_s5 + $0x4] sm:$0xf] }
  0x51   : > { %649 = vmatpush.bf16.msra.mxu1 %v967_v25  ;;  %663 = vmatpush.bf16.msra.mxu2 %v907_v26  ;;  %v1029_v55 = vld [vmem:[%s1266_s5 + $0x84] sm:$0xf0]  ;;  %v880_v57 = vld [vmem:[%s1266_s5 + $0x8] sm:$0xf0]  ;;  %v1028_v58 = vld [vmem:[%s1266_s5 + $0x84] sm:$0xf]  ;;  %v879_v60 = vor.u32 %v1013_v52, %v878_v51 }
  0x52   : > { %677 = vmatpush.bf16.msra.mxu3 %v971_v30  ;;  %v944_v59 = vld [vmem:[%s1266_s5 + $0x88] sm:$0xf0]  ;;  %v870_v61 = vld [vmem:[%s1371_s0] sm:$0xf]  ;;  %v1011_v62 = vld [vmem:[%s1371_s0 + $0x4] sm:$0xf0]  ;;  %v943_v63 = vor.u32 %v1029_v55, %v942_v53  ;;  %v883_v0 = vor.u32 %v1012_v56, %v880_v57 }
  0x53   : > { %v1010_v1 = vld [vmem:[%s1371_s0 + $0x4] sm:$0xf]  ;;  %v872_v2 = vld [vmem:[%s1371_s0 + $0x8] sm:$0xf0]  ;;  %v947_v3 = vor.u32 %v1028_v58, %v944_v59  ;;  %v871_v4 = vor.u32 %v1011_v62, %v870_v61  ;;  %s1383_s20 = smov (!%p409_p11, %s867_s20), 5  ;;  %s1044_s12 = sshll.u32 (%p1180_p6), %s1115_s14, 4 }
  0x54   : > { %636 = vmatpush.bf16.msra.mxu0 %v895_v36  ;;  %v875_v5 = vor.u32 %v1010_v1, %v872_v2  ;;  %s411_s25 = scalar_lea.vmem %s1373_s2, %s1383_s20  ;;  %s728_s30 = scalar_lea.vmem (%p1180_p6), %s1374_s3, %s1044_s12 }
  0x55   : > { %650 = vmatpush.bf16.msra.mxu1 %v959_v37  ;;  %664 = vmatpush.bf16.msra.mxu2 %v899_v38  ;;  %v702_v6 = vld [vmem:[%s411_s25] sm:$0x3] }
  0x56   : > { %678 = vmatpush.bf16.msra.mxu3 %v963_v42  ;;  %v704_v8 = vperm.slane %v702_v6, 0  ;;  %v705_v13 = vperm.slane %v702_v6, 1 }
  0x58   : > { %637 = vmatpush.bf16.msra.mxu0 %v887_v48 }
  0x59   : > { %651 = vmatpush.bf16.msra.mxu1 %v951_v49  ;;  %665 = vmatpush.bf16.msra.mxu2 %v891_v50 }
  0x5a   : > { %679 = vmatpush.bf16.msra.mxu3 %v955_v54 }
  0x5c   : > { %638 = vmatpush.bf16.msra.mxu0 %v879_v60 }
  0x5d   : > { %652 = vmatpush.bf16.msra.mxu1 %v943_v63  ;;  %666 = vmatpush.bf16.msra.mxu2 %v883_v0 }
  0x5e   : > { %680 = vmatpush.bf16.msra.mxu3 %v947_v3 }
  0x5f   : > { %639 = vmatmul.bf16.vlgmr.msra.gmra.mxu0 %v871_v4 }
  0x60   : > { %653 = vmatmul.bf16.vlgmr.msra.gmra.mxu1 %v875_v5  ;;  %667 = vmatmul.bf16.vlgmr.msra.gmra.mxu2 %v871_v4 }
  0x61   : > { %681 = vmatmul.bf16.vlgmr.msra.gmra.mxu3 %v875_v5 }
  0xdc   : > { %v640_v7 = vpop.f32.mrf.mxu0 }
  0xdd   : > { %v654_v9 = vpop.f32.mrf.mxu1 }
  0xde   : > { %v655_v10 = vadd.f32 %v654_v9, %v640_v7 }
  0xe0   : > { %v708_v11 = vadd.f32 %v704_v8, %v655_v10 }
  0xe2   : > { %712 = vst [vmem:[%s393_s27] sm:$0xff] %v708_v11 }
  0xe3   : > { %v668_v12 = vpop.f32.mrf.mxu2 }
  0xe4   : > { %v682_v14 = vpop.f32.mrf.mxu3  ;;  %v642_v15 = vpop.f32.mrf.mxu0 }
  0xe5   : > { %v683_v16 = vadd.f32 %v682_v14, %v668_v12  ;;  %v656_v17 = vpop.f32.mrf.mxu1 }
  0xe6   : > { %v657_v18 = vadd.f32 %v656_v17, %v642_v15 }
  0xe7   : > { %v709_v19 = vadd.f32 %v705_v13, %v683_v16 }
  0xe8   : > { %v710_v20 = vadd.f32 %v704_v8, %v657_v18 }
  0xe9   : > { %713 = vst [vmem:[%s393_s27 + $0x8] sm:$0xff] %v709_v19  ;;  %v741_v25 = vld [vmem:[%s393_s27] sm:$0xff] (%p1180_p6) }
  0xea   : > { %714 = vst [vmem:[%s393_s27 + $0x10] sm:$0xff] %v710_v20 }
  0xeb   : > { %v670_v21 = vpop.f32.mrf.mxu2  ;;  %742 = vst [vmem:[%s728_s30] sm:$0xff] (%p1180_p6), %v741_v25 }
  0xec   : > { %v684_v22 = vpop.f32.mrf.mxu3 }
  0xed   : > { %v685_v23 = vadd.f32 %v684_v22, %v670_v21  ;;  %722 = sbr.rel (!%p1180_p6) target bundleno = 250 (0xfa), region = 82 }
  0xef   : > { %v711_v24 = vadd.f32 %v705_v13, %v685_v23 }
  0xf0   : > { %v743_v26 = vld [vmem:[%s393_s27 + $0x8] sm:$0xff] (%p1180_p6) }
  0xf1   : > { %715 = vst [vmem:[%s393_s27 + $0x18] sm:$0xff] %v711_v24  ;;  %v745_v27 = vld [vmem:[%s393_s27 + $0x10] sm:$0xff] (%p1180_p6) }
  0xf2   : > { %744 = vst [vmem:[%s728_s30 + $0x8] sm:$0xff] %v743_v26 }
  0xf3   : > { %746 = vst [vmem:[%s728_s30 + $0x30] sm:$0xff] %v745_v27 }
  0xf8   : > { %v747_v28 = vld [vmem:[%s393_s27 + $0x18] sm:$0xff] }
  0xf9   : > { %748 = vst [vmem:[%s728_s30 + $0x38] sm:$0xff] %v747_v28 }
  0xfa PF: > { %s13_s16 = sadd.s32 1, %s1123_s16   ;;  %s1376_s12 = smov %s1111_s13 }
  0xfb   : > { %p10_p12 = scmp.ge.s32.totalorder %s13_s16, 5   ;;  %s1377_s13 = smov %s1185_s22 }
  0xfc   : > { %s1378_s14 = smov %s1119_s15  ;;  %s1379_s15 = smov %s1381_s17 }
  0xfd   :  { %12 = sbr.rel (!%p10_p12) target bundleno = 3 (0x3), region = 142 }

// kernel: vqgan3d_forward.174
= control target key start
LH: loop header
LB: loop body
LE: loop exit
PB: predicated region body
PF: predicated region fallthrough
CT: control target
= control target key end

     0   :  { %vm206_vm0 = vcmask 9216   ;;  %vm403_vm1 = vcmask 1041408   ;;  %vm399_vm6 = vcmask 15360   ;;  %s901_s1 = inlined_call_operand.vmem [shape: f32[8,2,128], index: 1, kind: input, shape index: {}]   ;;  %s902_s0 = inlined_call_operand.vmem [shape: f32[8,2,128], index: 0, kind: input, shape index: {}]   ;;  %s903_s2 = inlined_call_operand.vmem [shape: f32[8,2,128], index: 2, kind: input, shape index: {}]   ;;  %s904_s3 = inlined_call_operand.vmem [shape: f32[8,2,128], index: 3, kind: output, shape index: {}]  }
   0x1   :  { %v22_v0 = vld [vmem:[%s901_s1] sm:$0x3]  ;;  %v24_v1 = vld [vmem:[%s901_s1 + $0x4] sm:$0x3]  ;;  %v28_v4 = vld [vmem:[%s901_s1 + $0xc] sm:$0x3] }
   0x2   :  { %v14_v2 = vld [vmem:[%s902_s0] sm:$0x3]  ;;  %53 = vmatpush.xpose.msra.mxu0 %v22_v0  ;;  %93 = vmatpush.xpose.msra.mxu2 %v24_v1  ;;  %v16_v3 = vld [vmem:[%s902_s0 + $0x4] sm:$0x3]  ;;  %v23_v5 = vld [vmem:[%s901_s1 + $0x2] sm:$0x3] }
   0x3   :  { %73 = vmatpush.xpose.msra.mxu1 %v23_v5  ;;  %v25_v6 = vld [vmem:[%s901_s1 + $0x6] sm:$0x3]  ;;  %v15_v7 = vld [vmem:[%s902_s0 + $0x2] sm:$0x3]  ;;  %v29_v9 = vld [vmem:[%s901_s1 + $0xe] sm:$0x3] }
   0x4   :  { %113 = vmatpush.xpose.msra.mxu3 %v25_v6  ;;  %v17_v8 = vld [vmem:[%s902_s0 + $0x6] sm:$0x3]  ;;  %v27_v10 = vld [vmem:[%s901_s1 + $0xa] sm:$0x3]  ;;  %v26_v11 = vld [vmem:[%s901_s1 + $0x8] sm:$0x3] }
   0x5   :  { %54 = vmatmul.f32.vlgmr.msra.gmra.mxu0 %v14_v2  ;;  %94 = vmatmul.f32.vlgmr.msra.gmra.mxu2 %v16_v3  ;;  %v20_v12 = vld [vmem:[%s902_s0 + $0xc] sm:$0x3]  ;;  %v18_v13 = vld [vmem:[%s902_s0 + $0x8] sm:$0x3]  ;;  %v19_v14 = vld [vmem:[%s902_s0 + $0xa] sm:$0x3] }
   0x6   :  { %173 = vmatpush.xpose.msrb.mxu2 %v28_v4  ;;  %74 = vmatmul.f32.vlgmr.msra.gmra.mxu1 %v15_v7  ;;  %v21_v15 = vld [vmem:[%s902_s0 + $0xe] sm:$0x3] }
   0x7   :  { %114 = vmatmul.f32.vlgmr.msra.gmra.mxu3 %v17_v8  ;;  %153 = vmatpush.xpose.msrb.mxu1 %v27_v10 }
   0x8   :  { %193 = vmatpush.xpose.msrb.mxu3 %v29_v9  ;;  %133 = vmatpush.xpose.msrb.mxu0 %v26_v11 }
   0xd   :  { %174 = vmatmul.f32.vlgmr.msrb.gmra.mxu2 %v20_v12  ;;  %134 = vmatmul.f32.vlgmr.msrb.gmra.mxu0 %v18_v13 }
   0xe   :  { %154 = vmatmul.f32.vlgmr.msrb.gmra.mxu1 %v19_v14 }
   0xf   :  { %194 = vmatmul.f32.vlgmr.msrb.gmra.mxu3 %v21_v15 }
  0x82   :  { %v55_v16 = vpop.f32.mrf.mxu0 }
  0x83   :  { %v198_v17 = vmul.f32 0.09128709, %v55_v16  ;;  %v75_v18 = vpop.f32.mrf.mxu1  ;;  %v30_v16 = vld [vmem:[%s903_s2] sm:$0x3] }
  0x84   :  { %v199_v20 = vmul.f32 0.09128709, %v75_v18  ;;  %621 = vmatpush.msk.msra.mxu0 %vm403_vm1, %v30_v16 }
  0x85   :  { %v207_v19 = vsel %vm206_vm0, %v198_v17, -inf }
  0x86   :  { %208 = vmax.xlane.f32.xlu1 %v207_v19  ;;  %v210_v25 = vsel %vm206_vm0, %v199_v20, -inf }
  0x88   :  { %v95_v21 = vpop.f32.mrf.mxu2 }
  0x89   :  { %v200_v22 = vmul.f32 0.09128709, %v95_v21  ;;  %v31_v21 = vld [vmem:[%s903_s2 + $0x2] sm:$0x3] }
  0x8a   :  { %v115_v23 = vpop.f32.mrf.mxu3  ;;  %v135_v32 = vpop.f32.mrf.mxu0  ;;  %623 = vmatpush.msk.msra.mxu1 %vm403_vm1, %v31_v21 }
  0x8b   :  { %v213_v24 = vsel %vm206_vm0, %v200_v22, -inf  ;;  %v155_v26 = vpop.f32.mrf.mxu1  ;;  %v201_v27 = vmul.f32 0.09128709, %v115_v23  ;;  %v202_v36 = vmul.f32 0.09128709, %v135_v32 }
  0x8c   :  { %214 = vmax.xlane.f32.xlu0 %v213_v24  ;;  %v203_v28 = vmul.f32 0.09128709, %v155_v26 }
  0x8d   :  { %v216_v31 = vsel %vm206_vm0, %v201_v27, -inf  ;;  %v219_v39 = vsel %vm206_vm0, %v202_v36, -inf }
  0x8e   :  { %211 = vmax.xlane.f32.xlu1 %v210_v25  ;;  %v222_v35 = vsel %vm206_vm0, %v203_v28, -inf }
  0x90   :  { %v175_v29 = vpop.f32.mrf.mxu2 }
  0x91   :  { %v204_v30 = vmul.f32 0.09128709, %v175_v29 }
  0x92   :  { %v195_v33 = vpop.f32.mrf.mxu3 }
  0x93   :  { %v225_v34 = vsel %vm206_vm0, %v204_v30, -inf  ;;  %v205_v37 = vmul.f32 0.09128709, %v195_v33  ;;  %v36_v33 = vld [vmem:[%s903_s2 + $0xc] sm:$0x3] }
  0x94   :  { %217 = vmax.xlane.f32.xlu0 %v216_v31  ;;  %226 = vmax.xlane.f32.xlu2 %v225_v34  ;;  %v37_v34 = vld [vmem:[%s903_s2 + $0xe] sm:$0x3] }
  0x95   :  { %v228_v38 = vsel %vm206_vm0, %v205_v37, -inf }
  0x96   :  { %223 = vmax.xlane.f32.xlu1 %v222_v35  ;;  %v34_v35 = vld [vmem:[%s903_s2 + $0x8] sm:$0x3] }
  0x97   :  { %629 = vmatpush.msk.msrb.mxu0 %vm403_vm1, %v34_v35 }
  0x9c   :  { %229 = vmax.xlane.f32.xlu2 %v228_v38  ;;  %220 = vmax.xlane.f32.xlu0 %v219_v39  ;;  %v35_v39 = vld [vmem:[%s903_s2 + $0xa] sm:$0x3] }
  0x9d   :  { %631 = vmatpush.msk.msrb.mxu1 %vm403_vm1, %v35_v39 }
  0xf9   :  { %v209_v40 = vpop.xlane.xlu1 %208 }
  0xfa   :  { %v231_v41 = vsub.f32 %v198_v17, %v209_v40  ;;  %v32_v17 = vld [vmem:[%s903_s2 + $0x4] sm:$0x3] }
  0xfb   :  { %625 = vmatpush.msk.msra.mxu2 %vm403_vm1, %v32_v17 }
  0xfc   :  { %v239_v42 = vmul.f32 1.442695, %v231_v41 }
  0xfd   :  { %633 = vmatpush.msk.msrb.mxu2 %vm403_vm1, %v36_v33 }
  0xfe   :  { %637 = vpow2.f32 %v239_v42 }
  0xff   :  { %v215_v43 = vpop.xlane.xlu0 %214 }
 0x100   :  { %v233_v44 = vsub.f32 %v200_v22, %v215_v43 }
 0x101   :  { %v212_v45 = vpop.xlane.xlu1 %211 }
 0x102   :  { %v243_v46 = vmul.f32 1.442695, %v233_v44  ;;  %v232_v47 = vsub.f32 %v199_v20, %v212_v45  ;;  %v33_v20 = vld [vmem:[%s903_s2 + $0x6] sm:$0x3] }
 0x103   :  { %627 = vmatpush.msk.msra.mxu3 %vm403_vm1, %v33_v20 }
 0x104   :  { %v745_v48 = vpop.eup %637  ;;  %639 = vpow2.f32 %v243_v46  ;;  %v241_v50 = vmul.f32 1.442695, %v232_v47 }
 0x105   :  { %v255_v49 = vsel %vm206_vm0, %v745_v48, 0.0  ;;  %635 = vmatpush.msk.msrb.mxu3 %vm403_vm1, %v37_v34 }
 0x106   :  { %256 = vadd.xlane.f32.xlu1 %v255_v49  ;;  %641 = vpow2.f32 %v241_v50 }
 0x107   :  { %v218_v51 = vpop.xlane.xlu0 %217  ;;  %v227_v52 = vpop.xlane.xlu2 %226 }
 0x108   :  { %v234_v53 = vsub.f32 %v201_v27, %v218_v51  ;;  %v237_v56 = vsub.f32 %v204_v30, %v227_v52 }
 0x109   :  { %v224_v59 = vpop.xlane.xlu1 %223 }
 0x10a   :  { %v749_v54 = vpop.eup %639  ;;  %v245_v55 = vmul.f32 1.442695, %v234_v53  ;;  %v251_v58 = vmul.f32 1.442695, %v237_v56  ;;  %v236_v2 = vsub.f32 %v203_v28, %v224_v59 }
 0x10b   :  { %v261_v57 = vsel %vm206_vm0, %v749_v54, 0.0 }
 0x10c   :  { %643 = vpow2.f32 %v245_v55  ;;  %262 = vadd.xlane.f32.xlu2 %v261_v57  ;;  %v753_v62 = vpop.eup %641  ;;  %v249_v7 = vmul.f32 1.442695, %v236_v2 }
 0x10d   :  { %645 = vpow2.f32 %v251_v58  ;;  %v258_v5 = vsel %vm206_vm0, %v753_v62, 0.0 }
 0x10f   :  { %v230_v60 = vpop.xlane.xlu2 %229  ;;  %v221_v61 = vpop.xlane.xlu0 %220 }
 0x110   :  { %v238_v63 = vsub.f32 %v205_v37, %v230_v60  ;;  %v235_v0 = vsub.f32 %v202_v36, %v221_v61 }
 0x112   :  { %v755_v1 = vpop.eup %643  ;;  %v253_v3 = vmul.f32 1.442695, %v238_v63  ;;  %v247_v4 = vmul.f32 1.442695, %v235_v0 }
 0x113   :  { %v264_v6 = vsel %vm206_vm0, %v755_v1, 0.0  ;;  %v761_v8 = vpop.eup %645 }
 0x114   :  { %647 = vpow2.f32 %v253_v3  ;;  %259 = vadd.xlane.f32.xlu2 %v258_v5  ;;  %265 = vadd.xlane.f32.xlu0 %v264_v6  ;;  %v273_v12 = vsel %vm206_vm0, %v761_v8, 0.0 }
 0x115   :  { %649 = vpow2.f32 %v247_v4 }
 0x116   :  { %651 = vpow2.f32 %v249_v7 }
 0x11a   :  { %v763_v9 = vpop.eup %647 }
 0x11b   :  { %v765_v10 = vpop.eup %649  ;;  %v276_v11 = vsel %vm206_vm0, %v763_v9, 0.0 }
 0x11c   :  { %277 = vadd.xlane.f32.xlu1 %v276_v11  ;;  %274 = vadd.xlane.f32.xlu0 %v273_v12  ;;  %v267_v13 = vsel %vm206_vm0, %v765_v10, 0.0  ;;  %v773_v14 = vpop.eup %651 }
 0x11d   :  { %268 = vadd.xlane.f32.xlu2 %v267_v13  ;;  %v270_v15 = vsel %vm206_vm0, %v773_v14, 0.0 }
 0x124   :  { %271 = vadd.xlane.f32.xlu0 %v270_v15 }
 0x179   :  { %v257_v18 = vpop.xlane.xlu1 %256 }
 0x17a   :  { %653 = vrcp.f32 %v257_v18  ;;  %v290_v25 = vand.u32 2147483648, %v257_v18  ;;  %v288_v27 = vand.u32 2147483647, %v257_v18  ;;  %vm284_vm3 = vweird.f32 %v257_v18 }
 0x17c   :  { %v291_v36 = vor.u32 1.1754944e-38, %v290_v25  ;;  %vm289_vm5 = vcmp.eq.f32.partialorder %v288_v27, 8.507059e+37 }
 0x17f   :  { %v263_v19 = vpop.xlane.xlu2 %262 }
 0x180   :  { %v654_v22 = vpop.eup %653  ;;  %655 = vrcp.f32 %v263_v19  ;;  %v318_v44 = vand.u32 2147483647, %v263_v19  ;;  %v320_v45 = vand.u32 2147483648, %v263_v19  ;;  %vm314_vm8 = vweird.f32 %v263_v19 }
 0x181   :  { %v280_v23 = vmul.f32 %v654_v22, %v257_v18  ;;  %vm285_vm2 = vweird.f32 %v654_v22 }
 0x182   :  { %vm286_vm4 = vmor %vm284_vm3, %vm285_vm2  ;;  %vm319_vm10 = vcmp.eq.f32.partialorder %v318_v44, 8.507059e+37  ;;  %v321_v56 = vor.u32 1.1754944e-38, %v320_v45 }
 0x183   :  { %v281_v24 = vsub.f32 1.0, %v280_v23 }
 0x185   :  { %v282_v26 = vmul.f32 %v654_v22, %v281_v24 }
 0x186   :  { %v656_v28 = vpop.eup %655 }
 0x187   :  { %v283_v29 = vadd.f32 %v654_v22, %v282_v26  ;;  %v310_v30 = vmul.f32 %v656_v28, %v263_v19  ;;  %v260_v31 = vpop.xlane.xlu2 %259  ;;  %v793_v32 = vpop.xlane.xlu0 %265  ;;  %vm315_vm7 = vweird.f32 %v656_v28 }
 0x188   :  { %657 = vrcp.f32 %v260_v31  ;;  %vm814_vm9 = vmor %vm314_vm8, %vm315_vm7  ;;  %v303_v58 = vand.u32 2147483647, %v260_v31  ;;  %v305_v59 = vand.u32 2147483648, %v260_v31  ;;  %v333_v61 = vand.u32 2147483647, %v793_v32 }
 0x189   :  { %v287_v37 = vsel %vm286_vm4, %v654_v22, %v283_v29  ;;  %v311_v38 = vsub.f32 1.0, %v310_v30  ;;  %659 = vrcp.f32 %v793_v32  ;;  %v335_v2 = vand.u32 2147483648, %v793_v32 }
 0x18a   :  { %v292_v40 = vsel %vm289_vm5, %v291_v36, %v287_v37  ;;  %vm299_vm13 = vweird.f32 %v260_v31  ;;  %vm329_vm14 = vweird.f32 %v793_v32  ;;  %vm304_vm0 = vcmp.eq.f32.partialorder %v303_v58, 8.507059e+37 }
 0x18b   :  { %v312_v41 = vmul.f32 %v656_v28, %v311_v38  ;;  %v293_v42 = vmul.f32 %v745_v48, %v292_v40  ;;  %v306_v6 = vor.u32 1.1754944e-38, %v305_v59  ;;  %vm334_vm2 = vcmp.eq.f32.partialorder %v333_v61, 8.507059e+37 }
 0x18c   :  { %v336_v13 = vor.u32 1.1754944e-38, %v335_v2 }
 0x18d   :  { %v313_v43 = vadd.f32 %v656_v28, %v312_v41  ;;  %622 = vmatmul.msk.f32.vlgmr.msra.gmra.mxu0 %vm399_vm6, %v293_v42 }
 0x18e   :  { %v658_v46 = vpop.eup %657 }
 0x18f   :  { %v660_v47 = vpop.eup %659  ;;  %v295_v50 = vmul.f32 %v658_v46, %v260_v31  ;;  %v818_v51 = vpop.xlane.xlu1 %277  ;;  %v317_v48 = vsel %vm814_vm9, %v656_v28, %v313_v43  ;;  %vm300_vm11 = vweird.f32 %v658_v46 }
 0x190   :  { %v820_v52 = vpop.xlane.xlu0 %274  ;;  %v325_v53 = vmul.f32 %v660_v47, %v793_v32  ;;  %661 = vrcp.f32 %v818_v51  ;;  %v826_v55 = vpop.xlane.xlu2 %268  ;;  %v322_v63 = vsel %vm319_vm10, %v321_v56, %v317_v48  ;;  %vm330_vm12 = vweird.f32 %v660_v47  ;;  %vm301_vm15 = vmor %vm299_vm13, %vm300_vm11 }
 0x191   :  { %v296_v57 = vsub.f32 1.0, %v295_v50  ;;  %663 = vrcp.f32 %v826_v55  ;;  %v323_v11 = vmul.f32 %v749_v54, %v322_v63  ;;  %vm331_vm1 = vmor %vm329_vm14, %vm330_vm12  ;;  %vm389_vm3 = vweird.f32 %v818_v51 }
 0x192   :  { %v326_v60 = vsub.f32 1.0, %v325_v53  ;;  %665 = vrcp.f32 %v820_v52  ;;  %v393_v54 = vand.u32 2147483647, %v818_v51  ;;  %v395_v24 = vand.u32 2147483648, %v818_v51 }
 0x193   :  { %v297_v0 = vmul.f32 %v658_v46, %v296_v57  ;;  %626 = vmatmul.msk.f32.vlgmr.msra.gmra.mxu2 %vm399_vm6, %v323_v11  ;;  %vm344_vm4 = vweird.f32 %v826_v55  ;;  %v348_v25 = vand.u32 2147483647, %v826_v55  ;;  %v350_v30 = vand.u32 2147483648, %v826_v55 }
 0x194   :  { %v327_v3 = vmul.f32 %v660_v47, %v326_v60  ;;  %v378_v31 = vand.u32 2147483647, %v820_v52  ;;  %v380_v32 = vand.u32 2147483648, %v820_v52  ;;  %vm394_vm9 = vcmp.eq.f32.partialorder %v393_v54, 8.507059e+37 }
 0x195   :  { %v298_v4 = vadd.f32 %v658_v46, %v297_v0  ;;  %v396_v37 = vor.u32 1.1754944e-38, %v395_v24  ;;  %vm854_vm10 = vcmp.eq.f32.partialorder %v348_v25, 8.507059e+37  ;;  %v351_v43 = vor.u32 1.1754944e-38, %v350_v30 }
 0x196   :  { %v662_v5 = vpop.eup %661  ;;  %v328_v7 = vadd.f32 %v660_v47, %v327_v3  ;;  %vm374_vm13 = vweird.f32 %v820_v52  ;;  %vm379_vm14 = vcmp.eq.f32.partialorder %v378_v31, 8.507059e+37 }
 0x197   :  { %v302_v12 = vsel %vm301_vm15, %v658_v46, %v298_v4  ;;  %v385_v15 = vmul.f32 %v662_v5, %v818_v51  ;;  %v664_v17 = vpop.eup %663  ;;  %vm390_vm5 = vweird.f32 %v662_v5  ;;  %v381_v46 = vor.u32 1.1754944e-38, %v380_v32 }
 0x198   :  { %v835_v16 = vpop.xlane.xlu0 %271  ;;  %v307_v18 = vsel %vm304_vm0, %v306_v6, %v302_v12  ;;  %v332_v19 = vsel %vm331_vm1, %v660_v47, %v328_v7  ;;  %v340_v22 = vmul.f32 %v664_v17, %v826_v55  ;;  %v666_v23 = vpop.eup %665  ;;  %vm345_vm7 = vweird.f32 %v664_v17  ;;  %vm391_vm8 = vmor %vm389_vm3, %vm390_vm5 }
 0x199   :  { %667 = vrcp.f32 %v835_v16  ;;  %v337_v20 = vsel %vm334_vm2, %v336_v13, %v332_v19  ;;  %v386_v21 = vsub.f32 1.0, %v385_v15  ;;  %v308_v26 = vmul.f32 %v753_v62, %v307_v18  ;;  %vm346_vm12 = vmor %vm344_vm4, %vm345_vm7 }
 0x19a   :  { %v341_v28 = vsub.f32 1.0, %v340_v22  ;;  %v370_v29 = vmul.f32 %v666_v23, %v820_v52  ;;  %v338_v33 = vmul.f32 %v755_v1, %v337_v20  ;;  %vm375_vm11 = vweird.f32 %v666_v23 }
 0x19b   :  { %v387_v27 = vmul.f32 %v662_v5, %v386_v21  ;;  %624 = vmatmul.msk.f32.vlgmr.msra.gmra.mxu1 %vm399_vm6, %v308_v26  ;;  %vm376_vm15 = vmor %vm374_vm13, %vm375_vm11  ;;  %v363_v51 = vand.u32 2147483647, %v835_v16  ;;  %v365_v48 = vand.u32 2147483648, %v835_v16  ;;  %vm359_vm1 = vweird.f32 %v835_v16 }
 0x19c   :  { %v342_v35 = vmul.f32 %v664_v17, %v341_v28  ;;  %v371_v36 = vsub.f32 1.0, %v370_v29  ;;  %628 = vmatmul.msk.f32.vlgmr.msra.gmra.mxu3 %vm399_vm6, %v338_v33 }
 0x19d   :  { %v388_v34 = vadd.f32 %v662_v5, %v387_v27  ;;  %v366_v58 = vor.u32 1.1754944e-38, %v365_v48  ;;  %vm364_vm3 = vcmp.eq.f32.partialorder %v363_v51, 8.507059e+37 }
 0x19e   :  { %v343_v40 = vadd.f32 %v664_v17, %v342_v35  ;;  %v372_v1 = vmul.f32 %v666_v23, %v371_v36 }
 0x19f   :  { %v668_v62 = vpop.eup %667  ;;  %v392_v39 = vsel %vm391_vm8, %v662_v5, %v388_v34 }
 0x1a0   :  { %v355_v41 = vmul.f32 %v668_v62, %v835_v16  ;;  %v397_v42 = vsel %vm394_vm9, %v396_v37, %v392_v39  ;;  %v347_v44 = vsel %vm346_vm12, %v664_v17, %v343_v40  ;;  %v373_v45 = vadd.f32 %v666_v23, %v372_v1 }
 0x1a1   :  { %v398_v49 = vmul.f32 %v763_v9, %v397_v42  ;;  %v352_v50 = vsel %vm854_vm10, %v351_v43, %v347_v44  ;;  %vm360_vm0 = vweird.f32 %v668_v62 }
 0x1a2   :  { %v356_v47 = vsub.f32 1.0, %v355_v41  ;;  %v353_v53 = vmul.f32 %v765_v10, %v352_v50  ;;  %v377_v55 = vsel %vm376_vm15, %v666_v23, %v373_v45  ;;  %vm361_vm2 = vmor %vm359_vm1, %vm360_vm0 }
 0x1a3   :  { %v382_v56 = vsel %vm379_vm14, %v381_v46, %v377_v55 }
 0x1a4   :  { %v357_v52 = vmul.f32 %v668_v62, %v356_v47  ;;  %630 = vmatmul.msk.f32.vlgmr.msrb.gmra.mxu0 %vm399_vm6, %v353_v53  ;;  %v383_v9 = vmul.f32 %v761_v8, %v382_v56  ;;  %636 = vmatmul.msk.f32.vlgmr.msrb.gmra.mxu3 %vm399_vm6, %v398_v49 }
 0x1a6   :  { %v358_v57 = vadd.f32 %v668_v62, %v357_v52  ;;  %634 = vmatmul.msk.f32.vlgmr.msrb.gmra.mxu2 %vm399_vm6, %v383_v9 }
 0x1a8   :  { %v362_v59 = vsel %vm361_vm2, %v668_v62, %v358_v57 }
 0x1a9   :  { %v367_v10 = vsel %vm364_vm3, %v366_v58, %v362_v59 }
 0x1aa   :  { %v368_v60 = vmul.f32 %v773_v14, %v367_v10 }
 0x1ac   :  { %632 = vmatmul.msk.f32.vlgmr.msrb.gmra.mxu1 %vm399_vm6, %v368_v60 }
 0x20a   :  { %v424_v61 = vpop.f32.mrf.mxu0 }
 0x20b   :  { %609 = vst [vmem:[%s904_s3] sm:$0x3] %v424_v61 }
 0x216   :  { %v476_v8 = vpop.f32.mrf.mxu2 }
 0x217   :  { %611 = vst [vmem:[%s904_s3 + $0x4] sm:$0x3] %v476_v8 }
 0x218   :  { %v450_v63 = vpop.f32.mrf.mxu1 }
 0x219   :  { %610 = vst [vmem:[%s904_s3 + $0x2] sm:$0x3] %v450_v63 }
 0x21f   :  { %v502_v0 = vpop.f32.mrf.mxu3 }
 0x220   :  { %612 = vst [vmem:[%s904_s3 + $0x6] sm:$0x3] %v502_v0 }
 0x221   :  { %v528_v14 = vpop.f32.mrf.mxu0 }
 0x222   :  { %613 = vst [vmem:[%s904_s3 + $0x8] sm:$0x3] %v528_v14 }
 0x227   :  { %v606_v3 = vpop.f32.mrf.mxu3 }
 0x228   :  { %616 = vst [vmem:[%s904_s3 + $0xe] sm:$0x3] %v606_v3 }
 0x229   :  { %v554_v2 = vpop.f32.mrf.mxu1  ;;  %v580_v4 = vpop.f32.mrf.mxu2 }
 0x22a   :  { %614 = vst [vmem:[%s904_s3 + $0xa] sm:$0x3] %v554_v2 }
 0x22b   :  { %615 = vst [vmem:[%s904_s3 + $0xc] sm:$0x3] %v580_v4 }

// kernel: vqgan3d_forward.175
= control target key start
LH: loop header
LB: loop body
LE: loop exit
PB: predicated region body
PF: predicated region fallthrough
CT: control target
= control target key end

     0   :  { %s728_s1 = inlined_call_operand.vmem [shape: bf16[256,256], index: 1, kind: input, shape index: {}]   ;;  %s729_s0 = inlined_call_operand.vmem [shape: bf16[16,256], index: 0, kind: input, shape index: {}]   ;;  %s730_s2 = inlined_call_operand.vmem [shape: f32[1,256], index: 2, kind: input, shape index: {}]   ;;  %s731_s3 = inlined_call_operand.vmem [shape: f32[16,256], index: 3, kind: output, shape index: {}]  }
   0x1   :  { %v385_v0 = vld [vmem:[%s728_s1 + $0x70] sm:$0xf]  ;;  %v472_v1 = vld [vmem:[%s728_s1 + $0x74] sm:$0xf0]  ;;  %v471_v5 = vld [vmem:[%s728_s1 + $0x74] sm:$0xf] }
   0x2   :  { %v449_v2 = vld [vmem:[%s728_s1 + $0xf0] sm:$0xf]  ;;  %v386_v3 = vor.u32 %v472_v1, %v385_v0  ;;  %v488_v4 = vld [vmem:[%s728_s1 + $0xf4] sm:$0xf0]  ;;  %v387_v6 = vld [vmem:[%s728_s1 + $0x78] sm:$0xf0] }
   0x3   :  { %v450_v7 = vor.u32 %v488_v4, %v449_v2  ;;  %v390_v8 = vor.u32 %v471_v5, %v387_v6  ;;  %v487_v9 = vld [vmem:[%s728_s1 + $0xf4] sm:$0xf]  ;;  %v451_v10 = vld [vmem:[%s728_s1 + $0xf8] sm:$0xf0]  ;;  %v377_v11 = vld [vmem:[%s728_s1 + $0x60] sm:$0xf] }
   0x4   :  { %230 = vmatpush.bf16.msra.mxu0 %v386_v3  ;;  %v454_v12 = vor.u32 %v487_v9, %v451_v10  ;;  %v470_v13 = vld [vmem:[%s728_s1 + $0x64] sm:$0xf0]  ;;  %v441_v14 = vld [vmem:[%s728_s1 + $0xe0] sm:$0xf]  ;;  %v469_v18 = vld [vmem:[%s728_s1 + $0x64] sm:$0xf] }
   0x5   :  { %v486_v15 = vld [vmem:[%s728_s1 + $0xe4] sm:$0xf0]  ;;  %244 = vmatpush.bf16.msra.mxu1 %v450_v7  ;;  %258 = vmatpush.bf16.msra.mxu2 %v390_v8  ;;  %v378_v16 = vor.u32 %v470_v13, %v377_v11  ;;  %v379_v19 = vld [vmem:[%s728_s1 + $0x68] sm:$0xf0]  ;;  %v485_v20 = vld [vmem:[%s728_s1 + $0xe4] sm:$0xf] }
   0x6   :  { %v442_v17 = vor.u32 %v486_v15, %v441_v14  ;;  %272 = vmatpush.bf16.msra.mxu3 %v454_v12  ;;  %v382_v21 = vor.u32 %v469_v18, %v379_v19  ;;  %v443_v22 = vld [vmem:[%s728_s1 + $0xe8] sm:$0xf0]  ;;  %v369_v23 = vld [vmem:[%s728_s1 + $0x50] sm:$0xf]  ;;  %v468_v24 = vld [vmem:[%s728_s1 + $0x54] sm:$0xf0] }
   0x7   :  { %v446_v25 = vor.u32 %v485_v20, %v443_v22  ;;  %v433_v26 = vld [vmem:[%s728_s1 + $0xd0] sm:$0xf]  ;;  %v484_v27 = vld [vmem:[%s728_s1 + $0xd4] sm:$0xf0]  ;;  %v467_v28 = vld [vmem:[%s728_s1 + $0x54] sm:$0xf]  ;;  %v370_v29 = vor.u32 %v468_v24, %v369_v23 }
   0x8   :  { %231 = vmatpush.bf16.msra.mxu0 %v378_v16  ;;  %v371_v30 = vld [vmem:[%s728_s1 + $0x58] sm:$0xf0]  ;;  %v483_v31 = vld [vmem:[%s728_s1 + $0xd4] sm:$0xf]  ;;  %v434_v33 = vor.u32 %v484_v27, %v433_v26  ;;  %v361_v35 = vld [vmem:[%s728_s1 + $0x40] sm:$0xf] }
   0x9   :  { %v435_v32 = vld [vmem:[%s728_s1 + $0xd8] sm:$0xf0]  ;;  %245 = vmatpush.bf16.msra.mxu1 %v442_v17  ;;  %259 = vmatpush.bf16.msra.mxu2 %v382_v21  ;;  %v374_v34 = vor.u32 %v467_v28, %v371_v30  ;;  %v466_v36 = vld [vmem:[%s728_s1 + $0x44] sm:$0xf0]  ;;  %v425_v37 = vld [vmem:[%s728_s1 + $0xc0] sm:$0xf] }
   0xa   :  { %273 = vmatpush.bf16.msra.mxu3 %v446_v25  ;;  %v438_v38 = vor.u32 %v483_v31, %v435_v32  ;;  %v482_v39 = vld [vmem:[%s728_s1 + $0xc4] sm:$0xf0]  ;;  %v465_v40 = vld [vmem:[%s728_s1 + $0x44] sm:$0xf]  ;;  %v363_v41 = vld [vmem:[%s728_s1 + $0x48] sm:$0xf0]  ;;  %v362_v44 = vor.u32 %v466_v36, %v361_v35 }
   0xb   :  { %v481_v42 = vld [vmem:[%s728_s1 + $0xc4] sm:$0xf]  ;;  %v427_v43 = vld [vmem:[%s728_s1 + $0xc8] sm:$0xf0]  ;;  %v426_v45 = vor.u32 %v482_v39, %v425_v37  ;;  %v366_v46 = vor.u32 %v465_v40, %v363_v41  ;;  %v353_v47 = vld [vmem:[%s728_s1 + $0x30] sm:$0xf] }
   0xc   :  { %232 = vmatpush.bf16.msra.mxu0 %v370_v29  ;;  %v464_v48 = vld [vmem:[%s728_s1 + $0x34] sm:$0xf0]  ;;  %v417_v49 = vld [vmem:[%s728_s1 + $0xb0] sm:$0xf]  ;;  %v430_v50 = vor.u32 %v481_v42, %v427_v43  ;;  %v463_v52 = vld [vmem:[%s728_s1 + $0x34] sm:$0xf] }
   0xd   :  { %246 = vmatpush.bf16.msra.mxu1 %v434_v33  ;;  %260 = vmatpush.bf16.msra.mxu2 %v374_v34  ;;  %v480_v51 = vld [vmem:[%s728_s1 + $0xb4] sm:$0xf0]  ;;  %v355_v53 = vld [vmem:[%s728_s1 + $0x38] sm:$0xf0]  ;;  %v479_v54 = vld [vmem:[%s728_s1 + $0xb4] sm:$0xf]  ;;  %v354_v56 = vor.u32 %v464_v48, %v353_v47 }
   0xe   :  { %274 = vmatpush.bf16.msra.mxu3 %v438_v38  ;;  %v419_v55 = vld [vmem:[%s728_s1 + $0xb8] sm:$0xf0]  ;;  %v418_v57 = vor.u32 %v480_v51, %v417_v49  ;;  %v358_v58 = vor.u32 %v463_v52, %v355_v53  ;;  %v345_v59 = vld [vmem:[%s728_s1 + $0x20] sm:$0xf]  ;;  %v462_v60 = vld [vmem:[%s728_s1 + $0x24] sm:$0xf0] }
   0xf   :  { %v409_v61 = vld [vmem:[%s728_s1 + $0xa0] sm:$0xf]  ;;  %v422_v62 = vor.u32 %v479_v54, %v419_v55  ;;  %v478_v63 = vld [vmem:[%s728_s1 + $0xa4] sm:$0xf0]  ;;  %v461_v0 = vld [vmem:[%s728_s1 + $0x24] sm:$0xf]  ;;  %v346_v4 = vor.u32 %v462_v60, %v345_v59 }
  0x10   :  { %233 = vmatpush.bf16.msra.mxu0 %v362_v44  ;;  %v347_v1 = vld [vmem:[%s728_s1 + $0x28] sm:$0xf0]  ;;  %v477_v2 = vld [vmem:[%s728_s1 + $0xa4] sm:$0xf]  ;;  %v410_v5 = vor.u32 %v478_v63, %v409_v61  ;;  %v337_v7 = vld [vmem:[%s728_s1 + $0x10] sm:$0xf] }
  0x11   :  { %247 = vmatpush.bf16.msra.mxu1 %v426_v45  ;;  %261 = vmatpush.bf16.msra.mxu2 %v366_v46  ;;  %v411_v3 = vld [vmem:[%s728_s1 + $0xa8] sm:$0xf0]  ;;  %v350_v6 = vor.u32 %v461_v0, %v347_v1  ;;  %v460_v8 = vld [vmem:[%s728_s1 + $0x14] sm:$0xf0]  ;;  %v401_v9 = vld [vmem:[%s728_s1 + $0x90] sm:$0xf] }
  0x12   :  { %275 = vmatpush.bf16.msra.mxu3 %v430_v50  ;;  %v414_v10 = vor.u32 %v477_v2, %v411_v3  ;;  %v476_v11 = vld [vmem:[%s728_s1 + $0x94] sm:$0xf0]  ;;  %v459_v12 = vld [vmem:[%s728_s1 + $0x14] sm:$0xf]  ;;  %v339_v13 = vld [vmem:[%s728_s1 + $0x18] sm:$0xf0]  ;;  %v338_v16 = vor.u32 %v460_v8, %v337_v7 }
  0x13   :  { %v475_v14 = vld [vmem:[%s728_s1 + $0x94] sm:$0xf]  ;;  %v403_v15 = vld [vmem:[%s728_s1 + $0x98] sm:$0xf0]  ;;  %v402_v17 = vor.u32 %v476_v11, %v401_v9  ;;  %v342_v18 = vor.u32 %v459_v12, %v339_v13  ;;  %v329_v19 = vld [vmem:[%s728_s1] sm:$0xf] }
  0x14   :  { %234 = vmatpush.bf16.msra.mxu0 %v354_v56  ;;  %v458_v20 = vld [vmem:[%s728_s1 + $0x4] sm:$0xf0]  ;;  %v393_v21 = vld [vmem:[%s728_s1 + $0x80] sm:$0xf]  ;;  %v406_v22 = vor.u32 %v475_v14, %v403_v15  ;;  %v457_v24 = vld [vmem:[%s728_s1 + $0x4] sm:$0xf] }
  0x15   :  { %248 = vmatpush.bf16.msra.mxu1 %v418_v57  ;;  %262 = vmatpush.bf16.msra.mxu2 %v358_v58  ;;  %v474_v23 = vld [vmem:[%s728_s1 + $0x84] sm:$0xf0]  ;;  %v331_v25 = vld [vmem:[%s728_s1 + $0x8] sm:$0xf0]  ;;  %v473_v26 = vld [vmem:[%s728_s1 + $0x84] sm:$0xf]  ;;  %v330_v28 = vor.u32 %v458_v20, %v329_v19 }
  0x16   :  { %276 = vmatpush.bf16.msra.mxu3 %v422_v62  ;;  %v395_v27 = vld [vmem:[%s728_s1 + $0x88] sm:$0xf0]  ;;  %v321_v29 = vld [vmem:[%s729_s0] sm:$0xf]  ;;  %v456_v30 = vld [vmem:[%s729_s0 + $0x4] sm:$0xf0]  ;;  %v394_v31 = vor.u32 %v474_v23, %v393_v21  ;;  %v334_v32 = vor.u32 %v457_v24, %v331_v25 }
  0x17   :  { %v455_v33 = vld [vmem:[%s729_s0 + $0x4] sm:$0xf]  ;;  %v323_v34 = vld [vmem:[%s729_s0 + $0x8] sm:$0xf0]  ;;  %v398_v35 = vor.u32 %v473_v26, %v395_v27  ;;  %v322_v36 = vor.u32 %v456_v30, %v321_v29  ;;  %v301_v38 = vld [vmem:[%s730_s2] sm:$0x3] }
  0x18   :  { %235 = vmatpush.bf16.msra.mxu0 %v346_v4  ;;  %v326_v37 = vor.u32 %v455_v33, %v323_v34  ;;  %v303_v40 = vperm.slane %v301_v38, 0  ;;  %v304_v45 = vperm.slane %v301_v38, 1 }
  0x19   :  { %249 = vmatpush.bf16.msra.mxu1 %v410_v5  ;;  %263 = vmatpush.bf16.msra.mxu2 %v350_v6 }
  0x1a   :  { %277 = vmatpush.bf16.msra.mxu3 %v414_v10 }
  0x1c   :  { %236 = vmatpush.bf16.msra.mxu0 %v338_v16 }
  0x1d   :  { %250 = vmatpush.bf16.msra.mxu1 %v402_v17  ;;  %264 = vmatpush.bf16.msra.mxu2 %v342_v18 }
  0x1e   :  { %278 = vmatpush.bf16.msra.mxu3 %v406_v22 }
  0x20   :  { %237 = vmatpush.bf16.msra.mxu0 %v330_v28 }
  0x21   :  { %251 = vmatpush.bf16.msra.mxu1 %v394_v31  ;;  %265 = vmatpush.bf16.msra.mxu2 %v334_v32 }
  0x22   :  { %279 = vmatpush.bf16.msra.mxu3 %v398_v35 }
  0x23   :  { %238 = vmatmul.bf16.vlgmr.msra.gmra.mxu0 %v322_v36 }
  0x24   :  { %252 = vmatmul.bf16.vlgmr.msra.gmra.mxu1 %v326_v37  ;;  %266 = vmatmul.bf16.vlgmr.msra.gmra.mxu2 %v322_v36 }
  0x25   :  { %280 = vmatmul.bf16.vlgmr.msra.gmra.mxu3 %v326_v37 }
  0xa0   :  { %v239_v39 = vpop.f32.mrf.mxu0 }
  0xa1   :  { %v253_v41 = vpop.f32.mrf.mxu1 }
  0xa2   :  { %v254_v42 = vadd.f32 %v253_v41, %v239_v39 }
  0xa4   :  { %v307_v43 = vadd.f32 %v303_v40, %v254_v42 }
  0xa6   :  { %311 = vst [vmem:[%s731_s3] sm:$0xff] %v307_v43 }
  0xa7   :  { %v267_v44 = vpop.f32.mrf.mxu2 }
  0xa8   :  { %v281_v46 = vpop.f32.mrf.mxu3  ;;  %v241_v47 = vpop.f32.mrf.mxu0 }
  0xa9   :  { %v282_v48 = vadd.f32 %v281_v46, %v267_v44  ;;  %v255_v49 = vpop.f32.mrf.mxu1 }
  0xaa   :  { %v256_v50 = vadd.f32 %v255_v49, %v241_v47 }
  0xab   :  { %v308_v51 = vadd.f32 %v304_v45, %v282_v48 }
  0xac   :  { %v309_v52 = vadd.f32 %v303_v40, %v256_v50 }
  0xad   :  { %312 = vst [vmem:[%s731_s3 + $0x8] sm:$0xff] %v308_v51 }
  0xae   :  { %313 = vst [vmem:[%s731_s3 + $0x10] sm:$0xff] %v309_v52 }
  0xaf   :  { %v269_v53 = vpop.f32.mrf.mxu2 }
  0xb0   :  { %v283_v54 = vpop.f32.mrf.mxu3 }
  0xb1   :  { %v284_v55 = vadd.f32 %v283_v54, %v269_v53 }
  0xb3   :  { %v310_v56 = vadd.f32 %v304_v45, %v284_v55 }
  0xb5   :  { %314 = vst [vmem:[%s731_s3 + $0x18] sm:$0xff] %v310_v56 }

// kernel: vqgan3d_forward.235
= control target key start
LH: loop header
LB: loop body
LE: loop exit
PB: predicated region body
PF: predicated region fallthrough
CT: control target
= control target key end

     0   :  { %s391_s1 = inlined_call_operand.vmem [shape: bf16[256,128], index: 1, kind: input, shape index: {}]   ;;  %s392_s0 = inlined_call_operand.vmem [shape: bf16[16,256], index: 0, kind: input, shape index: {}]   ;;  %s393_s2 = inlined_call_operand.vmem [shape: f32[1,128], index: 2, kind: input, shape index: {}]   ;;  %s394_s3 = inlined_call_operand.vmem [shape: f32[16,128], index: 3, kind: output, shape index: {}]  }
   0x1   :  { %v292_v0 = vld [vmem:[%s391_s1 + $0x38] sm:$0xff]  ;;  %v291_v2 = vld [vmem:[%s391_s1 + $0x30] sm:$0xff]  ;;  %v290_v4 = vld [vmem:[%s391_s1 + $0x28] sm:$0xff] }
   0x2   :  { %v300_v1 = vld [vmem:[%s391_s1 + $0x78] sm:$0xff]  ;;  %162 = vmatpush.bf16.msra.mxu0 %v292_v0  ;;  %v299_v3 = vld [vmem:[%s391_s1 + $0x70] sm:$0xff]  ;;  %v298_v5 = vld [vmem:[%s391_s1 + $0x68] sm:$0xff] }
   0x3   :  { %176 = vmatpush.bf16.msra.mxu1 %v300_v1  ;;  %v289_v6 = vld [vmem:[%s391_s1 + $0x20] sm:$0xff]  ;;  %v288_v8 = vld [vmem:[%s391_s1 + $0x18] sm:$0xff]  ;;  %v287_v10 = vld [vmem:[%s391_s1 + $0x10] sm:$0xff] }
   0x4   :  { %v297_v7 = vld [vmem:[%s391_s1 + $0x60] sm:$0xff]  ;;  %v296_v9 = vld [vmem:[%s391_s1 + $0x58] sm:$0xff]  ;;  %v295_v11 = vld [vmem:[%s391_s1 + $0x50] sm:$0xff] }
   0x5   :  { %v286_v12 = vld [vmem:[%s391_s1 + $0x8] sm:$0xff]  ;;  %v285_v14 = vld [vmem:[%s391_s1] sm:$0xff] }
   0x6   :  { %163 = vmatpush.bf16.msra.mxu0 %v291_v2  ;;  %v294_v13 = vld [vmem:[%s391_s1 + $0x48] sm:$0xff]  ;;  %v293_v15 = vld [vmem:[%s391_s1 + $0x40] sm:$0xff] }
   0x7   :  { %177 = vmatpush.bf16.msra.mxu1 %v299_v3  ;;  %v213_v16 = vld [vmem:[%s392_s0] sm:$0xf]  ;;  %v284_v17 = vld [vmem:[%s392_s0 + $0x4] sm:$0xf0]  ;;  %v283_v18 = vld [vmem:[%s392_s0 + $0x4] sm:$0xf] }
   0x8   :  { %v215_v19 = vld [vmem:[%s392_s0 + $0x8] sm:$0xf0]  ;;  %v214_v20 = vor.u32 %v284_v17, %v213_v16  ;;  %v301_v22 = vld [vmem:[%s393_s2] ss:$0 sm:$0xff] }
   0x9   :  { %v218_v21 = vor.u32 %v283_v18, %v215_v19 }
   0xa   :  { %164 = vmatpush.bf16.msra.mxu0 %v290_v4 }
   0xb   :  { %178 = vmatpush.bf16.msra.mxu1 %v298_v5 }
   0xe   :  { %165 = vmatpush.bf16.msra.mxu0 %v289_v6 }
   0xf   :  { %179 = vmatpush.bf16.msra.mxu1 %v297_v7 }
  0x12   :  { %166 = vmatpush.bf16.msra.mxu0 %v288_v8 }
  0x13   :  { %180 = vmatpush.bf16.msra.mxu1 %v296_v9 }
  0x16   :  { %167 = vmatpush.bf16.msra.mxu0 %v287_v10 }
  0x17   :  { %181 = vmatpush.bf16.msra.mxu1 %v295_v11 }
  0x1a   :  { %168 = vmatpush.bf16.msra.mxu0 %v286_v12 }
  0x1b   :  { %182 = vmatpush.bf16.msra.mxu1 %v294_v13 }
  0x1e   :  { %169 = vmatpush.bf16.msra.mxu0 %v285_v14 }
  0x1f   :  { %183 = vmatpush.bf16.msra.mxu1 %v293_v15 }
  0x21   :  { %170 = vmatmul.bf16.vlgmr.msra.gmra.mxu0 %v214_v20 }
  0x22   :  { %184 = vmatmul.bf16.vlgmr.msra.gmra.mxu1 %v218_v21 }
  0x9e   :  { %v171_v23 = vpop.f32.mrf.mxu0 }
  0x9f   :  { %v185_v24 = vpop.f32.mrf.mxu1 }
  0xa0   :  { %v186_v25 = vadd.f32 %v185_v24, %v171_v23 }
  0xa2   :  { %v203_v26 = vadd.f32 %v301_v22, %v186_v25 }
  0xa4   :  { %205 = vst [vmem:[%s394_s3] sm:$0xff] %v203_v26 }
  0xa6   :  { %v173_v27 = vpop.f32.mrf.mxu0 }
  0xa7   :  { %v187_v28 = vpop.f32.mrf.mxu1 }
  0xa8   :  { %v188_v29 = vadd.f32 %v187_v28, %v173_v27 }
  0xaa   :  { %v204_v30 = vadd.f32 %v301_v22, %v188_v29 }
  0xac   :  { %206 = vst [vmem:[%s394_s3 + $0x8] sm:$0xff] %v204_v30 }

// kernel: vqgan3d_forward.236
= control target key start
LH: loop header
LB: loop body
LE: loop exit
PB: predicated region body
PF: predicated region fallthrough
CT: control target
= control target key end

     0   :  { %s830_s0 = inlined_call_operand.vmem [shape: f32[8,64], index: 0, kind: input, shape index: {}]   ;;  %s831_s1 = inlined_call_operand.vmem [shape: f32[64,512], index: 1, kind: input, shape index: {}]   ;;  %s832_s2 = inlined_call_operand.vmem [shape: f32[512,64], index: 2, kind: input, shape index: {}]   ;;  %s833_s3 = inlined_call_operand.vmem [shape: f32[1,512], index: 3, kind: input, shape index: {}]   ;;  %s834_s4 = inlined_call_operand.vmem [shape: f32[8,64], index: 4, kind: output, shape index: {0}]   ;;  %s835_s5 = inlined_call_operand.vmem [shape: s32[8,1], index: 5, kind: output, shape index: {1}]   ;;  %s836_s6 = inlined_call_operand.hbm [shape: f32[1,1], index: 6, kind: output, shape index: {2}]  }
   0x1   :  { %v59_v0 = vld [vmem:[%s831_s1 + $0xf0] sm:$0xff]  ;;  %v60_v1 = vld [vmem:[%s831_s1 + $0xf8] sm:$0xff]  ;;  %v57_v6 = vld [vmem:[%s831_s1 + $0xe0] sm:$0xff] }
   0x2   :  { %v55_v2 = vld [vmem:[%s831_s1 + $0xd0] sm:$0xff]  ;;  %113 = vmatpush.msra.mxu2 %v59_v0  ;;  %133 = vmatpush.msra.mxu3 %v60_v1  ;;  %v56_v3 = vld [vmem:[%s831_s1 + $0xd8] sm:$0xff]  ;;  %v58_v7 = vld [vmem:[%s831_s1 + $0xe8] sm:$0xff] }
   0x3   :  { %v51_v4 = vld [vmem:[%s831_s1 + $0xb0] sm:$0xff]  ;;  %v52_v5 = vld [vmem:[%s831_s1 + $0xb8] sm:$0xff]  ;;  %v53_v8 = vld [vmem:[%s831_s1 + $0xc0] sm:$0xff]  ;;  %73 = vmatpush.msra.mxu0 %v57_v6  ;;  %93 = vmatpush.msra.mxu1 %v58_v7 }
   0x4   :  { %114 = vmatpush.msra.mxu2 %v55_v2  ;;  %134 = vmatpush.msra.mxu3 %v56_v3  ;;  %v54_v9 = vld [vmem:[%s831_s1 + $0xc8] sm:$0xff]  ;;  %v47_v10 = vld [vmem:[%s831_s1 + $0x90] sm:$0xff]  ;;  %v48_v11 = vld [vmem:[%s831_s1 + $0x98] sm:$0xff] }
   0x5   :  { %v49_v12 = vld [vmem:[%s831_s1 + $0xa0] sm:$0xff]  ;;  %v50_v13 = vld [vmem:[%s831_s1 + $0xa8] sm:$0xff]  ;;  %74 = vmatpush.msra.mxu0 %v53_v8  ;;  %94 = vmatpush.msra.mxu1 %v54_v9  ;;  %v43_v14 = vld [vmem:[%s831_s1 + $0x70] sm:$0xff] }
   0x6   :  { %115 = vmatpush.msra.mxu2 %v51_v4  ;;  %135 = vmatpush.msra.mxu3 %v52_v5  ;;  %v44_v15 = vld [vmem:[%s831_s1 + $0x78] sm:$0xff]  ;;  %v45_v16 = vld [vmem:[%s831_s1 + $0x80] sm:$0xff]  ;;  %v46_v17 = vld [vmem:[%s831_s1 + $0x88] sm:$0xff] }
   0x7   :  { %75 = vmatpush.msra.mxu0 %v49_v12  ;;  %95 = vmatpush.msra.mxu1 %v50_v13  ;;  %v39_v18 = vld [vmem:[%s831_s1 + $0x50] sm:$0xff]  ;;  %v40_v19 = vld [vmem:[%s831_s1 + $0x58] sm:$0xff]  ;;  %v41_v20 = vld [vmem:[%s831_s1 + $0x60] sm:$0xff] }
   0x8   :  { %116 = vmatpush.msra.mxu2 %v47_v10  ;;  %136 = vmatpush.msra.mxu3 %v48_v11  ;;  %v42_v21 = vld [vmem:[%s831_s1 + $0x68] sm:$0xff]  ;;  %v35_v22 = vld [vmem:[%s831_s1 + $0x30] sm:$0xff]  ;;  %v36_v23 = vld [vmem:[%s831_s1 + $0x38] sm:$0xff] }
   0x9   :  { %76 = vmatpush.msra.mxu0 %v45_v16  ;;  %96 = vmatpush.msra.mxu1 %v46_v17  ;;  %v37_v24 = vld [vmem:[%s831_s1 + $0x40] sm:$0xff]  ;;  %v38_v25 = vld [vmem:[%s831_s1 + $0x48] sm:$0xff] }
   0xa   :  { %117 = vmatpush.msra.mxu2 %v43_v14  ;;  %137 = vmatpush.msra.mxu3 %v44_v15 }
   0xc   :  { %118 = vmatpush.msra.mxu2 %v39_v18  ;;  %138 = vmatpush.msra.mxu3 %v40_v19 }
   0xd   :  { %12 = vsyncpa [#allocation3], 0  ;;  %77 = vmatpush.msra.mxu0 %v41_v20  ;;  %97 = vmatpush.msra.mxu1 %v42_v21  ;;  %v31_v26 = vld [vmem:[%s831_s1 + $0x10] sm:$0xff]  ;;  %v32_v27 = vld [vmem:[%s831_s1 + $0x18] sm:$0xff]  ;;  %vm61_vm0 = vcmask 523264   ;;  %v167_v53 = vlaneseq  ;;  %vm200_vm9 = vcmask 7168  }
   0xe   :  { %119 = vmatpush.msra.mxu2 %v35_v22  ;;  %139 = vmatpush.msra.mxu3 %v36_v23  ;;  %v572_v28 = vld [vmem:[%s830_s0] sm:$0xff]  ;;  %v34_v30 = vld [vmem:[%s831_s1 + $0x28] sm:$0xff]  ;;  %v229_v4 = vld [vmem:[%s832_s2 + $0x78] sm:$0xff]  ;;  %vm25_vm14 = vcmask 0   ;;  %s449_s11 = smov [#allocation2]   ;;  %s393_s14 = sshll.u32 %s836_s6, 4  ;;  %s394_s14 = int_to_ptr.hbm [resolvable:$true] %s393_s14 }
   0xf   :  { %78 = vmatpush.msra.mxu0 %v37_v24  ;;  %98 = vmatpush.msra.mxu1 %v38_v25  ;;  %v33_v29 = vld [vmem:[%s831_s1 + $0x20] sm:$0xff]  ;;  %v30_v32 = vld [vmem:[%s831_s1 + $0x8] sm:$0xff]  ;;  %v597_v54 = vand.u32 127, %v167_v53  ;;  %v245_v5 = vld [vmem:[%s832_s2 + $0xf8] sm:$0xff] }
  0x10   :  { %120 = vmatpush.msra.mxu2 %v31_v26  ;;  %140 = vmatpush.msra.mxu3 %v32_v27  ;;  %v29_v31 = vld [vmem:[%s831_s1] sm:$0xff]  ;;  %v261_v6 = vld [vmem:[%s832_s2 + $0x178] sm:$0xff]  ;;  %v228_v8 = vld [vmem:[%s832_s2 + $0x70] sm:$0xff] }
  0x11   :  { %408 = vmatmul.msk.f32.vlgmr.msra.gmra.mxu2 %vm61_vm0, %v572_v28  ;;  %409 = vmatmul.msk.f32.vlgmr.msra.gmra.mxu3 %vm61_vm0, %v572_v28  ;;  %v28_v33 = vld [vmem:[%s833_s3] sm:$0xf]  ;;  %v600_v55 = vadd.s32 128, %v597_v54  ;;  %v603_v56 = vadd.s32 256, %v597_v54  ;;  %v606_v57 = vadd.s32 384, %v597_v54  ;;  %v277_v7 = vld [vmem:[%s832_s2 + $0x1f8] sm:$0xff] }
  0x12   :  { %79 = vmatpush.msra.mxu0 %v33_v29  ;;  %99 = vmatpush.msra.mxu1 %v34_v30  ;;  %v150_v34 = vperm.slane %v28_v33, 0  ;;  %v151_v35 = vperm.slane %v28_v33, 1  ;;  %v152_v40 = vperm.slane %v28_v33, 2  ;;  %v153_v41 = vperm.slane %v28_v33, 3  ;;  %v244_v9 = vld [vmem:[%s832_s2 + $0xf0] sm:$0xff]  ;;  %v227_v12 = vld [vmem:[%s832_s2 + $0x68] sm:$0xff] }
  0x13   :  { %318 = vmatpush.msrb.mxu2 %v261_v6  ;;  %338 = vmatpush.msrb.mxu3 %v277_v7  ;;  %v260_v10 = vld [vmem:[%s832_s2 + $0x170] sm:$0xff]  ;;  %v243_v13 = vld [vmem:[%s832_s2 + $0xe8] sm:$0xff]  ;;  %v226_v16 = vld [vmem:[%s832_s2 + $0x60] sm:$0xff] }
  0x14   :  { %80 = vmatpush.msra.mxu0 %v29_v31  ;;  %100 = vmatpush.msra.mxu1 %v30_v32  ;;  %v276_v11 = vld [vmem:[%s832_s2 + $0x1f0] sm:$0xff]  ;;  %v259_v14 = vld [vmem:[%s832_s2 + $0x168] sm:$0xff]  ;;  %v242_v17 = vld [vmem:[%s832_s2 + $0xe0] sm:$0xff] }
  0x15   :  { %406 = vmatmul.msk.f32.vlgmr.msra.gmra.mxu0 %vm61_vm0, %v572_v28  ;;  %407 = vmatmul.msk.f32.vlgmr.msra.gmra.mxu1 %vm61_vm0, %v572_v28  ;;  %v275_v15 = vld [vmem:[%s832_s2 + $0x1e8] sm:$0xff]  ;;  %v258_v18 = vld [vmem:[%s832_s2 + $0x160] sm:$0xff]  ;;  %v225_v20 = vld [vmem:[%s832_s2 + $0x58] sm:$0xff] }
  0x16   :  { %278 = vmatpush.msrb.mxu0 %v229_v4  ;;  %298 = vmatpush.msrb.mxu1 %v245_v5  ;;  %v274_v19 = vld [vmem:[%s832_s2 + $0x1e0] sm:$0xff]  ;;  %v241_v21 = vld [vmem:[%s832_s2 + $0xd8] sm:$0xff]  ;;  %v224_v24 = vld [vmem:[%s832_s2 + $0x50] sm:$0xff] }
  0x17   :  { %319 = vmatpush.msrb.mxu2 %v260_v10  ;;  %339 = vmatpush.msrb.mxu3 %v276_v11  ;;  %v257_v22 = vld [vmem:[%s832_s2 + $0x158] sm:$0xff]  ;;  %v240_v25 = vld [vmem:[%s832_s2 + $0xd0] sm:$0xff]  ;;  %v223_v29 = vld [vmem:[%s832_s2 + $0x48] sm:$0xff] }
  0x18   :  { %279 = vmatpush.msrb.mxu0 %v228_v8  ;;  %299 = vmatpush.msrb.mxu1 %v244_v9  ;;  %v273_v23 = vld [vmem:[%s832_s2 + $0x1d8] sm:$0xff]  ;;  %v256_v26 = vld [vmem:[%s832_s2 + $0x150] sm:$0xff]  ;;  %v239_v30 = vld [vmem:[%s832_s2 + $0xc8] sm:$0xff] }
  0x19   :  { %320 = vmatpush.msrb.mxu2 %v259_v14  ;;  %340 = vmatpush.msrb.mxu3 %v275_v15  ;;  %v272_v27 = vld [vmem:[%s832_s2 + $0x1d0] sm:$0xff]  ;;  %v255_v31 = vld [vmem:[%s832_s2 + $0x148] sm:$0xff]  ;;  %v222_v33 = vld [vmem:[%s832_s2 + $0x40] sm:$0xff] }
  0x1a   :  { %280 = vmatpush.msrb.mxu0 %v227_v12  ;;  %300 = vmatpush.msrb.mxu1 %v243_v13  ;;  %v271_v32 = vld [vmem:[%s832_s2 + $0x1c8] sm:$0xff]  ;;  %v217_v53 = vld [vmem:[%s832_s2 + $0x18] sm:$0xff]  ;;  %v232_v4 = vld [vmem:[%s832_s2 + $0x90] sm:$0xff] }
  0x1b   :  { %321 = vmatpush.msrb.mxu2 %v258_v18  ;;  %341 = vmatpush.msrb.mxu3 %v274_v19  ;;  %v215_v5 = vld [vmem:[%s832_s2 + $0x8] sm:$0xff]  ;;  %v214_v9 = vld [vmem:[%s832_s2] sm:$0xff]  ;;  %v447_v18 = vmov 1.0  }
  0x1c   :  { %281 = vmatpush.msrb.mxu0 %v226_v16  ;;  %301 = vmatpush.msrb.mxu1 %v242_v17  ;;  %v231_v6 = vld [vmem:[%s832_s2 + $0x88] sm:$0xff]  ;;  %v230_v10 = vld [vmem:[%s832_s2 + $0x80] sm:$0xff] }
  0x1d   :  { %322 = vmatpush.msrb.mxu2 %v257_v22  ;;  %342 = vmatpush.msrb.mxu3 %v273_v23  ;;  %v247_v7 = vld [vmem:[%s832_s2 + $0x108] sm:$0xff]  ;;  %v246_v11 = vld [vmem:[%s832_s2 + $0x100] sm:$0xff] }
  0x1e   :  { %282 = vmatpush.msrb.mxu0 %v225_v20  ;;  %302 = vmatpush.msrb.mxu1 %v241_v21  ;;  %v263_v8 = vld [vmem:[%s832_s2 + $0x188] sm:$0xff]  ;;  %v262_v12 = vld [vmem:[%s832_s2 + $0x180] sm:$0xff] }
  0x1f   :  { %323 = vmatpush.msrb.mxu2 %v256_v26  ;;  %343 = vmatpush.msrb.mxu3 %v272_v27 }
  0x20   :  { %283 = vmatpush.msrb.mxu0 %v224_v24  ;;  %303 = vmatpush.msrb.mxu1 %v240_v25 }
  0x21   :  { %324 = vmatpush.msrb.mxu2 %v255_v31  ;;  %344 = vmatpush.msrb.mxu3 %v271_v32 }
  0x22   :  { %284 = vmatpush.msrb.mxu0 %v223_v29  ;;  %304 = vmatpush.msrb.mxu1 %v239_v30 }
  0x24   :  { %285 = vmatpush.msrb.mxu0 %v222_v33 }
  0x92   :  { %v82_v36 = vpop.f32.mrf.mxu0  ;;  %v102_v37 = vpop.f32.mrf.mxu1 }
  0x93   :  { %v145_v38 = vmul.f32 2.0, %v82_v36  ;;  %v146_v39 = vmul.f32 2.0, %v102_v37  ;;  %v270_v36 = vld [vmem:[%s832_s2 + $0x1c0] sm:$0xff]  ;;  %v221_v37 = vld [vmem:[%s832_s2 + $0x38] sm:$0xff] }
  0x94   :  { %v122_v42 = vpop.f32.mrf.mxu2  ;;  %v142_v43 = vpop.f32.mrf.mxu3  ;;  %345 = vmatpush.msrb.mxu3 %v270_v36  ;;  %286 = vmatpush.msrb.mxu0 %v221_v37 }
  0x95   :  { %v158_v44 = vsub.f32 %v150_v34, %v145_v38  ;;  %v159_v45 = vsub.f32 %v151_v35, %v146_v39  ;;  %v147_v46 = vmul.f32 2.0, %v122_v42  ;;  %v148_v47 = vmul.f32 2.0, %v142_v43  ;;  %v238_v34 = vld [vmem:[%s832_s2 + $0xc0] sm:$0xff]  ;;  %v237_v38 = vld [vmem:[%s832_s2 + $0xb8] sm:$0xff]  ;;  %v236_v42 = vld [vmem:[%s832_s2 + $0xb0] sm:$0xff] }
  0x96   :  { %v254_v35 = vld [vmem:[%s832_s2 + $0x140] sm:$0xff]  ;;  %305 = vmatpush.msrb.mxu1 %v238_v34  ;;  %v253_v39 = vld [vmem:[%s832_s2 + $0x138] sm:$0xff]  ;;  %v252_v43 = vld [vmem:[%s832_s2 + $0x130] sm:$0xff] }
  0x97   :  { %v160_v48 = vsub.f32 %v152_v40, %v147_v46  ;;  %v161_v49 = vsub.f32 %v153_v41, %v148_v47  ;;  %v162_v50 = vmin.f32 %v158_v44, %v159_v45  ;;  %v269_v40 = vld [vmem:[%s832_s2 + $0x1b8] sm:$0xff]  ;;  %325 = vmatpush.msrb.mxu2 %v254_v35  ;;  %v220_v41 = vld [vmem:[%s832_s2 + $0x30] sm:$0xff]  ;;  %v235_v46 = vld [vmem:[%s832_s2 + $0xa8] sm:$0xff] }
  0x98   :  { %306 = vmatpush.msrb.mxu1 %v237_v38  ;;  %346 = vmatpush.msrb.mxu3 %v269_v40  ;;  %v251_v47 = vld [vmem:[%s832_s2 + $0x128] sm:$0xff] }
  0x99   :  { %v163_v51 = vmin.f32 %v160_v48, %v161_v49  ;;  %326 = vmatpush.msrb.mxu2 %v253_v39  ;;  %287 = vmatpush.msrb.mxu0 %v220_v41 }
  0x9a   :  { %307 = vmatpush.msrb.mxu1 %v236_v42 }
  0x9b   :  { %v164_v52 = vmin.f32 %v162_v50, %v163_v51  ;;  %327 = vmatpush.msrb.mxu2 %v252_v43  ;;  %v234_v50 = vld [vmem:[%s832_s2 + $0xa0] sm:$0xff] }
  0x9c   :  { %308 = vmatpush.msrb.mxu1 %v235_v46  ;;  %v250_v51 = vld [vmem:[%s832_s2 + $0x120] sm:$0xff] }
  0x9d   :  { %165 = vmin.xlane.f32.xlu0 %v164_v52  ;;  %v266_v52 = vld [vmem:[%s832_s2 + $0x1a0] sm:$0xff]  ;;  %328 = vmatpush.msrb.mxu2 %v251_v47 }
  0x9e   :  { %309 = vmatpush.msrb.mxu1 %v234_v50 }
  0x9f   :  { %329 = vmatpush.msrb.mxu2 %v250_v51 }
 0x110   :  { %v166_v58 = vpop.xlane.xlu0 %165 }
 0x111   :  { %vm172_vm1 = vcmp.le.f32.partialorder %v158_v44, %v166_v58  ;;  %vm173_vm2 = vcmp.le.f32.partialorder %v159_v45, %v166_v58  ;;  %vm174_vm3 = vcmp.le.f32.partialorder %v160_v48, %v166_v58  ;;  %vm175_vm4 = vcmp.le.f32.partialorder %v161_v49, %v166_v58  ;;  %v268_v44 = vld [vmem:[%s832_s2 + $0x1b0] sm:$0xff]  ;;  %v219_v45 = vld [vmem:[%s832_s2 + $0x28] sm:$0xff]  ;;  %v218_v49 = vld [vmem:[%s832_s2 + $0x20] sm:$0xff] }
 0x112   :  { %v176_v59 = vsel %vm172_vm1, %v597_v54, 512  ;;  %v177_v60 = vsel %vm173_vm2, %v600_v55, 512  ;;  %v178_v61 = vsel %vm174_vm3, %v603_v56, 512  ;;  %v179_v62 = vsel %vm175_vm4, %v606_v57, 512  ;;  %v267_v48 = vld [vmem:[%s832_s2 + $0x1a8] sm:$0xff]  ;;  %347 = vmatpush.msrb.mxu3 %v268_v44  ;;  %288 = vmatpush.msrb.mxu0 %v219_v45  ;;  %v233_v58 = vld [vmem:[%s832_s2 + $0x98] sm:$0xff] }
 0x113   :  { %vm180_vm5 = vcmp.lt.s32.totalorder %v176_v59, %v177_v60  ;;  %vm182_vm6 = vcmp.lt.s32.totalorder %v178_v61, %v179_v62  ;;  %310 = vmatpush.msrb.mxu1 %v233_v58 }
 0x114   :  { %v181_v63 = vsel %vm180_vm5, %v176_v59, %v177_v60  ;;  %v183_v0 = vsel %vm182_vm6, %v178_v61, %v179_v62  ;;  %348 = vmatpush.msrb.mxu3 %v267_v48  ;;  %289 = vmatpush.msrb.mxu0 %v218_v49  ;;  %v249_v59 = vld [vmem:[%s832_s2 + $0x118] sm:$0xff] }
 0x115   :  { %vm184_vm7 = vcmp.lt.s32.totalorder %v181_v63, %v183_v0  ;;  %v265_v60 = vld [vmem:[%s832_s2 + $0x198] sm:$0xff]  ;;  %330 = vmatpush.msrb.mxu2 %v249_v59  ;;  %311 = vmatpush.msrb.mxu1 %v232_v4 }
 0x116   :  { %v612_v1 = vsel %vm184_vm7, %v181_v63, %v183_v0  ;;  %349 = vmatpush.msrb.mxu3 %v266_v52  ;;  %290 = vmatpush.msrb.mxu0 %v217_v53 }
 0x117   :  { %v187_v2 = vshra.s32 %v612_v1, 16  ;;  %v186_v61 = vand.u32 65535, %v612_v1  ;;  %v248_v1 = vld [vmem:[%s832_s2 + $0x110] sm:$0xff]  ;;  %312 = vmatpush.msrb.mxu1 %v231_v6 }
 0x118   :  { %350 = vmatpush.msrb.mxu3 %v265_v60  ;;  %331 = vmatpush.msrb.mxu2 %v248_v1 }
 0x119   :  { %v615_v3 = vcvt.s32.f32 %v187_v2  ;;  %v188_v63 = vcvt.s32.f32 %v186_v61  ;;  %v216_v2 = vld [vmem:[%s832_s2 + $0x10] sm:$0xff]  ;;  %313 = vmatpush.msrb.mxu1 %v230_v10 }
 0x11a   :  { %291 = vmatpush.msrb.mxu0 %v216_v2  ;;  %332 = vmatpush.msrb.mxu2 %v247_v7 }
 0x11b   :  { %190 = vmin.xlane.f32.xlu0 %v615_v3 }
 0x11c   :  { %292 = vmatpush.msrb.mxu0 %v215_v5  ;;  %333 = vmatpush.msrb.mxu2 %v246_v11 }
 0x11e   :  { %293 = vmatpush.msrb.mxu0 %v214_v9 }
 0x18e   :  { %v191_v62 = vpop.xlane.xlu0 %190 }
 0x18f   :  { %vm192_vm8 = vcmp.eq.f32.partialorder %v615_v3, %v191_v62  ;;  %v264_v3 = vld [vmem:[%s832_s2 + $0x190] sm:$0xff]  ;;  %v197_v13 = vcvt.f32.s32 %v191_v62 }
 0x190   :  { %v193_v0 = vsel %vm192_vm8, %v188_v63, inf  ;;  %351 = vmatpush.msrb.mxu3 %v264_v3 }
 0x191   :  { %194 = vmin.xlane.f32.xlu1 %v193_v0  ;;  %v198_v15 = vshll.u32 %v197_v13, 16 }
 0x192   :  { %352 = vmatpush.msrb.mxu3 %v263_v8 }
 0x194   :  { %353 = vmatpush.msrb.mxu3 %v262_v12 }
 0x204   :  { %v195_v14 = vpop.xlane.xlu1 %194 }
 0x205   :  { %v196_v16 = vcvt.f32.s32 %v195_v14 }
 0x207   :  { %v199_v17 = vadd.s32 %v198_v15, %v196_v16 }
 0x209   :  { %201 = vst.msk [vmem:[%s835_s5] sm:$0xff] %vm200_vm9, %v199_v17  ;;  %vm202_vm10 = vcmp.eq.s32.totalorder %v597_v54, %v199_v17  ;;  %vm203_vm11 = vcmp.eq.s32.totalorder %v600_v55, %v199_v17  ;;  %vm204_vm12 = vcmp.eq.s32.totalorder %v603_v56, %v199_v17  ;;  %vm205_vm13 = vcmp.eq.s32.totalorder %v606_v57, %v199_v17 }
 0x20a   :  { %414 = vmatmul.msk.f32.vlgmr.msrb.gmra.mxu0 %vm202_vm10, %v447_v18  ;;  %415 = vmatmul.msk.f32.vlgmr.msrb.gmra.mxu1 %vm203_vm11, %v447_v18  ;;  %v448_v57 = vmov 0.0  }
 0x20b   :  { %416 = vmatmul.msk.f32.vlgmr.msrb.gmra.mxu2 %vm204_vm12, %v447_v18  ;;  %417 = vmatmul.msk.f32.vlgmr.msrb.gmra.mxu3 %vm205_vm13, %v447_v18  ;;  %26 = vst.msk [vmem:[#allocation2] sm:$0x1] %vm25_vm14, %v448_v57 }
 0x212   :  { %v371_v34 = vld [vmem:[#allocation2] sm:$0x1] }
 0x287   :  { %v295_v19 = vpop.f32.mrf.mxu0  ;;  %v315_v20 = vpop.f32.mrf.mxu1 }
 0x288   :  { %v316_v21 = vadd.f32 %v315_v20, %v295_v19 }
 0x28e   :  { %v335_v22 = vpop.f32.mrf.mxu2  ;;  %v355_v24 = vpop.f32.mrf.mxu3 }
 0x28f   :  { %v336_v23 = vadd.f32 %v335_v22, %v316_v21 }
 0x291   :  { %v356_v25 = vadd.f32 %v355_v24, %v336_v23 }
 0x293   :  { %358 = vst.msk [vmem:[%s834_s4] sm:$0xff] %vm61_vm0, %v356_v25  ;;  %v364_v54 = vsub.f32 %v356_v25, %v572_v28  ;;  %s391_s4 = sshll.u32 %s449_s11, 4  ;;  %s392_s4 = int_to_ptr.vmem [resolvable:$true] %s391_s4 }
 0x295   :  { %v366_v55 = vmul.f32 %v364_v54, %v364_v54 }
 0x297   :  { %v367_v56 = vsel %vm61_vm0, %v366_v55, 0.0 }
 0x298   :  { %368 = vadd.xlane.f32.xlu1 %v367_v56 }
 0x30b   :  { %v369_v26 = vpop.xlane.xlu1 %368 }
 0x30c   :  { %v372_v27 = vrot.slane %v369_v26, 4 }
 0x30e   :  { %v373_v29 = vadd.f32 %v372_v27, %v369_v26 }
 0x310   :  { %v374_v30 = vrot.slane %v373_v29, 2 }
 0x312   :  { %v375_v31 = vadd.f32 %v374_v30, %v373_v29 }
 0x314   :  { %v376_v32 = vrot.slane %v375_v31, 1 }
 0x316   :  { %v377_v33 = vadd.f32 %v376_v32, %v375_v31 }
 0x318   :  { %v378_v28 = vmul.f32 0.001953125, %v377_v33 }
 0x31a   :  { %v379_v35 = vadd.f32 %v378_v28, %v371_v34 }
 0x31c   :  { %381 = vst.msk [vmem:[#allocation2] sm:$0x1] %vm25_vm14, %v379_v35 }
 0x31d   :  { %396 = dma.vmem_to_hbm [thread:$0]  %s392_s4, 16, %s394_s14, [#allocation3]  }
 0x31e   :  { %445 = dma.done.wait [#allocation3], 16  }
 0x31f   :  { %446 = vsyncadd [#allocation3], 4294967280 }
 0x320   :  { %405 = vsyncpa [#allocation3], 1 }

// kernel: vqgan3d_forward.308
= control target key start
LH: loop header
LB: loop body
LE: loop exit
PB: predicated region body
PF: predicated region fallthrough
CT: control target
= control target key end

     0   :  { %s1448_s12 = smov 0   ;;  %s1450_s13 = smov 0   ;;  %s1686_s0 = inlined_call_operand.vmem [shape: bf16[16,2048], index: 0, kind: input, shape index: {}]   ;;  %s1687_s1 = inlined_call_operand.vmem [shape: bf16[2048,256], index: 1, kind: input, shape index: {}]   ;;  %s1688_s2 = inlined_call_operand.vmem [shape: f32[1,256], index: 2, kind: input, shape index: {}]   ;;  %s1689_s3 = inlined_call_operand.vmem [shape: f32[16,256], index: 3, kind: output, shape index: {}]  }
   0x1   :  { %s1452_s14 = smov 0   ;;  %s1454_s15 = smov 0  }
   0x2   :  { %s1456_s16 = smov 0  }
   0x3 LB: > { %s25_s17 = sadd.s32 1, %s1421_s15  ;;  %p48_p1 = scmp.ne.s32.totalorder %s1413_s13, %s1409_s12  ;;  %s1425_s16 = sphi %s1456_s16, %s13_s16   ;;  %s1421_s15 = sphi %s1454_s15, %s1693_s15   ;;  %s1417_s14 = sphi %s1452_s14, %s1692_s14   ;;  %s1413_s13 = sphi %s1450_s13, %s1691_s13   ;;  %s1409_s12 = sphi %s1448_s12, %s1690_s12  }
   0x4   : > { %p26_p0 = scmp.ge.s32.totalorder %s25_s17, 4  ;;  %p49_p2 = scmp.eq.s32.totalorder %s1425_s16, 0 }
   0x5   : > { %s41_s19 = sadd.s32 1, %s1413_s13  ;;  %p989_p5 = scmp.ge.s32.totalorder %s1425_s16, 4 }
   0x6   : > { %s1695_s17 = smov (%p26_p0, %s25_s17), 0  ;;  %p50_p3 = por %p49_p2, %p48_p1 }
   0x7   : > { %s37_s18 = ssub.s32 %s1421_s15, %s1695_s17  ;;  %164 = sbr.rel (%p989_p5) target bundleno = 20 (0x14), region = 20 }
   0x8   : > { %p39_p4 = scmp.eq.s32.totalorder %s37_s18, 0 }
   0xa   : > { %s1483_s20 = scalar_select %p39_p4, %s1413_s13, %s41_s19  }
   0xc   : > { %167 = sbr.rel (!%p50_p3) target bundleno = 20 (0x14), region = 24  ;;  %s169_s21 = sand.u32 (%p50_p3), 1, %s1413_s13  }
   0xd   : > { %s1276_s22 = sshll.u32 (%p50_p3), %s1421_s15, 4  ;;  %s990_s23 = sshll.u32 (%p50_p3), %s169_s21, 5 }
   0xe   : > { %s177_s26 = scalar_lea.vmem (%p50_p3), %s1686_s0, %s1276_s22  ;;  %s171_s27 = scalar_lea.vmem (%p50_p3), [#allocation3], %s990_s23 }
   0xf   : > { %v190_v0 = vld [vmem:[%s177_s26] sm:$0xff] (%p50_p3)  ;;  %v192_v1 = vld [vmem:[%s177_s26 + $0x8] sm:$0xff] (%p50_p3) }
  0x10   : > { %v194_v2 = vld [vmem:[%s177_s26 + $0x40] sm:$0xff] (%p50_p3)  ;;  %191 = vst [vmem:[%s171_s27] sm:$0xff] (%p50_p3), %v190_v0  ;;  %v196_v3 = vld [vmem:[%s177_s26 + $0x48] sm:$0xff] (%p50_p3) }
  0x11   : > { %193 = vst [vmem:[%s171_s27 + $0x8] sm:$0xff] %v192_v1 }
  0x12   : > { %195 = vst [vmem:[%s171_s27 + $0x10] sm:$0xff] %v194_v2 }
  0x13   : > { %197 = vst [vmem:[%s171_s27 + $0x18] sm:$0xff] %v196_v3 }
  0x14 PF: > { %p993_p6 = scmp.ge.s32.totalorder %s1425_s16, 1  ;;  %p217_p7 = scmp.lt.s32.totalorder %s1425_s16, 5 }
  0x16   : > { %p218_p8 = pnand %p993_p6, %p217_p7 }
  0x17   : > { %s224_s28 = sand.u32 (!%p218_p8), 1, %s1409_s12   ;;  %s995_s29 = sshll.u32 (!%p218_p8), %s1417_s14, 6 }
  0x18   : > { %221 = sbr.rel (%p218_p8) target bundleno = 266 (0x10a), region = 51  ;;  %s994_s30 = sshll.u32 (!%p218_p8), %s224_s28, 5 }
  0x19   : > { %p270_p9 = scmp.lt.s32.totalorder (!%p218_p8), %s995_s29, 255  ;;  %s1500_s8 = scalar_lea.vmem (!%p218_p8), [#allocation3], %s994_s30 }
  0x1a   : > { %p998_p10 = scmp.ne.s32.totalorder (!%p218_p8), %s1417_s14, 0 }
  0x1d   : > { %s1697_s29 = smov (!%p270_p9, %s995_s29), 255  ;;  %300 = sbr.rel (%p998_p10) target bundleno = 39 (0x27), region = 59 }
  0x1e   : > { %s1277_s4 = sshll.u32 %s1697_s29, 3 }
  0x1f   : > { %s1498_s7 = scalar_lea.vmem %s1687_s1, %s1277_s4 }
  0x22   : > { %v1427_v4 = vmov 0.0  }
  0x23   : > { %301 = vst [vmem:[#allocation2 + $0x10] sm:$0xff] %v1427_v4 }
  0x24   : > { %302 = vst [vmem:[#allocation2] sm:$0xff] %v1427_v4 }
  0x25   : > { %303 = vst [vmem:[#allocation2 + $0x18] sm:$0xff] %v1427_v4 }
  0x26   : > { %304 = vst [vmem:[#allocation2 + $0x8] sm:$0xff] %v1427_v4 }
  0x27 PF: > { %v1073_v5 = vld [vmem:[%s1498_s7 + $0x70] sm:$0xf]  ;;  %v1297_v6 = vld [vmem:[%s1498_s7 + $0x74] sm:$0xf0]  ;;  %v1065_v16 = vld [vmem:[%s1498_s7 + $0x60] sm:$0xf] }
  0x28   : > { %v1137_v7 = vld [vmem:[%s1498_s7 + $0xf0] sm:$0xf]  ;;  %v1074_v8 = vor.u32 %v1297_v6, %v1073_v5  ;;  %v1313_v9 = vld [vmem:[%s1498_s7 + $0xf4] sm:$0xf0]  ;;  %v1295_v18 = vld [vmem:[%s1498_s7 + $0x64] sm:$0xf0] }
  0x29   : > { %v1201_v10 = vld [vmem:[%s1498_s7 + $0x170] sm:$0xf]  ;;  %v1329_v11 = vld [vmem:[%s1498_s7 + $0x174] sm:$0xf0]  ;;  %v1138_v12 = vor.u32 %v1313_v9, %v1137_v7  ;;  %v1129_v19 = vld [vmem:[%s1498_s7 + $0xe0] sm:$0xf]  ;;  %v1066_v21 = vor.u32 %v1295_v18, %v1065_v16 }
  0x2a   : > { %v1202_v13 = vor.u32 %v1329_v11, %v1201_v10  ;;  %v1265_v14 = vld [vmem:[%s1498_s7 + $0x1f0] sm:$0xf]  ;;  %v1345_v15 = vld [vmem:[%s1498_s7 + $0x1f4] sm:$0xf0]  ;;  %717 = vmatpush.bf16.msra.mxu0 %v1074_v8  ;;  %v1311_v20 = vld [vmem:[%s1498_s7 + $0xe4] sm:$0xf0] }
  0x2b   : > { %v1266_v17 = vor.u32 %v1345_v15, %v1265_v14  ;;  %731 = vmatpush.bf16.msra.mxu1 %v1138_v12  ;;  %v1130_v22 = vor.u32 %v1311_v20, %v1129_v19  ;;  %v1193_v23 = vld [vmem:[%s1498_s7 + $0x160] sm:$0xf]  ;;  %v1327_v24 = vld [vmem:[%s1498_s7 + $0x164] sm:$0xf0]  ;;  %v1057_v28 = vld [vmem:[%s1498_s7 + $0x50] sm:$0xf] }
  0x2c   : > { %745 = vmatpush.bf16.msra.mxu2 %v1202_v13  ;;  %v1257_v25 = vld [vmem:[%s1498_s7 + $0x1e0] sm:$0xf]  ;;  %v1194_v26 = vor.u32 %v1327_v24, %v1193_v23  ;;  %v1343_v27 = vld [vmem:[%s1498_s7 + $0x1e4] sm:$0xf0]  ;;  %v1293_v29 = vld [vmem:[%s1498_s7 + $0x54] sm:$0xf0] }
  0x2d   : > { %759 = vmatpush.bf16.msra.mxu3 %v1266_v17  ;;  %v1258_v30 = vor.u32 %v1343_v27, %v1257_v25  ;;  %v1121_v31 = vld [vmem:[%s1498_s7 + $0xd0] sm:$0xf]  ;;  %v1309_v32 = vld [vmem:[%s1498_s7 + $0xd4] sm:$0xf0]  ;;  %v1058_v34 = vor.u32 %v1293_v29, %v1057_v28  ;;  %v1049_v40 = vld [vmem:[%s1498_s7 + $0x40] sm:$0xf] }
  0x2e   : > { %v1185_v33 = vld [vmem:[%s1498_s7 + $0x150] sm:$0xf]  ;;  %718 = vmatpush.bf16.msra.mxu0 %v1066_v21  ;;  %v1325_v35 = vld [vmem:[%s1498_s7 + $0x154] sm:$0xf0]  ;;  %v1122_v38 = vor.u32 %v1309_v32, %v1121_v31  ;;  %v1291_v41 = vld [vmem:[%s1498_s7 + $0x44] sm:$0xf0] }
  0x2f   : > { %v1249_v36 = vld [vmem:[%s1498_s7 + $0x1d0] sm:$0xf]  ;;  %v1341_v37 = vld [vmem:[%s1498_s7 + $0x1d4] sm:$0xf0]  ;;  %732 = vmatpush.bf16.msra.mxu1 %v1130_v22  ;;  %v1186_v39 = vor.u32 %v1325_v35, %v1185_v33  ;;  %v1113_v42 = vld [vmem:[%s1498_s7 + $0xc0] sm:$0xf]  ;;  %v1050_v49 = vor.u32 %v1291_v41, %v1049_v40 }
  0x30   : > { %746 = vmatpush.bf16.msra.mxu2 %v1194_v26  ;;  %v1250_v43 = vor.u32 %v1341_v37, %v1249_v36  ;;  %v1307_v44 = vld [vmem:[%s1498_s7 + $0xc4] sm:$0xf0]  ;;  %v1177_v45 = vld [vmem:[%s1498_s7 + $0x140] sm:$0xf]  ;;  %v1041_v52 = vld [vmem:[%s1498_s7 + $0x30] sm:$0xf] }
  0x31   : > { %760 = vmatpush.bf16.msra.mxu3 %v1258_v30  ;;  %v1323_v46 = vld [vmem:[%s1498_s7 + $0x144] sm:$0xf0]  ;;  %v1241_v47 = vld [vmem:[%s1498_s7 + $0x1c0] sm:$0xf]  ;;  %v1114_v50 = vor.u32 %v1307_v44, %v1113_v42  ;;  %v1289_v53 = vld [vmem:[%s1498_s7 + $0x34] sm:$0xf0] }
  0x32   : > { %v1339_v48 = vld [vmem:[%s1498_s7 + $0x1c4] sm:$0xf0]  ;;  %719 = vmatpush.bf16.msra.mxu0 %v1058_v34  ;;  %v1178_v51 = vor.u32 %v1323_v46, %v1177_v45  ;;  %v1105_v54 = vld [vmem:[%s1498_s7 + $0xb0] sm:$0xf]  ;;  %v1305_v56 = vld [vmem:[%s1498_s7 + $0xb4] sm:$0xf0]  ;;  %v1042_v61 = vor.u32 %v1289_v53, %v1041_v52 }
  0x33   : > { %733 = vmatpush.bf16.msra.mxu1 %v1122_v38  ;;  %v1242_v55 = vor.u32 %v1339_v48, %v1241_v47  ;;  %v1169_v57 = vld [vmem:[%s1498_s7 + $0x130] sm:$0xf]  ;;  %v1321_v58 = vld [vmem:[%s1498_s7 + $0x134] sm:$0xf0]  ;;  %v1106_v62 = vor.u32 %v1305_v56, %v1105_v54  ;;  %v1033_v0 = vld [vmem:[%s1498_s7 + $0x20] sm:$0xf] }
  0x34   : > { %747 = vmatpush.bf16.msra.mxu2 %v1186_v39  ;;  %v1233_v59 = vld [vmem:[%s1498_s7 + $0x1b0] sm:$0xf]  ;;  %v1337_v60 = vld [vmem:[%s1498_s7 + $0x1b4] sm:$0xf0]  ;;  %v1170_v63 = vor.u32 %v1321_v58, %v1169_v57  ;;  %v1287_v1 = vld [vmem:[%s1498_s7 + $0x24] sm:$0xf0] }
  0x35   : > { %761 = vmatpush.bf16.msra.mxu3 %v1250_v43  ;;  %v1097_v2 = vld [vmem:[%s1498_s7 + $0xa0] sm:$0xf]  ;;  %v1234_v3 = vor.u32 %v1337_v60, %v1233_v59  ;;  %v1303_v4 = vld [vmem:[%s1498_s7 + $0xa4] sm:$0xf0]  ;;  %v1034_v9 = vor.u32 %v1287_v1, %v1033_v0  ;;  %v1025_v12 = vld [vmem:[%s1498_s7 + $0x10] sm:$0xf] }
  0x36   : > { %720 = vmatpush.bf16.msra.mxu0 %v1050_v49  ;;  %v1161_v5 = vld [vmem:[%s1498_s7 + $0x120] sm:$0xf]  ;;  %v1319_v6 = vld [vmem:[%s1498_s7 + $0x124] sm:$0xf0]  ;;  %v1098_v10 = vor.u32 %v1303_v4, %v1097_v2  ;;  %v1285_v13 = vld [vmem:[%s1498_s7 + $0x14] sm:$0xf0] }
  0x37   : > { %734 = vmatpush.bf16.msra.mxu1 %v1114_v50  ;;  %v1225_v7 = vld [vmem:[%s1498_s7 + $0x1a0] sm:$0xf]  ;;  %v1335_v8 = vld [vmem:[%s1498_s7 + $0x1a4] sm:$0xf0]  ;;  %v1162_v11 = vor.u32 %v1319_v6, %v1161_v5  ;;  %v1089_v14 = vld [vmem:[%s1498_s7 + $0x90] sm:$0xf]  ;;  %v1026_v22 = vor.u32 %v1285_v13, %v1025_v12 }
  0x38   : > { %748 = vmatpush.bf16.msra.mxu2 %v1178_v51  ;;  %v1226_v15 = vor.u32 %v1335_v8, %v1225_v7  ;;  %v1301_v16 = vld [vmem:[%s1498_s7 + $0x94] sm:$0xf0]  ;;  %v1153_v17 = vld [vmem:[%s1498_s7 + $0x110] sm:$0xf]  ;;  %v1017_v21 = vld [vmem:[%s1498_s7] sm:$0xf] }
  0x39   : > { %762 = vmatpush.bf16.msra.mxu3 %v1242_v55  ;;  %v1317_v18 = vld [vmem:[%s1498_s7 + $0x114] sm:$0xf0]  ;;  %v1217_v19 = vld [vmem:[%s1498_s7 + $0x190] sm:$0xf]  ;;  %v1283_v23 = vld [vmem:[%s1498_s7 + $0x4] sm:$0xf0]  ;;  %v1090_v26 = vor.u32 %v1301_v16, %v1089_v14 }
  0x3a   : > { %721 = vmatpush.bf16.msra.mxu0 %v1042_v61  ;;  %v1333_v20 = vld [vmem:[%s1498_s7 + $0x194] sm:$0xf0]  ;;  %v1081_v24 = vld [vmem:[%s1498_s7 + $0x80] sm:$0xf]  ;;  %v1299_v25 = vld [vmem:[%s1498_s7 + $0x84] sm:$0xf0]  ;;  %v1154_v27 = vor.u32 %v1317_v18, %v1153_v17  ;;  %v1018_v38 = vor.u32 %v1283_v23, %v1017_v21 }
  0x3b   : > { %735 = vmatpush.bf16.msra.mxu1 %v1106_v62  ;;  %v1145_v28 = vld [vmem:[%s1498_s7 + $0x100] sm:$0xf]  ;;  %v1315_v29 = vld [vmem:[%s1498_s7 + $0x104] sm:$0xf0]  ;;  %v1218_v31 = vor.u32 %v1333_v20, %v1217_v19  ;;  %v1296_v33 = vld [vmem:[%s1498_s7 + $0x74] sm:$0xf]  ;;  %v1082_v42 = vor.u32 %v1299_v25, %v1081_v24 }
  0x3c   : > { %749 = vmatpush.bf16.msra.mxu2 %v1170_v63  ;;  %v1209_v30 = vld [vmem:[%s1498_s7 + $0x180] sm:$0xf]  ;;  %v1331_v32 = vld [vmem:[%s1498_s7 + $0x184] sm:$0xf0]  ;;  %v1075_v34 = vld [vmem:[%s1498_s7 + $0x78] sm:$0xf0]  ;;  %v1146_v43 = vor.u32 %v1315_v29, %v1145_v28 }
  0x3d   : > { %763 = vmatpush.bf16.msra.mxu3 %v1234_v3  ;;  %v1312_v35 = vld [vmem:[%s1498_s7 + $0xf4] sm:$0xf]  ;;  %v1139_v36 = vld [vmem:[%s1498_s7 + $0xf8] sm:$0xf0]  ;;  %v1294_v44 = vld [vmem:[%s1498_s7 + $0x64] sm:$0xf]  ;;  %v1210_v48 = vor.u32 %v1331_v32, %v1209_v30  ;;  %v1078_v49 = vor.u32 %v1296_v33, %v1075_v34 }
  0x3e   : > { %722 = vmatpush.bf16.msra.mxu0 %v1034_v9  ;;  %v1328_v37 = vld [vmem:[%s1498_s7 + $0x174] sm:$0xf]  ;;  %v1203_v39 = vld [vmem:[%s1498_s7 + $0x178] sm:$0xf0]  ;;  %v1067_v45 = vld [vmem:[%s1498_s7 + $0x68] sm:$0xf0]  ;;  %v1142_v54 = vor.u32 %v1312_v35, %v1139_v36 }
  0x3f   : > { %736 = vmatpush.bf16.msra.mxu1 %v1098_v10  ;;  %v1344_v40 = vld [vmem:[%s1498_s7 + $0x1f4] sm:$0xf]  ;;  %v1267_v41 = vld [vmem:[%s1498_s7 + $0x1f8] sm:$0xf0]  ;;  %v1009_v46 = vld [vmem:[%s1500_s8 + $0x8] sm:$0xf]  ;;  %v1206_v55 = vor.u32 %v1328_v37, %v1203_v39  ;;  %v1070_v4 = vor.u32 %v1294_v44, %v1067_v45 }
  0x40   : > { %750 = vmatpush.bf16.msra.mxu2 %v1162_v11  ;;  %v1281_v47 = vld [vmem:[%s1500_s8 + $0x14] sm:$0xf0]  ;;  %v1310_v50 = vld [vmem:[%s1498_s7 + $0xe4] sm:$0xf]  ;;  %v1131_v51 = vld [vmem:[%s1498_s7 + $0xe8] sm:$0xf0]  ;;  %v1270_v59 = vor.u32 %v1344_v40, %v1267_v41 }
  0x41   : > { %764 = vmatpush.bf16.msra.mxu3 %v1226_v15  ;;  %v1326_v52 = vld [vmem:[%s1498_s7 + $0x164] sm:$0xf]  ;;  %v1195_v53 = vld [vmem:[%s1498_s7 + $0x168] sm:$0xf0]  ;;  %v1011_v57 = vld [vmem:[%s1500_s8 + $0x18] sm:$0xf0]  ;;  %v1586_v60 = vor.u32 %v1281_v47, %v1009_v46  ;;  %v1134_v6 = vor.u32 %v1310_v50, %v1131_v51 }
  0x42   : > { %723 = vmatpush.bf16.msra.mxu0 %v1026_v22  ;;  %v1279_v56 = vld [vmem:[%s1500_s8 + $0xc] sm:$0xf]  ;;  %v1001_v58 = vld [vmem:[%s1500_s8] sm:$0xf]  ;;  %v1280_v61 = vld [vmem:[%s1500_s8 + $0xc] sm:$0xf0]  ;;  %v1198_v7 = vor.u32 %v1326_v52, %v1195_v53 }
  0x43   : > { %737 = vmatpush.bf16.msra.mxu1 %v1090_v26  ;;  %v1278_v62 = vld [vmem:[%s1500_s8 + $0x4] sm:$0xf]  ;;  %v1003_v63 = vld [vmem:[%s1500_s8 + $0x10] sm:$0xf0]  ;;  %v1259_v1 = vld [vmem:[%s1498_s7 + $0x1e8] sm:$0xf0]  ;;  %v1593_v2 = vor.u32 %v1279_v56, %v1011_v57  ;;  %v1595_v3 = vor.u32 %v1280_v61, %v1001_v58 }
  0x44   : > { %751 = vmatpush.bf16.msra.mxu2 %v1154_v27  ;;  %v1342_v0 = vld [vmem:[%s1498_s7 + $0x1e4] sm:$0xf]  ;;  %v1597_v5 = vor.u32 %v1278_v62, %v1003_v63  ;;  %v1292_v8 = vld [vmem:[%s1498_s7 + $0x54] sm:$0xf]  ;;  %v1059_v9 = vld [vmem:[%s1498_s7 + $0x58] sm:$0xf0] }
  0x45   : > { %765 = vmatpush.bf16.msra.mxu3 %v1218_v31  ;;  %v1308_v10 = vld [vmem:[%s1498_s7 + $0xd4] sm:$0xf]  ;;  %v1262_v11 = vor.u32 %v1342_v0, %v1259_v1  ;;  %v1123_v12 = vld [vmem:[%s1498_s7 + $0xd8] sm:$0xf0]  ;;  %v1062_v17 = vor.u32 %v1292_v8, %v1059_v9  ;;  %v1290_v20 = vld [vmem:[%s1498_s7 + $0x44] sm:$0xf] }
  0x46   : > { %724 = vmatpush.bf16.msra.mxu0 %v1018_v38  ;;  %v1324_v13 = vld [vmem:[%s1498_s7 + $0x154] sm:$0xf]  ;;  %v1187_v14 = vld [vmem:[%s1498_s7 + $0x158] sm:$0xf0]  ;;  %v1126_v18 = vor.u32 %v1308_v10, %v1123_v12  ;;  %v1051_v21 = vld [vmem:[%s1498_s7 + $0x48] sm:$0xf0] }
  0x47   : > { %738 = vmatpush.bf16.msra.mxu1 %v1082_v42  ;;  %v1340_v15 = vld [vmem:[%s1498_s7 + $0x1d4] sm:$0xf]  ;;  %v1251_v16 = vld [vmem:[%s1498_s7 + $0x1d8] sm:$0xf0]  ;;  %v1190_v19 = vor.u32 %v1324_v13, %v1187_v14  ;;  %v1306_v22 = vld [vmem:[%s1498_s7 + $0xc4] sm:$0xf]  ;;  %v1054_v29 = vor.u32 %v1290_v20, %v1051_v21 }
  0x48   : > { %752 = vmatpush.bf16.msra.mxu2 %v1146_v43  ;;  %v1254_v23 = vor.u32 %v1340_v15, %v1251_v16  ;;  %v1115_v24 = vld [vmem:[%s1498_s7 + $0xc8] sm:$0xf0]  ;;  %v1322_v25 = vld [vmem:[%s1498_s7 + $0x144] sm:$0xf]  ;;  %v1288_v32 = vld [vmem:[%s1498_s7 + $0x34] sm:$0xf] }
  0x49   : > { %766 = vmatpush.bf16.msra.mxu3 %v1210_v48  ;;  %725 = vmatmul.bf16.vlgmr.msra.gmra.mxu0 %v1595_v3  ;;  %v1179_v26 = vld [vmem:[%s1498_s7 + $0x148] sm:$0xf0]  ;;  %v1338_v27 = vld [vmem:[%s1498_s7 + $0x1c4] sm:$0xf]  ;;  %v1118_v30 = vor.u32 %v1306_v22, %v1115_v24  ;;  %v1043_v33 = vld [vmem:[%s1498_s7 + $0x38] sm:$0xf0] }
  0x4a   : > { %773 = vmatpush.bf16.msrb.mxu0 %v1078_v49  ;;  %739 = vmatmul.bf16.vlgmr.msra.gmra.mxu1 %v1597_v5  ;;  %v1243_v28 = vld [vmem:[%s1498_s7 + $0x1c8] sm:$0xf0]  ;;  %v1182_v31 = vor.u32 %v1322_v25, %v1179_v26  ;;  %v1304_v34 = vld [vmem:[%s1498_s7 + $0xb4] sm:$0xf]  ;;  %v1107_v36 = vld [vmem:[%s1498_s7 + $0xb8] sm:$0xf0]  ;;  %v1046_v41 = vor.u32 %v1288_v32, %v1043_v33 }
  0x4b   : > { %787 = vmatpush.bf16.msrb.mxu1 %v1142_v54  ;;  %753 = vmatmul.bf16.vlgmr.msra.gmra.mxu2 %v1586_v60  ;;  %v1246_v35 = vor.u32 %v1338_v27, %v1243_v28  ;;  %v1320_v37 = vld [vmem:[%s1498_s7 + $0x134] sm:$0xf]  ;;  %v1171_v38 = vld [vmem:[%s1498_s7 + $0x138] sm:$0xf0]  ;;  %v1110_v42 = vor.u32 %v1304_v34, %v1107_v36  ;;  %v1286_v44 = vld [vmem:[%s1498_s7 + $0x24] sm:$0xf] }
  0x4c   : > { %801 = vmatpush.bf16.msrb.mxu2 %v1206_v55  ;;  %767 = vmatmul.bf16.vlgmr.msra.gmra.mxu3 %v1593_v2  ;;  %v1336_v39 = vld [vmem:[%s1498_s7 + $0x1b4] sm:$0xf]  ;;  %v1235_v40 = vld [vmem:[%s1498_s7 + $0x1b8] sm:$0xf0]  ;;  %v1174_v43 = vor.u32 %v1320_v37, %v1171_v38  ;;  %v1035_v45 = vld [vmem:[%s1498_s7 + $0x28] sm:$0xf0] }
  0x4d   : > { %815 = vmatpush.bf16.msrb.mxu3 %v1270_v59  ;;  %v1302_v46 = vld [vmem:[%s1498_s7 + $0xa4] sm:$0xf]  ;;  %v1238_v47 = vor.u32 %v1336_v39, %v1235_v40  ;;  %v1099_v48 = vld [vmem:[%s1498_s7 + $0xa8] sm:$0xf0]  ;;  %v1038_v53 = vor.u32 %v1286_v44, %v1035_v45  ;;  %v1284_v56 = vld [vmem:[%s1498_s7 + $0x14] sm:$0xf] }
  0x4e   : > { %774 = vmatpush.bf16.msrb.mxu0 %v1070_v4  ;;  %v1318_v49 = vld [vmem:[%s1498_s7 + $0x124] sm:$0xf]  ;;  %v1163_v50 = vld [vmem:[%s1498_s7 + $0x128] sm:$0xf0]  ;;  %v1102_v54 = vor.u32 %v1302_v46, %v1099_v48  ;;  %v1027_v57 = vld [vmem:[%s1498_s7 + $0x18] sm:$0xf0] }
  0x4f   : > { %788 = vmatpush.bf16.msrb.mxu1 %v1134_v6  ;;  %v1334_v51 = vld [vmem:[%s1498_s7 + $0x1a4] sm:$0xf]  ;;  %v1227_v52 = vld [vmem:[%s1498_s7 + $0x1a8] sm:$0xf0]  ;;  %v1166_v55 = vor.u32 %v1318_v49, %v1163_v50  ;;  %v1300_v58 = vld [vmem:[%s1498_s7 + $0x94] sm:$0xf]  ;;  %v1030_v4 = vor.u32 %v1284_v56, %v1027_v57 }
  0x50   : > { %802 = vmatpush.bf16.msrb.mxu2 %v1198_v7  ;;  %v1230_v59 = vor.u32 %v1334_v51, %v1227_v52  ;;  %v1091_v61 = vld [vmem:[%s1498_s7 + $0x98] sm:$0xf0]  ;;  %v1316_v62 = vld [vmem:[%s1498_s7 + $0x114] sm:$0xf]  ;;  %v1282_v8 = vld [vmem:[%s1498_s7 + $0x4] sm:$0xf] }
  0x51   : > { %816 = vmatpush.bf16.msrb.mxu3 %v1262_v11  ;;  %v1155_v63 = vld [vmem:[%s1498_s7 + $0x118] sm:$0xf0]  ;;  %v1332_v0 = vld [vmem:[%s1498_s7 + $0x194] sm:$0xf]  ;;  %v1094_v6 = vor.u32 %v1300_v58, %v1091_v61  ;;  %v1019_v9 = vld [vmem:[%s1498_s7 + $0x8] sm:$0xf0] }
  0x52   : > { %775 = vmatpush.bf16.msrb.mxu0 %v1062_v17  ;;  %v1219_v1 = vld [vmem:[%s1498_s7 + $0x198] sm:$0xf0]  ;;  %v1158_v7 = vor.u32 %v1316_v62, %v1155_v63  ;;  %v1298_v10 = vld [vmem:[%s1498_s7 + $0x84] sm:$0xf]  ;;  %v1083_v12 = vld [vmem:[%s1498_s7 + $0x88] sm:$0xf0]  ;;  %v1022_v17 = vor.u32 %v1282_v8, %v1019_v9 }
  0x53   : > { %789 = vmatpush.bf16.msrb.mxu1 %v1126_v18  ;;  %v1222_v11 = vor.u32 %v1332_v0, %v1219_v1  ;;  %v1314_v13 = vld [vmem:[%s1498_s7 + $0x104] sm:$0xf]  ;;  %v1147_v14 = vld [vmem:[%s1498_s7 + $0x108] sm:$0xf0]  ;;  %v1086_v18 = vor.u32 %v1298_v10, %v1083_v12  ;;  %v305_v27 = vld [vmem:[#allocation2 + $0x10] sm:$0xff]  ;;  %p1271_p11 = scmp.ne.s32.totalorder %s1417_s14, 3 }
  0x54   : > { %803 = vmatpush.bf16.msrb.mxu2 %v1190_v19  ;;  %v1330_v15 = vld [vmem:[%s1498_s7 + $0x184] sm:$0xf]  ;;  %v1211_v16 = vld [vmem:[%s1498_s7 + $0x188] sm:$0xf0]  ;;  %v1150_v19 = vor.u32 %v1314_v13, %v1147_v14  ;;  %v307_v34 = vld [vmem:[#allocation2 + $0x18] sm:$0xff] }
  0x55   : > { %817 = vmatpush.bf16.msrb.mxu3 %v1254_v23  ;;  %v1214_v20 = vor.u32 %v1330_v15, %v1211_v16  ;;  %v308_v49 = vld [vmem:[#allocation2 + $0x8] sm:$0xff] }
  0x56   : > { %776 = vmatpush.bf16.msrb.mxu0 %v1054_v29 }
  0x57   : > { %790 = vmatpush.bf16.msrb.mxu1 %v1118_v30 }
  0x58   : > { %804 = vmatpush.bf16.msrb.mxu2 %v1182_v31 }
  0x59   : > { %818 = vmatpush.bf16.msrb.mxu3 %v1246_v35 }
  0x5a   : > { %777 = vmatpush.bf16.msrb.mxu0 %v1046_v41  ;;  %v306_v41 = vld [vmem:[#allocation2] sm:$0xff] }
  0x5b   : > { %791 = vmatpush.bf16.msrb.mxu1 %v1110_v42 }
  0x5c   : > { %805 = vmatpush.bf16.msrb.mxu2 %v1174_v43 }
  0x5d   : > { %819 = vmatpush.bf16.msrb.mxu3 %v1238_v47 }
  0x5e   : > { %778 = vmatpush.bf16.msrb.mxu0 %v1038_v53 }
  0x5f   : > { %792 = vmatpush.bf16.msrb.mxu1 %v1102_v54 }
  0x60   : > { %806 = vmatpush.bf16.msrb.mxu2 %v1166_v55 }
  0x61   : > { %820 = vmatpush.bf16.msrb.mxu3 %v1230_v59 }
  0x62   : > { %779 = vmatpush.bf16.msrb.mxu0 %v1030_v4 }
  0x63   : > { %793 = vmatpush.bf16.msrb.mxu1 %v1094_v6 }
  0x64   : > { %807 = vmatpush.bf16.msrb.mxu2 %v1158_v7 }
  0x65   : > { %821 = vmatpush.bf16.msrb.mxu3 %v1222_v11 }
  0x66   : > { %780 = vmatpush.bf16.msrb.mxu0 %v1022_v17 }
  0x67   : > { %794 = vmatpush.bf16.msrb.mxu1 %v1086_v18 }
  0x68   : > { %808 = vmatpush.bf16.msrb.mxu2 %v1150_v19 }
  0x69   : > { %822 = vmatpush.bf16.msrb.mxu3 %v1214_v20  ;;  %781 = vmatmul.bf16.vlgmr.msrb.gmra.mxu0 %v1595_v3 }
  0x6a   : > { %795 = vmatmul.bf16.vlgmr.msrb.gmra.mxu1 %v1597_v5 }
  0x6b   : > { %809 = vmatmul.bf16.vlgmr.msrb.gmra.mxu2 %v1586_v60 }
  0x6c   : > { %823 = vmatmul.bf16.vlgmr.msrb.gmra.mxu3 %v1593_v2 }
  0xc6   : > { %v726_v21 = vpop.f32.mrf.mxu0 }
  0xc7   : > { %v740_v22 = vpop.f32.mrf.mxu1 }
  0xc8   : > { %v741_v23 = vadd.f32 %v740_v22, %v726_v21 }
  0xce   : > { %v754_v24 = vpop.f32.mrf.mxu2  ;;  %v728_v29 = vpop.f32.mrf.mxu0 }
  0xcf   : > { %v755_v25 = vadd.f32 %v754_v24, %v741_v23  ;;  %v768_v26 = vpop.f32.mrf.mxu3  ;;  %v742_v30 = vpop.f32.mrf.mxu1 }
  0xd0   : > { %v743_v32 = vadd.f32 %v742_v30, %v728_v29 }
  0xd1   : > { %v769_v28 = vadd.f32 %v768_v26, %v755_v25 }
  0xd3   : > { %v829_v31 = vadd.f32 %v769_v28, %v305_v27 }
  0xd5   : > { %833 = vst [vmem:[#allocation2 + $0x10] sm:$0xff] %v829_v31 }
  0xd6   : > { %v756_v3 = vpop.f32.mrf.mxu2 }
  0xd7   : > { %v757_v33 = vadd.f32 %v756_v3, %v743_v32  ;;  %v770_v5 = vpop.f32.mrf.mxu3 }
  0xd9   : > { %v771_v60 = vadd.f32 %v770_v5, %v757_v33 }
  0xdb   : > { %v831_v35 = vadd.f32 %v771_v60, %v307_v34 }
  0xdd   : > { %835 = vst [vmem:[#allocation2 + $0x18] sm:$0xff] %v831_v35 }
  0xe6   : > { %v782_v2 = vpop.f32.mrf.mxu0 }
  0xe7   : > { %v796_v36 = vpop.f32.mrf.mxu1 }
  0xe8   : > { %v797_v37 = vadd.f32 %v796_v36, %v782_v2 }
  0xee   : > { %v810_v38 = vpop.f32.mrf.mxu2  ;;  %v784_v43 = vpop.f32.mrf.mxu0 }
  0xef   : > { %v811_v39 = vadd.f32 %v810_v38, %v797_v37  ;;  %v824_v40 = vpop.f32.mrf.mxu3  ;;  %v798_v44 = vpop.f32.mrf.mxu1 }
  0xf0   : > { %v799_v46 = vadd.f32 %v798_v44, %v784_v43 }
  0xf1   : > { %v825_v42 = vadd.f32 %v824_v40, %v811_v39 }
  0xf3   : > { %v830_v45 = vadd.f32 %v825_v42, %v306_v41 }
  0xf5   : > { %834 = vst [vmem:[#allocation2] sm:$0xff] %v830_v45 }
  0xf6   : > { %v812_v47 = vpop.f32.mrf.mxu2 }
  0xf7   : > { %v813_v48 = vadd.f32 %v812_v47, %v799_v46  ;;  %v826_v50 = vpop.f32.mrf.mxu3 }
  0xf9   : > { %v827_v51 = vadd.f32 %v826_v50, %v813_v48  ;;  %840 = sbr.rel (%p1271_p11) target bundleno = 266 (0x10a), region = 63 }
  0xfb   : > { %v832_v52 = vadd.f32 %v827_v51, %v308_v49 }
  0xfd   : > { %836 = vst [vmem:[#allocation2 + $0x8] sm:$0xff] %v832_v52 }
  0xfe   : > { %v841_v53 = vld [vmem:[#allocation2 + $0x10] sm:$0xff]  ;;  %v845_v54 = vld [vmem:[%s1688_s2] sm:$0x3]  ;;  %v843_v58 = vld [vmem:[#allocation2 + $0x18] sm:$0xff] }
  0xff   : > { %v842_v55 = vld [vmem:[#allocation2] sm:$0xff]  ;;  %v847_v56 = vperm.slane %v845_v54, 0  ;;  %v848_v57 = vperm.slane %v845_v54, 1 }
 0x101   : > { %v851_v61 = vadd.f32 %v847_v56, %v841_v53  ;;  %v852_v62 = vadd.f32 %v848_v57, %v842_v55  ;;  %v853_v63 = vadd.f32 %v847_v56, %v843_v58 }
 0x103   : > { %v855_v1 = vmax.f32 %v851_v61, 0.0  ;;  %v856_v4 = vmax.f32 %v852_v62, 0.0  ;;  %v857_v6 = vmax.f32 %v853_v63, 0.0 }
 0x104   : > { %v844_v59 = vld [vmem:[#allocation2 + $0x8] sm:$0xff] }
 0x105   : > { %v854_v0 = vadd.f32 %v848_v57, %v844_v59  ;;  %859 = vst [vmem:[%s1689_s3] sm:$0xff] %v855_v1 }
 0x106   : > { %860 = vst [vmem:[%s1689_s3 + $0x8] sm:$0xff] %v856_v4 }
 0x107   : > { %v858_v7 = vmax.f32 %v854_v0, 0.0  ;;  %861 = vst [vmem:[%s1689_s3 + $0x10] sm:$0xff] %v857_v6 }
 0x109   : > { %862 = vst [vmem:[%s1689_s3 + $0x18] sm:$0xff] %v858_v7 }
 0x10a PF: > { %s13_s16 = sadd.s32 1, %s1425_s16   ;;  %s1690_s12 = smov %s1413_s13 }
 0x10b   : > { %p10_p12 = scmp.ge.s32.totalorder %s13_s16, 6   ;;  %s1691_s13 = smov %s1483_s20 }
 0x10c   : > { %s1692_s14 = smov %s1421_s15  ;;  %s1693_s15 = smov %s1695_s17 }
 0x10d   :  { %12 = sbr.rel (!%p10_p12) target bundleno = 3 (0x3), region = 104 }

// kernel: vqgan3d_forward.316
= control target key start
LH: loop header
LB: loop body
LE: loop exit
PB: predicated region body
PF: predicated region fallthrough
CT: control target
= control target key end

     0   :  { %s1311_s12 = smov 0   ;;  %s1313_s13 = smov 0   ;;  %s1491_s0 = inlined_call_operand.vmem [shape: bf16[64,2048], index: 0, kind: input, shape index: {}]   ;;  %s1492_s1 = inlined_call_operand.vmem [shape: bf16[2048,128], index: 1, kind: input, shape index: {}]   ;;  %s1493_s2 = inlined_call_operand.vmem [shape: f32[1,128], index: 2, kind: input, shape index: {}]   ;;  %s1494_s3 = inlined_call_operand.vmem [shape: f32[64,128], index: 3, kind: output, shape index: {}]  }
   0x1   :  { %s1315_s14 = smov 0   ;;  %s1317_s15 = smov 0  }
   0x2   :  { %s1319_s16 = smov 0  }
   0x3 LB: > { %s25_s17 = sadd.s32 1, %s1284_s15  ;;  %p48_p1 = scmp.ne.s32.totalorder %s1276_s13, %s1272_s12  ;;  %s1288_s16 = sphi %s1319_s16, %s13_s16   ;;  %s1284_s15 = sphi %s1317_s15, %s1498_s15   ;;  %s1280_s14 = sphi %s1315_s14, %s1497_s14   ;;  %s1276_s13 = sphi %s1313_s13, %s1496_s13   ;;  %s1272_s12 = sphi %s1311_s12, %s1495_s12  }
   0x4   : > { %p26_p0 = scmp.ge.s32.totalorder %s25_s17, 4  ;;  %p49_p2 = scmp.eq.s32.totalorder %s1288_s16, 0 }
   0x5   : > { %s41_s19 = sadd.s32 1, %s1276_s13  ;;  %p953_p5 = scmp.ge.s32.totalorder %s1288_s16, 4 }
   0x6   : > { %s1500_s17 = smov (%p26_p0, %s25_s17), 0  ;;  %p50_p3 = por %p49_p2, %p48_p1 }
   0x7   : > { %s37_s18 = ssub.s32 %s1284_s15, %s1500_s17  ;;  %162 = sbr.rel (%p953_p5) target bundleno = 32 (0x20), region = 20 }
   0x8   : > { %p39_p4 = scmp.eq.s32.totalorder %s37_s18, 0 }
   0xa   : > { %s1346_s20 = scalar_select %p39_p4, %s1276_s13, %s41_s19  }
   0xc   : > { %165 = sbr.rel (!%p50_p3) target bundleno = 32 (0x20), region = 24  ;;  %s167_s21 = sand.u32 (%p50_p3), 1, %s1276_s13  }
   0xd   : > { %s1159_s22 = sshll.u32 (%p50_p3), %s1284_s15, 4  ;;  %s954_s23 = sshll.u32 (%p50_p3), %s167_s21, 7 }
   0xe   : > { %s1354_s26 = scalar_lea.vmem (%p50_p3), %s1491_s0, %s1159_s22  ;;  %s169_s27 = scalar_lea.vmem (%p50_p3), [#allocation3], %s954_s23 }
   0xf   : > { %v188_v0 = vld [vmem:[%s1354_s26] sm:$0xff] (%p50_p3)  ;;  %v190_v1 = vld [vmem:[%s1354_s26 + $0x8] sm:$0xff] (%p50_p3) }
  0x10   : > { %v192_v2 = vld [vmem:[%s1354_s26 + $0x40] sm:$0xff] (%p50_p3)  ;;  %189 = vst [vmem:[%s169_s27] sm:$0xff] (%p50_p3), %v188_v0  ;;  %v194_v3 = vld [vmem:[%s1354_s26 + $0x48] sm:$0xff] (%p50_p3) }
  0x11   : > { %191 = vst [vmem:[%s169_s27 + $0x8] sm:$0xff] %v190_v1  ;;  %v196_v4 = vld [vmem:[%s1354_s26 + $0x80] sm:$0xff]  ;;  %v198_v5 = vld [vmem:[%s1354_s26 + $0x88] sm:$0xff] }
  0x12   : > { %193 = vst [vmem:[%s169_s27 + $0x10] sm:$0xff] %v192_v2  ;;  %v200_v6 = vld [vmem:[%s1354_s26 + $0xc0] sm:$0xff]  ;;  %v202_v7 = vld [vmem:[%s1354_s26 + $0xc8] sm:$0xff] }
  0x13   : > { %195 = vst [vmem:[%s169_s27 + $0x18] sm:$0xff] %v194_v3  ;;  %v204_v8 = vld [vmem:[%s1354_s26 + $0x100] sm:$0xff]  ;;  %v206_v9 = vld [vmem:[%s1354_s26 + $0x108] sm:$0xff] }
  0x14   : > { %197 = vst [vmem:[%s169_s27 + $0x20] sm:$0xff] %v196_v4  ;;  %v208_v10 = vld [vmem:[%s1354_s26 + $0x140] sm:$0xff]  ;;  %v210_v11 = vld [vmem:[%s1354_s26 + $0x148] sm:$0xff] }
  0x15   : > { %199 = vst [vmem:[%s169_s27 + $0x28] sm:$0xff] %v198_v5  ;;  %v212_v12 = vld [vmem:[%s1354_s26 + $0x180] sm:$0xff]  ;;  %v214_v13 = vld [vmem:[%s1354_s26 + $0x188] sm:$0xff] }
  0x16   : > { %201 = vst [vmem:[%s169_s27 + $0x30] sm:$0xff] %v200_v6  ;;  %v216_v14 = vld [vmem:[%s1354_s26 + $0x1c0] sm:$0xff]  ;;  %v218_v15 = vld [vmem:[%s1354_s26 + $0x1c8] sm:$0xff] }
  0x17   : > { %203 = vst [vmem:[%s169_s27 + $0x38] sm:$0xff] %v202_v7 }
  0x18   : > { %205 = vst [vmem:[%s169_s27 + $0x40] sm:$0xff] %v204_v8 }
  0x19   : > { %207 = vst [vmem:[%s169_s27 + $0x48] sm:$0xff] %v206_v9 }
  0x1a   : > { %209 = vst [vmem:[%s169_s27 + $0x50] sm:$0xff] %v208_v10 }
  0x1b   : > { %211 = vst [vmem:[%s169_s27 + $0x58] sm:$0xff] %v210_v11 }
  0x1c   : > { %213 = vst [vmem:[%s169_s27 + $0x60] sm:$0xff] %v212_v12 }
  0x1d   : > { %215 = vst [vmem:[%s169_s27 + $0x68] sm:$0xff] %v214_v13 }
  0x1e   : > { %217 = vst [vmem:[%s169_s27 + $0x70] sm:$0xff] %v216_v14 }
  0x1f   : > { %219 = vst [vmem:[%s169_s27 + $0x78] sm:$0xff] %v218_v15 }
  0x20 PF: > { %p957_p6 = scmp.ge.s32.totalorder %s1288_s16, 1  ;;  %p236_p7 = scmp.lt.s32.totalorder %s1288_s16, 5 }
  0x22   : > { %p237_p8 = pnand %p957_p6, %p236_p7 }
  0x23   : > { %s243_s28 = sand.u32 (!%p237_p8), 1, %s1272_s12   ;;  %s959_s29 = sshll.u32 (!%p237_p8), %s1280_s14, 6 }
  0x24   : > { %240 = sbr.rel (%p237_p8) target bundleno = 295 (0x127), region = 51  ;;  %s958_s30 = sshll.u32 (!%p237_p8), %s243_s28, 7 }
  0x25   : > { %p283_p9 = scmp.lt.s32.totalorder (!%p237_p8), %s959_s29, 255  ;;  %s1381_s8 = scalar_lea.vmem (!%p237_p8), [#allocation3], %s958_s30 }
  0x26   : > { %p961_p10 = scmp.ne.s32.totalorder (!%p237_p8), %s1280_s14, 0 }
  0x29   : > { %s1502_s29 = smov (!%p283_p9, %s959_s29), 255  ;;  %306 = sbr.rel (%p961_p10) target bundleno = 55 (0x37), region = 59 }
  0x2a   : > { %s960_s4 = sshll.u32 %s1502_s29, 2 }
  0x2b   : > { %s1379_s7 = scalar_lea.vmem %s1492_s1, %s960_s4 }
  0x2e   : > { %v1290_v16 = vmov 0.0  }
  0x2f   : > { %307 = vst [vmem:[#allocation2 + $0x30] sm:$0xff] %v1290_v16 }
  0x30   : > { %308 = vst [vmem:[#allocation2] sm:$0xff] %v1290_v16 }
  0x31   : > { %309 = vst [vmem:[#allocation2 + $0x18] sm:$0xff] %v1290_v16 }
  0x32   : > { %310 = vst [vmem:[#allocation2 + $0x10] sm:$0xff] %v1290_v16 }
  0x33   : > { %311 = vst [vmem:[#allocation2 + $0x8] sm:$0xff] %v1290_v16 }
  0x34   : > { %312 = vst [vmem:[#allocation2 + $0x20] sm:$0xff] %v1290_v16 }
  0x35   : > { %313 = vst [vmem:[#allocation2 + $0x28] sm:$0xff] %v1290_v16 }
  0x36   : > { %314 = vst [vmem:[#allocation2 + $0x38] sm:$0xff] %v1290_v16 }
  0x37 PF: > { %v1183_v17 = vld [vmem:[%s1379_s7 + $0x38] sm:$0xff]  ;;  %v1182_v21 = vld [vmem:[%s1379_s7 + $0x30] sm:$0xff]  ;;  %v1181_v25 = vld [vmem:[%s1379_s7 + $0x28] sm:$0xff]  ;;  %p1154_p11 = scmp.ne.s32.totalorder %s1280_s14, 3 }
  0x38   : > { %v1191_v18 = vld [vmem:[%s1379_s7 + $0x78] sm:$0xff]  ;;  %675 = vmatpush.bf16.msra.mxu0 %v1183_v17  ;;  %v1190_v22 = vld [vmem:[%s1379_s7 + $0x70] sm:$0xff]  ;;  %v1189_v26 = vld [vmem:[%s1379_s7 + $0x68] sm:$0xff] }
  0x39   : > { %v1199_v19 = vld [vmem:[%s1379_s7 + $0xb8] sm:$0xff]  ;;  %704 = vmatpush.bf16.msra.mxu1 %v1191_v18  ;;  %v1198_v23 = vld [vmem:[%s1379_s7 + $0xb0] sm:$0xff]  ;;  %v1197_v27 = vld [vmem:[%s1379_s7 + $0xa8] sm:$0xff] }
  0x3a   : > { %v1207_v20 = vld [vmem:[%s1379_s7 + $0xf8] sm:$0xff]  ;;  %733 = vmatpush.bf16.msra.mxu2 %v1199_v19  ;;  %v1206_v24 = vld [vmem:[%s1379_s7 + $0xf0] sm:$0xff]  ;;  %v1205_v28 = vld [vmem:[%s1379_s7 + $0xe8] sm:$0xff] }
  0x3b   : > { %762 = vmatpush.bf16.msra.mxu3 %v1207_v20  ;;  %v1180_v29 = vld [vmem:[%s1379_s7 + $0x20] sm:$0xff]  ;;  %v1179_v33 = vld [vmem:[%s1379_s7 + $0x18] sm:$0xff]  ;;  %v1178_v37 = vld [vmem:[%s1379_s7 + $0x10] sm:$0xff] }
  0x3c   : > { %676 = vmatpush.bf16.msra.mxu0 %v1182_v21  ;;  %v1188_v30 = vld [vmem:[%s1379_s7 + $0x60] sm:$0xff]  ;;  %v1187_v34 = vld [vmem:[%s1379_s7 + $0x58] sm:$0xff]  ;;  %v1186_v38 = vld [vmem:[%s1379_s7 + $0x50] sm:$0xff] }
  0x3d   : > { %705 = vmatpush.bf16.msra.mxu1 %v1190_v22  ;;  %v1196_v31 = vld [vmem:[%s1379_s7 + $0xa0] sm:$0xff]  ;;  %v1195_v35 = vld [vmem:[%s1379_s7 + $0x98] sm:$0xff]  ;;  %v1194_v39 = vld [vmem:[%s1379_s7 + $0x90] sm:$0xff] }
  0x3e   : > { %734 = vmatpush.bf16.msra.mxu2 %v1198_v23  ;;  %v1204_v32 = vld [vmem:[%s1379_s7 + $0xe0] sm:$0xff]  ;;  %v1203_v36 = vld [vmem:[%s1379_s7 + $0xd8] sm:$0xff]  ;;  %v1202_v40 = vld [vmem:[%s1379_s7 + $0xd0] sm:$0xff] }
  0x3f   : > { %763 = vmatpush.bf16.msra.mxu3 %v1206_v24  ;;  %v1177_v41 = vld [vmem:[%s1379_s7 + $0x8] sm:$0xff]  ;;  %v1176_v45 = vld [vmem:[%s1379_s7] sm:$0xff]  ;;  %v1162_v50 = vld [vmem:[%s1381_s8 + $0xc] sm:$0xf0] }
  0x40   : > { %677 = vmatpush.bf16.msra.mxu0 %v1181_v25  ;;  %v1185_v42 = vld [vmem:[%s1379_s7 + $0x48] sm:$0xff]  ;;  %v1184_v46 = vld [vmem:[%s1379_s7 + $0x40] sm:$0xff]  ;;  %v966_v52 = vld [vmem:[%s1381_s8 + $0x10] sm:$0xf0] }
  0x41   : > { %706 = vmatpush.bf16.msra.mxu1 %v1189_v26  ;;  %v1193_v43 = vld [vmem:[%s1379_s7 + $0x88] sm:$0xff]  ;;  %v1192_v47 = vld [vmem:[%s1379_s7 + $0x80] sm:$0xff]  ;;  %v1163_v54 = vld [vmem:[%s1381_s8 + $0x14] sm:$0xf0] }
  0x42   : > { %735 = vmatpush.bf16.msra.mxu2 %v1197_v27  ;;  %v1201_v44 = vld [vmem:[%s1379_s7 + $0xc8] sm:$0xff]  ;;  %v1200_v48 = vld [vmem:[%s1379_s7 + $0xc0] sm:$0xff]  ;;  %v974_v56 = vld [vmem:[%s1381_s8 + $0x18] sm:$0xf0] }
  0x43   : > { %764 = vmatpush.bf16.msra.mxu3 %v1205_v28  ;;  %v964_v49 = vld [vmem:[%s1381_s8] sm:$0xf]  ;;  %v1160_v51 = vld [vmem:[%s1381_s8 + $0x4] sm:$0xf]  ;;  %v972_v53 = vld [vmem:[%s1381_s8 + $0x8] sm:$0xf] }
  0x44   : > { %678 = vmatpush.bf16.msra.mxu0 %v1180_v29  ;;  %v1161_v55 = vld [vmem:[%s1381_s8 + $0xc] sm:$0xf]  ;;  %v965_v57 = vor.u32 %v1162_v50, %v964_v49  ;;  %v969_v58 = vor.u32 %v1160_v51, %v966_v52  ;;  %v973_v59 = vor.u32 %v1163_v54, %v972_v53  ;;  %v980_v61 = vld [vmem:[%s1381_s8 + $0x20] sm:$0xf]  ;;  %v1166_v62 = vld [vmem:[%s1381_s8 + $0x2c] sm:$0xf0] }
  0x45   : > { %707 = vmatpush.bf16.msra.mxu1 %v1188_v30  ;;  %v977_v60 = vor.u32 %v1161_v55, %v974_v56  ;;  %v1164_v63 = vld [vmem:[%s1381_s8 + $0x24] sm:$0xf]  ;;  %v982_v0 = vld [vmem:[%s1381_s8 + $0x30] sm:$0xf0]  ;;  %v988_v1 = vld [vmem:[%s1381_s8 + $0x28] sm:$0xf]  ;;  %v981_v5 = vor.u32 %v1166_v62, %v980_v61 }
  0x46   : > { %736 = vmatpush.bf16.msra.mxu2 %v1196_v31  ;;  %v1167_v2 = vld [vmem:[%s1381_s8 + $0x34] sm:$0xf0]  ;;  %v1165_v3 = vld [vmem:[%s1381_s8 + $0x2c] sm:$0xf]  ;;  %v990_v4 = vld [vmem:[%s1381_s8 + $0x38] sm:$0xf0]  ;;  %v985_v6 = vor.u32 %v1164_v63, %v982_v0 }
  0x47   : > { %765 = vmatpush.bf16.msra.mxu3 %v1204_v32  ;;  %v989_v7 = vor.u32 %v1167_v2, %v988_v1  ;;  %v993_v8 = vor.u32 %v1165_v3, %v990_v4  ;;  %v996_v9 = vld [vmem:[%s1381_s8 + $0x40] sm:$0xf]  ;;  %v1170_v10 = vld [vmem:[%s1381_s8 + $0x4c] sm:$0xf0]  ;;  %v1168_v11 = vld [vmem:[%s1381_s8 + $0x44] sm:$0xf] }
  0x48   : > { %679 = vmatpush.bf16.msra.mxu0 %v1179_v33  ;;  %v998_v12 = vld [vmem:[%s1381_s8 + $0x50] sm:$0xf0]  ;;  %v1004_v13 = vld [vmem:[%s1381_s8 + $0x48] sm:$0xf]  ;;  %v1171_v14 = vld [vmem:[%s1381_s8 + $0x54] sm:$0xf0]  ;;  %v997_v17 = vor.u32 %v1170_v10, %v996_v9 }
  0x49   : > { %708 = vmatpush.bf16.msra.mxu1 %v1187_v34  ;;  %v1169_v15 = vld [vmem:[%s1381_s8 + $0x4c] sm:$0xf]  ;;  %v1006_v16 = vld [vmem:[%s1381_s8 + $0x58] sm:$0xf0]  ;;  %v1001_v18 = vor.u32 %v1168_v11, %v998_v12  ;;  %v1005_v19 = vor.u32 %v1171_v14, %v1004_v13  ;;  %v1012_v21 = vld [vmem:[%s1381_s8 + $0x60] sm:$0xf] }
  0x4a   : > { %737 = vmatpush.bf16.msra.mxu2 %v1195_v35  ;;  %v1009_v20 = vor.u32 %v1169_v15, %v1006_v16  ;;  %v1174_v22 = vld [vmem:[%s1381_s8 + $0x6c] sm:$0xf0]  ;;  %v1172_v23 = vld [vmem:[%s1381_s8 + $0x64] sm:$0xf]  ;;  %v1014_v24 = vld [vmem:[%s1381_s8 + $0x70] sm:$0xf0] }
  0x4b   : > { %766 = vmatpush.bf16.msra.mxu3 %v1203_v36  ;;  %v1020_v25 = vld [vmem:[%s1381_s8 + $0x68] sm:$0xf]  ;;  %v1175_v26 = vld [vmem:[%s1381_s8 + $0x74] sm:$0xf0]  ;;  %v1173_v27 = vld [vmem:[%s1381_s8 + $0x6c] sm:$0xf]  ;;  %v1013_v29 = vor.u32 %v1174_v22, %v1012_v21  ;;  %v1017_v30 = vor.u32 %v1172_v23, %v1014_v24 }
  0x4c   : > { %680 = vmatpush.bf16.msra.mxu0 %v1178_v37  ;;  %v1022_v28 = vld [vmem:[%s1381_s8 + $0x78] sm:$0xf0]  ;;  %v1021_v31 = vor.u32 %v1175_v26, %v1020_v25  ;;  %v316_v50 = vld [vmem:[#allocation2] sm:$0xff]  ;;  %v318_v4 = vld [vmem:[#allocation2 + $0x10] sm:$0xff] }
  0x4d   : > { %709 = vmatpush.bf16.msra.mxu1 %v1186_v38  ;;  %v1025_v32 = vor.u32 %v1173_v27, %v1022_v28  ;;  %v319_v13 = vld [vmem:[#allocation2 + $0x8] sm:$0xff] }
  0x4e   : > { %738 = vmatpush.bf16.msra.mxu2 %v1194_v39 }
  0x4f   : > { %767 = vmatpush.bf16.msra.mxu3 %v1202_v40 }
  0x50   : > { %681 = vmatpush.bf16.msra.mxu0 %v1177_v41  ;;  %v315_v41 = vld [vmem:[#allocation2 + $0x30] sm:$0xff] }
  0x51   : > { %710 = vmatpush.bf16.msra.mxu1 %v1185_v42 }
  0x52   : > { %739 = vmatpush.bf16.msra.mxu2 %v1193_v43 }
  0x53   : > { %768 = vmatpush.bf16.msra.mxu3 %v1201_v44 }
  0x54   : > { %682 = vmatpush.bf16.msra.mxu0 %v1176_v45 }
  0x55   : > { %711 = vmatpush.bf16.msra.mxu1 %v1184_v46 }
  0x56   : > { %740 = vmatpush.bf16.msra.mxu2 %v1192_v47 }
  0x57   : > { %769 = vmatpush.bf16.msra.mxu3 %v1200_v48  ;;  %683 = vmatmul.bf16.vlgmr.msra.gmra.mxu0 %v965_v57 }
  0x58   : > { %712 = vmatmul.bf16.vlgmr.msra.gmra.mxu1 %v969_v58 }
  0x59   : > { %741 = vmatmul.bf16.vlgmr.msra.gmra.mxu2 %v973_v59  ;;  %v317_v59 = vld [vmem:[#allocation2 + $0x18] sm:$0xff] }
  0x5a   : > { %770 = vmatmul.bf16.vlgmr.msra.gmra.mxu3 %v977_v60 }
  0x67   : > { %688 = vmatmul.bf16.gmra.mxu0 %v981_v5 }
  0x68   : > { %717 = vmatmul.bf16.gmra.mxu1 %v985_v6 }
  0x69   : > { %746 = vmatmul.bf16.gmra.mxu2 %v989_v7 }
  0x6a   : > { %775 = vmatmul.bf16.gmra.mxu3 %v993_v8 }
  0x77   : > { %693 = vmatmul.bf16.gmra.mxu0 %v997_v17 }
  0x78   : > { %722 = vmatmul.bf16.gmra.mxu1 %v1001_v18 }
  0x79   : > { %751 = vmatmul.bf16.gmra.mxu2 %v1005_v19 }
  0x7a   : > { %780 = vmatmul.bf16.gmra.mxu3 %v1009_v20  ;;  %v320_v20 = vld [vmem:[#allocation2 + $0x20] sm:$0xff] }
  0x87   : > { %698 = vmatmul.bf16.gmra.mxu0 %v1013_v29  ;;  %v321_v29 = vld [vmem:[#allocation2 + $0x28] sm:$0xff] }
  0x88   : > { %727 = vmatmul.bf16.gmra.mxu1 %v1017_v30 }
  0x89   : > { %756 = vmatmul.bf16.gmra.mxu2 %v1021_v31 }
  0x8a   : > { %785 = vmatmul.bf16.gmra.mxu3 %v1025_v32 }
  0xd4   : > { %v684_v33 = vpop.f32.mrf.mxu0 }
  0xd5   : > { %v713_v34 = vpop.f32.mrf.mxu1 }
  0xd6   : > { %v714_v35 = vadd.f32 %v713_v34, %v684_v33 }
  0xdc   : > { %v742_v36 = vpop.f32.mrf.mxu2  ;;  %v686_v39 = vpop.f32.mrf.mxu0 }
  0xdd   : > { %v771_v37 = vpop.f32.mrf.mxu3  ;;  %v743_v38 = vadd.f32 %v742_v36, %v714_v35  ;;  %v715_v40 = vpop.f32.mrf.mxu1 }
  0xde   : > { %v716_v44 = vadd.f32 %v715_v40, %v686_v39 }
  0xdf   : > { %v772_v42 = vadd.f32 %v771_v37, %v743_v38  ;;  %v322_v37 = vld [vmem:[#allocation2 + $0x38] sm:$0xff] }
  0xe1   : > { %v791_v43 = vadd.f32 %v772_v42, %v315_v41 }
  0xe3   : > { %799 = vst [vmem:[#allocation2 + $0x30] sm:$0xff] %v791_v43 }
  0xe4   : > { %v744_v45 = vpop.f32.mrf.mxu2  ;;  %v689_v48 = vpop.f32.mrf.mxu0 }
  0xe5   : > { %v773_v46 = vpop.f32.mrf.mxu3  ;;  %v745_v47 = vadd.f32 %v744_v45, %v716_v44  ;;  %v718_v49 = vpop.f32.mrf.mxu1 }
  0xe6   : > { %v719_v53 = vadd.f32 %v718_v49, %v689_v48 }
  0xe7   : > { %v774_v51 = vadd.f32 %v773_v46, %v745_v47 }
  0xe9   : > { %v792_v52 = vadd.f32 %v774_v51, %v316_v50 }
  0xeb   : > { %800 = vst [vmem:[#allocation2] sm:$0xff] %v792_v52 }
  0xec   : > { %v747_v54 = vpop.f32.mrf.mxu2  ;;  %v691_v57 = vpop.f32.mrf.mxu0 }
  0xed   : > { %v776_v55 = vpop.f32.mrf.mxu3  ;;  %v748_v56 = vadd.f32 %v747_v54, %v719_v53  ;;  %v720_v58 = vpop.f32.mrf.mxu1 }
  0xee   : > { %v721_v62 = vadd.f32 %v720_v58, %v691_v57 }
  0xef   : > { %v777_v60 = vadd.f32 %v776_v55, %v748_v56 }
  0xf1   : > { %v793_v61 = vadd.f32 %v777_v60, %v317_v59 }
  0xf3   : > { %801 = vst [vmem:[#allocation2 + $0x18] sm:$0xff] %v793_v61 }
  0xf4   : > { %v749_v63 = vpop.f32.mrf.mxu2  ;;  %v694_v2 = vpop.f32.mrf.mxu0 }
  0xf5   : > { %v778_v0 = vpop.f32.mrf.mxu3  ;;  %v750_v1 = vadd.f32 %v749_v63, %v721_v62  ;;  %v723_v3 = vpop.f32.mrf.mxu1 }
  0xf6   : > { %v724_v7 = vadd.f32 %v723_v3, %v694_v2 }
  0xf7   : > { %v779_v5 = vadd.f32 %v778_v0, %v750_v1 }
  0xf9   : > { %v794_v6 = vadd.f32 %v779_v5, %v318_v4 }
  0xfb   : > { %802 = vst [vmem:[#allocation2 + $0x10] sm:$0xff] %v794_v6 }
  0xfc   : > { %v752_v8 = vpop.f32.mrf.mxu2  ;;  %v696_v11 = vpop.f32.mrf.mxu0 }
  0xfd   : > { %v781_v9 = vpop.f32.mrf.mxu3  ;;  %v753_v10 = vadd.f32 %v752_v8, %v724_v7  ;;  %v725_v12 = vpop.f32.mrf.mxu1 }
  0xfe   : > { %v726_v16 = vadd.f32 %v725_v12, %v696_v11 }
  0xff   : > { %v782_v14 = vadd.f32 %v781_v9, %v753_v10 }
 0x101   : > { %v795_v15 = vadd.f32 %v782_v14, %v319_v13 }
 0x103   : > { %803 = vst [vmem:[#allocation2 + $0x8] sm:$0xff] %v795_v15 }
 0x104   : > { %v754_v17 = vpop.f32.mrf.mxu2  ;;  %v699_v21 = vpop.f32.mrf.mxu0 }
 0x105   : > { %v783_v18 = vpop.f32.mrf.mxu3  ;;  %v755_v19 = vadd.f32 %v754_v17, %v726_v16  ;;  %v728_v22 = vpop.f32.mrf.mxu1 }
 0x106   : > { %v729_v25 = vadd.f32 %v728_v22, %v699_v21 }
 0x107   : > { %v784_v23 = vadd.f32 %v783_v18, %v755_v19 }
 0x109   : > { %v796_v24 = vadd.f32 %v784_v23, %v320_v20 }
 0x10b   : > { %804 = vst [vmem:[#allocation2 + $0x20] sm:$0xff] %v796_v24 }
 0x10c   : > { %v757_v26 = vpop.f32.mrf.mxu2  ;;  %v701_v31 = vpop.f32.mrf.mxu0 }
 0x10d   : > { %v786_v27 = vpop.f32.mrf.mxu3  ;;  %v758_v28 = vadd.f32 %v757_v26, %v729_v25  ;;  %v730_v32 = vpop.f32.mrf.mxu1 }
 0x10e   : > { %v731_v34 = vadd.f32 %v730_v32, %v701_v31 }
 0x10f   : > { %v787_v30 = vadd.f32 %v786_v27, %v758_v28 }
 0x111   : > { %v797_v33 = vadd.f32 %v787_v30, %v321_v29 }
 0x113   : > { %805 = vst [vmem:[#allocation2 + $0x28] sm:$0xff] %v797_v33 }
 0x114   : > { %v759_v35 = vpop.f32.mrf.mxu2 }
 0x115   : > { %v760_v36 = vadd.f32 %v759_v35, %v731_v34  ;;  %v788_v38 = vpop.f32.mrf.mxu3 }
 0x117   : > { %v789_v39 = vadd.f32 %v788_v38, %v760_v36  ;;  %810 = sbr.rel (%p1154_p11) target bundleno = 295 (0x127), region = 63 }
 0x119   : > { %v798_v40 = vadd.f32 %v789_v39, %v322_v37 }
 0x11b   : > { %806 = vst [vmem:[#allocation2 + $0x38] sm:$0xff] %v798_v40 }
 0x11c   : > { %v811_v41 = vld [vmem:[#allocation2 + $0x30] sm:$0xff]  ;;  %v1249_v42 = vld [vmem:[%s1493_s2] ss:$0 sm:$0xff]  ;;  %v813_v44 = vld [vmem:[#allocation2 + $0x18] sm:$0xff] }
 0x11d   : > { %v812_v43 = vld [vmem:[#allocation2] sm:$0xff]  ;;  %v814_v45 = vld [vmem:[#allocation2 + $0x10] sm:$0xff]  ;;  %v823_v46 = vadd.f32 %v1249_v42, %v811_v41  ;;  %v825_v48 = vadd.f32 %v1249_v42, %v813_v44  ;;  %v815_v49 = vld [vmem:[#allocation2 + $0x8] sm:$0xff] }
 0x11e   : > { %v824_v47 = vadd.f32 %v1249_v42, %v812_v43  ;;  %v816_v50 = vld [vmem:[#allocation2 + $0x20] sm:$0xff]  ;;  %v826_v51 = vadd.f32 %v1249_v42, %v814_v45  ;;  %v817_v52 = vld [vmem:[#allocation2 + $0x28] sm:$0xff]  ;;  %v827_v53 = vadd.f32 %v1249_v42, %v815_v49 }
 0x11f   : > { %831 = vst [vmem:[%s1494_s3] sm:$0xff] %v823_v46  ;;  %v828_v55 = vadd.f32 %v1249_v42, %v816_v50  ;;  %v829_v56 = vadd.f32 %v1249_v42, %v817_v52 }
 0x120   : > { %832 = vst [vmem:[%s1494_s3 + $0x8] sm:$0xff] %v824_v47 }
 0x121   : > { %833 = vst [vmem:[%s1494_s3 + $0x10] sm:$0xff] %v825_v48 }
 0x122   : > { %v818_v54 = vld [vmem:[#allocation2 + $0x38] sm:$0xff]  ;;  %834 = vst [vmem:[%s1494_s3 + $0x18] sm:$0xff] %v826_v51 }
 0x123   : > { %v830_v57 = vadd.f32 %v1249_v42, %v818_v54  ;;  %835 = vst [vmem:[%s1494_s3 + $0x20] sm:$0xff] %v827_v53 }
 0x124   : > { %836 = vst [vmem:[%s1494_s3 + $0x28] sm:$0xff] %v828_v55 }
 0x125   : > { %837 = vst [vmem:[%s1494_s3 + $0x30] sm:$0xff] %v829_v56 }
 0x126   : > { %838 = vst [vmem:[%s1494_s3 + $0x38] sm:$0xff] %v830_v57 }
 0x127 PF: > { %s13_s16 = sadd.s32 1, %s1288_s16   ;;  %s1495_s12 = smov %s1276_s13 }
 0x128   : > { %p10_p12 = scmp.ge.s32.totalorder %s13_s16, 6   ;;  %s1496_s13 = smov %s1346_s20 }
 0x129   : > { %s1497_s14 = smov %s1284_s15  ;;  %s1498_s15 = smov %s1500_s17 }
 0x12a   :  { %12 = sbr.rel (!%p10_p12) target bundleno = 3 (0x3), region = 104 }

// kernel: squeeze.3
= control target key start
LH: loop header
LB: loop body
LE: loop exit
PB: predicated region body
PF: predicated region fallthrough
CT: control target
= control target key end

     0   :  { %s102_s0 = inlined_call_operand.vmem [shape: s32[8], index: 0, kind: input, shape index: {}]   ;;  %s103_s1 = inlined_call_operand.hbm [shape: s32[1,2,2,2], index: 1, kind: output, shape index: {}]  }
   0x1   :  { %v5_v0 = vld [vmem:[%s102_s0] sm:$0x1] }
   0x2   :  { %6 = vst [vmem:[#allocation3] sm:$0x1] %v5_v0 }
   0x3   :  { %2 = vsyncpa [#allocation1], 0  ;;  %s82_s0 = smov 126   ;;  %s83_s8 = smov 122   ;;  %vm8_vm0 = vcmask 15360  }
   0x4   :  { %s84_s9 = smov 124   ;;  %s85_s10 = smov [#allocation0]  }
   0x5   :  { %s43_s11 = sshll.u32 %s85_s10, 4  ;;  %s45_s1 = sshll.u32 %s103_s1, 4  ;;  %s44_s11 = int_to_ptr.vmem [resolvable:$true] %s43_s11  ;;  %s46_s1 = int_to_ptr.hbm [resolvable:$true] %s45_s1 }
   0x9   :  { %v10_v1 = vld [vmem:[#allocation3] sm:$0x1]  }
   0xa   :  { %v22_v2 = vld [vmem:[#allocation3] sm:$0x1]   ;;  %11 = vrot.lane.b32.xlu0 %v10_v1, %s82_s0 }
   0xb   :  { %23 = vrot.lane.b32.xlu1 %v22_v2, %s83_s8  ;;  %v16_v3 = vld [vmem:[#allocation3] sm:$0x1]  }
   0xc   :  { %v7_v4 = vld [vmem:[#allocation3] sm:$0x1]  }
   0xd   :  { %9 = vst.msk [vmem:[#allocation2] sm:$0x1] %vm8_vm0, %v7_v4  }
  0x12   :  { %17 = vrot.lane.b32.xlu0 %v16_v3, %s84_s9 }
  0x7c   :  { %v12_v5 = vpop.permute.xlu0 %11  }
  0x7d   :  { %v24_v6 = vpop.permute.xlu1 %23   ;;  %15 = vst.msk [vmem:[#allocation2 + $0x1] sm:$0x1] %vm8_vm0, %v12_v5  }
  0x7e   :  { %27 = vst.msk [vmem:[#allocation2 + $0x9] sm:$0x1] %vm8_vm0, %v24_v6  }
  0x84   :  { %v18_v7 = vpop.permute.xlu0 %17   ;;  %v30_v8 = vld [vmem:[#allocation2] sm:$0x3] }
  0x85   :  { %21 = vst.msk [vmem:[#allocation2 + $0x8] sm:$0x1] %vm8_vm0, %v18_v7  }
  0x86   :  { %33 = vst [vmem:[#allocation0] sm:$0x3] %v30_v8 }
  0x8c   :  { %v35_v9 = vld [vmem:[#allocation2 + $0x8] sm:$0x3] }
  0x8d   :  { %39 = vst [vmem:[#allocation0 + $0x2] sm:$0x3] %v35_v9 }
  0x8e   :  { %48 = dma.vmem_to_hbm [thread:$0]  %s44_s11, 64, %s46_s1, [#allocation1]  }
  0x8f   :  { %80 = dma.done.wait [#allocation1], 64  }
  0x90   :  { %81 = vsyncadd [#allocation1], 4294967232 }
  0x91   :  { %51 = vsyncpa [#allocation1], 1 }

</bundles_post_ra>
